<compile_context>
chip_gen: v6e
topology: v6e:2x2x1
jax: 0.10.0
libtpu: 0.0.40
codegen_flags: <defaults>
</compile_context>

<pallas_src>
import jax
import jax.numpy as jnp
from jax.experimental import pallas as pl
from jax.experimental.pallas import tpu as pltpu


# ---------------------------------------------------------------------------
# sizes
# ---------------------------------------------------------------------------
H_IN = 28
H1 = 26                    # conv1 output spatial (valid 3x3)
H2 = 24                    # conv2 output spatial
HP = 12                    # pooled spatial
C1 = 32
C2 = 64
K_FC1 = HP * HP * C2       # 9216
N_HID = 128
N_OUT = 10

ROWS1 = H1 * H1            # 676  conv1 rows (r = h*26 + w)
ROWS1_PAD = ROWS1 + 4      # 680  padding so shifted-slab reads never run off
ROWS2 = H2 * H1            # 624  conv2 acc rows (r = ho*26 + wo, wo>=24 junk)
HALF2 = ROWS2 // 2         # 312  conv2 M-split (keeps the f32 acc small)
COLP = ROWS2 // 2          # 312  rows after column pooling (= 24 * 13)


# ---------------------------------------------------------------------------
# Kernel 1: conv1 + ReLU + conv2 + bias + ReLU + 2x2 maxpool   (one image/step)
# ---------------------------------------------------------------------------
def _conv_block_kernel(cols1_ref, w1_ref, b1_ref, w2_ref, b2_ref, out_ref,
                       y1_s, s1, s2):
    # conv1: (680, 9) @ (9, 32) on the MXU (bf16 in, f32 acc), ReLU into VMEM.
    y1 = jnp.dot(cols1_ref[...], w1_ref[...],
                 preferred_element_type=jnp.float32)
    y1_s[...] = jnp.maximum(y1 + b1_ref[...], 0.0)          # (680, 32) f32

    # conv2: 9 shifted-slab matmuls accumulated in f32.
    # y1_s row index = h*26 + w, so tap (dh, dw) is the contiguous slab
    # starting at row dh*26 + dw.  Columns wo in {24,25} of s1 are junk and
    # are never read by the pooling stage.
    for half in range(2):
        base = half * HALF2
        acc = jnp.zeros((HALF2, C2), jnp.float32)
        for t in range(9):
            dh, dw = divmod(t, 3)
            slab = y1_s[pl.ds(base + dh * H1 + dw, HALF2), :].astype(
                jnp.bfloat16)                                # (312, 32)
            acc = acc + jnp.dot(slab, w2_ref[t],
                                preferred_element_type=jnp.float32)
        s1[pl.ds(base, HALF2), :] = jnp.maximum(acc + b2_ref[...], 0.0)

    # 2x2 / stride-2 max pool, fused in the epilogue.
    # column pairs: s2[ho*13 + j] = max over wo in {2j, 2j+1}
    s2[...] = jnp.maximum(s1[pl.ds(0, COLP, 2), :],
                          s1[pl.ds(1, COLP, 2), :])          # (312, 64)
    # row pairs: out[i*12 + j] = max over ho in {2i, 2i+1}, j < 12
    for i in range(HP):
        top = s2[pl.ds((2 * i) * 13, HP), :]
        bot = s2[pl.ds((2 * i + 1) * 13, HP), :]
        out_ref[pl.ds(HP * i, HP), :] = jnp.maximum(top, bot).astype(
            out_ref.dtype)


def conv_block(cols1, w1, b1, w2, b2):
    n = cols1.shape[0]
    return pl.pallas_call(
        _conv_block_kernel,
        out_shape=jax.ShapeDtypeStruct((n, HP * HP, C2), jnp.float32),
        grid_spec=pltpu.PrefetchScalarGridSpec(
            num_scalar_prefetch=0,
            grid=(n,),
            in_specs=[
                pl.BlockSpec((None, ROWS1_PAD, 9), lambda i: (i, 0, 0)),
                pl.BlockSpec((9, C1), lambda i: (0, 0)),
                pl.BlockSpec((1, C1), lambda i: (0, 0)),
                pl.BlockSpec((9, C1, C2), lambda i: (0, 0, 0)),
                pl.BlockSpec((1, C2), lambda i: (0, 0)),
            ],
            out_specs=pl.BlockSpec((None, HP * HP, C2), lambda i: (i, 0, 0)),
            scratch_shapes=[
                pltpu.VMEM((ROWS1_PAD, C1), jnp.float32),   # conv1 activation
                pltpu.VMEM((ROWS2, C2), jnp.float32),       # conv2 pre-pool
                pltpu.VMEM((COLP, C2), jnp.float32),        # column-pooled
            ],
        ),
        compiler_params=pltpu.CompilerParams(
            dimension_semantics=("parallel",)),
    )(cols1, w1, b1, w2, b2)


# ---------------------------------------------------------------------------
# Kernel 2: fc1 + ReLU + fc2  (batch-tiled)
# ---------------------------------------------------------------------------
def _fc_kernel(x_ref, w1_ref, b1_ref, w2_ref, b2_ref, o_ref):
    h = jnp.dot(x_ref[...].astype(jnp.bfloat16), w1_ref[...],
                preferred_element_type=jnp.float32)
    h = jnp.maximum(h + b1_ref[...], 0.0)
    o = jnp.dot(h.astype(jnp.bfloat16), w2_ref[...],
                preferred_element_type=jnp.float32)
    o_ref[...] = (o + b2_ref[...]).astype(o_ref.dtype)


def fc_block(x, w1, b1, w2, b2):
    n, k = x.shape
    tile_b = n
    for cand in (512, 256, 128, 64, 32, 16, 8):
        if n % cand == 0:
            tile_b = cand
            break
    return pl.pallas_call(
        _fc_kernel,
        out_shape=jax.ShapeDtypeStruct((n, N_OUT), jnp.float32),
        grid_spec=pltpu.PrefetchScalarGridSpec(
            num_scalar_prefetch=0,
            grid=(n // tile_b,),
            in_specs=[
                pl.BlockSpec((tile_b, k), lambda i: (i, 0)),
                pl.BlockSpec((k, N_HID), lambda i: (0, 0)),
                pl.BlockSpec((1, N_HID), lambda i: (0, 0)),
                pl.BlockSpec((N_HID, N_OUT), lambda i: (0, 0)),
                pl.BlockSpec((1, N_OUT), lambda i: (0, 0)),
            ],
            out_specs=pl.BlockSpec((tile_b, N_OUT), lambda i: (i, 0)),
        ),
        compiler_params=pltpu.CompilerParams(
            dimension_semantics=("parallel",)),
    )(x, w1, b1, w2, b2)


# ---------------------------------------------------------------------------
# Params (PyTorch layout) + one-time kernel re-layout
# ---------------------------------------------------------------------------
def init_params(key):
    ks = jax.random.split(key, 8)

    def u(k, shape, fan_in):
        bound = 1.0 / float(fan_in) ** 0.5
        return jax.random.uniform(k, shape, jnp.float32, -bound, bound)

    return dict(
        conv1_w=u(ks[0], (C1, 1, 3, 3), 9),
        conv1_b=u(ks[1], (C1,), 9),
        conv2_w=u(ks[2], (C2, C1, 3, 3), C1 * 9),
        conv2_b=u(ks[3], (C2,), C1 * 9),
        fc1_w=u(ks[4], (N_HID, K_FC1), K_FC1),
        fc1_b=u(ks[5], (N_HID,), K_FC1),
        fc2_w=u(ks[6], (N_OUT, N_HID), N_HID),
        fc2_b=u(ks[7], (N_OUT,), N_HID),
    )


def prepare_params(p):
    """One-time re-layout of PyTorch-convention weights (no per-call work)."""
    w1 = p["conv1_w"].reshape(C1, 9).T                          # (9, 32)
    w2 = p["conv2_w"].transpose(2, 3, 1, 0).reshape(9, C1, C2)  # (9, 32, 64)
    # fc1: permute K from PyTorch NCHW flatten (c,h,w) to our NHWC flatten
    # (h,w,c), then transpose so the kernel contracts against (K, 128).
    wf1 = (p["fc1_w"].reshape(N_HID, C2, HP, HP)
           .transpose(0, 2, 3, 1).reshape(N_HID, K_FC1).T)      # (9216, 128)
    wf2 = p["fc2_w"].T                                          # (128, 10)
    return dict(
        conv1_w=w1.astype(jnp.bfloat16),
        conv1_b=p["conv1_b"].reshape(1, C1).astype(jnp.float32),
        conv2_w=w2.astype(jnp.bfloat16),
        conv2_b=p["conv2_b"].reshape(1, C2).astype(jnp.float32),
        fc1_w=wf1.astype(jnp.bfloat16),
        fc1_b=p["fc1_b"].reshape(1, N_HID).astype(jnp.float32),
        fc2_w=wf2.astype(jnp.bfloat16),
        fc2_b=p["fc2_b"].reshape(1, N_OUT).astype(jnp.float32),
    )


# ---------------------------------------------------------------------------
# Forward
# ---------------------------------------------------------------------------
def mnist_cnn_forward(x_nchw, kp):
    n = x_nchw.shape[0]
    img = x_nchw[:, 0, :, :]                                    # (N, 28, 28)
    # conv1 im2col on the tiny single-channel input (cheap glue, ~12 KB/img).
    taps = [img[:, dh:dh + H1, dw:dw + H1]
            for dh in range(3) for dw in range(3)]
    cols1 = jnp.stack(taps, axis=-1).reshape(n, ROWS1, 9)
    cols1 = jnp.pad(cols1, ((0, 0), (0, ROWS1_PAD - ROWS1), (0, 0)))
    cols1 = cols1.astype(jnp.bfloat16)

    pooled = conv_block(cols1, kp["conv1_w"], kp["conv1_b"],
                        kp["conv2_w"], kp["conv2_b"])           # (N, 144, 64)
    feats = pooled.reshape(n, K_FC1)                            # free reshape
    return fc_block(feats, kp["fc1_w"], kp["fc1_b"],
                    kp["fc2_w"], kp["fc2_b"])


def reference_forward(x_nchw, p):
    hp = jax.lax.Precision.HIGHEST
    y = jax.lax.conv_general_dilated(
        x_nchw, p["conv1_w"], (1, 1), "VALID",
        dimension_numbers=("NCHW", "OIHW", "NCHW"), precision=hp)
    y = jax.nn.relu(y + p["conv1_b"][None, :, None, None])
    y = jax.lax.conv_general_dilated(
        y, p["conv2_w"], (1, 1), "VALID",
        dimension_numbers=("NCHW", "OIHW", "NCHW"), precision=hp)
    y = jax.nn.relu(y + p["conv2_b"][None, :, None, None])
    y = jax.lax.reduce_window(y, -jnp.inf, jax.lax.max,
                              (1, 1, 2, 2), (1, 1, 2, 2), "VALID")
    y = y.reshape(y.shape[0], -1)
    y = jax.nn.relu(jnp.dot(y, p["fc1_w"].T, precision=hp) + p["fc1_b"])
    return jnp.dot(y, p["fc2_w"].T, precision=hp) + p["fc2_b"]


if __name__ == "__main__":
    key = jax.random.PRNGKey(0)
    pkey, xkey = jax.random.split(key)
    params = init_params(pkey)
    kparams = prepare_params(params)      # one-time weight re-layout

    # MNIST-shaped input (fc1 requires 12*12*64, i.e. 28x28x1), batch=2.
    x = jax.random.normal(xkey, (2, 1, H_IN, H_IN), dtype=jnp.float32)

    fwd = jax.jit(mnist_cnn_forward)
    out = jax.block_until_ready(fwd(x, kparams))
    assert out.shape == (2, N_OUT), out.shape

    ref = reference_forward(x, params)
    max_err = float(jnp.max(jnp.abs(out - ref)))
    assert max_err < 5e-2, f"max abs error {max_err}"

    print("KERNEL_OK")
</pallas_src>

<mosaic_0001>
module attributes {stable_mosaic.version = 11 : i64} {
  func.func @_conv_block_kernel(%arg0: i32, %arg1: memref<1x680x9xbf16, #tpu.memory_space<vmem>>, %arg2: memref<9x32xbf16, #tpu.memory_space<vmem>>, %arg3: memref<1x32xf32, #tpu.memory_space<vmem>>, %arg4: memref<9x32x64xbf16, #tpu.memory_space<vmem>>, %arg5: memref<1x64xf32, #tpu.memory_space<vmem>>, %arg6: memref<1x144x64xf32, #tpu.memory_space<vmem>>, %arg7: memref<680x32xf32, #tpu.memory_space<vmem>>, %arg8: memref<624x64xf32, #tpu.memory_space<vmem>>, %arg9: memref<312x64xf32, #tpu.memory_space<vmem>>) attributes {dimension_semantics = [#tpu.dimension_semantics<parallel>], iteration_bounds = array<i64: 2>, scalar_prefetch = 0 : i64, scratch_operands = 3 : i64, tpu.core_type = #tpu.core_type<tc>, window_params = [{transform_indices = @transform_0, window_bounds = array<i64: 1, 680, 9>}, {pipeline_mode = #tpu.pipeline_mode<synchronous>, transform_indices = @transform_1, window_bounds = array<i64: 9, 32>}, {pipeline_mode = #tpu.pipeline_mode<synchronous>, transform_indices = @transform_2, window_bounds = array<i64: 1, 32>}, {pipeline_mode = #tpu.pipeline_mode<synchronous>, transform_indices = @transform_3, window_bounds = array<i64: 9, 32, 64>}, {pipeline_mode = #tpu.pipeline_mode<synchronous>, transform_indices = @transform_4, window_bounds = array<i64: 1, 64>}, {transform_indices = @transform_5, window_bounds = array<i64: 1, 144, 64>}]} {
    %c0 = arith.constant 0 : index
    %c0_0 = arith.constant 0 : index
    %c0_1 = arith.constant 0 : index
    %0 = vector.load %arg1[%c0, %c0_0, %c0_1] : memref<1x680x9xbf16, #tpu.memory_space<vmem>>, vector<1x680x9xbf16>
    %1 = vector.shape_cast %0 : vector<1x680x9xbf16> to vector<680x9xbf16>
    %c0_2 = arith.constant 0 : index
    %c0_3 = arith.constant 0 : index
    %2 = vector.load %arg2[%c0_2, %c0_3] : memref<9x32xbf16, #tpu.memory_space<vmem>>, vector<9x32xbf16>
    %cst = arith.constant dense<0.000000e+00> : vector<680x32xf32>
    %3 = tpu.matmul %1, %2, %cst {dimension_numbers = #tpu.dot_dimension_numbers<[1], [0], [0], [1], [0, 0, 1, 1], [], []>} : vector<680x9xbf16>, vector<9x32xbf16>, vector<680x32xf32> -> vector<680x32xf32>
    %c0_4 = arith.constant 0 : index
    %c0_5 = arith.constant 0 : index
    %4 = vector.load %arg3[%c0_4, %c0_5] : memref<1x32xf32, #tpu.memory_space<vmem>>, vector<1x32xf32>
    %5 = vector.broadcast %4 : vector<1x32xf32> to vector<680x32xf32>
    %6 = arith.addf %3, %5 : vector<680x32xf32>
    %cst_6 = arith.constant 0.000000e+00 : f32
    %7 = vector.broadcast %cst_6 : f32 to vector<680x32xf32>
    %8 = arith.maximumf %6, %7 : vector<680x32xf32>
    %c0_7 = arith.constant 0 : index
    %c0_8 = arith.constant 0 : index
    %9 = vector.load %arg7[%c0_7, %c0_8] : memref<680x32xf32, #tpu.memory_space<vmem>>, vector<680x32xf32>
    tpu.vector_store %arg7[%c0_7, %c0_8], %8 {strides = array<i32>} : memref<680x32xf32, #tpu.memory_space<vmem>>, vector<680x32xf32>,
    %cst_9 = arith.constant 0.000000e+00 : f32
    %10 = vector.broadcast %cst_9 : f32 to vector<312x64xf32>
    %c0_10 = arith.constant 0 : index
    %c0_11 = arith.constant 0 : index
    %11 = vector.load %arg7[%c0_10, %c0_11] : memref<680x32xf32, #tpu.memory_space<vmem>>, vector<312x32xf32>
    %12 = arith.truncf %11 : vector<312x32xf32> to vector<312x32xbf16>
    %c0_12 = arith.constant 0 : index
    %c0_13 = arith.constant 0 : index
    %c0_14 = arith.constant 0 : index
    %13 = vector.load %arg4[%c0_12, %c0_13, %c0_14] : memref<9x32x64xbf16, #tpu.memory_space<vmem>>, vector<1x32x64xbf16>
    %14 = vector.shape_cast %13 : vector<1x32x64xbf16> to vector<32x64xbf16>
    %cst_15 = arith.constant dense<0.000000e+00> : vector<312x64xf32>
    %15 = tpu.matmul %12, %14, %cst_15 {dimension_numbers = #tpu.dot_dimension_numbers<[1], [0], [0], [1], [0, 0, 1, 1], [], []>} : vector<312x32xbf16>, vector<32x64xbf16>, vector<312x64xf32> -> vector<312x64xf32>
    %16 = arith.addf %10, %15 : vector<312x64xf32>
    %c1 = arith.constant 1 : index
    %c0_16 = arith.constant 0 : index
    %17 = vector.load %arg7[%c1, %c0_16] : memref<680x32xf32, #tpu.memory_space<vmem>>, vector<312x32xf32>
    %18 = arith.truncf %17 : vector<312x32xf32> to vector<312x32xbf16>
    %c1_17 = arith.constant 1 : index
    %c0_18 = arith.constant 0 : index
    %c0_19 = arith.constant 0 : index
    %19 = vector.load %arg4[%c1_17, %c0_18, %c0_19] : memref<9x32x64xbf16, #tpu.memory_space<vmem>>, vector<1x32x64xbf16>
    %20 = vector.shape_cast %19 : vector<1x32x64xbf16> to vector<32x64xbf16>
    %cst_20 = arith.constant dense<0.000000e+00> : vector<312x64xf32>
    %21 = tpu.matmul %18, %20, %cst_20 {dimension_numbers = #tpu.dot_dimension_numbers<[1], [0], [0], [1], [0, 0, 1, 1], [], []>} : vector<312x32xbf16>, vector<32x64xbf16>, vector<312x64xf32> -> vector<312x64xf32>
    %22 = arith.addf %16, %21 : vector<312x64xf32>
    %c2 = arith.constant 2 : index
    %c0_21 = arith.constant 0 : index
    %23 = vector.load %arg7[%c2, %c0_21] : memref<680x32xf32, #tpu.memory_space<vmem>>, vector<312x32xf32>
    %24 = arith.truncf %23 : vector<312x32xf32> to vector<312x32xbf16>
    %c2_22 = arith.constant 2 : index
    %c0_23 = arith.constant 0 : index
    %c0_24 = arith.constant 0 : index
    %25 = vector.load %arg4[%c2_22, %c0_23, %c0_24] : memref<9x32x64xbf16, #tpu.memory_space<vmem>>, vector<1x32x64xbf16>
    %26 = vector.shape_cast %25 : vector<1x32x64xbf16> to vector<32x64xbf16>
    %cst_25 = arith.constant dense<0.000000e+00> : vector<312x64xf32>
    %27 = tpu.matmul %24, %26, %cst_25 {dimension_numbers = #tpu.dot_dimension_numbers<[1], [0], [0], [1], [0, 0, 1, 1], [], []>} : vector<312x32xbf16>, vector<32x64xbf16>, vector<312x64xf32> -> vector<312x64xf32>
    %28 = arith.addf %22, %27 : vector<312x64xf32>
    %c26 = arith.constant 26 : index
    %c0_26 = arith.constant 0 : index
    %29 = vector.load %arg7[%c26, %c0_26] : memref<680x32xf32, #tpu.memory_space<vmem>>, vector<312x32xf32>
    %30 = arith.truncf %29 : vector<312x32xf32> to vector<312x32xbf16>
    %c3 = arith.constant 3 : index
    %c0_27 = arith.constant 0 : index
    %c0_28 = arith.constant 0 : index
    %31 = vector.load %arg4[%c3, %c0_27, %c0_28] : memref<9x32x64xbf16, #tpu.memory_space<vmem>>, vector<1x32x64xbf16>
    %32 = vector.shape_cast %31 : vector<1x32x64xbf16> to vector<32x64xbf16>
    %cst_29 = arith.constant dense<0.000000e+00> : vector<312x64xf32>
    %33 = tpu.matmul %30, %32, %cst_29 {dimension_numbers = #tpu.dot_dimension_numbers<[1], [0], [0], [1], [0, 0, 1, 1], [], []>} : vector<312x32xbf16>, vector<32x64xbf16>, vector<312x64xf32> -> vector<312x64xf32>
    %34 = arith.addf %28, %33 : vector<312x64xf32>
    %c27 = arith.constant 27 : index
    %c0_30 = arith.constant 0 : index
    %35 = vector.load %arg7[%c27, %c0_30] : memref<680x32xf32, #tpu.memory_space<vmem>>, vector<312x32xf32>
    %36 = arith.truncf %35 : vector<312x32xf32> to vector<312x32xbf16>
    %c4 = arith.constant 4 : index
    %c0_31 = arith.constant 0 : index
    %c0_32 = arith.constant 0 : index
    %37 = vector.load %arg4[%c4, %c0_31, %c0_32] : memref<9x32x64xbf16, #tpu.memory_space<vmem>>, vector<1x32x64xbf16>
    %38 = vector.shape_cast %37 : vector<1x32x64xbf16> to vector<32x64xbf16>
    %cst_33 = arith.constant dense<0.000000e+00> : vector<312x64xf32>
    %39 = tpu.matmul %36, %38, %cst_33 {dimension_numbers = #tpu.dot_dimension_numbers<[1], [0], [0], [1], [0, 0, 1, 1], [], []>} : vector<312x32xbf16>, vector<32x64xbf16>, vector<312x64xf32> -> vector<312x64xf32>
    %40 = arith.addf %34, %39 : vector<312x64xf32>
    %c28 = arith.constant 28 : index
    %c0_34 = arith.constant 0 : index
    %41 = vector.load %arg7[%c28, %c0_34] : memref<680x32xf32, #tpu.memory_space<vmem>>, vector<312x32xf32>
    %42 = arith.truncf %41 : vector<312x32xf32> to vector<312x32xbf16>
    %c5 = arith.constant 5 : index
    %c0_35 = arith.constant 0 : index
    %c0_36 = arith.constant 0 : index
    %43 = vector.load %arg4[%c5, %c0_35, %c0_36] : memref<9x32x64xbf16, #tpu.memory_space<vmem>>, vector<1x32x64xbf16>
    %44 = vector.shape_cast %43 : vector<1x32x64xbf16> to vector<32x64xbf16>
    %cst_37 = arith.constant dense<0.000000e+00> : vector<312x64xf32>
    %45 = tpu.matmul %42, %44, %cst_37 {dimension_numbers = #tpu.dot_dimension_numbers<[1], [0], [0], [1], [0, 0, 1, 1], [], []>} : vector<312x32xbf16>, vector<32x64xbf16>, vector<312x64xf32> -> vector<312x64xf32>
    %46 = arith.addf %40, %45 : vector<312x64xf32>
    %c52 = arith.constant 52 : index
    %c0_38 = arith.constant 0 : index
    %47 = vector.load %arg7[%c52, %c0_38] : memref<680x32xf32, #tpu.memory_space<vmem>>, vector<312x32xf32>
    %48 = arith.truncf %47 : vector<312x32xf32> to vector<312x32xbf16>
    %c6 = arith.constant 6 : index
    %c0_39 = arith.constant 0 : index
    %c0_40 = arith.constant 0 : index
    %49 = vector.load %arg4[%c6, %c0_39, %c0_40] : memref<9x32x64xbf16, #tpu.memory_space<vmem>>, vector<1x32x64xbf16>
    %50 = vector.shape_cast %49 : vector<1x32x64xbf16> to vector<32x64xbf16>
    %cst_41 = arith.constant dense<0.000000e+00> : vector<312x64xf32>
    %51 = tpu.matmul %48, %50, %cst_41 {dimension_numbers = #tpu.dot_dimension_numbers<[1], [0], [0], [1], [0, 0, 1, 1], [], []>} : vector<312x32xbf16>, vector<32x64xbf16>, vector<312x64xf32> -> vector<312x64xf32>
    %52 = arith.addf %46, %51 : vector<312x64xf32>
    %c53 = arith.constant 53 : index
    %c0_42 = arith.constant 0 : index
    %53 = vector.load %arg7[%c53, %c0_42] : memref<680x32xf32, #tpu.memory_space<vmem>>, vector<312x32xf32>
    %54 = arith.truncf %53 : vector<312x32xf32> to vector<312x32xbf16>
    %c7 = arith.constant 7 : index
    %c0_43 = arith.constant 0 : index
    %c0_44 = arith.constant 0 : index
    %55 = vector.load %arg4[%c7, %c0_43, %c0_44] : memref<9x32x64xbf16, #tpu.memory_space<vmem>>, vector<1x32x64xbf16>
    %56 = vector.shape_cast %55 : vector<1x32x64xbf16> to vector<32x64xbf16>
    %cst_45 = arith.constant dense<0.000000e+00> : vector<312x64xf32>
    %57 = tpu.matmul %54, %56, %cst_45 {dimension_numbers = #tpu.dot_dimension_numbers<[1], [0], [0], [1], [0, 0, 1, 1], [], []>} : vector<312x32xbf16>, vector<32x64xbf16>, vector<312x64xf32> -> vector<312x64xf32>
    %58 = arith.addf %52, %57 : vector<312x64xf32>
    %c54 = arith.constant 54 : index
    %c0_46 = arith.constant 0 : index
    %59 = vector.load %arg7[%c54, %c0_46] : memref<680x32xf32, #tpu.memory_space<vmem>>, vector<312x32xf32>
    %60 = arith.truncf %59 : vector<312x32xf32> to vector<312x32xbf16>
    %c8 = arith.constant 8 : index
    %c0_47 = arith.constant 0 : index
    %c0_48 = arith.constant 0 : index
    %61 = vector.load %arg4[%c8, %c0_47, %c0_48] : memref<9x32x64xbf16, #tpu.memory_space<vmem>>, vector<1x32x64xbf16>
    %62 = vector.shape_cast %61 : vector<1x32x64xbf16> to vector<32x64xbf16>
    %cst_49 = arith.constant dense<0.000000e+00> : vector<312x64xf32>
    %63 = tpu.matmul %60, %62, %cst_49 {dimension_numbers = #tpu.dot_dimension_numbers<[1], [0], [0], [1], [0, 0, 1, 1], [], []>} : vector<312x32xbf16>, vector<32x64xbf16>, vector<312x64xf32> -> vector<312x64xf32>
    %64 = arith.addf %58, %63 : vector<312x64xf32>
    %c0_50 = arith.constant 0 : index
    %c0_51 = arith.constant 0 : index
    %65 = vector.load %arg5[%c0_50, %c0_51] : memref<1x64xf32, #tpu.memory_space<vmem>>, vector<1x64xf32>
    %66 = vector.broadcast %65 : vector<1x64xf32> to vector<312x64xf32>
    %67 = arith.addf %64, %66 : vector<312x64xf32>
    %cst_52 = arith.constant 0.000000e+00 : f32
    %68 = vector.broadcast %cst_52 : f32 to vector<312x64xf32>
    %69 = arith.maximumf %67, %68 : vector<312x64xf32>
    %c0_53 = arith.constant 0 : index
    %c0_54 = arith.constant 0 : index
    %70 = vector.load %arg8[%c0_53, %c0_54] : memref<624x64xf32, #tpu.memory_space<vmem>>, vector<312x64xf32>
    tpu.vector_store %arg8[%c0_53, %c0_54], %69 {strides = array<i32>} : memref<624x64xf32, #tpu.memory_space<vmem>>, vector<312x64xf32>,
    %cst_55 = arith.constant 0.000000e+00 : f32
    %71 = vector.broadcast %cst_55 : f32 to vector<312x64xf32>
    %c312 = arith.constant 312 : index
    %c0_56 = arith.constant 0 : index
    %72 = vector.load %arg7[%c312, %c0_56] : memref<680x32xf32, #tpu.memory_space<vmem>>, vector<312x32xf32>
    %73 = arith.truncf %72 : vector<312x32xf32> to vector<312x32xbf16>
    %c0_57 = arith.constant 0 : index
    %c0_58 = arith.constant 0 : index
    %c0_59 = arith.constant 0 : index
    %74 = vector.load %arg4[%c0_57, %c0_58, %c0_59] : memref<9x32x64xbf16, #tpu.memory_space<vmem>>, vector<1x32x64xbf16>
    %75 = vector.shape_cast %74 : vector<1x32x64xbf16> to vector<32x64xbf16>
    %cst_60 = arith.constant dense<0.000000e+00> : vector<312x64xf32>
    %76 = tpu.matmul %73, %75, %cst_60 {dimension_numbers = #tpu.dot_dimension_numbers<[1], [0], [0], [1], [0, 0, 1, 1], [], []>} : vector<312x32xbf16>, vector<32x64xbf16>, vector<312x64xf32> -> vector<312x64xf32>
    %77 = arith.addf %71, %76 : vector<312x64xf32>
    %c313 = arith.constant 313 : index
    %c0_61 = arith.constant 0 : index
    %78 = vector.load %arg7[%c313, %c0_61] : memref<680x32xf32, #tpu.memory_space<vmem>>, vector<312x32xf32>
    %79 = arith.truncf %78 : vector<312x32xf32> to vector<312x32xbf16>
    %c1_62 = arith.constant 1 : index
    %c0_63 = arith.constant 0 : index
    %c0_64 = arith.constant 0 : index
    %80 = vector.load %arg4[%c1_62, %c0_63, %c0_64] : memref<9x32x64xbf16, #tpu.memory_space<vmem>>, vector<1x32x64xbf16>
    %81 = vector.shape_cast %80 : vector<1x32x64xbf16> to vector<32x64xbf16>
    %cst_65 = arith.constant dense<0.000000e+00> : vector<312x64xf32>
    %82 = tpu.matmul %79, %81, %cst_65 {dimension_numbers = #tpu.dot_dimension_numbers<[1], [0], [0], [1], [0, 0, 1, 1], [], []>} : vector<312x32xbf16>, vector<32x64xbf16>, vector<312x64xf32> -> vector<312x64xf32>
    %83 = arith.addf %77, %82 : vector<312x64xf32>
    %c314 = arith.constant 314 : index
    %c0_66 = arith.constant 0 : index
    %84 = vector.load %arg7[%c314, %c0_66] : memref<680x32xf32, #tpu.memory_space<vmem>>, vector<312x32xf32>
    %85 = arith.truncf %84 : vector<312x32xf32> to vector<312x32xbf16>
    %c2_67 = arith.constant 2 : index
    %c0_68 = arith.constant 0 : index
    %c0_69 = arith.constant 0 : index
    %86 = vector.load %arg4[%c2_67, %c0_68, %c0_69] : memref<9x32x64xbf16, #tpu.memory_space<vmem>>, vector<1x32x64xbf16>
    %87 = vector.shape_cast %86 : vector<1x32x64xbf16> to vector<32x64xbf16>
    %cst_70 = arith.constant dense<0.000000e+00> : vector<312x64xf32>
    %88 = tpu.matmul %85, %87, %cst_70 {dimension_numbers = #tpu.dot_dimension_numbers<[1], [0], [0], [1], [0, 0, 1, 1], [], []>} : vector<312x32xbf16>, vector<32x64xbf16>, vector<312x64xf32> -> vector<312x64xf32>
    %89 = arith.addf %83, %88 : vector<312x64xf32>
    %c338 = arith.constant 338 : index
    %c0_71 = arith.constant 0 : index
    %90 = vector.load %arg7[%c338, %c0_71] : memref<680x32xf32, #tpu.memory_space<vmem>>, vector<312x32xf32>
    %91 = arith.truncf %90 : vector<312x32xf32> to vector<312x32xbf16>
    %c3_72 = arith.constant 3 : index
    %c0_73 = arith.constant 0 : index
    %c0_74 = arith.constant 0 : index
    %92 = vector.load %arg4[%c3_72, %c0_73, %c0_74] : memref<9x32x64xbf16, #tpu.memory_space<vmem>>, vector<1x32x64xbf16>
    %93 = vector.shape_cast %92 : vector<1x32x64xbf16> to vector<32x64xbf16>
    %cst_75 = arith.constant dense<0.000000e+00> : vector<312x64xf32>
    %94 = tpu.matmul %91, %93, %cst_75 {dimension_numbers = #tpu.dot_dimension_numbers<[1], [0], [0], [1], [0, 0, 1, 1], [], []>} : vector<312x32xbf16>, vector<32x64xbf16>, vector<312x64xf32> -> vector<312x64xf32>
    %95 = arith.addf %89, %94 : vector<312x64xf32>
    %c339 = arith.constant 339 : index
    %c0_76 = arith.constant 0 : index
    %96 = vector.load %arg7[%c339, %c0_76] : memref<680x32xf32, #tpu.memory_space<vmem>>, vector<312x32xf32>
    %97 = arith.truncf %96 : vector<312x32xf32> to vector<312x32xbf16>
    %c4_77 = arith.constant 4 : index
    %c0_78 = arith.constant 0 : index
    %c0_79 = arith.constant 0 : index
    %98 = vector.load %arg4[%c4_77, %c0_78, %c0_79] : memref<9x32x64xbf16, #tpu.memory_space<vmem>>, vector<1x32x64xbf16>
    %99 = vector.shape_cast %98 : vector<1x32x64xbf16> to vector<32x64xbf16>
    %cst_80 = arith.constant dense<0.000000e+00> : vector<312x64xf32>
    %100 = tpu.matmul %97, %99, %cst_80 {dimension_numbers = #tpu.dot_dimension_numbers<[1], [0], [0], [1], [0, 0, 1, 1], [], []>} : vector<312x32xbf16>, vector<32x64xbf16>, vector<312x64xf32> -> vector<312x64xf32>
    %101 = arith.addf %95, %100 : vector<312x64xf32>
    %c340 = arith.constant 340 : index
    %c0_81 = arith.constant 0 : index
    %102 = vector.load %arg7[%c340, %c0_81] : memref<680x32xf32, #tpu.memory_space<vmem>>, vector<312x32xf32>
    %103 = arith.truncf %102 : vector<312x32xf32> to vector<312x32xbf16>
    %c5_82 = arith.constant 5 : index
    %c0_83 = arith.constant 0 : index
    %c0_84 = arith.constant 0 : index
    %104 = vector.load %arg4[%c5_82, %c0_83, %c0_84] : memref<9x32x64xbf16, #tpu.memory_space<vmem>>, vector<1x32x64xbf16>
    %105 = vector.shape_cast %104 : vector<1x32x64xbf16> to vector<32x64xbf16>
    %cst_85 = arith.constant dense<0.000000e+00> : vector<312x64xf32>
    %106 = tpu.matmul %103, %105, %cst_85 {dimension_numbers = #tpu.dot_dimension_numbers<[1], [0], [0], [1], [0, 0, 1, 1], [], []>} : vector<312x32xbf16>, vector<32x64xbf16>, vector<312x64xf32> -> vector<312x64xf32>
    %107 = arith.addf %101, %106 : vector<312x64xf32>
    %c364 = arith.constant 364 : index
    %c0_86 = arith.constant 0 : index
    %108 = vector.load %arg7[%c364, %c0_86] : memref<680x32xf32, #tpu.memory_space<vmem>>, vector<312x32xf32>
    %109 = arith.truncf %108 : vector<312x32xf32> to vector<312x32xbf16>
    %c6_87 = arith.constant 6 : index
    %c0_88 = arith.constant 0 : index
    %c0_89 = arith.constant 0 : index
    %110 = vector.load %arg4[%c6_87, %c0_88, %c0_89] : memref<9x32x64xbf16, #tpu.memory_space<vmem>>, vector<1x32x64xbf16>
    %111 = vector.shape_cast %110 : vector<1x32x64xbf16> to vector<32x64xbf16>
    %cst_90 = arith.constant dense<0.000000e+00> : vector<312x64xf32>
    %112 = tpu.matmul %109, %111, %cst_90 {dimension_numbers = #tpu.dot_dimension_numbers<[1], [0], [0], [1], [0, 0, 1, 1], [], []>} : vector<312x32xbf16>, vector<32x64xbf16>, vector<312x64xf32> -> vector<312x64xf32>
    %113 = arith.addf %107, %112 : vector<312x64xf32>
    %c365 = arith.constant 365 : index
    %c0_91 = arith.constant 0 : index
    %114 = vector.load %arg7[%c365, %c0_91] : memref<680x32xf32, #tpu.memory_space<vmem>>, vector<312x32xf32>
    %115 = arith.truncf %114 : vector<312x32xf32> to vector<312x32xbf16>
    %c7_92 = arith.constant 7 : index
    %c0_93 = arith.constant 0 : index
    %c0_94 = arith.constant 0 : index
    %116 = vector.load %arg4[%c7_92, %c0_93, %c0_94] : memref<9x32x64xbf16, #tpu.memory_space<vmem>>, vector<1x32x64xbf16>
    %117 = vector.shape_cast %116 : vector<1x32x64xbf16> to vector<32x64xbf16>
    %cst_95 = arith.constant dense<0.000000e+00> : vector<312x64xf32>
    %118 = tpu.matmul %115, %117, %cst_95 {dimension_numbers = #tpu.dot_dimension_numbers<[1], [0], [0], [1], [0, 0, 1, 1], [], []>} : vector<312x32xbf16>, vector<32x64xbf16>, vector<312x64xf32> -> vector<312x64xf32>
    %119 = arith.addf %113, %118 : vector<312x64xf32>
    %c366 = arith.constant 366 : index
    %c0_96 = arith.constant 0 : index
    %120 = vector.load %arg7[%c366, %c0_96] : memref<680x32xf32, #tpu.memory_space<vmem>>, vector<312x32xf32>
    %121 = arith.truncf %120 : vector<312x32xf32> to vector<312x32xbf16>
    %c8_97 = arith.constant 8 : index
    %c0_98 = arith.constant 0 : index
    %c0_99 = arith.constant 0 : index
    %122 = vector.load %arg4[%c8_97, %c0_98, %c0_99] : memref<9x32x64xbf16, #tpu.memory_space<vmem>>, vector<1x32x64xbf16>
    %123 = vector.shape_cast %122 : vector<1x32x64xbf16> to vector<32x64xbf16>
    %cst_100 = arith.constant dense<0.000000e+00> : vector<312x64xf32>
    %124 = tpu.matmul %121, %123, %cst_100 {dimension_numbers = #tpu.dot_dimension_numbers<[1], [0], [0], [1], [0, 0, 1, 1], [], []>} : vector<312x32xbf16>, vector<32x64xbf16>, vector<312x64xf32> -> vector<312x64xf32>
    %125 = arith.addf %119, %124 : vector<312x64xf32>
    %c0_101 = arith.constant 0 : index
    %c0_102 = arith.constant 0 : index
    %126 = vector.load %arg5[%c0_101, %c0_102] : memref<1x64xf32, #tpu.memory_space<vmem>>, vector<1x64xf32>
    %127 = vector.broadcast %126 : vector<1x64xf32> to vector<312x64xf32>
    %128 = arith.addf %125, %127 : vector<312x64xf32>
    %cst_103 = arith.constant 0.000000e+00 : f32
    %129 = vector.broadcast %cst_103 : f32 to vector<312x64xf32>
    %130 = arith.maximumf %128, %129 : vector<312x64xf32>
    %c312_104 = arith.constant 312 : index
    %c0_105 = arith.constant 0 : index
    %131 = vector.load %arg8[%c312_104, %c0_105] : memref<624x64xf32, #tpu.memory_space<vmem>>, vector<312x64xf32>
    tpu.vector_store %arg8[%c312_104, %c0_105], %130 {strides = array<i32>} : memref<624x64xf32, #tpu.memory_space<vmem>>, vector<312x64xf32>,
    %c0_106 = arith.constant 0 : index
    %c0_107 = arith.constant 0 : index
    %132 = tpu.strided_load %arg8[%c0_106, %c0_107] {strides = array<i32: 2, 1>} : memref<624x64xf32, #tpu.memory_space<vmem>>, vector<312x64xf32>
    %c1_108 = arith.constant 1 : index
    %c0_109 = arith.constant 0 : index
    %133 = tpu.strided_load %arg8[%c1_108, %c0_109] {strides = array<i32: 2, 1>} : memref<624x64xf32, #tpu.memory_space<vmem>>, vector<312x64xf32>
    %134 = arith.maximumf %132, %133 : vector<312x64xf32>
    %c0_110 = arith.constant 0 : index
    %c0_111 = arith.constant 0 : index
    %135 = vector.load %arg9[%c0_110, %c0_111] : memref<312x64xf32, #tpu.memory_space<vmem>>, vector<312x64xf32>
    tpu.vector_store %arg9[%c0_110, %c0_111], %134 {strides = array<i32>} : memref<312x64xf32, #tpu.memory_space<vmem>>, vector<312x64xf32>,
    %c0_112 = arith.constant 0 : index
    %c0_113 = arith.constant 0 : index
    %136 = vector.load %arg9[%c0_112, %c0_113] : memref<312x64xf32, #tpu.memory_space<vmem>>, vector<12x64xf32>
    %c13 = arith.constant 13 : index
    %c0_114 = arith.constant 0 : index
    %137 = vector.load %arg9[%c13, %c0_114] : memref<312x64xf32, #tpu.memory_space<vmem>>, vector<12x64xf32>
    %138 = arith.maximumf %136, %137 : vector<12x64xf32>
    %c0_115 = arith.constant 0 : index
    %c0_116 = arith.constant 0 : index
    %c0_117 = arith.constant 0 : index
    %139 = vector.load %arg6[%c0_115, %c0_116, %c0_117] : memref<1x144x64xf32, #tpu.memory_space<vmem>>, vector<1x12x64xf32>
    %140 = vector.shape_cast %139 : vector<1x12x64xf32> to vector<12x64xf32>
    %141 = vector.shape_cast %138 : vector<12x64xf32> to vector<1x12x64xf32>
    tpu.vector_store %arg6[%c0_115, %c0_116, %c0_117], %141 {strides = array<i32>} : memref<1x144x64xf32, #tpu.memory_space<vmem>>, vector<1x12x64xf32>,
    %c26_118 = arith.constant 26 : index
    %c0_119 = arith.constant 0 : index
    %142 = vector.load %arg9[%c26_118, %c0_119] : memref<312x64xf32, #tpu.memory_space<vmem>>, vector<12x64xf32>
    %c39 = arith.constant 39 : index
    %c0_120 = arith.constant 0 : index
    %143 = vector.load %arg9[%c39, %c0_120] : memref<312x64xf32, #tpu.memory_space<vmem>>, vector<12x64xf32>
    %144 = arith.maximumf %142, %143 : vector<12x64xf32>
    %c0_121 = arith.constant 0 : index
    %c12 = arith.constant 12 : index
    %c0_122 = arith.constant 0 : index
    %145 = vector.load %arg6[%c0_121, %c12, %c0_122] : memref<1x144x64xf32, #tpu.memory_space<vmem>>, vector<1x12x64xf32>
    %146 = vector.shape_cast %145 : vector<1x12x64xf32> to vector<12x64xf32>
    %147 = vector.shape_cast %144 : vector<12x64xf32> to vector<1x12x64xf32>
    tpu.vector_store %arg6[%c0_121, %c12, %c0_122], %147 {strides = array<i32>} : memref<1x144x64xf32, #tpu.memory_space<vmem>>, vector<1x12x64xf32>,
    %c52_123 = arith.constant 52 : index
    %c0_124 = arith.constant 0 : index
    %148 = vector.load %arg9[%c52_123, %c0_124] : memref<312x64xf32, #tpu.memory_space<vmem>>, vector<12x64xf32>
    %c65 = arith.constant 65 : index
    %c0_125 = arith.constant 0 : index
    %149 = vector.load %arg9[%c65, %c0_125] : memref<312x64xf32, #tpu.memory_space<vmem>>, vector<12x64xf32>
    %150 = arith.maximumf %148, %149 : vector<12x64xf32>
    %c0_126 = arith.constant 0 : index
    %c24 = arith.constant 24 : index
    %c0_127 = arith.constant 0 : index
    %151 = vector.load %arg6[%c0_126, %c24, %c0_127] : memref<1x144x64xf32, #tpu.memory_space<vmem>>, vector<1x12x64xf32>
    %152 = vector.shape_cast %151 : vector<1x12x64xf32> to vector<12x64xf32>
    %153 = vector.shape_cast %150 : vector<12x64xf32> to vector<1x12x64xf32>
    tpu.vector_store %arg6[%c0_126, %c24, %c0_127], %153 {strides = array<i32>} : memref<1x144x64xf32, #tpu.memory_space<vmem>>, vector<1x12x64xf32>,
    %c78 = arith.constant 78 : index
    %c0_128 = arith.constant 0 : index
    %154 = vector.load %arg9[%c78, %c0_128] : memref<312x64xf32, #tpu.memory_space<vmem>>, vector<12x64xf32>
    %c91 = arith.constant 91 : index
    %c0_129 = arith.constant 0 : index
    %155 = vector.load %arg9[%c91, %c0_129] : memref<312x64xf32, #tpu.memory_space<vmem>>, vector<12x64xf32>
    %156 = arith.maximumf %154, %155 : vector<12x64xf32>
    %c0_130 = arith.constant 0 : index
    %c36 = arith.constant 36 : index
    %c0_131 = arith.constant 0 : index
    %157 = vector.load %arg6[%c0_130, %c36, %c0_131] : memref<1x144x64xf32, #tpu.memory_space<vmem>>, vector<1x12x64xf32>
    %158 = vector.shape_cast %157 : vector<1x12x64xf32> to vector<12x64xf32>
    %159 = vector.shape_cast %156 : vector<12x64xf32> to vector<1x12x64xf32>
    tpu.vector_store %arg6[%c0_130, %c36, %c0_131], %159 {strides = array<i32>} : memref<1x144x64xf32, #tpu.memory_space<vmem>>, vector<1x12x64xf32>,
    %c104 = arith.constant 104 : index
    %c0_132 = arith.constant 0 : index
    %160 = vector.load %arg9[%c104, %c0_132] : memref<312x64xf32, #tpu.memory_space<vmem>>, vector<12x64xf32>
    %c117 = arith.constant 117 : index
    %c0_133 = arith.constant 0 : index
    %161 = vector.load %arg9[%c117, %c0_133] : memref<312x64xf32, #tpu.memory_space<vmem>>, vector<12x64xf32>
    %162 = arith.maximumf %160, %161 : vector<12x64xf32>
    %c0_134 = arith.constant 0 : index
    %c48 = arith.constant 48 : index
    %c0_135 = arith.constant 0 : index
    %163 = vector.load %arg6[%c0_134, %c48, %c0_135] : memref<1x144x64xf32, #tpu.memory_space<vmem>>, vector<1x12x64xf32>
    %164 = vector.shape_cast %163 : vector<1x12x64xf32> to vector<12x64xf32>
    %165 = vector.shape_cast %162 : vector<12x64xf32> to vector<1x12x64xf32>
    tpu.vector_store %arg6[%c0_134, %c48, %c0_135], %165 {strides = array<i32>} : memref<1x144x64xf32, #tpu.memory_space<vmem>>, vector<1x12x64xf32>,
    %c130 = arith.constant 130 : index
    %c0_136 = arith.constant 0 : index
    %166 = vector.load %arg9[%c130, %c0_136] : memref<312x64xf32, #tpu.memory_space<vmem>>, vector<12x64xf32>
    %c143 = arith.constant 143 : index
    %c0_137 = arith.constant 0 : index
    %167 = vector.load %arg9[%c143, %c0_137] : memref<312x64xf32, #tpu.memory_space<vmem>>, vector<12x64xf32>
    %168 = arith.maximumf %166, %167 : vector<12x64xf32>
    %c0_138 = arith.constant 0 : index
    %c60 = arith.constant 60 : index
    %c0_139 = arith.constant 0 : index
    %169 = vector.load %arg6[%c0_138, %c60, %c0_139] : memref<1x144x64xf32, #tpu.memory_space<vmem>>, vector<1x12x64xf32>
    %170 = vector.shape_cast %169 : vector<1x12x64xf32> to vector<12x64xf32>
    %171 = vector.shape_cast %168 : vector<12x64xf32> to vector<1x12x64xf32>
    tpu.vector_store %arg6[%c0_138, %c60, %c0_139], %171 {strides = array<i32>} : memref<1x144x64xf32, #tpu.memory_space<vmem>>, vector<1x12x64xf32>,
    %c156 = arith.constant 156 : index
    %c0_140 = arith.constant 0 : index
    %172 = vector.load %arg9[%c156, %c0_140] : memref<312x64xf32, #tpu.memory_space<vmem>>, vector<12x64xf32>
    %c169 = arith.constant 169 : index
    %c0_141 = arith.constant 0 : index
    %173 = vector.load %arg9[%c169, %c0_141] : memref<312x64xf32, #tpu.memory_space<vmem>>, vector<12x64xf32>
    %174 = arith.maximumf %172, %173 : vector<12x64xf32>
    %c0_142 = arith.constant 0 : index
    %c72 = arith.constant 72 : index
    %c0_143 = arith.constant 0 : index
    %175 = vector.load %arg6[%c0_142, %c72, %c0_143] : memref<1x144x64xf32, #tpu.memory_space<vmem>>, vector<1x12x64xf32>
    %176 = vector.shape_cast %175 : vector<1x12x64xf32> to vector<12x64xf32>
    %177 = vector.shape_cast %174 : vector<12x64xf32> to vector<1x12x64xf32>
    tpu.vector_store %arg6[%c0_142, %c72, %c0_143], %177 {strides = array<i32>} : memref<1x144x64xf32, #tpu.memory_space<vmem>>, vector<1x12x64xf32>,
    %c182 = arith.constant 182 : index
    %c0_144 = arith.constant 0 : index
    %178 = vector.load %arg9[%c182, %c0_144] : memref<312x64xf32, #tpu.memory_space<vmem>>, vector<12x64xf32>
    %c195 = arith.constant 195 : index
    %c0_145 = arith.constant 0 : index
    %179 = vector.load %arg9[%c195, %c0_145] : memref<312x64xf32, #tpu.memory_space<vmem>>, vector<12x64xf32>
    %180 = arith.maximumf %178, %179 : vector<12x64xf32>
    %c0_146 = arith.constant 0 : index
    %c84 = arith.constant 84 : index
    %c0_147 = arith.constant 0 : index
    %181 = vector.load %arg6[%c0_146, %c84, %c0_147] : memref<1x144x64xf32, #tpu.memory_space<vmem>>, vector<1x12x64xf32>
    %182 = vector.shape_cast %181 : vector<1x12x64xf32> to vector<12x64xf32>
    %183 = vector.shape_cast %180 : vector<12x64xf32> to vector<1x12x64xf32>
    tpu.vector_store %arg6[%c0_146, %c84, %c0_147], %183 {strides = array<i32>} : memref<1x144x64xf32, #tpu.memory_space<vmem>>, vector<1x12x64xf32>,
    %c208 = arith.constant 208 : index
    %c0_148 = arith.constant 0 : index
    %184 = vector.load %arg9[%c208, %c0_148] : memref<312x64xf32, #tpu.memory_space<vmem>>, vector<12x64xf32>
    %c221 = arith.constant 221 : index
    %c0_149 = arith.constant 0 : index
    %185 = vector.load %arg9[%c221, %c0_149] : memref<312x64xf32, #tpu.memory_space<vmem>>, vector<12x64xf32>
    %186 = arith.maximumf %184, %185 : vector<12x64xf32>
    %c0_150 = arith.constant 0 : index
    %c96 = arith.constant 96 : index
    %c0_151 = arith.constant 0 : index
    %187 = vector.load %arg6[%c0_150, %c96, %c0_151] : memref<1x144x64xf32, #tpu.memory_space<vmem>>, vector<1x12x64xf32>
    %188 = vector.shape_cast %187 : vector<1x12x64xf32> to vector<12x64xf32>
    %189 = vector.shape_cast %186 : vector<12x64xf32> to vector<1x12x64xf32>
    tpu.vector_store %arg6[%c0_150, %c96, %c0_151], %189 {strides = array<i32>} : memref<1x144x64xf32, #tpu.memory_space<vmem>>, vector<1x12x64xf32>,
    %c234 = arith.constant 234 : index
    %c0_152 = arith.constant 0 : index
    %190 = vector.load %arg9[%c234, %c0_152] : memref<312x64xf32, #tpu.memory_space<vmem>>, vector<12x64xf32>
    %c247 = arith.constant 247 : index
    %c0_153 = arith.constant 0 : index
    %191 = vector.load %arg9[%c247, %c0_153] : memref<312x64xf32, #tpu.memory_space<vmem>>, vector<12x64xf32>
    %192 = arith.maximumf %190, %191 : vector<12x64xf32>
    %c0_154 = arith.constant 0 : index
    %c108 = arith.constant 108 : index
    %c0_155 = arith.constant 0 : index
    %193 = vector.load %arg6[%c0_154, %c108, %c0_155] : memref<1x144x64xf32, #tpu.memory_space<vmem>>, vector<1x12x64xf32>
    %194 = vector.shape_cast %193 : vector<1x12x64xf32> to vector<12x64xf32>
    %195 = vector.shape_cast %192 : vector<12x64xf32> to vector<1x12x64xf32>
    tpu.vector_store %arg6[%c0_154, %c108, %c0_155], %195 {strides = array<i32>} : memref<1x144x64xf32, #tpu.memory_space<vmem>>, vector<1x12x64xf32>,
    %c260 = arith.constant 260 : index
    %c0_156 = arith.constant 0 : index
    %196 = vector.load %arg9[%c260, %c0_156] : memref<312x64xf32, #tpu.memory_space<vmem>>, vector<12x64xf32>
    %c273 = arith.constant 273 : index
    %c0_157 = arith.constant 0 : index
    %197 = vector.load %arg9[%c273, %c0_157] : memref<312x64xf32, #tpu.memory_space<vmem>>, vector<12x64xf32>
    %198 = arith.maximumf %196, %197 : vector<12x64xf32>
    %c0_158 = arith.constant 0 : index
    %c120 = arith.constant 120 : index
    %c0_159 = arith.constant 0 : index
    %199 = vector.load %arg6[%c0_158, %c120, %c0_159] : memref<1x144x64xf32, #tpu.memory_space<vmem>>, vector<1x12x64xf32>
    %200 = vector.shape_cast %199 : vector<1x12x64xf32> to vector<12x64xf32>
    %201 = vector.shape_cast %198 : vector<12x64xf32> to vector<1x12x64xf32>
    tpu.vector_store %arg6[%c0_158, %c120, %c0_159], %201 {strides = array<i32>} : memref<1x144x64xf32, #tpu.memory_space<vmem>>, vector<1x12x64xf32>,
    %c286 = arith.constant 286 : index
    %c0_160 = arith.constant 0 : index
    %202 = vector.load %arg9[%c286, %c0_160] : memref<312x64xf32, #tpu.memory_space<vmem>>, vector<12x64xf32>
    %c299 = arith.constant 299 : index
    %c0_161 = arith.constant 0 : index
    %203 = vector.load %arg9[%c299, %c0_161] : memref<312x64xf32, #tpu.memory_space<vmem>>, vector<12x64xf32>
    %204 = arith.maximumf %202, %203 : vector<12x64xf32>
    %c0_162 = arith.constant 0 : index
    %c132 = arith.constant 132 : index
    %c0_163 = arith.constant 0 : index
    %205 = vector.load %arg6[%c0_162, %c132, %c0_163] : memref<1x144x64xf32, #tpu.memory_space<vmem>>, vector<1x12x64xf32>
    %206 = vector.shape_cast %205 : vector<1x12x64xf32> to vector<12x64xf32>
    %207 = vector.shape_cast %204 : vector<12x64xf32> to vector<1x12x64xf32>
    tpu.vector_store %arg6[%c0_162, %c132, %c0_163], %207 {strides = array<i32>} : memref<1x144x64xf32, #tpu.memory_space<vmem>>, vector<1x12x64xf32>,
    return
  }
  func.func @transform_0(%arg0: i32) -> (i32, i32, i32) {
    %c0_i32 = arith.constant 0 : i32
    %c0_i32_0 = arith.constant 0 : i32
    %c0_i32_1 = arith.constant 0 : i32
    return %arg0, %c0_i32, %c0_i32_0 : i32, i32, i32
  }
  func.func @transform_1(%arg0: i32) -> (i32, i32) {
    %c0_i32 = arith.constant 0 : i32
    %c0_i32_0 = arith.constant 0 : i32
    %c0_i32_1 = arith.constant 0 : i32
    return %c0_i32, %c0_i32_0 : i32, i32
  }
  func.func @transform_2(%arg0: i32) -> (i32, i32) {
    %c0_i32 = arith.constant 0 : i32
    %c0_i32_0 = arith.constant 0 : i32
    %c0_i32_1 = arith.constant 0 : i32
    return %c0_i32, %c0_i32_0 : i32, i32
  }
  func.func @transform_3(%arg0: i32) -> (i32, i32, i32) {
    %c0_i32 = arith.constant 0 : i32
    %c0_i32_0 = arith.constant 0 : i32
    %c0_i32_1 = arith.constant 0 : i32
    %c0_i32_2 = arith.constant 0 : i32
    return %c0_i32, %c0_i32_0, %c0_i32_1 : i32, i32, i32
  }
  func.func @transform_4(%arg0: i32) -> (i32, i32) {
    %c0_i32 = arith.constant 0 : i32
    %c0_i32_0 = arith.constant 0 : i32
    %c0_i32_1 = arith.constant 0 : i32
    return %c0_i32, %c0_i32_0 : i32, i32
  }
  func.func @transform_5(%arg0: i32) -> (i32, i32, i32) {
    %c0_i32 = arith.constant 0 : i32
    %c0_i32_0 = arith.constant 0 : i32
    %c0_i32_1 = arith.constant 0 : i32
    return %arg0, %c0_i32, %c0_i32_0 : i32, i32, i32
  }
}

module attributes {stable_mosaic.version = 11 : i64} {
  func.func @_fc_kernel(%arg0: i32, %arg1: memref<2x9216xf32, #tpu.memory_space<vmem>>, %arg2: memref<9216x128xbf16, #tpu.memory_space<vmem>>, %arg3: memref<1x128xf32, #tpu.memory_space<vmem>>, %arg4: memref<128x10xbf16, #tpu.memory_space<vmem>>, %arg5: memref<1x10xf32, #tpu.memory_space<vmem>>, %arg6: memref<2x10xf32, #tpu.memory_space<vmem>>) attributes {dimension_semantics = [#tpu.dimension_semantics<parallel>], iteration_bounds = array<i64: 1>, scalar_prefetch = 0 : i64, scratch_operands = 0 : i64, tpu.core_type = #tpu.core_type<tc>, window_params = [{transform_indices = @transform_0, window_bounds = array<i64: 2, 9216>}, {pipeline_mode = #tpu.pipeline_mode<synchronous>, transform_indices = @transform_1, window_bounds = array<i64: 9216, 128>}, {pipeline_mode = #tpu.pipeline_mode<synchronous>, transform_indices = @transform_2, window_bounds = array<i64: 1, 128>}, {pipeline_mode = #tpu.pipeline_mode<synchronous>, transform_indices = @transform_3, window_bounds = array<i64: 128, 10>}, {pipeline_mode = #tpu.pipeline_mode<synchronous>, transform_indices = @transform_4, window_bounds = array<i64: 1, 10>}, {transform_indices = @transform_5, window_bounds = array<i64: 2, 10>}]} {
    %c0 = arith.constant 0 : index
    %c0_0 = arith.constant 0 : index
    %0 = vector.load %arg1[%c0, %c0_0] : memref<2x9216xf32, #tpu.memory_space<vmem>>, vector<2x9216xf32>
    %1 = arith.truncf %0 : vector<2x9216xf32> to vector<2x9216xbf16>
    %c0_1 = arith.constant 0 : index
    %c0_2 = arith.constant 0 : index
    %2 = vector.load %arg2[%c0_1, %c0_2] : memref<9216x128xbf16, #tpu.memory_space<vmem>>, vector<9216x128xbf16>
    %cst = arith.constant dense<0.000000e+00> : vector<2x128xf32>
    %3 = tpu.matmul %1, %2, %cst {dimension_numbers = #tpu.dot_dimension_numbers<[1], [0], [0], [1], [0, 0, 1, 1], [], []>} : vector<2x9216xbf16>, vector<9216x128xbf16>, vector<2x128xf32> -> vector<2x128xf32>
    %c0_3 = arith.constant 0 : index
    %c0_4 = arith.constant 0 : index
    %4 = vector.load %arg3[%c0_3, %c0_4] : memref<1x128xf32, #tpu.memory_space<vmem>>, vector<1x128xf32>
    %5 = vector.broadcast %4 : vector<1x128xf32> to vector<2x128xf32>
    %6 = arith.addf %3, %5 : vector<2x128xf32>
    %cst_5 = arith.constant 0.000000e+00 : f32
    %7 = vector.broadcast %cst_5 : f32 to vector<2x128xf32>
    %8 = arith.maximumf %6, %7 : vector<2x128xf32>
    %9 = arith.truncf %8 : vector<2x128xf32> to vector<2x128xbf16>
    %c0_6 = arith.constant 0 : index
    %c0_7 = arith.constant 0 : index
    %10 = vector.load %arg4[%c0_6, %c0_7] : memref<128x10xbf16, #tpu.memory_space<vmem>>, vector<128x10xbf16>
    %cst_8 = arith.constant dense<0.000000e+00> : vector<2x10xf32>
    %11 = tpu.matmul %9, %10, %cst_8 {dimension_numbers = #tpu.dot_dimension_numbers<[1], [0], [0], [1], [0, 0, 1, 1], [], []>} : vector<2x128xbf16>, vector<128x10xbf16>, vector<2x10xf32> -> vector<2x10xf32>
    %c0_9 = arith.constant 0 : index
    %c0_10 = arith.constant 0 : index
    %12 = vector.load %arg5[%c0_9, %c0_10] : memref<1x10xf32, #tpu.memory_space<vmem>>, vector<1x10xf32>
    %13 = vector.broadcast %12 : vector<1x10xf32> to vector<2x10xf32>
    %14 = arith.addf %11, %13 : vector<2x10xf32>
    %c0_11 = arith.constant 0 : index
    %c0_12 = arith.constant 0 : index
    %15 = vector.load %arg6[%c0_11, %c0_12] : memref<2x10xf32, #tpu.memory_space<vmem>>, vector<2x10xf32>
    tpu.vector_store %arg6[%c0_11, %c0_12], %14 {strides = array<i32>} : memref<2x10xf32, #tpu.memory_space<vmem>>, vector<2x10xf32>,
    return
  }
  func.func @transform_0(%arg0: i32) -> (i32, i32) {
    %c0_i32 = arith.constant 0 : i32
    %c0_i32_0 = arith.constant 0 : i32
    return %arg0, %c0_i32 : i32, i32
  }
  func.func @transform_1(%arg0: i32) -> (i32, i32) {
    %c0_i32 = arith.constant 0 : i32
    %c0_i32_0 = arith.constant 0 : i32
    %c0_i32_1 = arith.constant 0 : i32
    return %c0_i32, %c0_i32_0 : i32, i32
  }
  func.func @transform_2(%arg0: i32) -> (i32, i32) {
    %c0_i32 = arith.constant 0 : i32
    %c0_i32_0 = arith.constant 0 : i32
    %c0_i32_1 = arith.constant 0 : i32
    return %c0_i32, %c0_i32_0 : i32, i32
  }
  func.func @transform_3(%arg0: i32) -> (i32, i32) {
    %c0_i32 = arith.constant 0 : i32
    %c0_i32_0 = arith.constant 0 : i32
    %c0_i32_1 = arith.constant 0 : i32
    return %c0_i32, %c0_i32_0 : i32, i32
  }
  func.func @transform_4(%arg0: i32) -> (i32, i32) {
    %c0_i32 = arith.constant 0 : i32
    %c0_i32_0 = arith.constant 0 : i32
    %c0_i32_1 = arith.constant 0 : i32
    return %c0_i32, %c0_i32_0 : i32, i32
  }
  func.func @transform_5(%arg0: i32) -> (i32, i32) {
    %c0_i32 = arith.constant 0 : i32
    %c0_i32_0 = arith.constant 0 : i32
    return %arg0, %c0_i32 : i32, i32
  }
}

</mosaic_0001>

<bundles_post_ra>
// kernel: mnist_cnn_forward.2
= control target key start
LH: loop header
LB: loop body
LE: loop exit
PB: predicated region body
PF: predicated region fallthrough
CT: control target
= control target key end

     0   :  { %10 = vsyncpa [#allocation6], 0  ;;  %s13805_s0 = inlined_call_operand.vmem [shape: bf16[2,680,9], index: 0, kind: input, shape index: {}]   ;;  %s13806_s1 = inlined_call_operand.hbm [shape: bf16[9,32], index: 1, kind: input, shape index: {}]   ;;  %s13807_s2 = inlined_call_operand.hbm [shape: f32[1,32], index: 2, kind: input, shape index: {}]   ;;  %s13808_s3 = inlined_call_operand.hbm [shape: bf16[9,32,64], index: 3, kind: input, shape index: {}]   ;;  %s13809_s4 = inlined_call_operand.hbm [shape: f32[1,64], index: 4, kind: input, shape index: {}]   ;;  %s13810_s5 = inlined_call_operand.vmem [shape: f32[2,144,64], index: 5, kind: output, shape index: {}]  }
   0x1   :  { %11 = vsyncpa [#allocation8], 0 }
   0x2   :  { %12 = vsyncpa [#allocation11], 0  ;;  %s10638_s18 = smov 0  }
   0x3 LB: > { %s10599_s19 = smov [#allocation7]   ;;  %s10644_s21 = sadd.s32 4294967295, %s10597_s18   ;;  %s10597_s18 = sphi %s10638_s18, %s18_s18  }
   0x4   : > { %s185_s20 = sshll.u32 %s10599_s19, 4  ;;  %p8394_p0 = scmp.ge.s32.totalorder %s10597_s18, 1  ;;  %s186_s20 = int_to_ptr.vmem [resolvable:$true] %s185_s20 }
   0x5   : > { %p159_p1 = scmp.lt.s32.totalorder %s10597_s18, 3  ;;  %p10334_p2 = scmp.eq.s32.totalorder %s10644_s21, 0 }
   0x6   : > { %s10600_s23 = smov [#allocation5]   ;;  %s10601_s26 = smov [#allocation9]  }
   0x7   : > { %p10649_p3 = pnand %p8394_p0, %p159_p1  ;;  %s171_s24 = sshll.u32 %s10600_s23, 4  ;;  %s10655_s24 = int_to_ptr.vmem [resolvable:$true] %s171_s24 }
   0x8   : > { %s195_s27 = sshll.u32 %s10601_s26, 4  ;;  %s10602_s28 = smov [#allocation10]   ;;  %s10663_s27 = int_to_ptr.vmem [resolvable:$true] %s195_s27 }
   0x9   : > { %p10321_p4 = pneg %p10649_p3  ;;  %s10665_s29 = sshll.u32 %s10602_s28, 4  ;;  %s210_s29 = int_to_ptr.vmem [resolvable:$true] %s10665_s29 }
   0xa   : > { %s10486_s30 = scalar_lea.vmem %s186_s20, 16  ;;  %s10493_s6 = scalar_lea.vmem %s186_s20, 32 }
   0xb   : > { %p10659_p5 = pnand %p10334_p2, %p10321_p4  ;;  %p10487_p7 = scmp.ne.s32.totalorder %s186_s20, %s10486_s30 }
   0xc   : > { %p10494_p10 = scmp.lt.s32.totalorder %s186_s20, %s186_s20  ;;  %p10495_p11 = scmp.lt.s32.totalorder %s10493_s6, %s10486_s30 }
   0xd   : > { %p10477_p6 = pneg %p10659_p5 }
   0xe   : > { %p10496_p12 = por %p10495_p11, %p10494_p10 }
   0xf   : > { %p10489_p8 = pnand %p10487_p7, %p10477_p6 }
  0x11   : > { %p10490_p9 = pneg %p10489_p8 }
  0x13   : > { %p10497_p13 = pnand %p10496_p12, %p10490_p9 }
  0x15   : > { %10500 = shalt.err (!%p10497_p13)
}
  0x16   : > { %10327 = dma.hbm_to_vmem [thread:$0]  (!%p10659_p5), %s13807_s2, 16, %s186_s20, [#allocation8]  }
  0x17   : > { %s10512_s9 = scalar_lea.vmem %s10655_s24, 128  ;;  %p10520_p7 = scmp.lt.s32.totalorder %s10655_s24, %s10655_s24 }
  0x18   : > { %p10513_p0 = scmp.ne.s32.totalorder %s10655_s24, %s10512_s9  ;;  %p10521_p8 = scmp.lt.s32.totalorder %s10512_s9, %s10512_s9 }
  0x1a   : > { %p10515_p1 = pnand %p10513_p0, %p10477_p6  ;;  %p10522_p9 = por %p10521_p8, %p10520_p7 }
  0x1c   : > { %p10516_p4 = pneg %p10515_p1 }
  0x1e   : > { %p10523_p10 = pnand %p10522_p9, %p10516_p4 }
  0x20   : > { %10526 = shalt.err (!%p10523_p10)
}
  0x21   : > { %s10603_s10 = smov 64   ;;  %s10604_s11 = smov 4  }
  0x22   : > { %10324 = dma.hbm_to_vmem [thread:$0]  (!%p10659_p5), %s13806_s1, 128, %s10655_s24, [#allocation6], %s10603_s10, %s10603_s10, %s10604_s11  }
  0x23   : > { %s10538_s14 = scalar_lea.vmem %s10663_s27, 2304  ;;  %p10546_p0 = scmp.lt.s32.totalorder %s10663_s27, %s10663_s27 }
  0x24   : > { %p10539_p11 = scmp.ne.s32.totalorder %s10663_s27, %s10538_s14  ;;  %p10547_p1 = scmp.lt.s32.totalorder %s10538_s14, %s10538_s14 }
  0x26   : > { %p10541_p12 = pnand %p10539_p11, %p10477_p6  ;;  %p10548_p4 = por %p10547_p1, %p10546_p0 }
  0x28   : > { %p10542_p13 = pneg %p10541_p12 }
  0x2a   : > { %p10549_p7 = pnand %p10548_p4, %p10542_p13 }
  0x2c   : > { %10552 = shalt.err (!%p10549_p7)
}
  0x2d   : > { %10330 = dma.hbm_to_vmem [thread:$0]  (!%p10659_p5), %s13808_s3, 2304, %s10663_s27, [#allocation8], %s10603_s10, %s10603_s10, %s10604_s11  }
  0x2e   : > { %s10564_s17 = scalar_lea.vmem %s210_s29, 16  ;;  %s10571_s19 = scalar_lea.vmem %s210_s29, 32 }
  0x2f   : > { %p10565_p8 = scmp.ne.s32.totalorder %s210_s29, %s10564_s17  ;;  %p10572_p11 = scmp.lt.s32.totalorder %s210_s29, %s210_s29 }
  0x30   : > { %p10573_p12 = scmp.lt.s32.totalorder %s10571_s19, %s10564_s17 }
  0x31   : > { %p10567_p9 = pnand %p10565_p8, %p10477_p6 }
  0x32   : > { %p10574_p13 = por %p10573_p12, %p10572_p11 }
  0x33   : > { %p10568_p10 = pneg %p10567_p9 }
  0x35   : > { %p10575_p0 = pnand %p10574_p13, %p10568_p10 }
  0x37   : > { %10578 = shalt.err (!%p10575_p0)
}
  0x38   : > { %10333 = dma.hbm_to_vmem [thread:$0]  (!%p10659_p5), %s13809_s4, 16, %s210_s29, [#allocation11]  }
  0x39   : > { %230 = sbr.rel (%p10649_p3) target bundleno = 1469 (0x5bd), region = 40 }
  0x3e   : > { %10584 = dma.done.wait (%p10334_p2), [#allocation6], 128  }
  0x3f   : > { %10586 = vsyncadd (%p10334_p2), [#allocation6], 4294967168 }
  0x40   : > { %10588 = dma.done.wait (%p10334_p2), [#allocation8], 2320  }
  0x41   : > { %10590 = vsyncadd (%p10334_p2), [#allocation8], 4294964976 }
  0x42   : > { %10592 = dma.done.wait (%p10334_p2), [#allocation11], 16  }
  0x43   : > { %10594 = vsyncadd (%p10334_p2), [#allocation11], 4294967280  ;;  %vm723_vm0 = vcmask 1043456   ;;  %v10605_v0 = vmov 0.0   ;;  %p270_p3 = scmp.lt.s32.totalorder %s10644_s21, 1  ;;  %vm10606_vm1 = vmmov 0  }
  0x44   : > { %9335 = vmatprep.subr.bf16.mxu0 %v10605_v0  ;;  %10301 = vmatprep.subr.bf16.mxu1 %v10605_v0  ;;  %vm724_vm2 = vcmask 1044480   ;;  %v10607_v1 = vmov 65535   ;;  %v10359_v4 = vld [vmem:[#allocation5] sm:$0x1f]   ;;  %vm593_vm3 = vcmask 72704   ;;  %v10829_v32 = vld [vmem:[#allocation9 + $0x8] sm:$0xff]  }
  0x45   : > { %9337 = vmatprep.mubr.msk.bf16.mxu0 %vm10606_vm1, %v10605_v0  ;;  %9505 = vmatprep.mubr.msk.bf16.mxu1 %vm10606_vm1, %v10605_v0  ;;  %v725_v2 = vsel %vm723_vm0, 4294967295, %v10607_v1  ;;  %s14418_s21 = smov (!%p270_p3, %s10644_s21), 1  ;;  %v10388_v19 = vld [vmem:[#allocation9 + $0x18] sm:$0xff]   ;;  %v10390_v20 = vld [vmem:[#allocation9 + $0x10] sm:$0xff]   ;;  %vm1191_vm4 = vcmask 261120   ;;  %vm4586_vm5 = vcmask 523264  }
  0x46   : > { %s10303_s22 = smul.u32 340, %s14418_s21  ;;  %v726_v3 = vsel %vm724_vm2, %v725_v2, 0  ;;  %v10398_v29 = vld [vmem:[#allocation9 + $0x58] sm:$0xff]   ;;  %v10408_v49 = vld [vmem:[#allocation9 + $0x50] sm:$0xff]   ;;  %vm8206_vm6 = vcmask 519168  }
  0x47   : > { %v728_v5 = vand.u32 %v10359_v4, %v726_v3  ;;  %v10844_v36 = vld [vmem:[#allocation7] ss:$0 sm:$0xff]  ;;  %s10304_s27 = smul.u32 144, %s14418_s21 }
  0x48   : > { %s10740_s26 = scalar_lea.vmem %s13805_s0, %s10303_s22 }
  0x49   : > { %v10360_v6 = vld [vmem:[%s10740_s26] sm:$0xff]   ;;  %9336 = vmatpush3.bf16.msra.mxu0 %v728_v5  ;;  %10302 = vmatpush3.bf16.msra.mxu1 %v728_v5  ;;  %v10361_v7 = vld [vmem:[%s10740_s26 + $0x8] sm:$0xff]   ;;  %v10362_v8 = vld [vmem:[%s10740_s26 + $0x10] sm:$0xff]   ;;  %s12887_s29 = scalar_lea.vmem %s13810_s5, %s10304_s27 }
  0x4a   : > { %v10363_v9 = vld [vmem:[%s10740_s26 + $0x18] sm:$0xff]   ;;  %v10364_v10 = vld [vmem:[%s10740_s26 + $0x20] sm:$0xff]   ;;  %v10365_v11 = vld [vmem:[%s10740_s26 + $0x28] sm:$0xff]   ;;  %9509 = vmatprep.subr.bf16.mxu1 %v10388_v19  ;;  %9729 = vmatprep.subr.bf16.mxu0 %v10398_v29 }
  0x4b   : > { %v10366_v12 = vld [vmem:[%s10740_s26 + $0x30] sm:$0xff]   ;;  %v10367_v13 = vld [vmem:[%s10740_s26 + $0x38] sm:$0xff]   ;;  %v10368_v14 = vld [vmem:[%s10740_s26 + $0x40] sm:$0xff]  }
  0x4c   : > { %9338 = vmatmul.mubr.msk.bf16.vlgmr.msra.gmra.mxu0 %vm593_vm3, %v10360_v6  ;;  %v10369_v15 = vld [vmem:[%s10740_s26 + $0x48] sm:$0xff]   ;;  %v10370_v16 = vld [vmem:[%s10740_s26 + $0x50] sm:$0xff]   ;;  %v10371_v17 = vld [vmem:[%s10740_s26 + $0x58] sm:$0xff]  }
  0x4d   : > { %9341 = vmatprep.mubr.msk.bf16.mxu0 %vm10606_vm1, %v10605_v0  ;;  %v10387_v18 = vld [vmem:[%s10740_s26 + $0x150] ss:$0 sps:$4 sm:$0xff]   ;;  %v10372_v21 = vld [vmem:[%s10740_s26 + $0x60] sm:$0xff]   ;;  %v10373_v22 = vld [vmem:[%s10740_s26 + $0x68] sm:$0xff]   ;;  %9730 = vmatpush3.bf16.msra.mxu0 %v10398_v29 }
  0x4e   : > { %9506 = vmatmul.mubr.msk.bf16.vlgmr.msra.gmra.mxu1 %vm593_vm3, %v10387_v18  ;;  %v10374_v23 = vld [vmem:[%s10740_s26 + $0x70] sm:$0xff]   ;;  %v10375_v24 = vld [vmem:[%s10740_s26 + $0x78] sm:$0xff]   ;;  %v10376_v25 = vld [vmem:[%s10740_s26 + $0x80] sm:$0xff]   ;;  %9731 = vmatprep.subr.bf16.mxu0 %v10408_v49 }
  0x4f   : > { %9510 = vmatpush3.bf16.msra.mxu1 %v10388_v19  ;;  %v10377_v26 = vld [vmem:[%s10740_s26 + $0x88] sm:$0xff]   ;;  %v10378_v27 = vld [vmem:[%s10740_s26 + $0x90] sm:$0xff]   ;;  %v10379_v28 = vld [vmem:[%s10740_s26 + $0x98] sm:$0xff]  }
  0x50   : > { %9511 = vmatprep.subr.bf16.mxu1 %v10390_v20  ;;  %v10380_v30 = vld [vmem:[%s10740_s26 + $0xa0] sm:$0xff]   ;;  %v10381_v31 = vld [vmem:[%s10740_s26 + $0xa8] sm:$0xff]   ;;  %v10382_v33 = vld [vmem:[%s10740_s26 + $0xb0] sm:$0xff]  }
  0x51   : > { %v10383_v34 = vld [vmem:[%s10740_s26 + $0xb8] sm:$0xff]   ;;  %v10384_v35 = vld [vmem:[%s10740_s26 + $0xc0] sm:$0xff]   ;;  %v10385_v42 = vld [vmem:[%s10740_s26 + $0xc8] sm:$0xff]   ;;  %9732 = vmatpush3.bf16.msra.mxu0 %v10408_v49 }
  0x52   : > { %v10386_v52 = vld [vmem:[%s10740_s26 + $0xd0] sm:$0xff]   ;;  %v10389_v63 = vld [vmem:[%s10740_s26 + $0xd8] sm:$0xff]  }
  0x53   : > { %9512 = vmatpush3.bf16.msra.mxu1 %v10390_v20 }
  0x54   : > { %9342 = vmatmul.mubr.msk.bf16.gmra.mxu0 %vm593_vm3, %v10361_v7  ;;  %9553 = vmatprep.subr.bf16.mxu1 %v10829_v32 }
  0x55   : > { %9345 = vmatprep.mubr.msk.bf16.mxu0 %vm10606_vm1, %v10605_v0 }
  0x5c   : > { %9346 = vmatmul.mubr.msk.bf16.gmra.mxu0 %vm593_vm3, %v10362_v8 }
  0x5d   : > { %9349 = vmatprep.mubr.msk.bf16.mxu0 %vm10606_vm1, %v10605_v0 }
  0x64   : > { %9350 = vmatmul.mubr.msk.bf16.gmra.mxu0 %vm593_vm3, %v10363_v9 }
  0x65   : > { %9353 = vmatprep.mubr.msk.bf16.mxu0 %vm10606_vm1, %v10605_v0 }
  0x6c   : > { %9354 = vmatmul.mubr.msk.bf16.gmra.mxu0 %vm593_vm3, %v10364_v10 }
  0x6d   : > { %9357 = vmatprep.mubr.msk.bf16.mxu0 %vm10606_vm1, %v10605_v0 }
  0x74   : > { %9358 = vmatmul.mubr.msk.bf16.gmra.mxu0 %vm593_vm3, %v10365_v11 }
  0x75   : > { %9361 = vmatprep.mubr.msk.bf16.mxu0 %vm10606_vm1, %v10605_v0 }
  0x7c   : > { %9362 = vmatmul.mubr.msk.bf16.gmra.mxu0 %vm593_vm3, %v10366_v12  ;;  %v10391_v12 = vld [vmem:[%s10740_s26 + $0xe0] sm:$0xff]  }
  0x7d   : > { %9365 = vmatprep.mubr.msk.bf16.mxu0 %vm10606_vm1, %v10605_v0 }
  0x84   : > { %9366 = vmatmul.mubr.msk.bf16.gmra.mxu0 %vm593_vm3, %v10367_v13 }
  0x85   : > { %9369 = vmatprep.mubr.msk.bf16.mxu0 %vm10606_vm1, %v10605_v0 }
  0x8c   : > { %9370 = vmatmul.mubr.msk.bf16.gmra.mxu0 %vm593_vm3, %v10368_v14 }
  0x8d   : > { %9373 = vmatprep.mubr.msk.bf16.mxu0 %vm10606_vm1, %v10605_v0 }
  0x94   : > { %9374 = vmatmul.mubr.msk.bf16.gmra.mxu0 %vm593_vm3, %v10369_v15  ;;  %v10407_v15 = vld [vmem:[#allocation9] sm:$0xff]  }
  0x95   : > { %9377 = vmatprep.mubr.msk.bf16.mxu0 %vm10606_vm1, %v10605_v0 }
  0x9c   : > { %9378 = vmatmul.mubr.msk.bf16.gmra.mxu0 %vm593_vm3, %v10370_v16 }
  0x9d   : > { %9381 = vmatprep.mubr.msk.bf16.mxu0 %vm10606_vm1, %v10605_v0 }
  0xa4   : > { %9382 = vmatmul.mubr.msk.bf16.gmra.mxu0 %vm593_vm3, %v10371_v17 }
  0xa5   : > { %9385 = vmatprep.mubr.msk.bf16.mxu0 %vm10606_vm1, %v10605_v0 }
  0xac   : > { %9386 = vmatmul.mubr.msk.bf16.gmra.mxu0 %vm593_vm3, %v10372_v21 }
  0xad   : > { %9389 = vmatprep.mubr.msk.bf16.mxu0 %vm10606_vm1, %v10605_v0 }
  0xb4   : > { %9390 = vmatmul.mubr.msk.bf16.gmra.mxu0 %vm593_vm3, %v10373_v22 }
  0xb5   : > { %9393 = vmatprep.mubr.msk.bf16.mxu0 %vm10606_vm1, %v10605_v0 }
  0xbc   : > { %9394 = vmatmul.mubr.msk.bf16.gmra.mxu0 %vm593_vm3, %v10374_v23 }
  0xbd   : > { %9397 = vmatprep.mubr.msk.bf16.mxu0 %vm10606_vm1, %v10605_v0 }
  0xc4   : > { %9398 = vmatmul.mubr.msk.bf16.gmra.mxu0 %vm593_vm3, %v10375_v24 }
  0xc5   : > { %9401 = vmatprep.mubr.msk.bf16.mxu0 %vm10606_vm1, %v10605_v0 }
  0xcc   : > { %9402 = vmatmul.mubr.msk.bf16.gmra.mxu0 %vm593_vm3, %v10376_v25 }
  0xcd   : > { %9405 = vmatprep.mubr.msk.bf16.mxu0 %vm10606_vm1, %v10605_v0 }
  0xd4   : > { %9406 = vmatmul.mubr.msk.bf16.gmra.mxu0 %vm593_vm3, %v10377_v26 }
  0xd5   : > { %9409 = vmatprep.mubr.msk.bf16.mxu0 %vm10606_vm1, %v10605_v0 }
  0xdc   : > { %9410 = vmatmul.mubr.msk.bf16.gmra.mxu0 %vm593_vm3, %v10378_v27 }
  0xdd   : > { %9413 = vmatprep.mubr.msk.bf16.mxu0 %vm10606_vm1, %v10605_v0 }
  0xe4   : > { %9414 = vmatmul.mubr.msk.bf16.gmra.mxu0 %vm593_vm3, %v10379_v28  ;;  %v10392_v28 = vld [vmem:[%s10740_s26 + $0xe8] sm:$0xff]  }
  0xe5   : > { %9417 = vmatprep.mubr.msk.bf16.mxu0 %vm10606_vm1, %v10605_v0 }
  0xec   : > { %9418 = vmatmul.mubr.msk.bf16.gmra.mxu0 %vm593_vm3, %v10380_v30 }
  0xed   : > { %9421 = vmatprep.mubr.msk.bf16.mxu0 %vm10606_vm1, %v10605_v0 }
  0xf4   : > { %9422 = vmatmul.mubr.msk.bf16.gmra.mxu0 %vm593_vm3, %v10381_v31 }
  0xf5   : > { %9425 = vmatprep.mubr.msk.bf16.mxu0 %vm10606_vm1, %v10605_v0 }
  0xfc   : > { %9426 = vmatmul.mubr.msk.bf16.gmra.mxu0 %vm593_vm3, %v10382_v33 }
  0xfd   : > { %9429 = vmatprep.mubr.msk.bf16.mxu0 %vm10606_vm1, %v10605_v0 }
 0x104   : > { %9430 = vmatmul.mubr.msk.bf16.gmra.mxu0 %vm593_vm3, %v10383_v34 }
 0x105   : > { %9433 = vmatprep.mubr.msk.bf16.mxu0 %vm10606_vm1, %v10605_v0 }
 0x10c   : > { %v764_v37 = vpop.f32.mrf.mxu0  ;;  %9434 = vmatmul.mubr.msk.bf16.gmra.mxu0 %vm593_vm3, %v10384_v35 }
 0x10d   : > { %v765_v38 = vadd.f32 %v10844_v36, %v764_v37  ;;  %9437 = vmatprep.mubr.msk.bf16.mxu0 %vm10606_vm1, %v10605_v0 }
 0x10e   : > { %v9339_v39 = vpop.f32.mrf.mxu0 }
 0x10f   : > { %v1106_v40 = vmax.f32 %v765_v38, 0.0 }
 0x110   : > { %v767_v41 = vpop.f32.mrf.mxu0 }
 0x111   : > { %1192 = vst.msk [vmem:[#allocation2] sm:$0xff] %vm1191_vm4, %v1106_v40  ;;  %v768_v43 = vadd.f32 %v10844_v36, %v767_v41 }
 0x112   : > { %v9340_v44 = vpop.f32.mrf.mxu0 }
 0x113   : > { %v1107_v45 = vmax.f32 %v768_v43, 0.0  ;;  %v10393_v44 = vld [vmem:[%s10740_s26 + $0xf0] sm:$0xff]  }
 0x114   : > { %v772_v46 = vpop.f32.mrf.mxu0  ;;  %9438 = vmatmul.mubr.msk.bf16.gmra.mxu0 %vm593_vm3, %v10385_v42 }
 0x115   : > { %1193 = vst.msk [vmem:[#allocation2 + $0x8] sm:$0xff] %vm1191_vm4, %v1107_v45  ;;  %v773_v47 = vadd.f32 %v10844_v36, %v772_v46  ;;  %9441 = vmatprep.mubr.msk.bf16.mxu0 %vm10606_vm1, %v10605_v0 }
 0x116   : > { %v9343_v48 = vpop.f32.mrf.mxu0 }
 0x117   : > { %v1108_v50 = vmax.f32 %v773_v47, 0.0 }
 0x118   : > { %v775_v51 = vpop.f32.mrf.mxu0 }
 0x119   : > { %1194 = vst.msk [vmem:[#allocation2 + $0x10] sm:$0xff] %vm1191_vm4, %v1108_v50  ;;  %v776_v53 = vadd.f32 %v10844_v36, %v775_v51 }
 0x11a   : > { %v9344_v54 = vpop.f32.mrf.mxu0 }
 0x11b   : > { %v1109_v55 = vmax.f32 %v776_v53, 0.0 }
 0x11c   : > { %v780_v56 = vpop.f32.mrf.mxu0  ;;  %9442 = vmatmul.mubr.msk.bf16.gmra.mxu0 %vm593_vm3, %v10386_v52  ;;  %v1340_v61 = vld [vmem:[#allocation2 + $0x1] sm:$0xff] }
 0x11d   : > { %1195 = vst.msk [vmem:[#allocation2 + $0x18] sm:$0xff] %vm1191_vm4, %v1109_v55  ;;  %v781_v57 = vadd.f32 %v10844_v36, %v780_v56  ;;  %9445 = vmatprep.mubr.msk.bf16.mxu0 %vm10606_vm1, %v10605_v0 }
 0x11e   : > { %v9347_v58 = vpop.f32.mrf.mxu0 }
 0x11f   : > { %v1110_v59 = vmax.f32 %v781_v57, 0.0 }
 0x120   : > { %v783_v60 = vpop.f32.mrf.mxu0  ;;  %v1341_v62 = vld [vmem:[#allocation2 + $0x9] sm:$0xff] }
 0x121   : > { %1196 = vst.msk [vmem:[#allocation2 + $0x20] sm:$0xff] %vm1191_vm4, %v1110_v59  ;;  %v784_v1 = vadd.f32 %v10844_v36, %v783_v60  ;;  %v1379_v2 = vpack.c.bf16 %v1341_v62, %v1340_v61  ;;  %v10394_v59 = vld [vmem:[%s10740_s26 + $0xf8] sm:$0xff]   ;;  %v10924_v62 = vld [vmem:[#allocation9 + $0x28] sm:$0xff]  }
 0x122   : > { %v9348_v3 = vpop.f32.mrf.mxu0 }
 0x123   : > { %v1111_v4 = vmax.f32 %v784_v1, 0.0  ;;  %9513 = vmatprep.mubr.msk.bf16.mxu1 %vm1191_vm4, %v1379_v2 }
 0x124   : > { %v788_v5 = vpop.f32.mrf.mxu0  ;;  %9446 = vmatmul.mubr.msk.bf16.gmra.mxu0 %vm593_vm3, %v10389_v63  ;;  %v1342_v10 = vld [vmem:[#allocation2 + $0x11] sm:$0xff] }
 0x125   : > { %1197 = vst.msk [vmem:[#allocation2 + $0x28] sm:$0xff] %vm1191_vm4, %v1111_v4  ;;  %v789_v6 = vadd.f32 %v10844_v36, %v788_v5  ;;  %9449 = vmatprep.mubr.msk.bf16.mxu0 %vm10606_vm1, %v10605_v0 }
 0x126   : > { %v9351_v7 = vpop.f32.mrf.mxu0 }
 0x127   : > { %v1112_v8 = vmax.f32 %v789_v6, 0.0 }
 0x128   : > { %v791_v9 = vpop.f32.mrf.mxu0  ;;  %v1343_v11 = vld [vmem:[#allocation2 + $0x19] sm:$0xff] }
 0x129   : > { %1198 = vst.msk [vmem:[#allocation2 + $0x30] sm:$0xff] %vm1191_vm4, %v1112_v8  ;;  %v792_v13 = vadd.f32 %v10844_v36, %v791_v9  ;;  %v1380_v14 = vpack.c.bf16 %v1343_v11, %v1342_v10  ;;  %v10885_v20 = vld [vmem:[#allocation2 + $0x1a] sm:$0xff] }
 0x12a   : > { %v9352_v16 = vpop.f32.mrf.mxu0 }
 0x12b   : > { %v1113_v17 = vmax.f32 %v792_v13, 0.0  ;;  %9514 = vmatmul.mubr.msk.bf16.vlgmr.msra.gmra.mxu1 %vm1191_vm4, %v1380_v14 }
 0x12c   : > { %v796_v18 = vpop.f32.mrf.mxu0  ;;  %9450 = vmatmul.mubr.msk.bf16.gmra.mxu0 %vm593_vm3, %v10391_v12  ;;  %9554 = vmatpush3.bf16.msra.mxu1 %v10829_v32  ;;  %v10887_v21 = vld [vmem:[#allocation2 + $0x22] sm:$0xff] }
 0x12d   : > { %1199 = vst.msk [vmem:[#allocation2 + $0x38] sm:$0xff] %vm1191_vm4, %v1113_v17  ;;  %v797_v19 = vadd.f32 %v10844_v36, %v796_v18  ;;  %9453 = vmatprep.mubr.msk.bf16.mxu0 %vm10606_vm1, %v10605_v0  ;;  %9555 = vmatprep.subr.bf16.mxu1 %v10407_v15  ;;  %v1344_v26 = vld [vmem:[#allocation2 + $0x21] sm:$0xff] }
 0x12e   : > { %v9355_v22 = vpop.f32.mrf.mxu0  ;;  %v10395_v12 = vld [vmem:[%s10740_s26 + $0x100] sm:$0xff]  }
 0x12f   : > { %v1114_v24 = vmax.f32 %v797_v19, 0.0 }
 0x130   : > { %v799_v25 = vpop.f32.mrf.mxu0  ;;  %v1345_v27 = vld [vmem:[#allocation2 + $0x29] sm:$0xff]  ;;  %9556 = vmatpush3.bf16.msra.mxu1 %v10407_v15 }
 0x131   : > { %1200 = vst.msk [vmem:[#allocation2 + $0x40] sm:$0xff] %vm1191_vm4, %v1114_v24  ;;  %v800_v29 = vadd.f32 %v10844_v36, %v799_v25  ;;  %v1381_v30 = vpack.c.bf16 %v1345_v27, %v1344_v26  ;;  %v10900_v35 = vld [vmem:[#allocation2 + $0x2a] sm:$0xff]  ;;  %9597 = vmatprep.subr.bf16.mxu1 %v10924_v62 }
 0x132   : > { %v9356_v31 = vpop.f32.mrf.mxu0  ;;  %v10415_v25 = vld [vmem:[#allocation9 + $0x30] sm:$0xff]  }
 0x133   : > { %v1115_v32 = vmax.f32 %v800_v29, 0.0  ;;  %9517 = vmatprep.mubr.msk.bf16.mxu1 %vm1191_vm4, %v1381_v30  ;;  %v10396_v30 = vld [vmem:[%s10740_s26 + $0x108] sm:$0xff]  }
 0x134   : > { %v804_v33 = vpop.f32.mrf.mxu0  ;;  %9454 = vmatmul.mubr.msk.bf16.gmra.mxu0 %vm593_vm3, %v10392_v28  ;;  %v10902_v37 = vld [vmem:[#allocation2 + $0x32] sm:$0xff] }
 0x135   : > { %1201 = vst.msk [vmem:[#allocation2 + $0x48] sm:$0xff] %vm1191_vm4, %v1115_v32  ;;  %v805_v34 = vadd.f32 %v10844_v36, %v804_v33  ;;  %9457 = vmatprep.mubr.msk.bf16.mxu0 %vm10606_vm1, %v10605_v0  ;;  %v1346_v42 = vld [vmem:[#allocation2 + $0x31] sm:$0xff] }
 0x136   : > { %v9359_v38 = vpop.f32.mrf.mxu0 }
 0x137   : > { %v1116_v40 = vmax.f32 %v805_v34, 0.0 }
 0x138   : > { %v807_v41 = vpop.f32.mrf.mxu0  ;;  %v1347_v43 = vld [vmem:[#allocation2 + $0x39] sm:$0xff] }
 0x139   : > { %1202 = vst.msk [vmem:[#allocation2 + $0x50] sm:$0xff] %vm1191_vm4, %v1116_v40  ;;  %v808_v45 = vadd.f32 %v10844_v36, %v807_v41  ;;  %v1382_v46 = vpack.c.bf16 %v1347_v43, %v1346_v42  ;;  %v10915_v51 = vld [vmem:[#allocation2 + $0x3a] sm:$0xff] }
 0x13a   : > { %v9360_v47 = vpop.f32.mrf.mxu0  ;;  %v10444_v7 = vld [vmem:[#allocation2 + $0x3a] sm:$0xff] }
 0x13b   : > { %v1117_v48 = vmax.f32 %v808_v45, 0.0  ;;  %9518 = vmatmul.mubr.msk.bf16.gmra.mxu1 %vm1191_vm4, %v1382_v46 }
 0x13c   : > { %v812_v49 = vpop.f32.mrf.mxu0  ;;  %9458 = vmatmul.mubr.msk.bf16.gmra.mxu0 %vm593_vm3, %v10393_v44  ;;  %v10917_v52 = vld [vmem:[#allocation2 + $0x42] sm:$0xff] }
 0x13d   : > { %1203 = vst.msk [vmem:[#allocation2 + $0x58] sm:$0xff] %vm1191_vm4, %v1117_v48  ;;  %v813_v50 = vadd.f32 %v10844_v36, %v812_v49  ;;  %9461 = vmatprep.mubr.msk.bf16.mxu0 %vm10606_vm1, %v10605_v0  ;;  %v1348_v57 = vld [vmem:[#allocation2 + $0x41] sm:$0xff]  ;;  %v10397_v49 = vld [vmem:[%s10740_s26 + $0x110] sm:$0xff]  }
 0x13e   : > { %v9363_v53 = vpop.f32.mrf.mxu0 }
 0x13f   : > { %v1118_v55 = vmax.f32 %v813_v50, 0.0 }
 0x140   : > { %v815_v56 = vpop.f32.mrf.mxu0  ;;  %v1349_v58 = vld [vmem:[#allocation2 + $0x49] sm:$0xff] }
 0x141   : > { %1204 = vst.msk [vmem:[#allocation2 + $0x60] sm:$0xff] %vm1191_vm4, %v1118_v55  ;;  %v816_v60 = vadd.f32 %v10844_v36, %v815_v56  ;;  %v1383_v61 = vpack.c.bf16 %v1349_v58, %v1348_v57  ;;  %v10933_v4 = vld [vmem:[#allocation2 + $0x4a] sm:$0xff] }
 0x142   : > { %v9364_v63 = vpop.f32.mrf.mxu0 }
 0x143   : > { %v1119_v1 = vmax.f32 %v816_v60, 0.0  ;;  %9521 = vmatprep.mubr.msk.bf16.mxu1 %vm1191_vm4, %v1383_v61 }
 0x144   : > { %v820_v2 = vpop.f32.mrf.mxu0  ;;  %9462 = vmatmul.mubr.msk.bf16.gmra.mxu0 %vm593_vm3, %v10394_v59  ;;  %v10935_v5 = vld [vmem:[#allocation2 + $0x52] sm:$0xff] }
 0x145   : > { %1205 = vst.msk [vmem:[#allocation2 + $0x68] sm:$0xff] %vm1191_vm4, %v1119_v1  ;;  %v821_v3 = vadd.f32 %v10844_v36, %v820_v2  ;;  %9465 = vmatprep.mubr.msk.bf16.mxu0 %vm10606_vm1, %v10605_v0  ;;  %v1350_v10 = vld [vmem:[#allocation2 + $0x51] sm:$0xff] }
 0x146   : > { %v9367_v6 = vpop.f32.mrf.mxu0 }
 0x147   : > { %v1120_v8 = vmax.f32 %v821_v3, 0.0 }
 0x148   : > { %v823_v9 = vpop.f32.mrf.mxu0  ;;  %v1351_v11 = vld [vmem:[#allocation2 + $0x59] sm:$0xff] }
 0x149   : > { %1206 = vst.msk [vmem:[#allocation2 + $0x70] sm:$0xff] %vm1191_vm4, %v1120_v8  ;;  %v824_v13 = vadd.f32 %v10844_v36, %v823_v9  ;;  %v1384_v14 = vpack.c.bf16 %v1351_v11, %v1350_v10  ;;  %v10948_v19 = vld [vmem:[#allocation2 + $0x5a] sm:$0xff] }
 0x14a   : > { %v9368_v15 = vpop.f32.mrf.mxu0  ;;  %v10399_v8 = vld [vmem:[%s10740_s26 + $0x118] sm:$0xff]  }
 0x14b   : > { %v1121_v16 = vmax.f32 %v824_v13, 0.0  ;;  %9522 = vmatmul.mubr.msk.bf16.gmra.mxu1 %vm1191_vm4, %v1384_v14  ;;  %v1100_v14 = vpop.f32.mrf.mxu1 }
 0x14c   : > { %v828_v17 = vpop.f32.mrf.mxu0  ;;  %9466 = vmatmul.mubr.msk.bf16.gmra.mxu0 %vm593_vm3, %v10395_v12  ;;  %v10950_v22 = vld [vmem:[#allocation2 + $0x62] sm:$0xff]  ;;  %v10987_v12 = vld [vmem:[#allocation9 + $0x78] sm:$0xff]  }
 0x14d   : > { %1207 = vst.msk [vmem:[#allocation2 + $0x78] sm:$0xff] %vm1191_vm4, %v1121_v16  ;;  %v829_v18 = vadd.f32 %v10844_v36, %v828_v17  ;;  %9469 = vmatprep.mubr.msk.bf16.mxu0 %vm10606_vm1, %v10605_v0  ;;  %v1352_v28 = vld [vmem:[#allocation2 + $0x61] sm:$0xff]  ;;  %9817 = vmatprep.subr.bf16.mxu0 %v10987_v12  ;;  %v1101_v17 = vadd.f32 %v10844_v36, %v1100_v14 }
 0x14e   : > { %v9371_v24 = vpop.f32.mrf.mxu0 }
 0x14f   : > { %v1122_v26 = vmax.f32 %v829_v18, 0.0  ;;  %v9507_v18 = vpop.f32.mrf.mxu1 }
 0x150   : > { %v831_v27 = vpop.f32.mrf.mxu0  ;;  %v1353_v29 = vld [vmem:[#allocation2 + $0x69] sm:$0xff] }
 0x151   : > { %1208 = vst.msk [vmem:[#allocation2 + $0x80] sm:$0xff] %vm1191_vm4, %v1122_v26  ;;  %v832_v31 = vadd.f32 %v10844_v36, %v831_v27  ;;  %v1385_v32 = vpack.c.bf16 %v1353_v29, %v1352_v28  ;;  %v10963_v41 = vld [vmem:[#allocation2 + $0x6a] sm:$0xff] }
 0x152   : > { %v9372_v33 = vpop.f32.mrf.mxu0 }
 0x153   : > { %v1123_v34 = vmax.f32 %v832_v31, 0.0  ;;  %9525 = vmatprep.mubr.msk.bf16.mxu1 %vm1191_vm4, %v1385_v32  ;;  %v1103_v31 = vpop.f32.mrf.mxu1 }
 0x154   : > { %v836_v38 = vpop.f32.mrf.mxu0  ;;  %9470 = vmatmul.mubr.msk.bf16.gmra.mxu0 %vm593_vm3, %v10396_v30  ;;  %v10965_v42 = vld [vmem:[#allocation2 + $0x72] sm:$0xff]  ;;  %v1190_v30 = vmax.f32 %v1101_v17, 0.0 }
 0x155   : > { %1209 = vst.msk [vmem:[#allocation2 + $0x88] sm:$0xff] %vm1191_vm4, %v1123_v34  ;;  %v837_v40 = vadd.f32 %v10844_v36, %v836_v38  ;;  %9473 = vmatprep.mubr.msk.bf16.mxu0 %vm10606_vm1, %v10605_v0  ;;  %v1354_v47 = vld [vmem:[#allocation2 + $0x71] sm:$0xff]  ;;  %v10400_v38 = vld [vmem:[%s10740_s26 + $0x120] sm:$0xff]  }
 0x156   : > { %v9375_v43 = vpop.f32.mrf.mxu0  ;;  %1276 = vst.msk [vmem:[#allocation2 + $0x2a0] sm:$0xff] %vm1191_vm4, %v1190_v30  ;;  %v10403_v30 = vld [vmem:[%s10740_s26 + $0x130] sm:$0xff]  }
 0x157   : > { %v1124_v45 = vmax.f32 %v837_v40, 0.0 }
 0x158   : > { %v839_v46 = vpop.f32.mrf.mxu0  ;;  %v1355_v48 = vld [vmem:[#allocation2 + $0x79] sm:$0xff] }
 0x159   : > { %1210 = vst.msk [vmem:[#allocation2 + $0x90] sm:$0xff] %vm1191_vm4, %v1124_v45  ;;  %v840_v50 = vadd.f32 %v10844_v36, %v839_v46  ;;  %v1386_v53 = vpack.c.bf16 %v1355_v48, %v1354_v47  ;;  %v10978_v59 = vld [vmem:[#allocation2 + $0x7a] sm:$0xff]  ;;  %v9508_v45 = vpop.f32.mrf.mxu1 }
 0x15a   : > { %v9376_v55 = vpop.f32.mrf.mxu0 }
 0x15b   : > { %v1125_v56 = vmax.f32 %v840_v50, 0.0  ;;  %9526 = vmatmul.mubr.msk.bf16.gmra.mxu1 %vm1191_vm4, %v1386_v53 }
 0x15c   : > { %v844_v57 = vpop.f32.mrf.mxu0  ;;  %9474 = vmatmul.mubr.msk.bf16.gmra.mxu0 %vm593_vm3, %v10397_v49  ;;  %v10980_v60 = vld [vmem:[#allocation2 + $0x82] sm:$0xff] }
 0x15d   : > { %1211 = vst.msk [vmem:[#allocation2 + $0x98] sm:$0xff] %vm1191_vm4, %v1125_v56  ;;  %v845_v58 = vadd.f32 %v10844_v36, %v844_v57  ;;  %9477 = vmatprep.mubr.msk.bf16.mxu0 %vm10606_vm1, %v10605_v0  ;;  %v1356_v3 = vld [vmem:[#allocation2 + $0x81] sm:$0xff] }
 0x15e   : > { %v9379_v61 = vpop.f32.mrf.mxu0  ;;  %v10411_v56 = vld [vmem:[#allocation9 + $0x20] sm:$0xff]  }
 0x15f   : > { %v1126_v1 = vmax.f32 %v845_v58, 0.0 }
 0x160   : > { %v847_v2 = vpop.f32.mrf.mxu0  ;;  %v1357_v6 = vld [vmem:[#allocation2 + $0x89] sm:$0xff] }
 0x161   : > { %1212 = vst.msk [vmem:[#allocation2 + $0xa0] sm:$0xff] %vm1191_vm4, %v1126_v1  ;;  %v848_v9 = vadd.f32 %v10844_v36, %v847_v2  ;;  %v1387_v10 = vpack.c.bf16 %v1357_v6, %v1356_v3  ;;  %v10997_v24 = vld [vmem:[#allocation2 + $0x8a] sm:$0xff] }
 0x162   : > { %v9380_v11 = vpop.f32.mrf.mxu0  ;;  %v10402_v2 = vld [vmem:[%s10740_s26 + $0x128] sm:$0xff]  }
 0x163   : > { %v1127_v13 = vmax.f32 %v848_v9, 0.0  ;;  %9529 = vmatprep.mubr.msk.bf16.mxu1 %vm1191_vm4, %v1387_v10 }
 0x164   : > { %v852_v15 = vpop.f32.mrf.mxu0  ;;  %9478 = vmatmul.mubr.msk.bf16.gmra.mxu0 %vm593_vm3, %v10399_v8  ;;  %v10999_v26 = vld [vmem:[#allocation2 + $0x92] sm:$0xff] }
 0x165   : > { %1213 = vst.msk [vmem:[#allocation2 + $0xa8] sm:$0xff] %vm1191_vm4, %v1127_v13  ;;  %v853_v16 = vadd.f32 %v10844_v36, %v852_v15  ;;  %9481 = vmatprep.mubr.msk.bf16.mxu0 %vm10606_vm1, %v10605_v0  ;;  %v1358_v33 = vld [vmem:[#allocation2 + $0x91] sm:$0xff] }
 0x166   : > { %v9383_v27 = vpop.f32.mrf.mxu0 }
 0x167   : > { %v1128_v29 = vmax.f32 %v853_v16, 0.0 }
 0x168   : > { %v855_v32 = vpop.f32.mrf.mxu0  ;;  %v1359_v34 = vld [vmem:[#allocation2 + $0x99] sm:$0xff] }
 0x169   : > { %1214 = vst.msk [vmem:[#allocation2 + $0xb0] sm:$0xff] %vm1191_vm4, %v1128_v29  ;;  %v856_v40 = vadd.f32 %v10844_v36, %v855_v32  ;;  %v1388_v43 = vpack.c.bf16 %v1359_v34, %v1358_v33  ;;  %v11013_v50 = vld [vmem:[#allocation2 + $0x9a] sm:$0xff] }
 0x16a   : > { %v9384_v46 = vpop.f32.mrf.mxu0 }
 0x16b   : > { %v1129_v47 = vmax.f32 %v856_v40, 0.0  ;;  %9530 = vmatmul.mubr.msk.bf16.gmra.mxu1 %vm1191_vm4, %v1388_v43 }
 0x16c   : > { %v860_v48 = vpop.f32.mrf.mxu0  ;;  %9482 = vmatmul.mubr.msk.bf16.gmra.mxu0 %vm593_vm3, %v10400_v38  ;;  %v11015_v53 = vld [vmem:[#allocation2 + $0xa2] sm:$0xff] }
 0x16d   : > { %1215 = vst.msk [vmem:[#allocation2 + $0xb8] sm:$0xff] %vm1191_vm4, %v1129_v47  ;;  %v861_v49 = vadd.f32 %v10844_v36, %v860_v48  ;;  %9485 = vmatprep.mubr.msk.bf16.mxu0 %vm10606_vm1, %v10605_v0  ;;  %v1360_v61 = vld [vmem:[#allocation2 + $0xa1] sm:$0xff] }
 0x16e   : > { %v9387_v55 = vpop.f32.mrf.mxu0 }
 0x16f   : > { %v1130_v57 = vmax.f32 %v861_v49, 0.0 }
 0x170   : > { %v863_v58 = vpop.f32.mrf.mxu0  ;;  %v1361_v1 = vld [vmem:[#allocation2 + $0xa9] sm:$0xff] }
 0x171   : > { %1216 = vst.msk [vmem:[#allocation2 + $0xc0] sm:$0xff] %vm1191_vm4, %v1130_v57  ;;  %v864_v3 = vadd.f32 %v10844_v36, %v863_v58  ;;  %v1389_v6 = vpack.c.bf16 %v1361_v1, %v1360_v61  ;;  %v11028_v13 = vld [vmem:[#allocation2 + $0xaa] sm:$0xff]  ;;  %v10404_v58 = vld [vmem:[%s10740_s26 + $0x138] sm:$0xff]  }
 0x172   : > { %v9388_v8 = vpop.f32.mrf.mxu0 }
 0x173   : > { %v1131_v9 = vmax.f32 %v864_v3, 0.0  ;;  %9533 = vmatprep.mubr.msk.bf16.mxu1 %vm1191_vm4, %v1389_v6 }
 0x174   : > { %v868_v10 = vpop.f32.mrf.mxu0  ;;  %9486 = vmatmul.mubr.msk.bf16.gmra.mxu0 %vm593_vm3, %v10402_v2  ;;  %v11030_v14 = vld [vmem:[#allocation2 + $0xb2] sm:$0xff] }
 0x175   : > { %1217 = vst.msk [vmem:[#allocation2 + $0xc8] sm:$0xff] %vm1191_vm4, %v1131_v9  ;;  %v869_v11 = vadd.f32 %v10844_v36, %v868_v10  ;;  %9489 = vmatprep.mubr.msk.bf16.mxu0 %vm10606_vm1, %v10605_v0  ;;  %v1362_v27 = vld [vmem:[#allocation2 + $0xb1] sm:$0xff] }
 0x176   : > { %v9391_v15 = vpop.f32.mrf.mxu0 }
 0x177   : > { %v1132_v17 = vmax.f32 %v869_v11, 0.0 }
 0x178   : > { %v871_v18 = vpop.f32.mrf.mxu0  ;;  %v1363_v29 = vld [vmem:[#allocation2 + $0xb9] sm:$0xff] }
 0x179   : > { %1218 = vst.msk [vmem:[#allocation2 + $0xd0] sm:$0xff] %vm1191_vm4, %v1132_v17  ;;  %v872_v31 = vadd.f32 %v10844_v36, %v871_v18  ;;  %v1390_v32 = vpack.c.bf16 %v1363_v29, %v1362_v27  ;;  %v11043_v43 = vld [vmem:[#allocation2 + $0xba] sm:$0xff] }
 0x17a   : > { %v9392_v33 = vpop.f32.mrf.mxu0 }
 0x17b   : > { %v1133_v34 = vmax.f32 %v872_v31, 0.0  ;;  %9534 = vmatmul.mubr.msk.bf16.gmra.mxu1 %vm1191_vm4, %v1390_v32 }
 0x17c   : > { %v876_v38 = vpop.f32.mrf.mxu0  ;;  %9490 = vmatmul.mubr.msk.bf16.gmra.mxu0 %vm593_vm3, %v10403_v30  ;;  %v11045_v45 = vld [vmem:[#allocation2 + $0xc2] sm:$0xff] }
 0x17d   : > { %1219 = vst.msk [vmem:[#allocation2 + $0xd8] sm:$0xff] %vm1191_vm4, %v1133_v34  ;;  %v877_v40 = vadd.f32 %v10844_v36, %v876_v38  ;;  %9493 = vmatprep.mubr.msk.bf16.mxu0 %vm10606_vm1, %v10605_v0  ;;  %v1364_v55 = vld [vmem:[#allocation2 + $0xc1] sm:$0xff] }
 0x17e   : > { %v9395_v46 = vpop.f32.mrf.mxu0  ;;  %v10405_v30 = vld [vmem:[%s10740_s26 + $0x140] sm:$0xff]   ;;  %v1302_v28 = vld [vmem:[#allocation2 + $0xc8] sm:$0xff] }
 0x17f   : > { %v1134_v48 = vmax.f32 %v877_v40, 0.0 }
 0x180   : > { %v879_v49 = vpop.f32.mrf.mxu0  ;;  %v1365_v57 = vld [vmem:[#allocation2 + $0xc9] sm:$0xff] }
 0x181   : > { %1220 = vst.msk [vmem:[#allocation2 + $0xe0] sm:$0xff] %vm1191_vm4, %v1134_v48  ;;  %v880_v61 = vadd.f32 %v10844_v36, %v879_v49  ;;  %v1391_v1 = vpack.c.bf16 %v1365_v57, %v1364_v55  ;;  %v11058_v9 = vld [vmem:[#allocation2 + $0xca] sm:$0xff] }
 0x182   : > { %v9396_v2 = vpop.f32.mrf.mxu0 }
 0x183   : > { %v1135_v3 = vmax.f32 %v880_v61, 0.0  ;;  %9537 = vmatprep.mubr.msk.bf16.mxu1 %vm1191_vm4, %v1391_v1 }
 0x184   : > { %v884_v6 = vpop.f32.mrf.mxu0  ;;  %9494 = vmatmul.mubr.msk.bf16.gmra.mxu0 %vm593_vm3, %v10404_v58  ;;  %v11060_v10 = vld [vmem:[#allocation2 + $0xd2] sm:$0xff]  ;;  %v10406_v58 = vld [vmem:[%s10740_s26 + $0x148] sm:$0xff]  }
 0x185   : > { %1221 = vst.msk [vmem:[#allocation2 + $0xe8] sm:$0xff] %vm1191_vm4, %v1135_v3  ;;  %v885_v8 = vadd.f32 %v10844_v36, %v884_v6  ;;  %9497 = vmatprep.mubr.msk.bf16.mxu0 %vm10606_vm1, %v10605_v0  ;;  %v1366_v27 = vld [vmem:[#allocation2 + $0xd1] sm:$0xff]  ;;  %v3034_v3 = vld [vmem:[#allocation2 + $0x24] sm:$0xff] }
 0x186   : > { %v9399_v11 = vpop.f32.mrf.mxu0 }
 0x187   : > { %v1136_v17 = vmax.f32 %v885_v8, 0.0  ;;  %v3033_v11 = vld [vmem:[#allocation2 + $0x1c] sm:$0xff] }
 0x188   : > { %v887_v18 = vpop.f32.mrf.mxu0  ;;  %v1367_v29 = vld [vmem:[#allocation2 + $0xd9] sm:$0xff] }
 0x189   : > { %1222 = vst.msk [vmem:[#allocation2 + $0xf0] sm:$0xff] %vm1191_vm4, %v1136_v17  ;;  %v888_v31 = vadd.f32 %v10844_v36, %v887_v18  ;;  %v1392_v32 = vpack.c.bf16 %v1367_v29, %v1366_v27  ;;  %v11073_v46 = vld [vmem:[#allocation2 + $0xda] sm:$0xff]  ;;  %v3072_v18 = vpack.c.bf16 %v3034_v3, %v3033_v11 }
 0x18a   : > { %v9400_v33 = vpop.f32.mrf.mxu0 }
 0x18b   : > { %v1137_v34 = vmax.f32 %v888_v31, 0.0  ;;  %9538 = vmatmul.mubr.msk.bf16.gmra.mxu1 %vm1191_vm4, %v1392_v32  ;;  %v3049_v33 = vld [vmem:[#allocation2 + $0x9c] sm:$0xff] }
 0x18c   : > { %v892_v38 = vpop.f32.mrf.mxu0  ;;  %9498 = vmatmul.mubr.msk.bf16.gmra.mxu0 %vm593_vm3, %v10405_v30  ;;  %v11075_v48 = vld [vmem:[#allocation2 + $0xe2] sm:$0xff] }
 0x18d   : > { %1223 = vst.msk [vmem:[#allocation2 + $0xf8] sm:$0xff] %vm1191_vm4, %v1137_v34  ;;  %v893_v40 = vadd.f32 %v10844_v36, %v892_v38  ;;  %9501 = vmatprep.mubr.msk.bf16.mxu0 %vm10606_vm1, %v10605_v0  ;;  %v1368_v1 = vld [vmem:[#allocation2 + $0xe1] sm:$0xff]  ;;  %v3036_v38 = vld [vmem:[#allocation2 + $0x34] sm:$0xff] }
 0x18e   : > { %v9403_v49 = vpop.f32.mrf.mxu0 }
 0x18f   : > { %v1138_v57 = vmax.f32 %v893_v40, 0.0 }
 0x190   : > { %v895_v61 = vpop.f32.mrf.mxu0  ;;  %v1369_v2 = vld [vmem:[#allocation2 + $0xe9] sm:$0xff] }
 0x191   : > { %1224 = vst.msk [vmem:[#allocation2 + $0x100] sm:$0xff] %vm1191_vm4, %v1138_v57  ;;  %v896_v6 = vadd.f32 %v10844_v36, %v895_v61  ;;  %v1393_v8 = vpack.c.bf16 %v1369_v2, %v1368_v1  ;;  %v11087_v30 = vld [vmem:[#allocation2 + $0xea] sm:$0xff] }
 0x192   : > { %v9404_v0 = vpop.f32.mrf.mxu0  ;;  %v3035_v2 = vld [vmem:[#allocation2 + $0x2c] sm:$0xff] }
 0x193   : > { %v1139_v17 = vmax.f32 %v896_v6, 0.0  ;;  %9541 = vmatprep.mubr.msk.bf16.mxu1 %vm1191_vm4, %v1393_v8  ;;  %v3073_v6 = vpack.c.bf16 %v3036_v38, %v3035_v2  ;;  %v3037_v8 = vld [vmem:[#allocation2 + $0x3c] sm:$0xff]  ;;  %v10412_v0 = vld [vmem:[#allocation9 + $0x70] sm:$0xff]  }
 0x194   : > { %v900_v27 = vpop.f32.mrf.mxu0  ;;  %9502 = vmatmul.mubr.msk.bf16.gmra.mxu0 %vm593_vm3, %v10406_v58  ;;  %v11089_v31 = vld [vmem:[#allocation2 + $0xf2] sm:$0xff]  ;;  %v3038_v58 = vld [vmem:[#allocation2 + $0x44] sm:$0xff] }
 0x195   : > { %1225 = vst.msk [vmem:[#allocation2 + $0x108] sm:$0xff] %vm1191_vm4, %v1139_v17  ;;  %v901_v29 = vadd.f32 %v10844_v36, %v900_v27  ;;  %9733 = vmatprep.mubr.msk.bf16.mxu0 %vm1191_vm4, %v3072_v18  ;;  %v1370_v49 = vld [vmem:[#allocation2 + $0xf1] sm:$0xff]  ;;  %v3074_v17 = vpack.c.bf16 %v3038_v58, %v3037_v8 }
 0x196   : > { %v9407_v32 = vpop.f32.mrf.mxu0 }
 0x197   : > { %v1140_v34 = vmax.f32 %v901_v29, 0.0 }
 0x198   : > { %v903_v40 = vpop.f32.mrf.mxu0  ;;  %v1371_v57 = vld [vmem:[#allocation2 + $0xf9] sm:$0xff] }
 0x199   : > { %1226 = vst.msk [vmem:[#allocation2 + $0x110] sm:$0xff] %vm1191_vm4, %v1140_v34  ;;  %v904_v61 = vadd.f32 %v10844_v36, %v903_v40  ;;  %v1394_v1 = vpack.c.bf16 %v1371_v57, %v1370_v49  ;;  %v11101_v29 = vld [vmem:[#allocation2 + $0xfa] sm:$0xff] }
 0x19a   : > { %v9408_v3 = vpop.f32.mrf.mxu0  ;;  %v3040_v49 = vld [vmem:[#allocation2 + $0x54] sm:$0xff] }
 0x19b   : > { %v1141_v11 = vmax.f32 %v904_v61, 0.0  ;;  %9542 = vmatmul.mubr.msk.bf16.gmra.mxu1 %vm1191_vm4, %v1394_v1  ;;  %v3042_v1 = vld [vmem:[#allocation2 + $0x64] sm:$0xff]  ;;  %v3039_v3 = vld [vmem:[#allocation2 + $0x4c] sm:$0xff] }
 0x19c   : > { %v908_v18 = vpop.f32.mrf.mxu0  ;;  %9734 = vmatmul.mubr.msk.bf16.vlgmr.msra.gmra.mxu0 %vm1191_vm4, %v3073_v6  ;;  %v11103_v32 = vld [vmem:[#allocation2 + $0x102] sm:$0xff]  ;;  %v3075_v8 = vpack.c.bf16 %v3040_v49, %v3039_v3 }
 0x19d   : > { %1227 = vst.msk [vmem:[#allocation2 + $0x118] sm:$0xff] %vm1191_vm4, %v1141_v11  ;;  %v909_v27 = vadd.f32 %v10844_v36, %v908_v18  ;;  %9737 = vmatprep.mubr.msk.bf16.mxu0 %vm1191_vm4, %v3074_v17  ;;  %9818 = vmatpush3.bf16.msra.mxu0 %v10987_v12  ;;  %v1372_v58 = vld [vmem:[#allocation2 + $0x101] sm:$0xff] }
 0x19e   : > { %v9411_v34 = vpop.f32.mrf.mxu0  ;;  %9819 = vmatprep.subr.bf16.mxu0 %v10412_v0  ;;  %v3041_v11 = vld [vmem:[#allocation2 + $0x5c] sm:$0xff]  ;;  %v3046_v3 = vld [vmem:[#allocation2 + $0x84] sm:$0xff] }
 0x19f   : > { %v1142_v40 = vmax.f32 %v909_v27, 0.0  ;;  %v3076_v18 = vpack.c.bf16 %v3042_v1, %v3041_v11  ;;  %v3043_v11 = vld [vmem:[#allocation2 + $0x6c] sm:$0xff] }
 0x1a0   : > { %v911_v57 = vpop.f32.mrf.mxu0  ;;  %v1373_v61 = vld [vmem:[#allocation2 + $0x109] sm:$0xff] }
 0x1a1   : > { %1228 = vst.msk [vmem:[#allocation2 + $0x120] sm:$0xff] %vm1191_vm4, %v1142_v40  ;;  %v912_v2 = vadd.f32 %v10844_v36, %v911_v57  ;;  %v1395_v12 = vpack.c.bf16 %v1373_v61, %v1372_v58  ;;  %9820 = vmatpush3.bf16.msra.mxu0 %v10412_v0  ;;  %v11114_v40 = vld [vmem:[#allocation2 + $0x10a] sm:$0xff]  ;;  %v3044_v61 = vld [vmem:[#allocation2 + $0x74] sm:$0xff] }
 0x1a2   : > { %v9412_v6 = vpop.f32.mrf.mxu0 }
 0x1a3   : > { %v1143_v17 = vmax.f32 %v912_v2, 0.0  ;;  %9545 = vmatprep.mubr.msk.bf16.mxu1 %vm1191_vm4, %v1395_v12 }
 0x1a4   : > { %v916_v27 = vpop.f32.mrf.mxu0  ;;  %9738 = vmatmul.mubr.msk.bf16.gmra.mxu0 %vm1191_vm4, %v3075_v8  ;;  %v11116_v57 = vld [vmem:[#allocation2 + $0x112] sm:$0xff] }
 0x1a5   : > { %1229 = vst.msk [vmem:[#allocation2 + $0x128] sm:$0xff] %vm1191_vm4, %v1143_v17  ;;  %v917_v34 = vadd.f32 %v10844_v36, %v916_v27  ;;  %9741 = vmatprep.mubr.msk.bf16.mxu0 %vm1191_vm4, %v3076_v18  ;;  %v1374_v2 = vld [vmem:[#allocation2 + $0x111] sm:$0xff]  ;;  %v3077_v18 = vpack.c.bf16 %v3044_v61, %v3043_v11  ;;  %v3045_v27 = vld [vmem:[#allocation2 + $0x7c] sm:$0xff]  ;;  %v1278_v61 = vld [vmem:[#allocation2 + $0x8] sm:$0xff] }
 0x1a6   : > { %v9415_v0 = vpop.f32.mrf.mxu0 }
 0x1a7   : > { %v1144_v58 = vmax.f32 %v917_v34, 0.0  ;;  %v3078_v0 = vpack.c.bf16 %v3046_v3, %v3045_v27 }
 0x1a8   : > { %v919_v1 = vpop.f32.mrf.mxu0  ;;  %v1375_v12 = vld [vmem:[#allocation2 + $0x119] sm:$0xff] }
 0x1a9   : > { %1230 = vst.msk [vmem:[#allocation2 + $0x130] sm:$0xff] %vm1191_vm4, %v1144_v58  ;;  %v920_v6 = vadd.f32 %v10844_v36, %v919_v1  ;;  %v1396_v8 = vpack.c.bf16 %v1375_v12, %v1374_v2  ;;  %v11127_v58 = vld [vmem:[#allocation2 + $0x11a] sm:$0xff] }
 0x1aa   : > { %v9416_v17 = vpop.f32.mrf.mxu0 }
 0x1ab   : > { %v1145_v38 = vmax.f32 %v920_v6, 0.0  ;;  %9546 = vmatmul.mubr.msk.bf16.gmra.mxu1 %vm1191_vm4, %v1396_v8  ;;  %v3048_v6 = vld [vmem:[#allocation2 + $0x94] sm:$0xff]  ;;  %v3050_v17 = vld [vmem:[#allocation2 + $0xa4] sm:$0xff] }
 0x1ac   : > { %v924_v49 = vpop.f32.mrf.mxu0  ;;  %9742 = vmatmul.mubr.msk.bf16.gmra.mxu0 %vm1191_vm4, %v3077_v18  ;;  %v11129_v1 = vld [vmem:[#allocation2 + $0x122] sm:$0xff]  ;;  %v3047_v18 = vld [vmem:[#allocation2 + $0x8c] sm:$0xff] }
 0x1ad   : > { %1231 = vst.msk [vmem:[#allocation2 + $0x138] sm:$0xff] %vm1191_vm4, %v1145_v38  ;;  %v925_v34 = vadd.f32 %v10844_v36, %v924_v49  ;;  %9745 = vmatprep.mubr.msk.bf16.mxu0 %vm1191_vm4, %v3078_v0  ;;  %v1376_v8 = vld [vmem:[#allocation2 + $0x121] sm:$0xff]  ;;  %v3079_v0 = vpack.c.bf16 %v3048_v6, %v3047_v18 }
 0x1ae   : > { %v9419_v2 = vpop.f32.mrf.mxu0  ;;  %v1277_v6 = vld [vmem:[#allocation2] sm:$0xff] }
 0x1af   : > { %v1146_v12 = vmax.f32 %v925_v34, 0.0  ;;  %v3080_v2 = vpack.c.bf16 %v3050_v17, %v3049_v33  ;;  %v11136_v34 = vld [vmem:[#allocation9 + $0x18] sm:$0xff]   ;;  %v1316_v17 = vpack.c.bf16 %v1278_v61, %v1277_v6 }
 0x1b0   : > { %v927_v3 = vpop.f32.mrf.mxu0  ;;  %v1377_v11 = vld [vmem:[#allocation2 + $0x129] sm:$0xff]  ;;  %9905 = vmatprep.subr.bf16.mxu0 %v11136_v34  ;;  %v1280_v61 = vld [vmem:[#allocation2 + $0x18] sm:$0xff] }
 0x1b1   : > { %1232 = vst.msk [vmem:[#allocation2 + $0x140] sm:$0xff] %vm1191_vm4, %v1146_v12  ;;  %v928_v38 = vadd.f32 %v10844_v36, %v927_v3  ;;  %v1397_v49 = vpack.c.bf16 %v1377_v11, %v1376_v8  ;;  %v11143_v8 = vld [vmem:[#allocation2 + $0x12a] sm:$0xff] }
 0x1b2   : > { %v9420_v27 = vpop.f32.mrf.mxu0 }
 0x1b3   : > { %v1147_v55 = vmax.f32 %v928_v38, 0.0  ;;  %9549 = vmatprep.mubr.msk.bf16.mxu1 %vm1191_vm4, %v1397_v49  ;;  %v3051_v27 = vld [vmem:[#allocation2 + $0xac] sm:$0xff] }
 0x1b4   : > { %v932_v15 = vpop.f32.mrf.mxu0  ;;  %9746 = vmatmul.mubr.msk.bf16.gmra.mxu0 %vm1191_vm4, %v3079_v0  ;;  %v1378_v47 = vld [vmem:[#allocation2 + $0x131] sm:$0xff]  ;;  %v1282_v38 = vld [vmem:[#allocation2 + $0x28] sm:$0xff] }
 0x1b5   : > { %1233 = vst.msk [vmem:[#allocation2 + $0x148] sm:$0xff] %vm1191_vm4, %v1147_v55  ;;  %v933_v12 = vadd.f32 %v10844_v36, %v932_v15  ;;  %9749 = vmatprep.mubr.msk.bf16.mxu0 %vm1191_vm4, %v3080_v2  ;;  %v1398_v3 = vpack.c.bf16 %v1378_v47, %v1378_v47  ;;  %v11145_v33 = vld [vmem:[#allocation2 + $0x132] sm:$0xff]  ;;  %v3054_v47 = vld [vmem:[#allocation2 + $0xc4] sm:$0xff] }
 0x1b6   : > { %v9423_v11 = vpop.f32.mrf.mxu0  ;;  %v3052_v55 = vld [vmem:[#allocation2 + $0xb4] sm:$0xff] }
 0x1b7   : > { %v1148_v49 = vmax.f32 %v933_v12, 0.0  ;;  %9550 = vmatmul.mubr.msk.bf16.gmra.mxu1 %vm1191_vm4, %v1398_v3  ;;  %v3081_v2 = vpack.c.bf16 %v3052_v55, %v3051_v27  ;;  %v3053_v11 = vld [vmem:[#allocation2 + $0xbc] sm:$0xff]  ;;  %v1279_v3 = vld [vmem:[#allocation2 + $0x10] sm:$0xff] }
 0x1b8   : > { %v935_v15 = vpop.f32.mrf.mxu0  ;;  %9557 = vmatprep.mubr.msk.bf16.mxu1 %vm1191_vm4, %v1316_v17  ;;  %v3082_v16 = vpack.c.bf16 %v3054_v47, %v3053_v11  ;;  %v3056_v47 = vld [vmem:[#allocation2 + $0xd4] sm:$0xff] }
 0x1b9   : > { %1234 = vst.msk [vmem:[#allocation2 + $0x150] sm:$0xff] %vm1191_vm4, %v1148_v49  ;;  %v936_v18 = vadd.f32 %v10844_v36, %v935_v15  ;;  %v1317_v49 = vpack.c.bf16 %v1280_v61, %v1279_v3  ;;  %v1281_v15 = vld [vmem:[#allocation2 + $0x20] sm:$0xff]  ;;  %v11162_v61 = vld [vmem:[#allocation9 + $0x38] sm:$0xff]  }
 0x1ba   : > { %v9424_v0 = vpop.f32.mrf.mxu0  ;;  %v1318_v55 = vpack.c.bf16 %v1282_v38, %v1281_v15  ;;  %v1284_v3 = vld [vmem:[#allocation2 + $0x38] sm:$0xff]  ;;  %v1286_v15 = vld [vmem:[#allocation2 + $0x48] sm:$0xff] }
 0x1bb   : > { %v1149_v6 = vmax.f32 %v936_v18, 0.0 }
 0x1bc   : > { %v940_v12 = vpop.f32.mrf.mxu0  ;;  %9750 = vmatmul.mubr.msk.bf16.gmra.mxu0 %vm1191_vm4, %v3081_v2  ;;  %v3058_v2 = vld [vmem:[#allocation2 + $0xe4] sm:$0xff] }
 0x1bd   : > { %1235 = vst.msk [vmem:[#allocation2 + $0x158] sm:$0xff] %vm1191_vm4, %v1149_v6  ;;  %v941_v17 = vadd.f32 %v10844_v36, %v940_v12  ;;  %9753 = vmatprep.mubr.msk.bf16.mxu0 %vm1191_vm4, %v3082_v16  ;;  %v3055_v16 = vld [vmem:[#allocation2 + $0xcc] sm:$0xff]  ;;  %v3057_v12 = vld [vmem:[#allocation2 + $0xdc] sm:$0xff] }
 0x1be   : > { %v9427_v0 = vpop.f32.mrf.mxu0  ;;  %v3083_v38 = vpack.c.bf16 %v3056_v47, %v3055_v16  ;;  %v1285_v47 = vld [vmem:[#allocation2 + $0x40] sm:$0xff]  ;;  %v3060_v16 = vld [vmem:[#allocation2 + $0xf4] sm:$0xff] }
 0x1bf   : > { %v1150_v27 = vmax.f32 %v941_v17, 0.0  ;;  %9558 = vmatmul.mubr.msk.bf16.vlgmr.msra.gmra.mxu1 %vm1191_vm4, %v1317_v49  ;;  %v3084_v49 = vpack.c.bf16 %v3058_v2, %v3057_v12  ;;  %v1283_v0 = vld [vmem:[#allocation2 + $0x30] sm:$0xff]  ;;  %v1320_v2 = vpack.c.bf16 %v1286_v15, %v1285_v47  ;;  %v1290_v15 = vld [vmem:[#allocation2 + $0x68] sm:$0xff] }
 0x1c0   : > { %9598 = vmatpush3.bf16.msra.mxu1 %v10924_v62  ;;  %v943_v18 = vpop.f32.mrf.mxu0  ;;  %9561 = vmatprep.mubr.msk.bf16.mxu1 %vm1191_vm4, %v1318_v55  ;;  %v11166_v55 = vld [vmem:[#allocation7] ss:$0 sm:$0xff]  ;;  %v3059_v12 = vld [vmem:[#allocation2 + $0xec] sm:$0xff] }
 0x1c1   : > { %1236 = vst.msk [vmem:[#allocation2 + $0x160] sm:$0xff] %vm1191_vm4, %v1150_v27  ;;  %v944_v11 = vadd.f32 %v10844_v36, %v943_v18  ;;  %9599 = vmatprep.subr.bf16.mxu1 %v10411_v56  ;;  %v1319_v27 = vpack.c.bf16 %v1284_v3, %v1283_v0  ;;  %v3085_v3 = vpack.c.bf16 %v3060_v16, %v3059_v12  ;;  %v3066_v12 = vld [vmem:[#allocation2 + $0x124] sm:$0xff] }
 0x1c2   : > { %v9428_v6 = vpop.f32.mrf.mxu0 }
 0x1c3   : > { %v1151_v17 = vmax.f32 %v944_v11, 0.0 }
 0x1c4   : > { %v948_v62 = vpop.f32.mrf.mxu0  ;;  %9754 = vmatmul.mubr.msk.bf16.gmra.mxu0 %vm1191_vm4, %v3083_v38  ;;  %9600 = vmatpush3.bf16.msra.mxu1 %v10411_v56  ;;  %v3062_v56 = vld [vmem:[#allocation2 + $0x104] sm:$0xff] }
 0x1c5   : > { %1237 = vst.msk [vmem:[#allocation2 + $0x168] sm:$0xff] %vm1191_vm4, %v1151_v17  ;;  %v949_v36 = vadd.f32 %v11166_v55, %v948_v62  ;;  %9757 = vmatprep.mubr.msk.bf16.mxu0 %vm1191_vm4, %v3084_v49  ;;  %9641 = vmatprep.subr.bf16.mxu1 %v11162_v61  ;;  %v3061_v49 = vld [vmem:[#allocation2 + $0xfc] sm:$0xff] }
 0x1c6   : > { %v9431_v18 = vpop.f32.mrf.mxu0  ;;  %v1288_v62 = vld [vmem:[#allocation2 + $0x58] sm:$0xff] }
 0x1c7   : > { %v1152_v11 = vmax.f32 %v949_v36, 0.0  ;;  %9562 = vmatmul.mubr.msk.bf16.gmra.mxu1 %vm1191_vm4, %v1319_v27  ;;  %v3086_v18 = vpack.c.bf16 %v3062_v56, %v3061_v49  ;;  %v1287_v27 = vld [vmem:[#allocation2 + $0x50] sm:$0xff] }
 0x1c8   : > { %v951_v6 = vpop.f32.mrf.mxu0  ;;  %9565 = vmatprep.mubr.msk.bf16.mxu1 %vm1191_vm4, %v1320_v2  ;;  %v1321_v2 = vpack.c.bf16 %v1288_v62, %v1287_v27  ;;  %v3063_v49 = vld [vmem:[#allocation2 + $0x10c] sm:$0xff]  ;;  %v1292_v62 = vld [vmem:[#allocation2 + $0x78] sm:$0xff] }
 0x1c9   : > { %1238 = vst.msk [vmem:[#allocation2 + $0x170] sm:$0xff] %vm1191_vm4, %v1152_v11  ;;  %v952_v38 = vadd.f32 %v11166_v55, %v951_v6  ;;  %v1289_v11 = vld [vmem:[#allocation2 + $0x60] sm:$0xff] }
 0x1ca   : > { %v9432_v17 = vpop.f32.mrf.mxu0 }
 0x1cb   : > { %v1153_v0 = vmax.f32 %v952_v38, 0.0  ;;  %v1322_v17 = vpack.c.bf16 %v1290_v15, %v1289_v11  ;;  %v3064_v38 = vld [vmem:[#allocation2 + $0x114] sm:$0xff]  ;;  %v1294_v15 = vld [vmem:[#allocation2 + $0x88] sm:$0xff] }
 0x1cc   : > { %v956_v36 = vpop.f32.mrf.mxu0  ;;  %9758 = vmatmul.mubr.msk.bf16.gmra.mxu0 %vm1191_vm4, %v3085_v3 }
 0x1cd   : > { %1239 = vst.msk [vmem:[#allocation2 + $0x178] sm:$0xff] %vm1191_vm4, %v1153_v0  ;;  %v957_v47 = vadd.f32 %v11166_v55, %v956_v36  ;;  %9761 = vmatprep.mubr.msk.bf16.mxu0 %vm1191_vm4, %v3086_v18  ;;  %v3087_v36 = vpack.c.bf16 %v3064_v38, %v3063_v49  ;;  %v3065_v18 = vld [vmem:[#allocation2 + $0x11c] sm:$0xff]  ;;  %v3070_v49 = vld [vmem:[#allocation2 + $0x144] sm:$0xff] }
 0x1ce   : > { %v9435_v6 = vpop.f32.mrf.mxu0 }
 0x1cf   : > { %v1154_v16 = vmax.f32 %v957_v47, 0.0  ;;  %9566 = vmatmul.mubr.msk.bf16.gmra.mxu1 %vm1191_vm4, %v1321_v2  ;;  %v3088_v6 = vpack.c.bf16 %v3066_v12, %v3065_v18  ;;  %v1291_v2 = vld [vmem:[#allocation2 + $0x70] sm:$0xff] }
 0x1d0   : > { %v959_v56 = vpop.f32.mrf.mxu0  ;;  %9569 = vmatprep.mubr.msk.bf16.mxu1 %vm1191_vm4, %v1322_v17  ;;  %v1323_v17 = vpack.c.bf16 %v1292_v62, %v1291_v2  ;;  %v3067_v18 = vld [vmem:[#allocation2 + $0x12c] sm:$0xff]  ;;  %v1296_v62 = vld [vmem:[#allocation2 + $0x98] sm:$0xff] }
 0x1d1   : > { %1240 = vst.msk [vmem:[#allocation2 + $0x180] sm:$0xff] %vm1191_vm4, %v1154_v16  ;;  %v960_v3 = vadd.f32 %v11166_v55, %v959_v56  ;;  %v1293_v16 = vld [vmem:[#allocation2 + $0x80] sm:$0xff] }
 0x1d2   : > { %v9436_v0 = vpop.f32.mrf.mxu0 }
 0x1d3   : > { %v1155_v27 = vmax.f32 %v960_v3, 0.0  ;;  %v1324_v0 = vpack.c.bf16 %v1294_v15, %v1293_v16  ;;  %v3068_v3 = vld [vmem:[#allocation2 + $0x134] sm:$0xff]  ;;  %v1298_v15 = vld [vmem:[#allocation2 + $0xa8] sm:$0xff] }
 0x1d4   : > { %v964_v47 = vpop.f32.mrf.mxu0  ;;  %9762 = vmatmul.mubr.msk.bf16.gmra.mxu0 %vm1191_vm4, %v3087_v36 }
 0x1d5   : > { %1241 = vst.msk [vmem:[#allocation2 + $0x188] sm:$0xff] %vm1191_vm4, %v1155_v27  ;;  %v965_v11 = vadd.f32 %v11166_v55, %v964_v47  ;;  %9765 = vmatprep.mubr.msk.bf16.mxu0 %vm1191_vm4, %v3088_v6  ;;  %v3089_v47 = vpack.c.bf16 %v3068_v3, %v3067_v18  ;;  %v3069_v6 = vld [vmem:[#allocation2 + $0x13c] sm:$0xff] }
 0x1d6   : > { %v9439_v56 = vpop.f32.mrf.mxu0 }
 0x1d7   : > { %v1156_v38 = vmax.f32 %v965_v11, 0.0  ;;  %9570 = vmatmul.mubr.msk.bf16.gmra.mxu1 %vm1191_vm4, %v1323_v17  ;;  %v3090_v56 = vpack.c.bf16 %v3070_v49, %v3069_v6  ;;  %v1295_v17 = vld [vmem:[#allocation2 + $0x90] sm:$0xff] }
 0x1d8   : > { %v967_v12 = vpop.f32.mrf.mxu0  ;;  %9573 = vmatprep.mubr.msk.bf16.mxu1 %vm1191_vm4, %v1324_v0  ;;  %v1325_v0 = vpack.c.bf16 %v1296_v62, %v1295_v17 }
 0x1d9   : > { %1242 = vst.msk [vmem:[#allocation2 + $0x190] sm:$0xff] %vm1191_vm4, %v1156_v38  ;;  %v968_v36 = vadd.f32 %v11166_v55, %v967_v12  ;;  %v1297_v38 = vld [vmem:[#allocation2 + $0xa0] sm:$0xff]  ;;  %v3071_v12 = vld [vmem:[#allocation2 + $0x14c] sm:$0xff] }
 0x1da   : > { %v9440_v27 = vpop.f32.mrf.mxu0  ;;  %v1326_v3 = vpack.c.bf16 %v1298_v15, %v1297_v38  ;;  %v1299_v15 = vld [vmem:[#allocation2 + $0xb0] sm:$0xff]  ;;  %v1301_v38 = vld [vmem:[#allocation2 + $0xc0] sm:$0xff] }
 0x1db   : > { %v1157_v2 = vmax.f32 %v968_v36, 0.0  ;;  %v3091_v36 = vpack.c.bf16 %v3071_v12, %v3071_v12 }
 0x1dc   : > { %v972_v11 = vpop.f32.mrf.mxu0  ;;  %9766 = vmatmul.mubr.msk.bf16.gmra.mxu0 %vm1191_vm4, %v3089_v47  ;;  %v3768_v47 = vld [vmem:[#allocation2 + $0x3d] sm:$0xff] }
 0x1dd   : > { %1243 = vst.msk [vmem:[#allocation2 + $0x198] sm:$0xff] %vm1191_vm4, %v1157_v2  ;;  %v973_v16 = vadd.f32 %v11166_v55, %v972_v11  ;;  %9769 = vmatprep.mubr.msk.bf16.mxu0 %vm1191_vm4, %v3090_v56  ;;  %v3767_v11 = vld [vmem:[#allocation2 + $0x35] sm:$0xff] }
 0x1de   : > { %v9443_v27 = vpop.f32.mrf.mxu0  ;;  %v1300_v56 = vld [vmem:[#allocation2 + $0xb8] sm:$0xff]  ;;  %v3806_v17 = vpack.c.bf16 %v3768_v47, %v3767_v11 }
 0x1df   : > { %v1158_v18 = vmax.f32 %v973_v16, 0.0  ;;  %9574 = vmatmul.mubr.msk.bf16.gmra.mxu1 %vm1191_vm4, %v1325_v0  ;;  %v1327_v0 = vpack.c.bf16 %v1300_v56, %v1299_v15  ;;  %v1304_v56 = vld [vmem:[#allocation2 + $0xd8] sm:$0xff] }
 0x1e0   : > { %v975_v49 = vpop.f32.mrf.mxu0  ;;  %9577 = vmatprep.mubr.msk.bf16.mxu1 %vm1191_vm4, %v1326_v3  ;;  %v1328_v3 = vpack.c.bf16 %v1302_v28, %v1301_v38 }
 0x1e1   : > { %1244 = vst.msk [vmem:[#allocation2 + $0x1a0] sm:$0xff] %vm1191_vm4, %v1158_v18  ;;  %v976_v6 = vadd.f32 %v11166_v55, %v975_v49  ;;  %v3770_v49 = vld [vmem:[#allocation2 + $0x4d] sm:$0xff] }
 0x1e2   : > { %v9444_v2 = vpop.f32.mrf.mxu0 }
 0x1e3   : > { %v1159_v62 = vmax.f32 %v976_v6, 0.0  ;;  %v3772_v6 = vld [vmem:[#allocation2 + $0x5d] sm:$0xff]  ;;  %v3769_v2 = vld [vmem:[#allocation2 + $0x45] sm:$0xff] }
 0x1e4   : > { %v980_v27 = vpop.f32.mrf.mxu0  ;;  %9770 = vmatmul.mubr.msk.bf16.gmra.mxu0 %vm1191_vm4, %v3091_v36 }
 0x1e5   : > { %1245 = vst.msk [vmem:[#allocation2 + $0x1a8] sm:$0xff] %vm1191_vm4, %v1159_v62  ;;  %v981_v16 = vadd.f32 %v11166_v55, %v980_v27  ;;  %9821 = vmatprep.mubr.msk.bf16.mxu0 %vm1191_vm4, %v3806_v17  ;;  %v3807_v62 = vpack.c.bf16 %v3770_v49, %v3769_v2  ;;  %v3771_v17 = vld [vmem:[#allocation2 + $0x55] sm:$0xff]  ;;  %v10416_v27 = vld [vmem:[#allocation9 + $0x10] sm:$0xff]  }
 0x1e6   : > { %v9447_v12 = vpop.f32.mrf.mxu0  ;;  %v3808_v28 = vpack.c.bf16 %v3772_v6, %v3771_v17  ;;  %v3774_v6 = vld [vmem:[#allocation2 + $0x6d] sm:$0xff]  ;;  %v3773_v17 = vld [vmem:[#allocation2 + $0x65] sm:$0xff] }
 0x1e7   : > { %v1160_v18 = vmax.f32 %v981_v16, 0.0  ;;  %9578 = vmatmul.mubr.msk.bf16.gmra.mxu1 %vm1191_vm4, %v1327_v0  ;;  %v1306_v16 = vld [vmem:[#allocation2 + $0xe8] sm:$0xff]  ;;  %v1303_v0 = vld [vmem:[#allocation2 + $0xd0] sm:$0xff] }
 0x1e8   : > { %v983_v47 = vpop.f32.mrf.mxu0  ;;  %9581 = vmatprep.mubr.msk.bf16.mxu1 %vm1191_vm4, %v1328_v3  ;;  %v1329_v3 = vpack.c.bf16 %v1304_v56, %v1303_v0  ;;  %v1310_v0 = vld [vmem:[#allocation2 + $0x108] sm:$0xff] }
 0x1e9   : > { %1246 = vst.msk [vmem:[#allocation2 + $0x1b0] sm:$0xff] %vm1191_vm4, %v1160_v18  ;;  %v984_v36 = vadd.f32 %v11166_v55, %v983_v47  ;;  %v1305_v18 = vld [vmem:[#allocation2 + $0xe0] sm:$0xff] }
 0x1ea   : > { %v9448_v11 = vpop.f32.mrf.mxu0  ;;  %v1330_v47 = vpack.c.bf16 %v1306_v16, %v1305_v18 }
 0x1eb   : > { %v1161_v15 = vmax.f32 %v984_v36, 0.0  ;;  %v3776_v11 = vld [vmem:[#allocation2 + $0x7d] sm:$0xff] }
 0x1ec   : > { %v988_v38 = vpop.f32.mrf.mxu0  ;;  %9822 = vmatmul.mubr.msk.bf16.vlgmr.msra.gmra.mxu0 %vm1191_vm4, %v3807_v62 }
 0x1ed   : > { %1247 = vst.msk [vmem:[#allocation2 + $0x1b8] sm:$0xff] %vm1191_vm4, %v1161_v15  ;;  %v989_v12 = vadd.f32 %v11166_v55, %v988_v38  ;;  %9825 = vmatprep.mubr.msk.bf16.mxu0 %vm1191_vm4, %v3808_v28  ;;  %9906 = vmatpush3.bf16.msra.mxu0 %v11136_v34  ;;  %v3809_v15 = vpack.c.bf16 %v3774_v6, %v3773_v17  ;;  %v3775_v34 = vld [vmem:[#allocation2 + $0x75] sm:$0xff] }
 0x1ee   : > { %v9451_v49 = vpop.f32.mrf.mxu0  ;;  %9907 = vmatprep.subr.bf16.mxu0 %v10416_v27  ;;  %v1308_v28 = vld [vmem:[#allocation2 + $0xf8] sm:$0xff]  ;;  %v3810_v38 = vpack.c.bf16 %v3776_v11, %v3775_v34 }
 0x1ef   : > { %v1162_v36 = vmax.f32 %v989_v12, 0.0  ;;  %9582 = vmatmul.mubr.msk.bf16.gmra.mxu1 %vm1191_vm4, %v1329_v3  ;;  %v1307_v3 = vld [vmem:[#allocation2 + $0xf0] sm:$0xff] }
 0x1f0   : > { %v991_v2 = vpop.f32.mrf.mxu0  ;;  %9585 = vmatprep.mubr.msk.bf16.mxu1 %vm1191_vm4, %v1330_v47  ;;  %v1331_v49 = vpack.c.bf16 %v1308_v28, %v1307_v3  ;;  %v1309_v47 = vld [vmem:[#allocation2 + $0x100] sm:$0xff]  ;;  %v1312_v28 = vld [vmem:[#allocation2 + $0x118] sm:$0xff]  ;;  %v1314_v3 = vld [vmem:[#allocation2 + $0x128] sm:$0xff] }
 0x1f1   : > { %1248 = vst.msk [vmem:[#allocation2 + $0x1c0] sm:$0xff] %vm1191_vm4, %v1162_v36  ;;  %v992_v62 = vadd.f32 %v11166_v55, %v991_v2  ;;  %9908 = vmatpush3.bf16.msra.mxu0 %v10416_v27  ;;  %v1332_v36 = vpack.c.bf16 %v1310_v0, %v1309_v47  ;;  %v3778_v2 = vld [vmem:[#allocation2 + $0x8d] sm:$0xff] }
 0x1f2   : > { %v9452_v56 = vpop.f32.mrf.mxu0 }
 0x1f3   : > { %v1163_v16 = vmax.f32 %v992_v62, 0.0  ;;  %v3780_v62 = vld [vmem:[#allocation2 + $0x9d] sm:$0xff]  ;;  %v3777_v56 = vld [vmem:[#allocation2 + $0x85] sm:$0xff] }
 0x1f4   : > { %v996_v12 = vpop.f32.mrf.mxu0  ;;  %9826 = vmatmul.mubr.msk.bf16.gmra.mxu0 %vm1191_vm4, %v3809_v15  ;;  %v3811_v34 = vpack.c.bf16 %v3778_v2, %v3777_v56 }
 0x1f5   : > { %1249 = vst.msk [vmem:[#allocation2 + $0x1c8] sm:$0xff] %vm1191_vm4, %v1163_v16  ;;  %v997_v18 = vadd.f32 %v11166_v55, %v996_v12  ;;  %9829 = vmatprep.mubr.msk.bf16.mxu0 %vm1191_vm4, %v3810_v38  ;;  %v3779_v16 = vld [vmem:[#allocation2 + $0x95] sm:$0xff]  ;;  %v11224_v38 = vpop.f32.mrf.mxu1 }
 0x1f6   : > { %v9455_v27 = vpop.f32.mrf.mxu0  ;;  %v3812_v12 = vpack.c.bf16 %v3780_v62, %v3779_v16  ;;  %v3782_v62 = vld [vmem:[#allocation2 + $0xad] sm:$0xff]  ;;  %v3781_v16 = vld [vmem:[#allocation2 + $0xa5] sm:$0xff] }
 0x1f7   : > { %v1164_v6 = vmax.f32 %v997_v18, 0.0  ;;  %9586 = vmatmul.mubr.msk.bf16.gmra.mxu1 %vm1191_vm4, %v1331_v49  ;;  %v1311_v49 = vld [vmem:[#allocation2 + $0x110] sm:$0xff] }
 0x1f8   : > { %v999_v11 = vpop.f32.mrf.mxu0  ;;  %9589 = vmatprep.mubr.msk.bf16.mxu1 %vm1191_vm4, %v1332_v36  ;;  %v1333_v27 = vpack.c.bf16 %v1312_v28, %v1311_v49  ;;  %v1313_v36 = vld [vmem:[#allocation2 + $0x120] sm:$0xff]  ;;  %v3813_v28 = vpack.c.bf16 %v3782_v62, %v3781_v16 }
 0x1f9   : > { %1250 = vst.msk [vmem:[#allocation2 + $0x1d0] sm:$0xff] %vm1191_vm4, %v1164_v6  ;;  %v1000_v17 = vadd.f32 %v11166_v55, %v999_v11  ;;  %v1334_v2 = vpack.c.bf16 %v1314_v3, %v1313_v36  ;;  %v11230_v11 = vpop.f32.mrf.mxu1  ;;  %v1933_v36 = vld [vmem:[#allocation2 + $0xa] sm:$0xff]  ;;  %v1932_v62 = vld [vmem:[#allocation2 + $0x2] sm:$0xff] }
 0x1fa   : > { %v9456_v15 = vpop.f32.mrf.mxu0  ;;  %v1971_v16 = vpack.c.bf16 %v1933_v36, %v1932_v62  ;;  %v3787_v36 = vld [vmem:[#allocation2 + $0xd5] sm:$0xff] }
 0x1fb   : > { %v1165_v0 = vmax.f32 %v1000_v17, 0.0  ;;  %v3784_v15 = vld [vmem:[#allocation2 + $0xbd] sm:$0xff]  ;;  %v11236_v3 = vpop.f32.mrf.mxu1 }
 0x1fc   : > { %v1004_v18 = vpop.f32.mrf.mxu0  ;;  %9830 = vmatmul.mubr.msk.bf16.gmra.mxu0 %vm1191_vm4, %v3811_v34 }
 0x1fd   : > { %1251 = vst.msk [vmem:[#allocation2 + $0x1d8] sm:$0xff] %vm1191_vm4, %v1165_v0  ;;  %v1005_v47 = vadd.f32 %v11166_v55, %v1004_v18  ;;  %9833 = vmatprep.mubr.msk.bf16.mxu0 %vm1191_vm4, %v3812_v12  ;;  %v3783_v12 = vld [vmem:[#allocation2 + $0xb5] sm:$0xff] }
 0x1fe   : > { %v9459_v6 = vpop.f32.mrf.mxu0  ;;  %v1315_v18 = vld [vmem:[#allocation2 + $0x130] sm:$0xff] }
 0x1ff   : > { %v1166_v56 = vmax.f32 %v1005_v47, 0.0  ;;  %9590 = vmatmul.mubr.msk.bf16.gmra.mxu1 %vm1191_vm4, %v1333_v27  ;;  %v3814_v47 = vpack.c.bf16 %v3784_v15, %v3783_v12  ;;  %v11238_v27 = vld [vmem:[#allocation9 + $0x28] sm:$0xff]  }
 0x200   : > { %v1007_v17 = vpop.f32.mrf.mxu0  ;;  %9593 = vmatprep.mubr.msk.bf16.mxu1 %vm1191_vm4, %v1334_v2  ;;  %9993 = vmatprep.subr.bf16.mxu0 %v11238_v27 }
 0x201   : > { %1252 = vst.msk [vmem:[#allocation2 + $0x1e0] sm:$0xff] %vm1191_vm4, %v1166_v56  ;;  %v1008_v34 = vadd.f32 %v11166_v55, %v1007_v17  ;;  %v1335_v56 = vpack.c.bf16 %v1315_v18, %v1315_v18 }
 0x202   : > { %v9460_v0 = vpop.f32.mrf.mxu0 }
 0x203   : > { %v1167_v49 = vmax.f32 %v1008_v34, 0.0  ;;  %v11245_v34 = vpop.f32.mrf.mxu1  ;;  %v3786_v0 = vld [vmem:[#allocation2 + $0xcd] sm:$0xff] }
 0x204   : > { %v1012_v6 = vpop.f32.mrf.mxu0  ;;  %9834 = vmatmul.mubr.msk.bf16.gmra.mxu0 %vm1191_vm4, %v3813_v28  ;;  %v3788_v28 = vld [vmem:[#allocation2 + $0xdd] sm:$0xff] }
 0x205   : > { %1253 = vst.msk [vmem:[#allocation2 + $0x1e8] sm:$0xff] %vm1191_vm4, %v1167_v49  ;;  %v1013_v2 = vadd.f32 %v11166_v55, %v1012_v6  ;;  %9837 = vmatprep.mubr.msk.bf16.mxu0 %vm1191_vm4, %v3814_v47  ;;  %v11249_v49 = vpop.f32.mrf.mxu1  ;;  %v3785_v47 = vld [vmem:[#allocation2 + $0xc5] sm:$0xff]  ;;  %v3816_v63 = vpack.c.bf16 %v3788_v28, %v3787_v36 }
 0x206   : > { %v9463_v17 = vpop.f32.mrf.mxu0 }
 0x207   : > { %v1168_v15 = vmax.f32 %v1013_v2, 0.0  ;;  %9594 = vmatmul.mubr.msk.bf16.gmra.mxu1 %vm1191_vm4, %v1335_v56  ;;  %v3815_v17 = vpack.c.bf16 %v3786_v0, %v3785_v47  ;;  %v1934_v56 = vld [vmem:[#allocation2 + $0x12] sm:$0xff]  ;;  %v11254_v44 = vpop.f32.mrf.mxu1  ;;  %v10441_v0 = vld [vmem:[#allocation2 + $0x22] sm:$0xff]  ;;  %v10442_v47 = vld [vmem:[#allocation2 + $0x2a] sm:$0xff] }
 0x208   : > { %v1015_v12 = vpop.f32.mrf.mxu0  ;;  %9601 = vmatprep.mubr.msk.bf16.mxu1 %vm1191_vm4, %v1971_v16 }
 0x209   : > { %1254 = vst.msk [vmem:[#allocation2 + $0x1f0] sm:$0xff] %vm1191_vm4, %v1168_v15  ;;  %v1016_v18 = vadd.f32 %v11166_v55, %v1015_v12  ;;  %v10440_v15 = vld [vmem:[#allocation2 + $0x1a] sm:$0xff] }
 0x20a   : > { %v9464_v6 = vpop.f32.mrf.mxu0  ;;  %v1972_v12 = vpack.c.bf16 %v10440_v15, %v1934_v56  ;;  %v3789_v56 = vld [vmem:[#allocation2 + $0xe5] sm:$0xff] }
 0x20b   : > { %v1169_v62 = vmax.f32 %v1016_v18, 0.0  ;;  %v1973_v18 = vpack.c.bf16 %v10442_v47, %v10441_v0  ;;  %v11266_v15 = vld [vmem:[#allocation9 + $0x48] sm:$0xff]  }
 0x20c   : > { %v1020_v2 = vpop.f32.mrf.mxu0  ;;  %9838 = vmatmul.mubr.msk.bf16.gmra.mxu0 %vm1191_vm4, %v3815_v17  ;;  %v3790_v17 = vld [vmem:[#allocation2 + $0xed] sm:$0xff] }
 0x20d   : > { %1255 = vst.msk [vmem:[#allocation2 + $0x1f8] sm:$0xff] %vm1191_vm4, %v1169_v62  ;;  %v1021_v16 = vadd.f32 %v11166_v55, %v1020_v2  ;;  %9841 = vmatprep.mubr.msk.bf16.mxu0 %vm1191_vm4, %v3816_v63  ;;  %v3792_v62 = vld [vmem:[#allocation2 + $0xfd] sm:$0xff]  ;;  %v11262_v2 = vpop.f32.mrf.mxu1 }
 0x20e   : > { %v9467_v6 = vpop.f32.mrf.mxu0 }
 0x20f   : > { %v1170_v28 = vmax.f32 %v1021_v16, 0.0  ;;  %9602 = vmatmul.mubr.msk.bf16.vlgmr.msra.gmra.mxu1 %vm1191_vm4, %v1972_v12  ;;  %v3817_v6 = vpack.c.bf16 %v3790_v17, %v3789_v56  ;;  %v3791_v12 = vld [vmem:[#allocation2 + $0xf5] sm:$0xff] }
 0x210   : > { %9642 = vmatpush3.bf16.msra.mxu1 %v11162_v61  ;;  %v1023_v36 = vpop.f32.mrf.mxu0  ;;  %9605 = vmatprep.mubr.msk.bf16.mxu1 %vm1191_vm4, %v1973_v18  ;;  %v3818_v47 = vpack.c.bf16 %v3792_v62, %v3791_v12  ;;  %v11269_v18 = vpop.f32.mrf.mxu1  ;;  %v10446_v62 = vld [vmem:[#allocation2 + $0x4a] sm:$0xff] }
 0x211   : > { %1256 = vst.msk [vmem:[#allocation2 + $0x200] sm:$0xff] %vm1191_vm4, %v1170_v28  ;;  %v1024_v63 = vadd.f32 %v11166_v55, %v1023_v36  ;;  %9643 = vmatprep.subr.bf16.mxu1 %v10415_v25  ;;  %13813 = vst [vmem:[#allocation15_spill] sm:$0xff] %v11269_v18  ;;  %v10443_v36 = vld [vmem:[#allocation2 + $0x32] sm:$0xff] }
 0x212   : > { %v9468_v16 = vpop.f32.mrf.mxu0  ;;  %v1974_v54 = vpack.c.bf16 %v10444_v7, %v10443_v36 }
 0x213   : > { %v1171_v0 = vmax.f32 %v1024_v63, 0.0  ;;  %v10445_v63 = vld [vmem:[#allocation2 + $0x42] sm:$0xff]  ;;  %v11275_v16 = vpop.f32.mrf.mxu1 }
 0x214   : > { %v1028_v61 = vpop.f32.mrf.mxu0  ;;  %9842 = vmatmul.mubr.msk.bf16.gmra.mxu0 %vm1191_vm4, %v3817_v6  ;;  %9644 = vmatpush3.bf16.msra.mxu1 %v10415_v25  ;;  %v1975_v56 = vpack.c.bf16 %v10446_v62, %v10445_v63  ;;  %13814 = vst [vmem:[#allocation16_spill] sm:$0xff] %v11275_v16  ;;  %v3794_v6 = vld [vmem:[#allocation2 + $0x10d] sm:$0xff] }
 0x215   : > { %1257 = vst.msk [vmem:[#allocation2 + $0x208] sm:$0xff] %vm1191_vm4, %v1171_v0  ;;  %v1029_v28 = vadd.f32 %v11166_v55, %v1028_v61  ;;  %9845 = vmatprep.mubr.msk.bf16.mxu0 %vm1191_vm4, %v3818_v47  ;;  %9685 = vmatprep.subr.bf16.mxu1 %v11266_v15  ;;  %v3796_v0 = vld [vmem:[#allocation2 + $0x11d] sm:$0xff]  ;;  %v3793_v47 = vld [vmem:[#allocation2 + $0x105] sm:$0xff]  ;;  %v11281_v39 = vpop.f32.mrf.mxu1 }
 0x216   : > { %v9471_v17 = vpop.f32.mrf.mxu0  ;;  %v3819_v36 = vpack.c.bf16 %v3794_v6, %v3793_v47  ;;  %13815 = vst [vmem:[#allocation17_spill] sm:$0xff] %v11281_v39  ;;  %v10450_v6 = vld [vmem:[#allocation2 + $0x6a] sm:$0xff]  ;;  %v3804_v39 = vld [vmem:[#allocation2 + $0x15d] sm:$0xff] }
 0x217   : > { %v1172_v25 = vmax.f32 %v1029_v28, 0.0  ;;  %9606 = vmatmul.mubr.msk.bf16.gmra.mxu1 %vm1191_vm4, %v1974_v54  ;;  %v3795_v17 = vld [vmem:[#allocation2 + $0x115] sm:$0xff]  ;;  %v11287_v16 = vpop.f32.mrf.mxu1 }
 0x218   : > { %v1031_v12 = vpop.f32.mrf.mxu0  ;;  %9609 = vmatprep.mubr.msk.bf16.mxu1 %vm1191_vm4, %v1975_v56  ;;  %v3820_v62 = vpack.c.bf16 %v3796_v0, %v3795_v17  ;;  %v10447_v56 = vld [vmem:[#allocation2 + $0x52] sm:$0xff]  ;;  %13816 = vst [vmem:[#allocation18_spill] sm:$0xff] %v11287_v16  ;;  %v3800_v17 = vld [vmem:[#allocation2 + $0x13d] sm:$0xff] }
 0x219   : > { %1258 = vst.msk [vmem:[#allocation2 + $0x210] sm:$0xff] %vm1191_vm4, %v1172_v25  ;;  %v1032_v7 = vadd.f32 %v11166_v55, %v1031_v12  ;;  %v10448_v25 = vld [vmem:[#allocation2 + $0x5a] sm:$0xff]  ;;  %v3798_v0 = vld [vmem:[#allocation2 + $0x12d] sm:$0xff] }
 0x21a   : > { %v9472_v61 = vpop.f32.mrf.mxu0  ;;  %v1976_v12 = vpack.c.bf16 %v10448_v25, %v10447_v56  ;;  %v3799_v56 = vld [vmem:[#allocation2 + $0x135] sm:$0xff]  ;;  %v11293_v25 = vpop.f32.mrf.mxu1 }
 0x21b   : > { %v1173_v63 = vmax.f32 %v1032_v7, 0.0  ;;  %v10449_v61 = vld [vmem:[#allocation2 + $0x62] sm:$0xff]  ;;  %13817 = vst [vmem:[#allocation19_spill] sm:$0xff] %v11293_v25 }
 0x21c   : > { %v1036_v28 = vpop.f32.mrf.mxu0  ;;  %9846 = vmatmul.mubr.msk.bf16.gmra.mxu0 %vm1191_vm4, %v3819_v36  ;;  %v1977_v47 = vpack.c.bf16 %v10450_v6, %v10449_v61  ;;  %v3822_v6 = vpack.c.bf16 %v3800_v17, %v3799_v56  ;;  %v10453_v25 = vld [vmem:[#allocation2 + $0x82] sm:$0xff]  ;;  %v3803_v56 = vld [vmem:[#allocation2 + $0x155] sm:$0xff] }
 0x21d   : > { %1259 = vst.msk [vmem:[#allocation2 + $0x218] sm:$0xff] %vm1191_vm4, %v1173_v63  ;;  %v1037_v54 = vadd.f32 %v11166_v55, %v1036_v28  ;;  %9849 = vmatprep.mubr.msk.bf16.mxu0 %vm1191_vm4, %v3820_v62  ;;  %v3797_v62 = vld [vmem:[#allocation2 + $0x125] sm:$0xff] }
 0x21e   : > { %v9475_v23 = vpop.f32.mrf.mxu0 }
 0x21f   : > { %v1174_v7 = vmax.f32 %v1037_v54, 0.0  ;;  %9610 = vmatmul.mubr.msk.bf16.gmra.mxu1 %vm1191_vm4, %v1976_v12  ;;  %v3821_v23 = vpack.c.bf16 %v3798_v0, %v3797_v62  ;;  %v11296_v12 = vpop.f32.mrf.mxu1  ;;  %v3801_v0 = vld [vmem:[#allocation2 + $0x145] sm:$0xff]  ;;  %v3802_v62 = vld [vmem:[#allocation2 + $0x14d] sm:$0xff] }
 0x220   : > { %v1039_v36 = vpop.f32.mrf.mxu0  ;;  %9613 = vmatprep.mubr.msk.bf16.mxu1 %vm1191_vm4, %v1977_v47  ;;  %13818 = vst [vmem:[#allocation20_spill] sm:$0xff] %v11296_v12 }
 0x221   : > { %1260 = vst.msk [vmem:[#allocation2 + $0x220] sm:$0xff] %vm1191_vm4, %v1174_v7  ;;  %v1040_v63 = vadd.f32 %v11166_v55, %v1039_v36  ;;  %v10451_v7 = vld [vmem:[#allocation2 + $0x72] sm:$0xff]  ;;  %v10452_v36 = vld [vmem:[#allocation2 + $0x7a] sm:$0xff] }
 0x222   : > { %v9476_v28 = vpop.f32.mrf.mxu0 }
 0x223   : > { %v1175_v61 = vmax.f32 %v1040_v63, 0.0  ;;  %v1978_v28 = vpack.c.bf16 %v10452_v36, %v10451_v7  ;;  %v10454_v63 = vld [vmem:[#allocation2 + $0x8a] sm:$0xff]  ;;  %v3824_v7 = vpack.c.bf16 %v3804_v39, %v3803_v56 }
 0x224   : > { %v1044_v54 = vpop.f32.mrf.mxu0  ;;  %9850 = vmatmul.mubr.msk.bf16.gmra.mxu0 %vm1191_vm4, %v3821_v23  ;;  %v1979_v17 = vpack.c.bf16 %v10454_v63, %v10453_v25  ;;  %v3805_v63 = vld [vmem:[#allocation2 + $0x165] sm:$0xff] }
 0x225   : > { %1261 = vst.msk [vmem:[#allocation2 + $0x228] sm:$0xff] %vm1191_vm4, %v1175_v61  ;;  %v1045_v47 = vadd.f32 %v11166_v55, %v1044_v54  ;;  %9853 = vmatprep.mubr.msk.bf16.mxu0 %vm1191_vm4, %v3822_v6  ;;  %v3823_v61 = vpack.c.bf16 %v3802_v62, %v3801_v0  ;;  %v11303_v54 = vpop.f32.mrf.mxu1  ;;  %v10456_v0 = vld [vmem:[#allocation2 + $0x9a] sm:$0xff]  ;;  %v10458_v39 = vld [vmem:[#allocation2 + $0xaa] sm:$0xff] }
 0x226   : > { %v9479_v16 = vpop.f32.mrf.mxu0  ;;  %13819 = vst [vmem:[#allocation21_spill] sm:$0xff] %v11303_v54 }
 0x227   : > { %v1176_v23 = vmax.f32 %v1045_v47, 0.0  ;;  %9614 = vmatmul.mubr.msk.bf16.gmra.mxu1 %vm1191_vm4, %v1978_v28  ;;  %v11308_v25 = vpop.f32.mrf.mxu1  ;;  %v10455_v28 = vld [vmem:[#allocation2 + $0x92] sm:$0xff] }
 0x228   : > { %v1047_v12 = vpop.f32.mrf.mxu0  ;;  %9617 = vmatprep.mubr.msk.bf16.mxu1 %vm1191_vm4, %v1979_v17  ;;  %13820 = vst [vmem:[#allocation22_spill] sm:$0xff] %v11308_v25  ;;  %v1980_v62 = vpack.c.bf16 %v10456_v0, %v10455_v28  ;;  %v4689_v28 = vld [vmem:[#allocation2 + $0x139] sm:$0xff]  ;;  %v10462_v25 = vld [vmem:[#allocation2 + $0xca] sm:$0xff] }
 0x229   : > { %1262 = vst.msk [vmem:[#allocation2 + $0x230] sm:$0xff] %vm1191_vm4, %v1176_v23  ;;  %v1048_v6 = vadd.f32 %v11166_v55, %v1047_v12  ;;  %v10457_v12 = vld [vmem:[#allocation2 + $0xa2] sm:$0xff] }
 0x22a   : > { %v9480_v16 = vpop.f32.mrf.mxu0  ;;  %v1981_v56 = vpack.c.bf16 %v10458_v39, %v10457_v12  ;;  %v10460_v39 = vld [vmem:[#allocation2 + $0xba] sm:$0xff] }
 0x22b   : > { %v1177_v36 = vmax.f32 %v1048_v6, 0.0  ;;  %v3825_v6 = vpack.c.bf16 %v3805_v63, %v3805_v63  ;;  %v4690_v16 = vld [vmem:[#allocation2 + $0x141] sm:$0xff]  ;;  %v10459_v63 = vld [vmem:[#allocation2 + $0xb2] sm:$0xff] }
 0x22c   : > { %v1052_v18 = vpop.f32.mrf.mxu0  ;;  %9854 = vmatmul.mubr.msk.bf16.gmra.mxu0 %vm1191_vm4, %v3823_v61  ;;  %v4728_v12 = vpack.c.bf16 %v4690_v16, %v4689_v28  ;;  %v4694_v16 = vld [vmem:[#allocation2 + $0x161] sm:$0xff] }
 0x22d   : > { %1263 = vst.msk [vmem:[#allocation2 + $0x238] sm:$0xff] %vm1191_vm4, %v1177_v36  ;;  %v1053_v47 = vadd.f32 %v11166_v55, %v1052_v18  ;;  %9857 = vmatprep.mubr.msk.bf16.mxu0 %vm1191_vm4, %v3824_v7  ;;  %v11315_v36 = vpop.f32.mrf.mxu1 }
 0x22e   : > { %v9483_v17 = vpop.f32.mrf.mxu0  ;;  %13821 = vst [vmem:[#allocation23_spill] sm:$0xff] %v11315_v36  ;;  %v10461_v36 = vld [vmem:[#allocation2 + $0xc2] sm:$0xff] }
 0x22f   : > { %v1178_v23 = vmax.f32 %v1053_v47, 0.0  ;;  %9618 = vmatmul.mubr.msk.bf16.gmra.mxu1 %vm1191_vm4, %v1980_v62  ;;  %v11319_v0 = vpop.f32.mrf.mxu1 }
 0x230   : > { %v1055_v61 = vpop.f32.mrf.mxu0  ;;  %9621 = vmatprep.mubr.msk.bf16.mxu1 %vm1191_vm4, %v1981_v56  ;;  %13822 = vst [vmem:[#allocation24_spill] sm:$0xff] %v11319_v0  ;;  %v1982_v56 = vpack.c.bf16 %v10460_v39, %v10459_v63  ;;  %v1983_v0 = vpack.c.bf16 %v10462_v25, %v10461_v36 }
 0x231   : > { %1264 = vst.msk [vmem:[#allocation2 + $0x240] sm:$0xff] %vm1191_vm4, %v1178_v23  ;;  %v1056_v18 = vadd.f32 %v11166_v55, %v1055_v61  ;;  %v4691_v23 = vld [vmem:[#allocation2 + $0x149] sm:$0xff]  ;;  %v4692_v61 = vld [vmem:[#allocation2 + $0x151] sm:$0xff]  ;;  %v11325_v28 = vpop.f32.mrf.mxu1 }
 0x232   : > { %v9484_v7 = vpop.f32.mrf.mxu0 }
 0x233   : > { %v1179_v17 = vmax.f32 %v1056_v18, 0.0  ;;  %v4693_v18 = vld [vmem:[#allocation2 + $0x159] sm:$0xff]  ;;  %v11331_v54 = vpop.f32.mrf.mxu1 }
 0x234   : > { %v1060_v47 = vpop.f32.mrf.mxu0  ;;  %9858 = vmatmul.mubr.msk.bf16.gmra.mxu0 %vm1191_vm4, %v3825_v6  ;;  %v4730_v63 = vpack.c.bf16 %v4694_v16, %v4693_v18  ;;  %13823 = vst [vmem:[#allocation25_spill] sm:$0xff] %v11331_v54  ;;  %v10465_v16 = vld [vmem:[#allocation2 + $0xe2] sm:$0xff] }
 0x235   : > { %1265 = vst.msk [vmem:[#allocation2 + $0x248] sm:$0xff] %vm1191_vm4, %v1179_v17  ;;  %v1061_v62 = vadd.f32 %v11166_v55, %v1060_v47  ;;  %9909 = vmatprep.mubr.msk.bf16.mxu0 %vm1191_vm4, %v4728_v12  ;;  %v4729_v12 = vpack.c.bf16 %v4692_v61, %v4691_v23  ;;  %v4695_v61 = vld [vmem:[#allocation2 + $0x169] sm:$0xff]  ;;  %v4698_v54 = vld [vmem:[#allocation2 + $0x181] sm:$0xff] }
 0x236   : > { %v9487_v7 = vpop.f32.mrf.mxu0 }
 0x237   : > { %v1180_v6 = vmax.f32 %v1061_v62, 0.0  ;;  %9622 = vmatmul.mubr.msk.bf16.gmra.mxu1 %vm1191_vm4, %v1982_v56  ;;  %v10420_v7 = vld [vmem:[#allocation9 + $0x20] sm:$0xff]   ;;  %v10463_v56 = vld [vmem:[#allocation2 + $0xd2] sm:$0xff] }
 0x238   : > { %v1063_v17 = vpop.f32.mrf.mxu0  ;;  %9625 = vmatprep.mubr.msk.bf16.mxu1 %vm1191_vm4, %v1983_v0  ;;  %v10464_v0 = vld [vmem:[#allocation2 + $0xda] sm:$0xff] }
 0x239   : > { %1266 = vst.msk [vmem:[#allocation2 + $0x250] sm:$0xff] %vm1191_vm4, %v1180_v6  ;;  %v1064_v47 = vadd.f32 %v11166_v55, %v1063_v17  ;;  %v1984_v23 = vpack.c.bf16 %v10464_v0, %v10463_v56  ;;  %v4696_v6 = vld [vmem:[#allocation2 + $0x171] sm:$0xff] }
 0x23a   : > { %v9488_v39 = vpop.f32.mrf.mxu0  ;;  %v10466_v17 = vld [vmem:[#allocation2 + $0xea] sm:$0xff] }
 0x23b   : > { %v1181_v25 = vmax.f32 %v1064_v47, 0.0  ;;  %v1985_v47 = vpack.c.bf16 %v10466_v17, %v10465_v16  ;;  %v4697_v39 = vld [vmem:[#allocation2 + $0x179] sm:$0xff] }
 0x23c   : > { %v1068_v36 = vpop.f32.mrf.mxu0  ;;  %9910 = vmatmul.mubr.msk.bf16.vlgmr.msra.gmra.mxu0 %vm1191_vm4, %v4729_v12  ;;  %v11338_v12 = vpop.f32.mrf.mxu1  ;;  %v4732_v0 = vpack.c.bf16 %v4698_v54, %v4697_v39  ;;  %v10470_v39 = vld [vmem:[#allocation2 + $0x10a] sm:$0xff] }
 0x23d   : > { %1267 = vst.msk [vmem:[#allocation2 + $0x258] sm:$0xff] %vm1191_vm4, %v1181_v25  ;;  %v1069_v62 = vadd.f32 %v11166_v55, %v1068_v36  ;;  %9913 = vmatprep.mubr.msk.bf16.mxu0 %vm1191_vm4, %v4730_v63  ;;  %9994 = vmatpush3.bf16.msra.mxu0 %v11238_v27  ;;  %13824 = vst [vmem:[#allocation26_spill] sm:$0xff] %v11338_v12  ;;  %v4731_v63 = vpack.c.bf16 %v4696_v6, %v4695_v61  ;;  %v10467_v61 = vld [vmem:[#allocation2 + $0xf2] sm:$0xff]  ;;  %v10468_v6 = vld [vmem:[#allocation2 + $0xfa] sm:$0xff] }
 0x23e   : > { %v9491_v18 = vpop.f32.mrf.mxu0  ;;  %9995 = vmatprep.subr.bf16.mxu0 %v10420_v7  ;;  %v11342_v56 = vpop.f32.mrf.mxu1 }
 0x23f   : > { %v1182_v25 = vmax.f32 %v1069_v62, 0.0  ;;  %9626 = vmatmul.mubr.msk.bf16.gmra.mxu1 %vm1191_vm4, %v1984_v23  ;;  %13825 = vst [vmem:[#allocation27_spill] sm:$0xff] %v11342_v56  ;;  %v4702_v56 = vld [vmem:[#allocation2 + $0x1a1] sm:$0xff] }
 0x240   : > { %v1071_v36 = vpop.f32.mrf.mxu0  ;;  %9629 = vmatprep.mubr.msk.bf16.mxu1 %vm1191_vm4, %v1985_v47  ;;  %v11347_v62 = vpop.f32.mrf.mxu1  ;;  %v1986_v47 = vpack.c.bf16 %v10468_v6, %v10467_v61 }
 0x241   : > { %1268 = vst.msk [vmem:[#allocation2 + $0x260] sm:$0xff] %vm1191_vm4, %v1182_v25  ;;  %v1072_v27 = vadd.f32 %v11166_v55, %v1071_v36  ;;  %9996 = vmatpush3.bf16.msra.mxu0 %v10420_v7  ;;  %13826 = vst [vmem:[#allocation28_spill] sm:$0xff] %v11347_v62  ;;  %v4699_v25 = vld [vmem:[#allocation2 + $0x189] sm:$0xff]  ;;  %v4700_v36 = vld [vmem:[#allocation2 + $0x191] sm:$0xff] }
 0x242   : > { %v9492_v18 = vpop.f32.mrf.mxu0  ;;  %v10469_v7 = vld [vmem:[#allocation2 + $0x102] sm:$0xff] }
 0x243   : > { %v1183_v16 = vmax.f32 %v1072_v27, 0.0  ;;  %v1987_v27 = vpack.c.bf16 %v10470_v39, %v10469_v7  ;;  %v4701_v18 = vld [vmem:[#allocation2 + $0x199] sm:$0xff]  ;;  %v4703_v39 = vld [vmem:[#allocation2 + $0x1a9] sm:$0xff] }
 0x244   : > { %v1076_v17 = vpop.f32.mrf.mxu0  ;;  %9914 = vmatmul.mubr.msk.bf16.gmra.mxu0 %vm1191_vm4, %v4731_v63  ;;  %v4734_v61 = vpack.c.bf16 %v4702_v56, %v4701_v18  ;;  %v10473_v56 = vld [vmem:[#allocation2 + $0x122] sm:$0xff] }
 0x245   : > { %1269 = vst.msk [vmem:[#allocation2 + $0x268] sm:$0xff] %vm1191_vm4, %v1183_v16  ;;  %v1077_v23 = vadd.f32 %v11166_v55, %v1076_v17  ;;  %9917 = vmatprep.mubr.msk.bf16.mxu0 %vm1191_vm4, %v4732_v0  ;;  %v4733_v16 = vpack.c.bf16 %v4700_v36, %v4699_v25  ;;  %v11354_v17 = vpop.f32.mrf.mxu1  ;;  %v10472_v25 = vld [vmem:[#allocation2 + $0x11a] sm:$0xff]  ;;  %v1989_v18 = vpack.c.bf16 %v11143_v8, %v10473_v56 }
 0x246   : > { %v9495_v54 = vpop.f32.mrf.mxu0 }
 0x247   : > { %v1184_v63 = vmax.f32 %v1077_v23, 0.0  ;;  %9630 = vmatmul.mubr.msk.bf16.gmra.mxu1 %vm1191_vm4, %v1986_v47  ;;  %v11359_v7 = vpop.f32.mrf.mxu1  ;;  %v10471_v47 = vld [vmem:[#allocation2 + $0x112] sm:$0xff] }
 0x248   : > { %v1079_v62 = vpop.f32.mrf.mxu0  ;;  %9633 = vmatprep.mubr.msk.bf16.mxu1 %vm1191_vm4, %v1987_v27  ;;  %13827 = vst [vmem:[#allocation29_spill] sm:$0xff] %v11359_v7  ;;  %v1988_v36 = vpack.c.bf16 %v10472_v25, %v10471_v47  ;;  %v4704_v27 = vld [vmem:[#allocation2 + $0x1b1] sm:$0xff] }
 0x249   : > { %1270 = vst.msk [vmem:[#allocation2 + $0x270] sm:$0xff] %vm1191_vm4, %v1184_v63  ;;  %v1080_v0 = vadd.f32 %v11166_v55, %v1079_v62  ;;  %v4705_v63 = vld [vmem:[#allocation2 + $0x1b9] sm:$0xff] }
 0x24a   : > { %v9496_v6 = vpop.f32.mrf.mxu0 }
 0x24b   : > { %v1185_v54 = vmax.f32 %v1080_v0, 0.0  ;;  %v4706_v0 = vld [vmem:[#allocation2 + $0x1c1] sm:$0xff] }
 0x24c   : > { %v1084_v12 = vpop.f32.mrf.mxu0  ;;  %9918 = vmatmul.mubr.msk.bf16.gmra.mxu0 %vm1191_vm4, %v4733_v16  ;;  %v11365_v16 = vpop.f32.mrf.mxu1  ;;  %v4736_v47 = vpack.c.bf16 %v4706_v0, %v4705_v63  ;;  %v4709_v0 = vld [vmem:[#allocation2 + $0x1d9] sm:$0xff] }
 0x24d   : > { %1271 = vst.msk [vmem:[#allocation2 + $0x278] sm:$0xff] %vm1191_vm4, %v1185_v54  ;;  %v1085_v23 = vadd.f32 %v11166_v55, %v1084_v12  ;;  %9921 = vmatprep.mubr.msk.bf16.mxu0 %vm1191_vm4, %v4734_v61  ;;  %13828 = vst [vmem:[#allocation30_spill] sm:$0xff] %v11365_v16  ;;  %v4735_v12 = vpack.c.bf16 %v4704_v27, %v4703_v39  ;;  %v11374_v16 = vld [vmem:[#allocation9 + $0x48] sm:$0xff]  }
 0x24e   : > { %v9499_v62 = vpop.f32.mrf.mxu0  ;;  %v4707_v27 = vld [vmem:[#allocation2 + $0x1c9] sm:$0xff]  ;;  %10081 = vmatprep.subr.bf16.mxu0 %v11374_v16 }
 0x24f   : > { %v1186_v6 = vmax.f32 %v1085_v23, 0.0  ;;  %9634 = vmatmul.mubr.msk.bf16.gmra.mxu1 %vm1191_vm4, %v1988_v36  ;;  %v11371_v62 = vpop.f32.mrf.mxu1  ;;  %v10474_v36 = vld [vmem:[#allocation2 + $0x132] sm:$0xff] }
 0x250   : > { %v1087_v54 = vpop.f32.mrf.mxu0  ;;  %9637 = vmatprep.mubr.msk.bf16.mxu1 %vm1191_vm4, %v1989_v18  ;;  %13829 = vst [vmem:[#allocation31_spill] sm:$0xff] %v11371_v62  ;;  %v1990_v39 = vpack.c.bf16 %v10474_v36, %v10474_v36  ;;  %v4708_v18 = vld [vmem:[#allocation2 + $0x1d1] sm:$0xff] }
 0x251   : > { %1272 = vst.msk [vmem:[#allocation2 + $0x280] sm:$0xff] %vm1191_vm4, %v1186_v6  ;;  %v1088_v61 = vadd.f32 %v11166_v55, %v1087_v54  ;;  %v4710_v6 = vld [vmem:[#allocation2 + $0x1e1] sm:$0xff]  ;;  %v11380_v54 = vpop.f32.mrf.mxu1 }
 0x252   : > { %v9500_v25 = vpop.f32.mrf.mxu0  ;;  %13830 = vst [vmem:[#allocation32_spill] sm:$0xff] %v11380_v54 }
 0x253   : > { %v1187_v56 = vmax.f32 %v1088_v61, 0.0  ;;  %v4737_v25 = vpack.c.bf16 %v4708_v18, %v4707_v27  ;;  %v4714_v18 = vld [vmem:[#allocation2 + $0x201] sm:$0xff] }
 0x254   : > { %v1092_v7 = vpop.f32.mrf.mxu0  ;;  %9922 = vmatmul.mubr.msk.bf16.gmra.mxu0 %vm1191_vm4, %v4735_v12 }
 0x255   : > { %1273 = vst.msk [vmem:[#allocation2 + $0x288] sm:$0xff] %vm1191_vm4, %v1187_v56  ;;  %v1093_v23 = vadd.f32 %v11166_v55, %v1092_v7  ;;  %9925 = vmatprep.mubr.msk.bf16.mxu0 %vm1191_vm4, %v4736_v47  ;;  %v13831_v7 = vpack.c.bf16 %v10887_v21, %v10885_v20  ;;  %v4738_v56 = vpack.c.bf16 %v4710_v6, %v4709_v0  ;;  %v4711_v20 = vld [vmem:[#allocation2 + $0x1e9] sm:$0xff]  ;;  %v4712_v21 = vld [vmem:[#allocation2 + $0x1f1] sm:$0xff] }
 0x256   : > { %v9503_v63 = vpop.f32.mrf.mxu0  ;;  %v13834_v0 = vpack.c.bf16 %v10902_v37, %v10900_v35 }
 0x257   : > { %v1188_v12 = vmax.f32 %v1093_v23, 0.0  ;;  %9638 = vmatmul.mubr.msk.bf16.gmra.mxu1 %vm1191_vm4, %v1990_v39  ;;  %v11389_v63 = vpop.f32.mrf.mxu1  ;;  %v10419_v39 = vld [vmem:[#allocation9 + $0x40] sm:$0xff]  }
 0x258   : > { %v1095_v61 = vpop.f32.mrf.mxu0  ;;  %9645 = vmatprep.mubr.msk.bf16.mxu1 %vm1191_vm4, %v13831_v7 }
 0x259   : > { %1274 = vst.msk [vmem:[#allocation2 + $0x290] sm:$0xff] %vm1191_vm4, %v1188_v12  ;;  %v1096_v47 = vadd.f32 %v11166_v55, %v1095_v61  ;;  %v4713_v55 = vld [vmem:[#allocation2 + $0x1f9] sm:$0xff]  ;;  %v4739_v12 = vpack.c.bf16 %v4712_v21, %v4711_v20  ;;  %v13840_v20 = vpack.c.bf16 %v10935_v5, %v10933_v4  ;;  %v13841_v21 = vpack.c.bf16 %v10950_v22, %v10948_v19  ;;  %v4719_v5 = vld [vmem:[#allocation2 + $0x229] sm:$0xff]  ;;  %v4720_v19 = vld [vmem:[#allocation2 + $0x231] sm:$0xff] }
 0x25a   : > { %v9504_v36 = vpop.f32.mrf.mxu0  ;;  %v4740_v7 = vpack.c.bf16 %v4714_v18, %v4713_v55 }
 0x25b   : > { %v1189_v62 = vmax.f32 %v1096_v47, 0.0  ;;  %v11395_v23 = vpop.f32.mrf.mxu1  ;;  %v4718_v36 = vld [vmem:[#allocation2 + $0x221] sm:$0xff] }
 0x25c   : > { %v11391_v54 = vpop.f32.mrf.mxu0  ;;  %9926 = vmatmul.mubr.msk.bf16.gmra.mxu0 %vm1191_vm4, %v4737_v25  ;;  %v11413_v25 = vld [vmem:[#allocation9 + $0x68] sm:$0xff]  }
 0x25d   : > { %13832 = vst [vmem:[#allocation33_spill] sm:$0xff] %v11391_v54  ;;  %1275 = vst.msk [vmem:[#allocation2 + $0x298] sm:$0xff] %vm1191_vm4, %v1189_v62  ;;  %9929 = vmatprep.mubr.msk.bf16.mxu0 %vm1191_vm4, %v4738_v56  ;;  %v13835_v62 = vpack.c.bf16 %v10917_v52, %v10915_v51  ;;  %v11411_v61 = vpop.f32.mrf.mxu1  ;;  %v4715_v51 = vld [vmem:[#allocation2 + $0x209] sm:$0xff]  ;;  %v4716_v52 = vld [vmem:[#allocation2 + $0x211] sm:$0xff] }
 0x25e   : > { %v11398_v27 = vpop.f32.mrf.mxu0  ;;  %v4717_v56 = vld [vmem:[#allocation2 + $0x219] sm:$0xff]  ;;  %v4741_v55 = vpack.c.bf16 %v4716_v52, %v4715_v51  ;;  %v4722_v52 = vld [vmem:[#allocation2 + $0x241] sm:$0xff] }
 0x25f   : > { %13833 = vst [vmem:[#allocation34_spill] sm:$0xff] %v11398_v27  ;;  %9646 = vmatmul.mubr.msk.bf16.vlgmr.msra.gmra.mxu1 %vm1191_vm4, %v13834_v0  ;;  %v11420_v37 = vpop.f32.mrf.mxu1  ;;  %v4742_v0 = vpack.c.bf16 %v4718_v36, %v4717_v56  ;;  %v4721_v51 = vld [vmem:[#allocation2 + $0x239] sm:$0xff]  ;;  %v13848_v56 = vpack.c.bf16 %v10965_v42, %v10963_v41  ;;  %v13849_v36 = vpack.c.bf16 %v10980_v60, %v10978_v59  ;;  %v4723_v42 = vld [vmem:[#allocation2 + $0x249] sm:$0xff]  ;;  %v4724_v59 = vld [vmem:[#allocation2 + $0x251] sm:$0xff] }
 0x260   : > { %9686 = vmatpush3.bf16.msra.mxu1 %v11266_v15  ;;  %9649 = vmatprep.mubr.msk.bf16.mxu1 %vm1191_vm4, %v13835_v62  ;;  %v11409_v6 = vpop.f32.mrf.mxu0  ;;  %v2675_v54 = vld [vmem:[#allocation2 + $0x63] sm:$0xff] }
 0x261   : > { %13836 = vst [vmem:[#allocation35_spill] sm:$0xff] %v11409_v6  ;;  %9687 = vmatprep.subr.bf16.mxu1 %v10419_v39  ;;  %v11436_v18 = vpop.f32.mrf.mxu1  ;;  %v5305_v6 = vld [vmem:[#allocation2 + $0x202] sm:$0xff] }
 0x262   : > { %v11415_v47 = vpop.f32.mrf.mxu0 }
 0x263   : > { %13837 = vst [vmem:[#allocation36_spill] sm:$0xff] %v11415_v47  ;;  %v2670_v47 = vld [vmem:[#allocation2 + $0x3b] sm:$0xff] }
 0x264   : > { %v11417_v35 = vpop.f32.mrf.mxu0  ;;  %9930 = vmatmul.mubr.msk.bf16.gmra.mxu0 %vm1191_vm4, %v4739_v12  ;;  %9688 = vmatpush3.bf16.msra.mxu1 %v10419_v39 }
 0x265   : > { %13838 = vst [vmem:[#allocation37_spill] sm:$0xff] %v11417_v35  ;;  %9933 = vmatprep.mubr.msk.bf16.mxu0 %vm1191_vm4, %v4740_v7  ;;  %9773 = vmatprep.subr.bf16.mxu1 %v11413_v25  ;;  %v2668_v35 = vld [vmem:[#allocation2 + $0x2b] sm:$0xff] }
 0x266   : > { %v11424_v15 = vpop.f32.mrf.mxu0 }
 0x267   : > { %13839 = vst [vmem:[#allocation38_spill] sm:$0xff] %v11424_v15  ;;  %9650 = vmatmul.mubr.msk.bf16.gmra.mxu1 %vm1191_vm4, %v13840_v20  ;;  %v2669_v15 = vld [vmem:[#allocation2 + $0x33] sm:$0xff] }
 0x268   : > { %9653 = vmatprep.mubr.msk.bf16.mxu1 %vm1191_vm4, %v13841_v21  ;;  %v11434_v39 = vpop.f32.mrf.mxu0  ;;  %v4743_v21 = vpack.c.bf16 %v4720_v19, %v4719_v5  ;;  %v13857_v19 = vpack.c.bf16 %v10999_v26, %v10997_v24  ;;  %v4727_v26 = vld [vmem:[#allocation2 + $0x269] sm:$0xff] }
 0x269   : > { %13842 = vst [vmem:[#allocation39_spill] sm:$0xff] %v11434_v39 }
 0x26a   : > { %v11438_v62 = vpop.f32.mrf.mxu0 }
 0x26b   : > { %13843 = vst [vmem:[#allocation40_spill] sm:$0xff] %v11438_v62  ;;  %v11440_v12 = vpop.f32.mrf.mxu1 }
 0x26c   : > { %13844 = vst [vmem:[#allocation41_spill] sm:$0xff] %v11440_v12  ;;  %v11442_v7 = vpop.f32.mrf.mxu0  ;;  %9934 = vmatmul.mubr.msk.bf16.gmra.mxu0 %vm1191_vm4, %v4741_v55  ;;  %v2681_v12 = vld [vmem:[#allocation2 + $0x93] sm:$0xff] }
 0x26d   : > { %13845 = vst [vmem:[#allocation42_spill] sm:$0xff] %v11442_v7  ;;  %v11445_v4 = vpop.f32.mrf.mxu1  ;;  %9937 = vmatprep.mubr.msk.bf16.mxu0 %vm1191_vm4, %v4742_v0  ;;  %v4744_v0 = vpack.c.bf16 %v4722_v52, %v4721_v51  ;;  %v13858_v51 = vpack.c.bf16 %v11015_v53, %v11013_v50 }
 0x26e   : > { %13846 = vst [vmem:[#allocation43_spill] sm:$0xff] %v11445_v4  ;;  %v11448_v22 = vpop.f32.mrf.mxu0 }
 0x26f   : > { %13847 = vst [vmem:[#allocation44_spill] sm:$0xff] %v11448_v22  ;;  %9654 = vmatmul.mubr.msk.bf16.gmra.mxu1 %vm1191_vm4, %v13848_v56  ;;  %v11460_v55 = vpop.f32.mrf.mxu1  ;;  %v4725_v56 = vld [vmem:[#allocation2 + $0x259] sm:$0xff] }
 0x270   : > { %9657 = vmatprep.mubr.msk.bf16.mxu1 %vm1191_vm4, %v13849_v36  ;;  %v11458_v20 = vpop.f32.mrf.mxu0  ;;  %13851 = vst [vmem:[#allocation46_spill] sm:$0xff] %v11460_v55  ;;  %v4726_v36 = vld [vmem:[#allocation2 + $0x261] sm:$0xff] }
 0x271   : > { %13850 = vst [vmem:[#allocation45_spill] sm:$0xff] %v11458_v20  ;;  %v11467_v41 = vpop.f32.mrf.mxu1  ;;  %v2678_v55 = vld [vmem:[#allocation2 + $0x7b] sm:$0xff] }
 0x272   : > { %v11462_v7 = vpop.f32.mrf.mxu0  ;;  %13854 = vst [vmem:[#allocation49_spill] sm:$0xff] %v11467_v41 }
 0x273   : > { %13852 = vst [vmem:[#allocation47_spill] sm:$0xff] %v11462_v7 }
 0x274   : > { %v11464_v22 = vpop.f32.mrf.mxu0  ;;  %9938 = vmatmul.mubr.msk.bf16.gmra.mxu0 %vm1191_vm4, %v4743_v21  ;;  %v4745_v21 = vpack.c.bf16 %v4724_v59, %v4723_v42  ;;  %v13865_v42 = vpack.c.bf16 %v11030_v14, %v11028_v13 }
 0x275   : > { %13853 = vst [vmem:[#allocation48_spill] sm:$0xff] %v11464_v22  ;;  %9941 = vmatprep.mubr.msk.bf16.mxu0 %vm1191_vm4, %v4744_v0 }
 0x276   : > { %v11470_v60 = vpop.f32.mrf.mxu0 }
 0x277   : > { %13855 = vst [vmem:[#allocation50_spill] sm:$0xff] %v11470_v60  ;;  %v11472_v5 = vpop.f32.mrf.mxu1  ;;  %9658 = vmatmul.mubr.msk.bf16.gmra.mxu1 %vm1191_vm4, %v13857_v19  ;;  %v4746_v60 = vpack.c.bf16 %v4726_v36, %v4725_v56  ;;  %v4747_v56 = vpack.c.bf16 %v4727_v26, %v4727_v26  ;;  %v5281_v36 = vld [vmem:[#allocation2 + $0x142] sm:$0xff] }
 0x278   : > { %13856 = vst [vmem:[#allocation51_spill] sm:$0xff] %v11472_v5  ;;  %9661 = vmatprep.mubr.msk.bf16.mxu1 %vm1191_vm4, %v13858_v51  ;;  %v11482_v52 = vpop.f32.mrf.mxu0  ;;  %v5280_v51 = vld [vmem:[#allocation2 + $0x13a] sm:$0xff] }
 0x279   : > { %13859 = vst [vmem:[#allocation52_spill] sm:$0xff] %v11482_v52  ;;  %v11484_v0 = vpop.f32.mrf.mxu1  ;;  %v2677_v5 = vld [vmem:[#allocation2 + $0x73] sm:$0xff] }
 0x27a   : > { %13860 = vst [vmem:[#allocation53_spill] sm:$0xff] %v11484_v0  ;;  %v11486_v22 = vpop.f32.mrf.mxu0  ;;  %v5309_v0 = vld [vmem:[#allocation2 + $0x222] sm:$0xff] }
 0x27b   : > { %13861 = vst [vmem:[#allocation54_spill] sm:$0xff] %v11486_v22  ;;  %v9552_v7 = vpop.f32.mrf.mxu1  ;;  %v10424_v22 = vld [vmem:[#allocation9 + $0x40] sm:$0xff]  }
 0x27c   : > { %v11488_v20 = vpop.f32.mrf.mxu0  ;;  %9942 = vmatmul.mubr.msk.bf16.gmra.mxu0 %vm1191_vm4, %v4745_v21  ;;  %v13866_v7 = vpack.c.bf16 %v11045_v45, %v11043_v43  ;;  %v11523_v43 = vld [vmem:[#allocation2 + $0x14a] sm:$0xff]  ;;  %v5283_v45 = vld [vmem:[#allocation2 + $0x152] sm:$0xff] }
 0x27d   : > { %13862 = vst [vmem:[#allocation55_spill] sm:$0xff] %v11488_v20  ;;  %v11491_v24 = vpop.f32.mrf.mxu1  ;;  %9945 = vmatprep.mubr.msk.bf16.mxu0 %vm1191_vm4, %v4746_v60 }
 0x27e   : > { %13863 = vst [vmem:[#allocation56_spill] sm:$0xff] %v11491_v24  ;;  %v11494_v50 = vpop.f32.mrf.mxu0  ;;  %v5308_v24 = vld [vmem:[#allocation2 + $0x21a] sm:$0xff] }
 0x27f   : > { %13864 = vst [vmem:[#allocation57_spill] sm:$0xff] %v11494_v50  ;;  %v11496_v53 = vpop.f32.mrf.mxu1  ;;  %9662 = vmatmul.mubr.msk.bf16.gmra.mxu1 %vm1191_vm4, %v13865_v42  ;;  %v11514_v50 = vpack.c.bf16 %v5281_v36, %v5280_v51  ;;  %v5284_v42 = vld [vmem:[#allocation2 + $0x15a] sm:$0xff]  ;;  %v13871_v36 = vpack.c.bf16 %v11060_v10, %v11058_v9 }
 0x280   : > { %9665 = vmatprep.mubr.msk.bf16.mxu1 %vm1191_vm4, %v13866_v7  ;;  %v11506_v59 = vpop.f32.mrf.mxu0  ;;  %v5285_v7 = vld [vmem:[#allocation2 + $0x162] sm:$0xff] }
 0x281   : > { %13867 = vst [vmem:[#allocation58_spill] sm:$0xff] %v11506_v59  ;;  %v11508_v60 = vpop.f32.mrf.mxu1 }
 0x282   : > { %v11510_v19 = vpop.f32.mrf.mxu0 }
 0x283   : > { %13868 = vst [vmem:[#allocation59_spill] sm:$0xff] %v11510_v19  ;;  %v11512_v21 = vpop.f32.mrf.mxu1 }
 0x284   : > { %v11516_v13 = vpop.f32.mrf.mxu0  ;;  %9946 = vmatmul.mubr.msk.bf16.gmra.mxu0 %vm1191_vm4, %v4747_v56  ;;  %v13872_v56 = vpack.c.bf16 %v11075_v48, %v11073_v46  ;;  %v5286_v46 = vld [vmem:[#allocation2 + $0x16a] sm:$0xff]  ;;  %v5287_v48 = vld [vmem:[#allocation2 + $0x172] sm:$0xff] }
 0x285   : > { %13869 = vst [vmem:[#allocation60_spill] sm:$0xff] %v11516_v13  ;;  %v11519_v14 = vpop.f32.mrf.mxu1  ;;  %9997 = vmatprep.mubr.msk.bf16.mxu0 %vm1191_vm4, %v11514_v50  ;;  %v5320_v13 = vpack.c.bf16 %v5283_v45, %v11523_v43 }
 0x286   : > { %v11525_v26 = vpop.f32.mrf.mxu0 }
 0x287   : > { %13870 = vst [vmem:[#allocation61_spill] sm:$0xff] %v11525_v26  ;;  %v11527_v19 = vpop.f32.mrf.mxu1  ;;  %9666 = vmatmul.mubr.msk.bf16.gmra.mxu1 %vm1191_vm4, %v13871_v36  ;;  %v5321_v26 = vpack.c.bf16 %v5285_v7, %v5284_v42  ;;  %v5288_v42 = vld [vmem:[#allocation2 + $0x17a] sm:$0xff]  ;;  %v5289_v7 = vld [vmem:[#allocation2 + $0x182] sm:$0xff] }
 0x288   : > { %9669 = vmatprep.mubr.msk.bf16.mxu1 %vm1191_vm4, %v13872_v56  ;;  %v11537_v51 = vpop.f32.mrf.mxu0  ;;  %v13877_v56 = vpack.c.bf16 %v11089_v31, %v11087_v30  ;;  %v5290_v31 = vld [vmem:[#allocation2 + $0x18a] sm:$0xff] }
 0x289   : > { %13873 = vst [vmem:[#allocation62_spill] sm:$0xff] %v11537_v51  ;;  %v11540_v59 = vpop.f32.mrf.mxu1 }
 0x28a   : > { %v11542_v20 = vpop.f32.mrf.mxu0 }
 0x28b   : > { %13874 = vst [vmem:[#allocation63_spill] sm:$0xff] %v11542_v20  ;;  %v11544_v52 = vpop.f32.mrf.mxu1 }
 0x28c   : > { %v11546_v9 = vpop.f32.mrf.mxu0  ;;  %9998 = vmatmul.mubr.msk.bf16.vlgmr.msra.gmra.mxu0 %vm1191_vm4, %v5320_v13  ;;  %v13878_v13 = vpack.c.bf16 %v11103_v32, %v11101_v29  ;;  %v5291_v29 = vld [vmem:[#allocation2 + $0x192] sm:$0xff] }
 0x28d   : > { %13875 = vst [vmem:[#allocation64_spill] sm:$0xff] %v11546_v9  ;;  %v11549_v10 = vpop.f32.mrf.mxu1  ;;  %10001 = vmatprep.mubr.msk.bf16.mxu0 %vm1191_vm4, %v5321_v26  ;;  %10082 = vmatpush3.bf16.msra.mxu0 %v11374_v16  ;;  %v5322_v16 = vpack.c.bf16 %v5287_v48, %v5286_v46  ;;  %v5292_v46 = vld [vmem:[#allocation2 + $0x19a] sm:$0xff]  ;;  %v5293_v48 = vld [vmem:[#allocation2 + $0x1a2] sm:$0xff] }
 0x28e   : > { %v11553_v45 = vpop.f32.mrf.mxu0  ;;  %10083 = vmatprep.subr.bf16.mxu0 %v10424_v22 }
 0x28f   : > { %13876 = vst [vmem:[#allocation65_spill] sm:$0xff] %v11553_v45  ;;  %v11555_v36 = vpop.f32.mrf.mxu1  ;;  %9670 = vmatmul.mubr.msk.bf16.gmra.mxu1 %vm1191_vm4, %v13877_v56  ;;  %v5323_v45 = vpack.c.bf16 %v5289_v7, %v5288_v42  ;;  %v13884_v7 = vpack.c.bf16 %v11129_v1, %v11127_v58  ;;  %v5295_v58 = vld [vmem:[#allocation2 + $0x1b2] sm:$0xff] }
 0x290   : > { %9673 = vmatprep.mubr.msk.bf16.mxu1 %vm1191_vm4, %v13878_v13  ;;  %v11565_v26 = vpop.f32.mrf.mxu0 }
 0x291   : > { %13879 = vst [vmem:[#allocation66_spill] sm:$0xff] %v11565_v26  ;;  %v11567_v9 = vpop.f32.mrf.mxu1  ;;  %10084 = vmatpush3.bf16.msra.mxu0 %v10424_v22  ;;  %v13883_v22 = vpack.c.bf16 %v11116_v57, %v11114_v40  ;;  %v5294_v57 = vld [vmem:[#allocation2 + $0x1aa] sm:$0xff] }
 0x292   : > { %v11569_v20 = vpop.f32.mrf.mxu0 }
 0x293   : > { %13880 = vst [vmem:[#allocation67_spill] sm:$0xff] %v11569_v20  ;;  %v11571_v51 = vpop.f32.mrf.mxu1 }
 0x294   : > { %v11573_v62 = vpop.f32.mrf.mxu0  ;;  %10002 = vmatmul.mubr.msk.bf16.gmra.mxu0 %vm1191_vm4, %v5322_v16  ;;  %v5325_v16 = vpack.c.bf16 %v5293_v48, %v5292_v46  ;;  %v13889_v46 = vpack.c.bf16 %v11145_v33, %v11143_v8  ;;  %v11626_v8 = vld [vmem:[#allocation9 + $0x68] sm:$0xff]  }
 0x295   : > { %13881 = vst [vmem:[#allocation68_spill] sm:$0xff] %v11573_v62  ;;  %v11576_v30 = vpop.f32.mrf.mxu1  ;;  %10005 = vmatprep.mubr.msk.bf16.mxu0 %vm1191_vm4, %v5323_v45  ;;  %v5324_v45 = vpack.c.bf16 %v5291_v29, %v5290_v31  ;;  %v5296_v31 = vld [vmem:[#allocation2 + $0x1ba] sm:$0xff]  ;;  %v5297_v29 = vld [vmem:[#allocation2 + $0x1c2] sm:$0xff]  ;;  %10169 = vmatprep.subr.bf16.mxu0 %v11626_v8 }
 0x296   : > { %v11579_v32 = vpop.f32.mrf.mxu0 }
 0x297   : > { %13882 = vst [vmem:[#allocation69_spill] sm:$0xff] %v11579_v32  ;;  %v11581_v42 = vpop.f32.mrf.mxu1  ;;  %9674 = vmatmul.mubr.msk.bf16.gmra.mxu1 %vm1191_vm4, %v13883_v22 }
 0x298   : > { %9677 = vmatprep.mubr.msk.bf16.mxu1 %vm1191_vm4, %v13884_v7  ;;  %v11591_v56 = vpop.f32.mrf.mxu0  ;;  %v5326_v7 = vpack.c.bf16 %v5295_v58, %v5294_v57  ;;  %v2666_v57 = vld [vmem:[#allocation2 + $0x1b] sm:$0xff]  ;;  %v5298_v58 = vld [vmem:[#allocation2 + $0x1ca] sm:$0xff] }
 0x299   : > { %13885 = vst [vmem:[#allocation70_spill] sm:$0xff] %v11591_v56  ;;  %v11593_v13 = vpop.f32.mrf.mxu1 }
 0x29a   : > { %v11595_v32 = vpop.f32.mrf.mxu0 }
 0x29b   : > { %13886 = vst [vmem:[#allocation71_spill] sm:$0xff] %v11595_v32  ;;  %v11597_v62 = vpop.f32.mrf.mxu1  ;;  %v2667_v32 = vld [vmem:[#allocation2 + $0x23] sm:$0xff] }
 0x29c   : > { %v11599_v20 = vpop.f32.mrf.mxu0  ;;  %10006 = vmatmul.mubr.msk.bf16.gmra.mxu0 %vm1191_vm4, %v5324_v45 }
 0x29d   : > { %13887 = vst [vmem:[#allocation72_spill] sm:$0xff] %v11599_v20  ;;  %v11602_v40 = vpop.f32.mrf.mxu1  ;;  %10009 = vmatprep.mubr.msk.bf16.mxu0 %vm1191_vm4, %v5325_v16  ;;  %v5327_v16 = vpack.c.bf16 %v5297_v29, %v5296_v31  ;;  %v5299_v31 = vld [vmem:[#allocation2 + $0x1d2] sm:$0xff] }
 0x29e   : > { %v11605_v1 = vpop.f32.mrf.mxu0 }
 0x29f   : > { %13888 = vst [vmem:[#allocation73_spill] sm:$0xff] %v11605_v1  ;;  %v11607_v22 = vpop.f32.mrf.mxu1  ;;  %9678 = vmatmul.mubr.msk.bf16.gmra.mxu1 %vm1191_vm4, %v13889_v46  ;;  %v2705_v46 = vpack.c.bf16 %v2667_v32, %v2666_v57  ;;  %v2671_v32 = vld [vmem:[#allocation2 + $0x43] sm:$0xff] }
 0x2a0   : > { %9681 = vmatprep.mubr.msk.bf16.mxu1 %vm1191_vm4, %v11514_v50  ;;  %v11615_v48 = vpop.f32.mrf.mxu0  ;;  %v2357_v50 = vpack.c.bf16 %v11523_v43, %v11523_v43  ;;  %v5328_v43 = vpack.c.bf16 %v5299_v31, %v5298_v58  ;;  %v5303_v58 = vld [vmem:[#allocation2 + $0x1f2] sm:$0xff]  ;;  %v2707_v31 = vpack.c.bf16 %v2671_v32, %v2670_v47 }
 0x2a1   : > { %13890 = vst [vmem:[#allocation74_spill] sm:$0xff] %v11615_v48  ;;  %v11617_v45 = vpop.f32.mrf.mxu1  ;;  %v5301_v48 = vld [vmem:[#allocation2 + $0x1e2] sm:$0xff]  ;;  %v2673_v32 = vld [vmem:[#allocation2 + $0x53] sm:$0xff] }
 0x2a2   : > { %v11619_v20 = vpop.f32.mrf.mxu0 }
 0x2a3   : > { %13891 = vst [vmem:[#allocation75_spill] sm:$0xff] %v11619_v20  ;;  %v11621_v1 = vpop.f32.mrf.mxu1  ;;  %v5300_v20 = vld [vmem:[#allocation2 + $0x1da] sm:$0xff] }
 0x2a4   : > { %v11623_v56 = vpop.f32.mrf.mxu0  ;;  %10010 = vmatmul.mubr.msk.bf16.gmra.mxu0 %vm1191_vm4, %v5326_v7 }
 0x2a5   : > { %13892 = vst [vmem:[#allocation76_spill] sm:$0xff] %v11623_v56  ;;  %v11628_v33 = vpop.f32.mrf.mxu1  ;;  %10013 = vmatprep.mubr.msk.bf16.mxu0 %vm1191_vm4, %v5327_v16  ;;  %v5329_v16 = vpack.c.bf16 %v5301_v48, %v5300_v20  ;;  %v10423_v20 = vld [vmem:[#allocation9 + $0x60] sm:$0xff]  }
 0x2a6   : > { %v11633_v29 = vpop.f32.mrf.mxu0 }
 0x2a7   : > { %13893 = vst [vmem:[#allocation77_spill] sm:$0xff] %v11633_v29  ;;  %v11636_v7 = vpop.f32.mrf.mxu1  ;;  %9682 = vmatmul.mubr.msk.bf16.gmra.mxu1 %vm1191_vm4, %v2357_v50 }
 0x2a8   : > { %9689 = vmatprep.mubr.msk.bf16.mxu1 %vm1191_vm4, %v2705_v46  ;;  %v9772_v56 = vpop.f32.mrf.mxu0  ;;  %v2706_v46 = vpack.c.bf16 %v2669_v15, %v2668_v35 }
 0x2a9   : > { %v11640_v26 = vpop.f32.mrf.mxu1  ;;  %v5302_v56 = vld [vmem:[#allocation2 + $0x1ea] sm:$0xff] }
 0x2aa   : > { %v11642_v39 = vpop.f32.mrf.mxu0  ;;  %v5330_v35 = vpack.c.bf16 %v5303_v58, %v5302_v56  ;;  %v2674_v58 = vld [vmem:[#allocation2 + $0x5b] sm:$0xff] }
 0x2ab   : > { %13894 = vst [vmem:[#allocation78_spill] sm:$0xff] %v11642_v39  ;;  %v11644_v29 = vpop.f32.mrf.mxu1  ;;  %v5304_v39 = vld [vmem:[#allocation2 + $0x1fa] sm:$0xff] }
 0x2ac   : > { %v11646_v57 = vpop.f32.mrf.mxu0  ;;  %10014 = vmatmul.mubr.msk.bf16.gmra.mxu0 %vm1191_vm4, %v5328_v43 }
 0x2ad   : > { %13895 = vst [vmem:[#allocation79_spill] sm:$0xff] %v11646_v57  ;;  %v11649_v50 = vpop.f32.mrf.mxu1  ;;  %10017 = vmatprep.mubr.msk.bf16.mxu0 %vm1191_vm4, %v5329_v16  ;;  %v5331_v16 = vpack.c.bf16 %v5305_v6, %v5304_v39  ;;  %v11663_v57 = vld [vmem:[#allocation9 + $0x88] sm:$0xff]   ;;  %v5306_v6 = vld [vmem:[#allocation2 + $0x20a] sm:$0xff]  ;;  %v5307_v39 = vld [vmem:[#allocation2 + $0x212] sm:$0xff] }
 0x2ae   : > { %v11652_v48 = vpop.f32.mrf.mxu0 }
 0x2af   : > { %13896 = vst [vmem:[#allocation80_spill] sm:$0xff] %v11652_v48  ;;  %v11654_v27 = vpop.f32.mrf.mxu1  ;;  %9690 = vmatmul.mubr.msk.bf16.vlgmr.msra.gmra.mxu1 %vm1191_vm4, %v2706_v46 }
 0x2b0   : > { %9774 = vmatpush3.bf16.msra.mxu1 %v11413_v25  ;;  %9693 = vmatprep.mubr.msk.bf16.mxu1 %vm1191_vm4, %v2707_v31  ;;  %v11659_v43 = vpop.f32.mrf.mxu0  ;;  %v2672_v25 = vld [vmem:[#allocation2 + $0x4b] sm:$0xff] }
 0x2b1   : > { %13897 = vst [vmem:[#allocation81_spill] sm:$0xff] %v11659_v43  ;;  %v11661_v15 = vpop.f32.mrf.mxu1  ;;  %9775 = vmatprep.subr.bf16.mxu1 %v10423_v20  ;;  %v2708_v56 = vpack.c.bf16 %v2673_v32, %v2672_v25  ;;  %v2709_v43 = vpack.c.bf16 %v2675_v54, %v2674_v58  ;;  %v2679_v54 = vld [vmem:[#allocation2 + $0x83] sm:$0xff] }
 0x2b2   : > { %v11665_v47 = vpop.f32.mrf.mxu0 }
 0x2b3   : > { %13898 = vst [vmem:[#allocation82_spill] sm:$0xff] %v11665_v47  ;;  %v11667_v48 = vpop.f32.mrf.mxu1 }
 0x2b4   : > { %v11669_v46 = vpop.f32.mrf.mxu0  ;;  %10018 = vmatmul.mubr.msk.bf16.gmra.mxu0 %vm1191_vm4, %v5330_v35  ;;  %9776 = vmatpush3.bf16.msra.mxu1 %v10423_v20  ;;  %v5332_v35 = vpack.c.bf16 %v5307_v39, %v5306_v6  ;;  %v5310_v6 = vld [vmem:[#allocation2 + $0x22a] sm:$0xff]  ;;  %v5311_v39 = vld [vmem:[#allocation2 + $0x232] sm:$0xff] }
 0x2b5   : > { %13899 = vst [vmem:[#allocation83_spill] sm:$0xff] %v11669_v46  ;;  %v11672_v31 = vpop.f32.mrf.mxu1  ;;  %10021 = vmatprep.mubr.msk.bf16.mxu0 %vm1191_vm4, %v5331_v16  ;;  %9861 = vmatprep.subr.bf16.mxu1 %v11663_v57  ;;  %v5333_v16 = vpack.c.bf16 %v5309_v0, %v5308_v24  ;;  %v2711_v24 = vpack.c.bf16 %v2679_v54, %v2678_v55  ;;  %v2683_v55 = vld [vmem:[#allocation2 + $0xa3] sm:$0xff] }
 0x2b6   : > { %v11676_v47 = vpop.f32.mrf.mxu0 }
 0x2b7   : > { %13900 = vst [vmem:[#allocation84_spill] sm:$0xff] %v11676_v47  ;;  %v11678_v46 = vpop.f32.mrf.mxu1  ;;  %9694 = vmatmul.mubr.msk.bf16.gmra.mxu1 %vm1191_vm4, %v2708_v56  ;;  %v2676_v47 = vld [vmem:[#allocation2 + $0x6b] sm:$0xff] }
 0x2b8   : > { %9697 = vmatprep.mubr.msk.bf16.mxu1 %vm1191_vm4, %v2709_v43  ;;  %v11682_v20 = vpop.f32.mrf.mxu0  ;;  %v2710_v43 = vpack.c.bf16 %v2677_v5, %v2676_v47 }
 0x2b9   : > { %13901 = vst [vmem:[#allocation85_spill] sm:$0xff] %v11682_v20  ;;  %v11684_v32 = vpop.f32.mrf.mxu1  ;;  %v5313_v20 = vld [vmem:[#allocation2 + $0x242] sm:$0xff] }
 0x2ba   : > { %v11686_v25 = vpop.f32.mrf.mxu0 }
 0x2bb   : > { %13902 = vst [vmem:[#allocation86_spill] sm:$0xff] %v11686_v25  ;;  %v11688_v41 = vpop.f32.mrf.mxu1  ;;  %v5312_v25 = vld [vmem:[#allocation2 + $0x23a] sm:$0xff] }
 0x2bc   : > { %v11690_v58 = vpop.f32.mrf.mxu0  ;;  %10022 = vmatmul.mubr.msk.bf16.gmra.mxu0 %vm1191_vm4, %v5332_v35  ;;  %v5335_v47 = vpack.c.bf16 %v5313_v20, %v5312_v25 }
 0x2bd   : > { %13903 = vst [vmem:[#allocation87_spill] sm:$0xff] %v11690_v58  ;;  %v11693_v56 = vpop.f32.mrf.mxu1  ;;  %10025 = vmatprep.mubr.msk.bf16.mxu0 %vm1191_vm4, %v5333_v16  ;;  %v5334_v58 = vpack.c.bf16 %v5311_v39, %v5310_v6  ;;  %v5314_v6 = vld [vmem:[#allocation2 + $0x24a] sm:$0xff]  ;;  %v5315_v39 = vld [vmem:[#allocation2 + $0x252] sm:$0xff] }
 0x2be   : > { %13904 = vst [vmem:[#allocation88_spill] sm:$0xff] %v11693_v56  ;;  %v11696_v0 = vpop.f32.mrf.mxu0 }
 0x2bf   : > { %13905 = vst [vmem:[#allocation89_spill] sm:$0xff] %v11696_v0  ;;  %v11698_v4 = vpop.f32.mrf.mxu1  ;;  %9698 = vmatmul.mubr.msk.bf16.gmra.mxu1 %vm1191_vm4, %v2710_v43  ;;  %v2680_v0 = vld [vmem:[#allocation2 + $0x8b] sm:$0xff] }
 0x2c0   : > { %13906 = vst [vmem:[#allocation90_spill] sm:$0xff] %v11698_v4  ;;  %9701 = vmatprep.mubr.msk.bf16.mxu1 %vm1191_vm4, %v2711_v24  ;;  %v11702_v35 = vpop.f32.mrf.mxu0  ;;  %v2712_v24 = vpack.c.bf16 %v2681_v12, %v2680_v0  ;;  %v2682_v4 = vld [vmem:[#allocation2 + $0x9b] sm:$0xff] }
 0x2c1   : > { %13907 = vst [vmem:[#allocation91_spill] sm:$0xff] %v11702_v35  ;;  %v11704_v5 = vpop.f32.mrf.mxu1  ;;  %v2713_v25 = vpack.c.bf16 %v2683_v55, %v2682_v4  ;;  %v5317_v35 = vld [vmem:[#allocation2 + $0x262] sm:$0xff]  ;;  %v2684_v55 = vld [vmem:[#allocation2 + $0xab] sm:$0xff] }
 0x2c2   : > { %13908 = vst [vmem:[#allocation92_spill] sm:$0xff] %v11704_v5  ;;  %v11706_v16 = vpop.f32.mrf.mxu0 }
 0x2c3   : > { %13909 = vst [vmem:[#allocation93_spill] sm:$0xff] %v11706_v16  ;;  %v11708_v56 = vpop.f32.mrf.mxu1  ;;  %v5316_v16 = vld [vmem:[#allocation2 + $0x25a] sm:$0xff] }
 0x2c4   : > { %13910 = vst [vmem:[#allocation94_spill] sm:$0xff] %v11708_v56  ;;  %v11710_v54 = vpop.f32.mrf.mxu0  ;;  %10026 = vmatmul.mubr.msk.bf16.gmra.mxu0 %vm1191_vm4, %v5334_v58  ;;  %v5337_v0 = vpack.c.bf16 %v5317_v35, %v5316_v16  ;;  %v1783_v35 = vadd.f32 %v11496_v53, %v11224_v38  ;;  %v1786_v38 = vadd.f32 %v11512_v21, %v11236_v3  ;;  %v2690_v21 = vld [vmem:[#allocation2 + $0xdb] sm:$0xff] }
 0x2c5   : > { %13911 = vst [vmem:[#allocation95_spill] sm:$0xff] %v11710_v54  ;;  %v11713_v43 = vpop.f32.mrf.mxu1  ;;  %10029 = vmatprep.mubr.msk.bf16.mxu0 %vm1191_vm4, %v5335_v47  ;;  %v5336_v54 = vpack.c.bf16 %v5315_v39, %v5314_v6  ;;  %v5318_v6 = vld [vmem:[#allocation2 + $0x26a] sm:$0xff] }
 0x2c6   : > { %13912 = vst [vmem:[#allocation96_spill] sm:$0xff] %v11713_v43  ;;  %v11716_v20 = vpop.f32.mrf.mxu0  ;;  %v2685_v43 = vld [vmem:[#allocation2 + $0xb3] sm:$0xff] }
 0x2c7   : > { %13913 = vst [vmem:[#allocation97_spill] sm:$0xff] %v11716_v20  ;;  %v11718_v56 = vpop.f32.mrf.mxu1  ;;  %9702 = vmatmul.mubr.msk.bf16.gmra.mxu1 %vm1191_vm4, %v2712_v24  ;;  %v2687_v20 = vld [vmem:[#allocation2 + $0xc3] sm:$0xff]  ;;  %v2714_v24 = vpack.c.bf16 %v2685_v43, %v2684_v55  ;;  %v6012_v55 = vld [vmem:[#allocation2 + $0x153] sm:$0xff] }
 0x2c8   : > { %13914 = vst [vmem:[#allocation98_spill] sm:$0xff] %v11718_v56  ;;  %9705 = vmatprep.mubr.msk.bf16.mxu1 %vm1191_vm4, %v2713_v25  ;;  %v11722_v58 = vpop.f32.mrf.mxu0  ;;  %v2686_v25 = vld [vmem:[#allocation2 + $0xbb] sm:$0xff] }
 0x2c9   : > { %13915 = vst [vmem:[#allocation99_spill] sm:$0xff] %v11722_v58  ;;  %v11724_v12 = vpop.f32.mrf.mxu1  ;;  %v2715_v39 = vpack.c.bf16 %v2687_v20, %v2686_v25 }
 0x2ca   : > { %v11726_v47 = vpop.f32.mrf.mxu0 }
 0x2cb   : > { %13916 = vst [vmem:[#allocation100_spill] sm:$0xff] %v11726_v47  ;;  %v9596_v5 = vpop.f32.mrf.mxu1  ;;  %v6013_v47 = vld [vmem:[#allocation2 + $0x15b] sm:$0xff] }
 0x2cc   : > { %v11728_v4 = vpop.f32.mrf.mxu0  ;;  %10030 = vmatmul.mubr.msk.bf16.gmra.mxu0 %vm1191_vm4, %v5336_v54  ;;  %v1775_v54 = vadd.f32 %v11508_v60, %v11230_v11  ;;  %v6051_v11 = vpack.c.bf16 %v6013_v47, %v6012_v55  ;;  %v2691_v60 = vld [vmem:[#allocation2 + $0xe3] sm:$0xff]  ;;  %v1799_v47 = vadd.f32 %v11527_v19, %v11249_v49 }
 0x2cd   : > { %13917 = vst [vmem:[#allocation101_spill] sm:$0xff] %v11728_v4  ;;  %v11731_v56 = vpop.f32.mrf.mxu1  ;;  %10033 = vmatprep.mubr.msk.bf16.mxu0 %vm1191_vm4, %v5337_v0  ;;  %v5338_v0 = vpack.c.bf16 %v5318_v6, %v5318_v6 }
 0x2ce   : > { %v11736_v16 = vpop.f32.mrf.mxu0 }
 0x2cf   : > { %v9603_v5 = vpop.f32.mrf.mxu1  ;;  %9706 = vmatmul.mubr.msk.bf16.gmra.mxu1 %vm1191_vm4, %v2714_v24  ;;  %v2689_v24 = vld [vmem:[#allocation2 + $0xd3] sm:$0xff] }
 0x2d0   : > { %v11741_v4 = vadd.f32 %v9603_v5, %v1783_v35  ;;  %9709 = vmatprep.mubr.msk.bf16.mxu1 %vm1191_vm4, %v2715_v39  ;;  %v11744_v43 = vpop.f32.mrf.mxu0  ;;  %v1778_v35 = vadd.f32 %v11519_v14, %v11245_v34  ;;  %v2688_v5 = vld [vmem:[#allocation2 + $0xcb] sm:$0xff]  ;;  %v2717_v14 = vpack.c.bf16 %v2691_v60, %v2690_v21  ;;  %v1802_v60 = vadd.f32 %v11544_v52, %v11262_v2  ;;  %v10428_v21 = vld [vmem:[#allocation9 + $0x60] sm:$0xff]  }
 0x2d1   : > { %13918 = vst [vmem:[#allocation102_spill] sm:$0xff] %v11744_v43  ;;  %v2102_v58 = vpop.f32.mrf.mxu1  ;;  %v2716_v3 = vpack.c.bf16 %v2689_v24, %v2688_v5  ;;  %v2694_v52 = vld [vmem:[#allocation2 + $0xfb] sm:$0xff] }
 0x2d2   : > { %v11748_v53 = vadd.f32 %v2102_v58, %v1775_v54  ;;  %v11750_v20 = vpop.f32.mrf.mxu0  ;;  %v6014_v58 = vld [vmem:[#allocation2 + $0x163] sm:$0xff]  ;;  %v6015_v54 = vld [vmem:[#allocation2 + $0x16b] sm:$0xff] }
 0x2d3   : > { %v9604_v25 = vpop.f32.mrf.mxu1  ;;  %v6052_v49 = vpack.c.bf16 %v6015_v54, %v6014_v58  ;;  %v2692_v58 = vld [vmem:[#allocation2 + $0xeb] sm:$0xff] }
 0x2d4   : > { %v11754_v39 = vadd.f32 %v9604_v25, %v1786_v38  ;;  %v11756_v6 = vpop.f32.mrf.mxu0  ;;  %10034 = vmatmul.mubr.msk.bf16.gmra.mxu0 %vm1191_vm4, %v5338_v0  ;;  %v6016_v38 = vld [vmem:[#allocation2 + $0x173] sm:$0xff]  ;;  %v6017_v25 = vld [vmem:[#allocation2 + $0x17b] sm:$0xff]  ;;  %v1791_v0 = vadd.f32 %v11540_v59, %v11254_v44  ;;  %v2695_v44 = vld [vmem:[#allocation2 + $0x103] sm:$0xff] }
 0x2d5   : > { %13919 = vst [vmem:[#allocation103_spill] sm:$0xff] %v11756_v6  ;;  %v2105_v43 = vpop.f32.mrf.mxu1  ;;  %10085 = vmatprep.mubr.msk.bf16.mxu0 %vm1191_vm4, %v6051_v11  ;;  %v13922_v59 = vld [vmem:[#allocation15_spill] sm:$0xff] }
 0x2d6   : > { %v11762_v55 = vadd.f32 %v2105_v43, %v1778_v35  ;;  %v11764_v34 = vpop.f32.mrf.mxu0  ;;  %v6053_v43 = vpack.c.bf16 %v6017_v25, %v6016_v38  ;;  %v6018_v38 = vld [vmem:[#allocation2 + $0x183] sm:$0xff]  ;;  %v6019_v25 = vld [vmem:[#allocation2 + $0x18b] sm:$0xff] }
 0x2d7   : > { %13920 = vst [vmem:[#allocation104_spill] sm:$0xff] %v11764_v34  ;;  %v9607_v6 = vpop.f32.mrf.mxu1  ;;  %9710 = vmatmul.mubr.msk.bf16.gmra.mxu1 %vm1191_vm4, %v2716_v3  ;;  %v2693_v3 = vld [vmem:[#allocation2 + $0xf3] sm:$0xff] }
 0x2d8   : > { %v11769_v24 = vadd.f32 %v9607_v6, %v1799_v47  ;;  %9713 = vmatprep.mubr.msk.bf16.mxu1 %vm1191_vm4, %v2717_v14  ;;  %v11772_v11 = vpop.f32.mrf.mxu0  ;;  %v1794_v6 = vadd.f32 %v11549_v10, %v13922_v59  ;;  %v2718_v2 = vpack.c.bf16 %v2693_v3, %v2692_v58  ;;  %v6020_v59 = vld [vmem:[#allocation2 + $0x193] sm:$0xff]  ;;  %v13926_v3 = vld [vmem:[#allocation17_spill] sm:$0xff] }
 0x2d9   : > { %v2118_v19 = vpop.f32.mrf.mxu1 }
 0x2da   : > { %v11776_v35 = vadd.f32 %v2118_v19, %v1791_v0  ;;  %v11778_v5 = vpop.f32.mrf.mxu0  ;;  %v13924_v0 = vld [vmem:[#allocation16_spill] sm:$0xff] }
 0x2db   : > { %13921 = vst [vmem:[#allocation105_spill] sm:$0xff] %v11778_v5  ;;  %v9608_v34 = vpop.f32.mrf.mxu1  ;;  %v1815_v19 = vadd.f32 %v11555_v36, %v13924_v0  ;;  %v6054_v36 = vpack.c.bf16 %v6019_v25, %v6018_v38 }
 0x2dc   : > { %v11782_v47 = vadd.f32 %v9608_v34, %v1802_v60  ;;  %v11784_v14 = vpop.f32.mrf.mxu0  ;;  %10086 = vmatmul.mubr.msk.bf16.vlgmr.msra.gmra.mxu0 %vm1191_vm4, %v6052_v49  ;;  %v2719_v60 = vpack.c.bf16 %v2695_v44, %v2694_v52  ;;  %v6021_v49 = vld [vmem:[#allocation2 + $0x19b] sm:$0xff]  ;;  %v13928_v44 = vld [vmem:[#allocation18_spill] sm:$0xff] }
 0x2dd   : > { %13923 = vst [vmem:[#allocation15_spill] sm:$0xff] %v11784_v14  ;;  %v2121_v54 = vpop.f32.mrf.mxu1  ;;  %10089 = vmatprep.mubr.msk.bf16.mxu0 %vm1191_vm4, %v6053_v43  ;;  %10170 = vmatpush3.bf16.msra.mxu0 %v11626_v8  ;;  %v1807_v43 = vadd.f32 %v11567_v9, %v13926_v3  ;;  %v1818_v52 = vadd.f32 %v11571_v51, %v13928_v44  ;;  %v2699_v9 = vld [vmem:[#allocation2 + $0x123] sm:$0xff]  ;;  %v2698_v51 = vld [vmem:[#allocation2 + $0x11b] sm:$0xff] }
 0x2de   : > { %v11791_v10 = vadd.f32 %v2121_v54, %v1794_v6  ;;  %v11793_v34 = vpop.f32.mrf.mxu0  ;;  %10171 = vmatprep.subr.bf16.mxu0 %v10428_v21  ;;  %v6055_v54 = vpack.c.bf16 %v6021_v49, %v6020_v59  ;;  %v6022_v59 = vld [vmem:[#allocation2 + $0x1a3] sm:$0xff]  ;;  %v6023_v49 = vld [vmem:[#allocation2 + $0x1ab] sm:$0xff] }
 0x2df   : > { %13925 = vst [vmem:[#allocation16_spill] sm:$0xff] %v11793_v34  ;;  %v9611_v14 = vpop.f32.mrf.mxu1  ;;  %9714 = vmatmul.mubr.msk.bf16.gmra.mxu1 %vm1191_vm4, %v2718_v2  ;;  %v2697_v2 = vld [vmem:[#allocation2 + $0x113] sm:$0xff] }
 0x2e0   : > { %v11798_v58 = vadd.f32 %v9611_v14, %v1815_v19  ;;  %9717 = vmatprep.mubr.msk.bf16.mxu1 %vm1191_vm4, %v2719_v60  ;;  %v11801_v8 = vpop.f32.mrf.mxu0  ;;  %v13930_v14 = vld [vmem:[#allocation19_spill] sm:$0xff] }
 0x2e1   : > { %13927 = vst [vmem:[#allocation17_spill] sm:$0xff] %v11801_v8  ;;  %v2134_v6 = vpop.f32.mrf.mxu1  ;;  %10172 = vmatpush3.bf16.msra.mxu0 %v10428_v21  ;;  %v1810_v19 = vadd.f32 %v11576_v30, %v13930_v14  ;;  %v2696_v21 = vld [vmem:[#allocation2 + $0x10b] sm:$0xff]  ;;  %v6025_v14 = vld [vmem:[#allocation2 + $0x1bb] sm:$0xff]  ;;  %v2703_v8 = vld [vmem:[#allocation2 + $0x143] sm:$0xff] }
 0x2e2   : > { %v11805_v0 = vadd.f32 %v2134_v6, %v1807_v43  ;;  %v11807_v34 = vpop.f32.mrf.mxu0  ;;  %v2720_v25 = vpack.c.bf16 %v2697_v2, %v2696_v21  ;;  %v13932_v43 = vld [vmem:[#allocation20_spill] sm:$0xff] }
 0x2e3   : > { %13929 = vst [vmem:[#allocation18_spill] sm:$0xff] %v11807_v34  ;;  %v9612_v5 = vpop.f32.mrf.mxu1  ;;  %v1831_v6 = vadd.f32 %v11581_v42, %v13932_v43  ;;  %v6056_v42 = vpack.c.bf16 %v6023_v49, %v6022_v59  ;;  %v13936_v43 = vld [vmem:[#allocation22_spill] sm:$0xff] }
 0x2e4   : > { %v11811_v60 = vadd.f32 %v9612_v5, %v1818_v52  ;;  %v11813_v3 = vpop.f32.mrf.mxu0  ;;  %10090 = vmatmul.mubr.msk.bf16.gmra.mxu0 %vm1191_vm4, %v6054_v36  ;;  %v2721_v5 = vpack.c.bf16 %v2699_v9, %v2698_v51  ;;  %v6024_v52 = vld [vmem:[#allocation2 + $0x1b3] sm:$0xff]  ;;  %v13934_v36 = vld [vmem:[#allocation21_spill] sm:$0xff]  ;;  %v1834_v9 = vadd.f32 %v11597_v62, %v13936_v43  ;;  %v2700_v59 = vld [vmem:[#allocation2 + $0x12b] sm:$0xff] }
 0x2e5   : > { %13931 = vst [vmem:[#allocation19_spill] sm:$0xff] %v11813_v3  ;;  %v2137_v38 = vpop.f32.mrf.mxu1  ;;  %10093 = vmatprep.mubr.msk.bf16.mxu0 %vm1191_vm4, %v6055_v54  ;;  %v1823_v2 = vadd.f32 %v11593_v13, %v13934_v36  ;;  %v13938_v13 = vld [vmem:[#allocation23_spill] sm:$0xff]  ;;  %v2702_v62 = vld [vmem:[#allocation2 + $0x13b] sm:$0xff] }
 0x2e6   : > { %v11819_v44 = vadd.f32 %v2137_v38, %v1810_v19  ;;  %v11821_v30 = vpop.f32.mrf.mxu0  ;;  %v6057_v38 = vpack.c.bf16 %v6025_v14, %v6024_v52  ;;  %v6026_v14 = vld [vmem:[#allocation2 + $0x1c3] sm:$0xff]  ;;  %v6027_v36 = vld [vmem:[#allocation2 + $0x1cb] sm:$0xff] }
 0x2e7   : > { %13933 = vst [vmem:[#allocation20_spill] sm:$0xff] %v11821_v30  ;;  %v9615_v3 = vpop.f32.mrf.mxu1  ;;  %9718 = vmatmul.mubr.msk.bf16.gmra.mxu1 %vm1191_vm4, %v2720_v25  ;;  %v2701_v25 = vld [vmem:[#allocation2 + $0x133] sm:$0xff] }
 0x2e8   : > { %v11826_v21 = vadd.f32 %v9615_v3, %v1831_v6  ;;  %9721 = vmatprep.mubr.msk.bf16.mxu1 %vm1191_vm4, %v2721_v5  ;;  %v11829_v54 = vpop.f32.mrf.mxu0  ;;  %v1826_v3 = vadd.f32 %v11602_v40, %v13938_v13  ;;  %v2722_v52 = vpack.c.bf16 %v2701_v25, %v2700_v59  ;;  %v6029_v13 = vld [vmem:[#allocation2 + $0x1db] sm:$0xff] }
 0x2e9   : > { %13935 = vst [vmem:[#allocation21_spill] sm:$0xff] %v11829_v54  ;;  %v2150_v19 = vpop.f32.mrf.mxu1  ;;  %v13951_v54 = vld [vmem:[#allocation29_spill] sm:$0xff] }
 0x2ea   : > { %v11833_v51 = vadd.f32 %v2150_v19, %v1823_v2  ;;  %v11835_v30 = vpop.f32.mrf.mxu0  ;;  %v13940_v2 = vld [vmem:[#allocation24_spill] sm:$0xff] }
 0x2eb   : > { %13937 = vst [vmem:[#allocation22_spill] sm:$0xff] %v11835_v30  ;;  %v9616_v34 = vpop.f32.mrf.mxu1  ;;  %v1847_v19 = vadd.f32 %v11607_v22, %v13940_v2  ;;  %v6058_v22 = vpack.c.bf16 %v6027_v36, %v6026_v14  ;;  %v3401_v30 = vld [vmem:[#allocation2 + $0x3c] sm:$0xff] }
 0x2ec   : > { %v11839_v6 = vadd.f32 %v9616_v34, %v1834_v9  ;;  %v11841_v5 = vpop.f32.mrf.mxu0  ;;  %10094 = vmatmul.mubr.msk.bf16.gmra.mxu0 %vm1191_vm4, %v6056_v42  ;;  %v2723_v34 = vpack.c.bf16 %v2703_v8, %v2702_v62  ;;  %v6028_v9 = vld [vmem:[#allocation2 + $0x1d3] sm:$0xff]  ;;  %v1839_v42 = vadd.f32 %v11617_v45, %v11325_v28  ;;  %v13945_v28 = vld [vmem:[#allocation26_spill] sm:$0xff] }
 0x2ed   : > { %13939 = vst [vmem:[#allocation23_spill] sm:$0xff] %v11841_v5  ;;  %v2153_v49 = vpop.f32.mrf.mxu1  ;;  %10097 = vmatprep.mubr.msk.bf16.mxu0 %vm1191_vm4, %v6057_v38  ;;  %v6059_v59 = vpack.c.bf16 %v6029_v13, %v6028_v9  ;;  %v1842_v45 = vadd.f32 %v11628_v33, %v13945_v28  ;;  %v11872_v14 = vld [vmem:[#allocation9 + $0x88] sm:$0xff]   ;;  %v6031_v13 = vld [vmem:[#allocation2 + $0x1eb] sm:$0xff] }
 0x2ee   : > { %v11847_v43 = vadd.f32 %v2153_v49, %v1826_v3  ;;  %v11849_v40 = vpop.f32.mrf.mxu0  ;;  %v13943_v49 = vld [vmem:[#allocation25_spill] sm:$0xff]  ;;  %10257 = vmatprep.subr.bf16.mxu0 %v11872_v14 }
 0x2ef   : > { %13941 = vst [vmem:[#allocation24_spill] sm:$0xff] %v11849_v40  ;;  %v9619_v5 = vpop.f32.mrf.mxu1  ;;  %9722 = vmatmul.mubr.msk.bf16.gmra.mxu1 %vm1191_vm4, %v2722_v52  ;;  %v1850_v8 = vadd.f32 %v11621_v1, %v13943_v49  ;;  %v2704_v52 = vld [vmem:[#allocation2 + $0x14b] sm:$0xff]  ;;  %v6030_v9 = vld [vmem:[#allocation2 + $0x1e3] sm:$0xff]  ;;  %v6033_v28 = vld [vmem:[#allocation2 + $0x1fb] sm:$0xff] }
 0x2f0   : > { %v11854_v25 = vadd.f32 %v9619_v5, %v1847_v19  ;;  %9725 = vmatprep.mubr.msk.bf16.mxu1 %vm1191_vm4, %v2723_v34  ;;  %v11857_v38 = vpop.f32.mrf.mxu0  ;;  %v2724_v1 = vpack.c.bf16 %v2704_v52, %v2704_v52  ;;  %v3400_v34 = vld [vmem:[#allocation2 + $0x34] sm:$0xff] }
 0x2f1   : > { %13942 = vst [vmem:[#allocation106_spill] sm:$0xff] %v11857_v38  ;;  %v2166_v3 = vpop.f32.mrf.mxu1  ;;  %v13949_v52 = vld [vmem:[#allocation28_spill] sm:$0xff]  ;;  %v3405_v38 = vld [vmem:[#allocation2 + $0x5c] sm:$0xff] }
 0x2f2   : > { %v11861_v62 = vadd.f32 %v2166_v3, %v1839_v42  ;;  %v11863_v2 = vpop.f32.mrf.mxu0  ;;  %v13947_v42 = vld [vmem:[#allocation27_spill] sm:$0xff] }
 0x2f3   : > { %13944 = vst [vmem:[#allocation25_spill] sm:$0xff] %v11863_v2  ;;  %v9620_v40 = vpop.f32.mrf.mxu1  ;;  %v1863_v3 = vadd.f32 %v11636_v7, %v13947_v42  ;;  %v3403_v2 = vld [vmem:[#allocation2 + $0x4c] sm:$0xff] }
 0x2f4   : > { %v11867_v5 = vadd.f32 %v9620_v40, %v1850_v8  ;;  %v11869_v19 = vpop.f32.mrf.mxu0  ;;  %10098 = vmatmul.mubr.msk.bf16.gmra.mxu0 %vm1191_vm4, %v6058_v22  ;;  %v3439_v40 = vpack.c.bf16 %v3401_v30, %v3400_v34  ;;  %v6032_v8 = vld [vmem:[#allocation2 + $0x1f3] sm:$0xff]  ;;  %v1866_v30 = vadd.f32 %v11644_v29, %v11354_v17  ;;  %v6034_v29 = vld [vmem:[#allocation2 + $0x203] sm:$0xff] }
 0x2f5   : > { %13946 = vst [vmem:[#allocation26_spill] sm:$0xff] %v11869_v19  ;;  %v2169_v36 = vpop.f32.mrf.mxu1  ;;  %10101 = vmatprep.mubr.msk.bf16.mxu0 %vm1191_vm4, %v6059_v59  ;;  %v1855_v59 = vadd.f32 %v11640_v26, %v13949_v52  ;;  %v6061_v42 = vpack.c.bf16 %v6033_v28, %v6032_v8  ;;  %v1858_v26 = vadd.f32 %v11649_v50, %v13951_v54  ;;  %v6035_v28 = vld [vmem:[#allocation2 + $0x20b] sm:$0xff] }
 0x2f6   : > { %v11877_v49 = vadd.f32 %v2169_v36, %v1842_v45  ;;  %v11879_v33 = vpop.f32.mrf.mxu0  ;;  %v6060_v45 = vpack.c.bf16 %v6031_v13, %v6030_v9  ;;  %v3402_v9 = vld [vmem:[#allocation2 + $0x44] sm:$0xff]  ;;  %v3404_v13 = vld [vmem:[#allocation2 + $0x54] sm:$0xff] }
 0x2f7   : > { %13948 = vst [vmem:[#allocation27_spill] sm:$0xff] %v11879_v33  ;;  %v9623_v22 = vpop.f32.mrf.mxu1  ;;  %9726 = vmatmul.mubr.msk.bf16.gmra.mxu1 %vm1191_vm4, %v2724_v1  ;;  %v3440_v17 = vpack.c.bf16 %v3403_v2, %v3402_v9  ;;  %v13953_v52 = vld [vmem:[#allocation30_spill] sm:$0xff]  ;;  %v3441_v54 = vpack.c.bf16 %v3405_v38, %v3404_v13  ;;  %v13957_v13 = vld [vmem:[#allocation32_spill] sm:$0xff] }
 0x2f8   : > { %v11885_v19 = vadd.f32 %v9623_v22, %v1863_v3  ;;  %9777 = vmatprep.mubr.msk.bf16.mxu1 %vm1191_vm4, %v3439_v40  ;;  %v9860_v7 = vpop.f32.mrf.mxu0  ;;  %v10427_v22 = vld [vmem:[#allocation9 + $0x80] sm:$0xff]   ;;  %v11917_v38 = vld [vmem:[#allocation9 + $0x8] sm:$0xff]  }
 0x2f9   : > { %v2182_v36 = vpop.f32.mrf.mxu1 }
 0x2fa   : > { %v11890_v34 = vadd.f32 %v2182_v36, %v1855_v59  ;;  %v11892_v33 = vpop.f32.mrf.mxu0  ;;  %v1879_v59 = vadd.f32 %v11654_v27, %v13953_v52  ;;  %v6036_v36 = vld [vmem:[#allocation2 + $0x213] sm:$0xff] }
 0x2fb   : > { %13950 = vst [vmem:[#allocation28_spill] sm:$0xff] %v11892_v33  ;;  %v9624_v1 = vpop.f32.mrf.mxu1 }
 0x2fc   : > { %v11896_v3 = vadd.f32 %v9624_v1, %v1866_v30  ;;  %v11898_v40 = vpop.f32.mrf.mxu0  ;;  %10102 = vmatmul.mubr.msk.bf16.gmra.mxu0 %vm1191_vm4, %v6060_v45  ;;  %v6037_v30 = vld [vmem:[#allocation2 + $0x21b] sm:$0xff]  ;;  %v13955_v1 = vld [vmem:[#allocation31_spill] sm:$0xff] }
 0x2fd   : > { %13952 = vst [vmem:[#allocation29_spill] sm:$0xff] %v11898_v40  ;;  %v2185_v8 = vpop.f32.mrf.mxu1  ;;  %10105 = vmatprep.mubr.msk.bf16.mxu0 %vm1191_vm4, %v6061_v42  ;;  %v1871_v2 = vadd.f32 %v11661_v15, %v13955_v1  ;;  %v3421_v40 = vld [vmem:[#allocation2 + $0xdc] sm:$0xff] }
 0x2fe   : > { %v11904_v7 = vadd.f32 %v2185_v8, %v1858_v26  ;;  %v11906_v50 = vpop.f32.mrf.mxu0  ;;  %v6062_v26 = vpack.c.bf16 %v6035_v28, %v6034_v29  ;;  %v6063_v8 = vpack.c.bf16 %v6037_v30, %v6036_v36  ;;  %v3406_v28 = vld [vmem:[#allocation2 + $0x64] sm:$0xff]  ;;  %v3408_v30 = vld [vmem:[#allocation2 + $0x74] sm:$0xff] }
 0x2ff   : > { %13954 = vst [vmem:[#allocation30_spill] sm:$0xff] %v11906_v50  ;;  %v9627_v45 = vpop.f32.mrf.mxu1  ;;  %9778 = vmatmul.mubr.msk.bf16.vlgmr.msra.gmra.mxu1 %vm1191_vm4, %v3440_v17  ;;  %v1882_v17 = vadd.f32 %v11667_v48, %v13957_v13  ;;  %v3417_v50 = vld [vmem:[#allocation2 + $0xbc] sm:$0xff] }
 0x300   : > { %v11911_v42 = vadd.f32 %v9627_v45, %v1879_v59  ;;  %9862 = vmatpush3.bf16.msra.mxu1 %v11663_v57  ;;  %9781 = vmatprep.mubr.msk.bf16.mxu1 %vm1191_vm4, %v3441_v54  ;;  %v11915_v27 = vpop.f32.mrf.mxu0  ;;  %v3407_v59 = vld [vmem:[#allocation2 + $0x6c] sm:$0xff]  ;;  %v3409_v57 = vld [vmem:[#allocation2 + $0x7c] sm:$0xff]  ;;  %v1874_v54 = vadd.f32 %v11672_v31, %v11389_v63  ;;  %v1895_v63 = vadd.f32 %v11678_v46, %v11395_v23 }
 0x301   : > { %13956 = vst [vmem:[#allocation31_spill] sm:$0xff] %v11915_v27  ;;  %v2198_v9 = vpop.f32.mrf.mxu1  ;;  %9863 = vmatprep.subr.bf16.mxu1 %v10427_v22  ;;  %v3442_v48 = vpack.c.bf16 %v3407_v59, %v3406_v28 }
 0x302   : > { %v11921_v52 = vadd.f32 %v2198_v9, %v1871_v2  ;;  %v11923_v15 = vpop.f32.mrf.mxu0  ;;  %v6038_v2 = vld [vmem:[#allocation2 + $0x223] sm:$0xff]  ;;  %v6039_v9 = vld [vmem:[#allocation2 + $0x22b] sm:$0xff] }
 0x303   : > { %13958 = vst [vmem:[#allocation32_spill] sm:$0xff] %v11923_v15  ;;  %v9628_v45 = vpop.f32.mrf.mxu1  ;;  %v6064_v23 = vpack.c.bf16 %v6039_v9, %v6038_v2  ;;  %v3410_v2 = vld [vmem:[#allocation2 + $0x84] sm:$0xff] }
 0x304   : > { %v11927_v1 = vadd.f32 %v9628_v45, %v1882_v17  ;;  %v11929_v29 = vpop.f32.mrf.mxu0  ;;  %10106 = vmatmul.mubr.msk.bf16.gmra.mxu0 %vm1191_vm4, %v6062_v26  ;;  %9864 = vmatpush3.bf16.msra.mxu1 %v10427_v22  ;;  %v3443_v17 = vpack.c.bf16 %v3409_v57, %v3408_v30  ;;  %v6040_v26 = vld [vmem:[#allocation2 + $0x233] sm:$0xff]  ;;  %v6041_v45 = vld [vmem:[#allocation2 + $0x23b] sm:$0xff]  ;;  %v1898_v57 = vadd.f32 %v11688_v41, %v11420_v37  ;;  %v6042_v41 = vld [vmem:[#allocation2 + $0x243] sm:$0xff] }
 0x305   : > { %13959 = vst [vmem:[#allocation107_spill] sm:$0xff] %v11929_v29  ;;  %v2201_v36 = vpop.f32.mrf.mxu1  ;;  %10109 = vmatprep.mubr.msk.bf16.mxu0 %vm1191_vm4, %v6063_v8  ;;  %9949 = vmatprep.subr.bf16.mxu1 %v11917_v38  ;;  %v1887_v8 = vadd.f32 %v11684_v32, %v11411_v61  ;;  %v3413_v29 = vld [vmem:[#allocation2 + $0x9c] sm:$0xff]  ;;  %v13963_v61 = vld [vmem:[#allocation88_spill] sm:$0xff] }
 0x306   : > { %v11936_v31 = vadd.f32 %v2201_v36, %v1874_v54  ;;  %v11938_v13 = vpop.f32.mrf.mxu0  ;;  %v6065_v54 = vpack.c.bf16 %v6041_v45, %v6040_v26  ;;  %v1890_v32 = vadd.f32 %v13963_v61, %v11436_v18  ;;  %v3412_v37 = vld [vmem:[#allocation2 + $0x94] sm:$0xff]  ;;  %v6043_v45 = vld [vmem:[#allocation2 + $0x24b] sm:$0xff] }
 0x307   : > { %13960 = vst [vmem:[#allocation108_spill] sm:$0xff] %v11938_v13  ;;  %v9631_v22 = vpop.f32.mrf.mxu1  ;;  %9782 = vmatmul.mubr.msk.bf16.gmra.mxu1 %vm1191_vm4, %v3442_v48  ;;  %v3411_v48 = vld [vmem:[#allocation2 + $0x8c] sm:$0xff]  ;;  %v6045_v61 = vld [vmem:[#allocation2 + $0x25b] sm:$0xff] }
 0x308   : > { %v11943_v59 = vadd.f32 %v9631_v22, %v1895_v63  ;;  %9785 = vmatprep.mubr.msk.bf16.mxu1 %vm1191_vm4, %v3443_v17  ;;  %v11946_v28 = vpop.f32.mrf.mxu0  ;;  %v3444_v26 = vpack.c.bf16 %v3411_v48, %v3410_v2  ;;  %v13965_v22 = vld [vmem:[#allocation41_spill] sm:$0xff]  ;;  %v13969_v48 = vld [vmem:[#allocation92_spill] sm:$0xff] }
 0x309   : > { %13961 = vst [vmem:[#allocation109_spill] sm:$0xff] %v11946_v28  ;;  %v2214_v46 = vpop.f32.mrf.mxu1 }
 0x30a   : > { %v11950_v36 = vadd.f32 %v2214_v46, %v1887_v8  ;;  %v11952_v30 = vpop.f32.mrf.mxu0  ;;  %v13966_v8 = vld [vmem:[#allocation90_spill] sm:$0xff] }
 0x30b   : > { %13962 = vst [vmem:[#allocation110_spill] sm:$0xff] %v11952_v30  ;;  %v9632_v13 = vpop.f32.mrf.mxu1  ;;  %v1911_v46 = vadd.f32 %v13966_v8, %v13965_v22  ;;  %v6066_v22 = vpack.c.bf16 %v6043_v45, %v6042_v41  ;;  %v13971_v8 = vld [vmem:[#allocation46_spill] sm:$0xff] }
 0x30c   : > { %v11956_v63 = vadd.f32 %v9632_v13, %v1898_v57  ;;  %v11958_v17 = vpop.f32.mrf.mxu0  ;;  %10110 = vmatmul.mubr.msk.bf16.gmra.mxu0 %vm1191_vm4, %v6064_v23  ;;  %v3445_v13 = vpack.c.bf16 %v3413_v29, %v3412_v37  ;;  %v6044_v57 = vld [vmem:[#allocation2 + $0x253] sm:$0xff]  ;;  %v3414_v41 = vld [vmem:[#allocation2 + $0xa4] sm:$0xff] }
 0x30d   : > { %13964 = vst [vmem:[#allocation88_spill] sm:$0xff] %v11958_v17  ;;  %v2217_v9 = vpop.f32.mrf.mxu1  ;;  %10113 = vmatprep.mubr.msk.bf16.mxu0 %vm1191_vm4, %v6065_v54  ;;  %v13968_v23 = vld [vmem:[#allocation43_spill] sm:$0xff] }
 0x30e   : > { %v11964_v30 = vadd.f32 %v2217_v9, %v1890_v32  ;;  %v11966_v18 = vpop.f32.mrf.mxu0  ;;  %v1903_v2 = vadd.f32 %v13969_v48, %v13968_v23  ;;  %v6067_v9 = vpack.c.bf16 %v6045_v61, %v6044_v57  ;;  %v13974_v23 = vld [vmem:[#allocation49_spill] sm:$0xff] }
 0x30f   : > { %13967 = vst [vmem:[#allocation41_spill] sm:$0xff] %v11966_v18  ;;  %v9635_v17 = vpop.f32.mrf.mxu1  ;;  %9786 = vmatmul.mubr.msk.bf16.gmra.mxu1 %vm1191_vm4, %v3444_v26  ;;  %v13972_v18 = vld [vmem:[#allocation94_spill] sm:$0xff]  ;;  %v3415_v26 = vld [vmem:[#allocation2 + $0xac] sm:$0xff] }
 0x310   : > { %v11971_v28 = vadd.f32 %v9635_v17, %v1911_v46  ;;  %9789 = vmatprep.mubr.msk.bf16.mxu1 %vm1191_vm4, %v3445_v13  ;;  %v11974_v54 = vpop.f32.mrf.mxu0  ;;  %v1914_v29 = vadd.f32 %v13972_v18, %v13971_v8  ;;  %v13975_v17 = vld [vmem:[#allocation96_spill] sm:$0xff]  ;;  %v3446_v57 = vpack.c.bf16 %v3415_v26, %v3414_v41  ;;  %v6046_v61 = vld [vmem:[#allocation2 + $0x263] sm:$0xff] }
 0x311   : > { %13970 = vst [vmem:[#allocation90_spill] sm:$0xff] %v11974_v54  ;;  %v2230_v32 = vpop.f32.mrf.mxu1  ;;  %v1906_v46 = vadd.f32 %v13975_v17, %v13974_v23  ;;  %v3416_v18 = vld [vmem:[#allocation2 + $0xb4] sm:$0xff]  ;;  %v13978_v8 = vld [vmem:[#allocation98_spill] sm:$0xff] }
 0x312   : > { %v11978_v37 = vadd.f32 %v2230_v32, %v1903_v2  ;;  %v11980_v15 = vpop.f32.mrf.mxu0  ;;  %v6047_v2 = vld [vmem:[#allocation2 + $0x26b] sm:$0xff]  ;;  %v6049_v17 = vld [vmem:[#allocation2 + $0x27b] sm:$0xff] }
 0x313   : > { %13973 = vst [vmem:[#allocation43_spill] sm:$0xff] %v11980_v15  ;;  %v9636_v27 = vpop.f32.mrf.mxu1  ;;  %v13977_v32 = vld [vmem:[#allocation51_spill] sm:$0xff] }
 0x314   : > { %v11984_v48 = vadd.f32 %v9636_v27, %v1914_v29  ;;  %v11986_v13 = vpop.f32.mrf.mxu0  ;;  %10114 = vmatmul.mubr.msk.bf16.gmra.mxu0 %vm1191_vm4, %v6066_v22  ;;  %v1927_v15 = vadd.f32 %v13978_v8, %v13977_v32  ;;  %v3447_v27 = vpack.c.bf16 %v3417_v50, %v3416_v18  ;;  %v6048_v29 = vld [vmem:[#allocation2 + $0x273] sm:$0xff]  ;;  %v13980_v22 = vld [vmem:[#allocation53_spill] sm:$0xff]  ;;  %v6068_v32 = vpack.c.bf16 %v6047_v2, %v6046_v61 }
 0x315   : > { %13976 = vst [vmem:[#allocation92_spill] sm:$0xff] %v11986_v13  ;;  %v2233_v45 = vpop.f32.mrf.mxu1  ;;  %10117 = vmatprep.mubr.msk.bf16.mxu0 %vm1191_vm4, %v6067_v9  ;;  %v1919_v26 = vadd.f32 %v11724_v12, %v13980_v22  ;;  %v3419_v18 = vld [vmem:[#allocation2 + $0xcc] sm:$0xff]  ;;  %v3420_v61 = vld [vmem:[#allocation2 + $0xd4] sm:$0xff]  ;;  %v6050_v2 = vld [vmem:[#allocation2 + $0x283] sm:$0xff] }
 0x316   : > { %v11992_v54 = vadd.f32 %v2233_v45, %v1906_v46  ;;  %v11994_v23 = vpop.f32.mrf.mxu0  ;;  %v6069_v45 = vpack.c.bf16 %v6049_v17, %v6048_v29 }
 0x317   : > { %13979 = vst [vmem:[#allocation46_spill] sm:$0xff] %v11994_v23  ;;  %v9639_v13 = vpop.f32.mrf.mxu1  ;;  %9790 = vmatmul.mubr.msk.bf16.gmra.mxu1 %vm1191_vm4, %v3446_v57  ;;  %v13983_v57 = vld [vmem:[#allocation56_spill] sm:$0xff] }
 0x318   : > { %v11999_v41 = vadd.f32 %v9639_v13, %v1927_v15  ;;  %9793 = vmatprep.mubr.msk.bf16.mxu1 %vm1191_vm4, %v3447_v27  ;;  %v12002_v9 = vpop.f32.mrf.mxu0  ;;  %v1922_v33 = vadd.f32 %v11731_v56, %v13983_v57  ;;  %v3418_v15 = vld [vmem:[#allocation2 + $0xc4] sm:$0xff] }
 0x319   : > { %13981 = vst [vmem:[#allocation94_spill] sm:$0xff] %v12002_v9  ;;  %v2246_v46 = vpop.f32.mrf.mxu1  ;;  %v3448_v27 = vpack.c.bf16 %v3419_v18, %v3418_v15  ;;  %v6745_v18 = vld [vmem:[#allocation2 + $0x174] sm:$0xff] }
 0x31a   : > { %v12004_v8 = vadd.f32 %v2246_v46, %v1919_v26  ;;  %v12006_v50 = vpop.f32.mrf.mxu0  ;;  %v6744_v46 = vld [vmem:[#allocation2 + $0x16c] sm:$0xff] }
 0x31b   : > { %13982 = vst [vmem:[#allocation49_spill] sm:$0xff] %v12006_v50  ;;  %v9640_v23 = vpop.f32.mrf.mxu1 }
 0x31c   : > { %v12010_v12 = vpop.f32.mrf.mxu0  ;;  %10118 = vmatmul.mubr.msk.bf16.gmra.mxu0 %vm1191_vm4, %v6068_v32  ;;  %v3449_v23 = vpack.c.bf16 %v3421_v40, %v3420_v61  ;;  %v6070_v32 = vpack.c.bf16 %v6050_v2, %v6050_v2  ;;  %v3423_v40 = vld [vmem:[#allocation2 + $0xec] sm:$0xff]  ;;  %v3422_v2 = vld [vmem:[#allocation2 + $0xe4] sm:$0xff] }
 0x31d   : > { %13984 = vst [vmem:[#allocation96_spill] sm:$0xff] %v12010_v12  ;;  %v2249_v13 = vpop.f32.mrf.mxu1  ;;  %10121 = vmatprep.mubr.msk.bf16.mxu0 %vm1191_vm4, %v6069_v45  ;;  %v4140_v12 = vld [vmem:[#allocation2 + $0x66] sm:$0xff] }
 0x31e   : > { %v12014_v29 = vadd.f32 %v2249_v13, %v1922_v33  ;;  %v12016_v17 = vpop.f32.mrf.mxu0  ;;  %v6783_v13 = vpack.c.bf16 %v6745_v18, %v6744_v46 }
 0x31f   : > { %13985 = vst [vmem:[#allocation51_spill] sm:$0xff] %v12016_v17  ;;  %v9647_v22 = vpop.f32.mrf.mxu1  ;;  %9794 = vmatmul.mubr.msk.bf16.gmra.mxu1 %vm1191_vm4, %v3448_v27  ;;  %v3425_v27 = vld [vmem:[#allocation2 + $0xfc] sm:$0xff] }
 0x320   : > { %v12020_v56 = vadd.f32 %v9647_v22, %v11741_v4  ;;  %9797 = vmatprep.mubr.msk.bf16.mxu1 %vm1191_vm4, %v3449_v23  ;;  %v12023_v26 = vpop.f32.mrf.mxu0  ;;  %v3450_v22 = vpack.c.bf16 %v3423_v40, %v3422_v2  ;;  %v6748_v40 = vld [vmem:[#allocation2 + $0x18c] sm:$0xff]  ;;  %v3429_v17 = vld [vmem:[#allocation2 + $0x11c] sm:$0xff] }
 0x321   : > { %13986 = vst [vmem:[#allocation98_spill] sm:$0xff] %v12023_v26  ;;  %v2469_v45 = vpop.f32.mrf.mxu1 }
 0x322   : > { %v12026_v33 = vadd.f32 %v2469_v45, %v11748_v53  ;;  %v12028_v57 = vpop.f32.mrf.mxu0  ;;  %v3424_v53 = vld [vmem:[#allocation2 + $0xf4] sm:$0xff] }
 0x323   : > { %13987 = vst [vmem:[#allocation53_spill] sm:$0xff] %v12028_v57  ;;  %v9648_v15 = vpop.f32.mrf.mxu1  ;;  %v3451_v46 = vpack.c.bf16 %v3425_v27, %v3424_v53  ;;  %v3427_v53 = vld [vmem:[#allocation2 + $0x10c] sm:$0xff] }
 0x324   : > { %v12031_v4 = vadd.f32 %v9648_v15, %v11754_v39  ;;  %v12033_v61 = vpop.f32.mrf.mxu0  ;;  %10122 = vmatmul.mubr.msk.bf16.gmra.mxu0 %vm1191_vm4, %v6070_v32  ;;  %v6746_v39 = vld [vmem:[#allocation2 + $0x17c] sm:$0xff]  ;;  %v6747_v15 = vld [vmem:[#allocation2 + $0x184] sm:$0xff] }
 0x325   : > { %13988 = vst [vmem:[#allocation56_spill] sm:$0xff] %v12033_v61  ;;  %v2472_v23 = vpop.f32.mrf.mxu1  ;;  %10173 = vmatprep.mubr.msk.bf16.mxu0 %vm1191_vm4, %v6783_v13  ;;  %v6749_v13 = vld [vmem:[#allocation2 + $0x194] sm:$0xff]  ;;  %v6784_v27 = vpack.c.bf16 %v6747_v15, %v6746_v39 }
 0x326   : > { %v12038_v45 = vadd.f32 %v2472_v23, %v11762_v55  ;;  %v12040_v57 = vpop.f32.mrf.mxu0  ;;  %v6785_v26 = vpack.c.bf16 %v6749_v13, %v6748_v40  ;;  %v6751_v13 = vld [vmem:[#allocation2 + $0x1a4] sm:$0xff] }
 0x327   : > { %13989 = vst [vmem:[#allocation111_spill] sm:$0xff] %v12040_v57  ;;  %v9651_v18 = vpop.f32.mrf.mxu1  ;;  %9798 = vmatmul.mubr.msk.bf16.gmra.mxu1 %vm1191_vm4, %v3450_v22  ;;  %v10432_v22 = vld [vmem:[#allocation9 + $0x80] sm:$0xff]  }
 0x328   : > { %v12044_v61 = vadd.f32 %v9651_v18, %v11769_v24  ;;  %9801 = vmatprep.mubr.msk.bf16.mxu1 %vm1191_vm4, %v3451_v46  ;;  %v12047_v32 = vpop.f32.mrf.mxu0  ;;  %v3426_v18 = vld [vmem:[#allocation2 + $0x104] sm:$0xff] }
 0x329   : > { %13990 = vst [vmem:[#allocation112_spill] sm:$0xff] %v12047_v32  ;;  %v2485_v2 = vpop.f32.mrf.mxu1 }
 0x32a   : > { %v12050_v55 = vadd.f32 %v2485_v2, %v11776_v35  ;;  %v12052_v23 = vpop.f32.mrf.mxu0  ;;  %v3452_v35 = vpack.c.bf16 %v3427_v53, %v3426_v18  ;;  %v3428_v2 = vld [vmem:[#allocation2 + $0x114] sm:$0xff] }
 0x32b   : > { %13991 = vst [vmem:[#allocation113_spill] sm:$0xff] %v12052_v23  ;;  %v9652_v57 = vpop.f32.mrf.mxu1  ;;  %v3453_v40 = vpack.c.bf16 %v3429_v17, %v3428_v2  ;;  %v6753_v53 = vld [vmem:[#allocation2 + $0x1b4] sm:$0xff] }
 0x32c   : > { %v12055_v24 = vadd.f32 %v9652_v57, %v11782_v47  ;;  %v12057_v46 = vpop.f32.mrf.mxu0  ;;  %10174 = vmatmul.mubr.msk.bf16.vlgmr.msra.gmra.mxu0 %vm1191_vm4, %v6784_v27  ;;  %v6750_v57 = vld [vmem:[#allocation2 + $0x19c] sm:$0xff] }
 0x32d   : > { %13992 = vst [vmem:[#allocation114_spill] sm:$0xff] %v12057_v46  ;;  %v2488_v32 = vpop.f32.mrf.mxu1  ;;  %10177 = vmatprep.mubr.msk.bf16.mxu0 %vm1191_vm4, %v6785_v26  ;;  %10258 = vmatpush3.bf16.msra.mxu0 %v11872_v14  ;;  %v6752_v14 = vld [vmem:[#allocation2 + $0x1ac] sm:$0xff]  ;;  %v6786_v18 = vpack.c.bf16 %v6751_v13, %v6750_v57  ;;  %v3433_v46 = vld [vmem:[#allocation2 + $0x13c] sm:$0xff] }
 0x32e   : > { %v12063_v39 = vadd.f32 %v2488_v32, %v11791_v10  ;;  %v12065_v15 = vpop.f32.mrf.mxu0  ;;  %10259 = vmatprep.subr.bf16.mxu0 %v10432_v22 }
 0x32f   : > { %13993 = vst [vmem:[#allocation115_spill] sm:$0xff] %v12065_v15  ;;  %v9655_v47 = vpop.f32.mrf.mxu1  ;;  %9802 = vmatmul.mubr.msk.bf16.gmra.mxu1 %vm1191_vm4, %v3452_v35  ;;  %v3431_v35 = vld [vmem:[#allocation2 + $0x12c] sm:$0xff]  ;;  %v6787_v15 = vpack.c.bf16 %v6753_v53, %v6752_v14  ;;  %v6755_v53 = vld [vmem:[#allocation2 + $0x1c4] sm:$0xff] }
 0x330   : > { %v12069_v27 = vadd.f32 %v9655_v47, %v11798_v58  ;;  %9805 = vmatprep.mubr.msk.bf16.mxu1 %vm1191_vm4, %v3453_v40  ;;  %v12072_v26 = vpop.f32.mrf.mxu0  ;;  %v3430_v47 = vld [vmem:[#allocation2 + $0x124] sm:$0xff] }
 0x331   : > { %13994 = vst [vmem:[#allocation116_spill] sm:$0xff] %v12072_v26  ;;  %v2501_v10 = vpop.f32.mrf.mxu1  ;;  %10260 = vmatpush3.bf16.msra.mxu0 %v10432_v22  ;;  %v3432_v22 = vld [vmem:[#allocation2 + $0x134] sm:$0xff] }
 0x332   : > { %v12075_v32 = vadd.f32 %v2501_v10, %v11805_v0  ;;  %v12077_v17 = vpop.f32.mrf.mxu0  ;;  %v3454_v0 = vpack.c.bf16 %v3431_v35, %v3430_v47  ;;  %v3455_v13 = vpack.c.bf16 %v3433_v46, %v3432_v22  ;;  %v6757_v35 = vld [vmem:[#allocation2 + $0x1d4] sm:$0xff]  ;;  %v3434_v22 = vld [vmem:[#allocation2 + $0x144] sm:$0xff] }
 0x333   : > { %13995 = vst [vmem:[#allocation117_spill] sm:$0xff] %v12077_v17  ;;  %v9656_v2 = vpop.f32.mrf.mxu1  ;;  %v3436_v17 = vld [vmem:[#allocation2 + $0x154] sm:$0xff] }
 0x334   : > { %v12080_v58 = vadd.f32 %v9656_v2, %v11811_v60  ;;  %v12082_v40 = vpop.f32.mrf.mxu0  ;;  %10178 = vmatmul.mubr.msk.bf16.gmra.mxu0 %vm1191_vm4, %v6786_v18  ;;  %v6754_v60 = vld [vmem:[#allocation2 + $0x1bc] sm:$0xff] }
 0x335   : > { %13996 = vst [vmem:[#allocation118_spill] sm:$0xff] %v12082_v40  ;;  %v2504_v26 = vpop.f32.mrf.mxu1  ;;  %10181 = vmatprep.mubr.msk.bf16.mxu0 %vm1191_vm4, %v6787_v15  ;;  %v6756_v15 = vld [vmem:[#allocation2 + $0x1cc] sm:$0xff]  ;;  %v6788_v46 = vpack.c.bf16 %v6755_v53, %v6754_v60 }
 0x336   : > { %v12087_v10 = vadd.f32 %v2504_v26, %v11819_v44  ;;  %v12089_v57 = vpop.f32.mrf.mxu0  ;;  %v6789_v40 = vpack.c.bf16 %v6757_v35, %v6756_v15  ;;  %v6758_v35 = vld [vmem:[#allocation2 + $0x1dc] sm:$0xff] }
 0x337   : > { %13997 = vst [vmem:[#allocation119_spill] sm:$0xff] %v12089_v57  ;;  %v9659_v14 = vpop.f32.mrf.mxu1  ;;  %9806 = vmatmul.mubr.msk.bf16.gmra.mxu1 %vm1191_vm4, %v3454_v0  ;;  %v3435_v0 = vld [vmem:[#allocation2 + $0x14c] sm:$0xff] }
 0x338   : > { %v12093_v2 = vadd.f32 %v9659_v14, %v11826_v21  ;;  %9809 = vmatprep.mubr.msk.bf16.mxu1 %vm1191_vm4, %v3455_v13  ;;  %v12096_v18 = vpop.f32.mrf.mxu0  ;;  %v3437_v21 = vld [vmem:[#allocation2 + $0x15c] sm:$0xff] }
 0x339   : > { %13998 = vst [vmem:[#allocation120_spill] sm:$0xff] %v12096_v18  ;;  %v2517_v47 = vpop.f32.mrf.mxu1  ;;  %v3457_v53 = vpack.c.bf16 %v3437_v21, %v3436_v17  ;;  %v3438_v21 = vld [vmem:[#allocation2 + $0x164] sm:$0xff] }
 0x33a   : > { %v12099_v44 = vadd.f32 %v2517_v47, %v11833_v51  ;;  %v12101_v26 = vpop.f32.mrf.mxu0  ;;  %v3456_v51 = vpack.c.bf16 %v3435_v0, %v3434_v22  ;;  %v6761_v22 = vld [vmem:[#allocation2 + $0x1f4] sm:$0xff] }
 0x33b   : > { %13999 = vst [vmem:[#allocation121_spill] sm:$0xff] %v12101_v26  ;;  %v9660_v57 = vpop.f32.mrf.mxu1 }
 0x33c   : > { %v12104_v14 = vadd.f32 %v9660_v57, %v11839_v6  ;;  %v12106_v13 = vpop.f32.mrf.mxu0  ;;  %10182 = vmatmul.mubr.msk.bf16.gmra.mxu0 %vm1191_vm4, %v6788_v46  ;;  %v6759_v6 = vld [vmem:[#allocation2 + $0x1e4] sm:$0xff] }
 0x33d   : > { %14000 = vst [vmem:[#allocation122_spill] sm:$0xff] %v12106_v13  ;;  %v2520_v18 = vpop.f32.mrf.mxu1  ;;  %10185 = vmatprep.mubr.msk.bf16.mxu0 %vm1191_vm4, %v6789_v40  ;;  %v6760_v40 = vld [vmem:[#allocation2 + $0x1ec] sm:$0xff]  ;;  %v6790_v17 = vpack.c.bf16 %v6759_v6, %v6758_v35  ;;  %v4135_v13 = vld [vmem:[#allocation2 + $0x3e] sm:$0xff] }
 0x33e   : > { %v12111_v47 = vadd.f32 %v2520_v18, %v11847_v43  ;;  %v12113_v60 = vpop.f32.mrf.mxu0 }
 0x33f   : > { %14001 = vst [vmem:[#allocation123_spill] sm:$0xff] %v12113_v60  ;;  %v9663_v15 = vpop.f32.mrf.mxu1  ;;  %9810 = vmatmul.mubr.msk.bf16.gmra.mxu1 %vm1191_vm4, %v3456_v51  ;;  %v6791_v60 = vpack.c.bf16 %v6761_v22, %v6760_v40  ;;  %v6763_v22 = vld [vmem:[#allocation2 + $0x204] sm:$0xff] }
 0x340   : > { %v12117_v57 = vadd.f32 %v9663_v15, %v11854_v25  ;;  %9813 = vmatprep.mubr.msk.bf16.mxu1 %vm1191_vm4, %v3457_v53  ;;  %v12120_v46 = vpop.f32.mrf.mxu0 }
 0x341   : > { %14002 = vst [vmem:[#allocation124_spill] sm:$0xff] %v12120_v46  ;;  %v2533_v0 = vpop.f32.mrf.mxu1  ;;  %v3458_v46 = vpack.c.bf16 %v3438_v21, %v3438_v21  ;;  %v6765_v21 = vld [vmem:[#allocation2 + $0x214] sm:$0xff] }
 0x342   : > { %v12123_v43 = vadd.f32 %v2533_v0, %v11861_v62  ;;  %v12125_v18 = vpop.f32.mrf.mxu0  ;;  %v4134_v62 = vld [vmem:[#allocation2 + $0x36] sm:$0xff] }
 0x343   : > { %14003 = vst [vmem:[#allocation125_spill] sm:$0xff] %v12125_v18  ;;  %v9664_v51 = vpop.f32.mrf.mxu1  ;;  %v4173_v6 = vpack.c.bf16 %v4135_v13, %v4134_v62  ;;  %v4137_v62 = vld [vmem:[#allocation2 + $0x4e] sm:$0xff]  ;;  %v4139_v18 = vld [vmem:[#allocation2 + $0x5e] sm:$0xff] }
 0x344   : > { %v12128_v25 = vadd.f32 %v9664_v51, %v11867_v5  ;;  %v12130_v15 = vpop.f32.mrf.mxu0  ;;  %10186 = vmatmul.mubr.msk.bf16.gmra.mxu0 %vm1191_vm4, %v6790_v17  ;;  %v6762_v5 = vld [vmem:[#allocation2 + $0x1fc] sm:$0xff] }
 0x345   : > { %14004 = vst [vmem:[#allocation126_spill] sm:$0xff] %v12130_v15  ;;  %v2536_v53 = vpop.f32.mrf.mxu1  ;;  %10189 = vmatprep.mubr.msk.bf16.mxu0 %vm1191_vm4, %v6791_v60  ;;  %v6764_v60 = vld [vmem:[#allocation2 + $0x20c] sm:$0xff]  ;;  %v6792_v13 = vpack.c.bf16 %v6763_v22, %v6762_v5 }
 0x346   : > { %v12135_v0 = vadd.f32 %v2536_v53, %v11877_v49  ;;  %v12137_v35 = vpop.f32.mrf.mxu0 }
 0x347   : > { %14005 = vst [vmem:[#allocation127_spill] sm:$0xff] %v12137_v35  ;;  %v9667_v40 = vpop.f32.mrf.mxu1  ;;  %9814 = vmatmul.mubr.msk.bf16.gmra.mxu1 %vm1191_vm4, %v3458_v46  ;;  %v6793_v46 = vpack.c.bf16 %v6765_v21, %v6764_v60 }
 0x348   : > { %v12141_v51 = vadd.f32 %v9667_v40, %v11885_v19  ;;  %9865 = vmatprep.mubr.msk.bf16.mxu1 %vm1191_vm4, %v4173_v6  ;;  %v9948_v17 = vpop.f32.mrf.mxu0  ;;  %v4136_v6 = vld [vmem:[#allocation2 + $0x46] sm:$0xff] }
 0x349   : > { %v2549_v15 = vpop.f32.mrf.mxu1  ;;  %v10431_v17 = vld [vmem:[#allocation9] sm:$0xff]  }
 0x34a   : > { %v12145_v49 = vadd.f32 %v2549_v15, %v11890_v34  ;;  %v12147_v53 = vpop.f32.mrf.mxu0  ;;  %v4174_v34 = vpack.c.bf16 %v4137_v62, %v4136_v6  ;;  %v4138_v15 = vld [vmem:[#allocation2 + $0x56] sm:$0xff] }
 0x34b   : > { %14006 = vst [vmem:[#allocation128_spill] sm:$0xff] %v12147_v53  ;;  %v9668_v35 = vpop.f32.mrf.mxu1  ;;  %v4175_v60 = vpack.c.bf16 %v4139_v18, %v4138_v15 }
 0x34c   : > { %v12150_v26 = vadd.f32 %v9668_v35, %v11896_v3  ;;  %v12152_v19 = vpop.f32.mrf.mxu0  ;;  %10190 = vmatmul.mubr.msk.bf16.gmra.mxu0 %vm1191_vm4, %v6792_v13  ;;  %v6766_v3 = vld [vmem:[#allocation2 + $0x21c] sm:$0xff]  ;;  %v6767_v35 = vld [vmem:[#allocation2 + $0x224] sm:$0xff] }
 0x34d   : > { %v2552_v40 = vpop.f32.mrf.mxu1  ;;  %10193 = vmatprep.mubr.msk.bf16.mxu0 %vm1191_vm4, %v6793_v46  ;;  %v6768_v46 = vld [vmem:[#allocation2 + $0x22c] sm:$0xff]  ;;  %v6794_v15 = vpack.c.bf16 %v6767_v35, %v6766_v3 }
 0x34e   : > { %v12157_v5 = vadd.f32 %v2552_v40, %v11904_v7  ;;  %v12159_v22 = vpop.f32.mrf.mxu0  ;;  %v6769_v7 = vld [vmem:[#allocation2 + $0x234] sm:$0xff] }
 0x34f   : > { %v9671_v21 = vpop.f32.mrf.mxu1  ;;  %9866 = vmatmul.mubr.msk.bf16.vlgmr.msra.gmra.mxu1 %vm1191_vm4, %v4174_v34  ;;  %v12169_v40 = vld [vmem:[#allocation9 + $0x38] sm:$0xff]   ;;  %v6795_v53 = vpack.c.bf16 %v6769_v7, %v6768_v46  ;;  %v6770_v7 = vld [vmem:[#allocation2 + $0x23c] sm:$0xff] }
 0x350   : > { %v12163_v13 = vadd.f32 %v9671_v21, %v11911_v42  ;;  %9950 = vmatpush3.bf16.msra.mxu1 %v11917_v38  ;;  %9869 = vmatprep.mubr.msk.bf16.mxu1 %vm1191_vm4, %v4175_v60  ;;  %v12167_v62 = vpop.f32.mrf.mxu0  ;;  %v4141_v42 = vld [vmem:[#allocation2 + $0x6e] sm:$0xff]  ;;  %v4143_v38 = vld [vmem:[#allocation2 + $0x7e] sm:$0xff] }
 0x351   : > { %14007 = vst [vmem:[#allocation129_spill] sm:$0xff] %v12167_v62  ;;  %v2565_v6 = vpop.f32.mrf.mxu1  ;;  %9951 = vmatprep.subr.bf16.mxu1 %v10431_v17 }
 0x352   : > { %v12172_v18 = vadd.f32 %v2565_v6, %v11921_v52  ;;  %v12174_v34 = vpop.f32.mrf.mxu0  ;;  %v4176_v52 = vpack.c.bf16 %v4141_v42, %v4140_v12  ;;  %v4142_v6 = vld [vmem:[#allocation2 + $0x76] sm:$0xff] }
 0x353   : > { %14008 = vst [vmem:[#allocation130_spill] sm:$0xff] %v12174_v34  ;;  %v9672_v21 = vpop.f32.mrf.mxu1  ;;  %v6773_v42 = vld [vmem:[#allocation2 + $0x254] sm:$0xff] }
 0x354   : > { %v12177_v60 = vadd.f32 %v9672_v21, %v11927_v1  ;;  %v12179_v23 = vpop.f32.mrf.mxu0  ;;  %10194 = vmatmul.mubr.msk.bf16.gmra.mxu0 %vm1191_vm4, %v6794_v15  ;;  %9952 = vmatpush3.bf16.msra.mxu1 %v10431_v17  ;;  %v4177_v1 = vpack.c.bf16 %v4143_v38, %v4142_v6  ;;  %v6771_v15 = vld [vmem:[#allocation2 + $0x244] sm:$0xff]  ;;  %v4145_v6 = vld [vmem:[#allocation2 + $0x8e] sm:$0xff]  ;;  %v4154_v34 = vld [vmem:[#allocation2 + $0xd6] sm:$0xff] }
 0x355   : > { %14009 = vst [vmem:[#allocation131_spill] sm:$0xff] %v12179_v23  ;;  %v2568_v50 = vpop.f32.mrf.mxu1  ;;  %10197 = vmatprep.mubr.msk.bf16.mxu0 %vm1191_vm4, %v6795_v53  ;;  %10037 = vmatprep.subr.bf16.mxu1 %v12169_v40  ;;  %v6772_v53 = vld [vmem:[#allocation2 + $0x24c] sm:$0xff]  ;;  %v6796_v38 = vpack.c.bf16 %v6771_v15, %v6770_v7 }
 0x356   : > { %v12185_v3 = vadd.f32 %v2568_v50, %v11936_v31  ;;  %v12187_v35 = vpop.f32.mrf.mxu0  ;;  %v6797_v9 = vpack.c.bf16 %v6773_v42, %v6772_v53  ;;  %v6775_v42 = vld [vmem:[#allocation2 + $0x264] sm:$0xff] }
 0x357   : > { %14010 = vst [vmem:[#allocation132_spill] sm:$0xff] %v12187_v35  ;;  %v9675_v46 = vpop.f32.mrf.mxu1  ;;  %9870 = vmatmul.mubr.msk.bf16.gmra.mxu1 %vm1191_vm4, %v4176_v52  ;;  %v4147_v35 = vld [vmem:[#allocation2 + $0x9e] sm:$0xff] }
 0x358   : > { %v12191_v17 = vadd.f32 %v9675_v46, %v11943_v59  ;;  %9873 = vmatprep.mubr.msk.bf16.mxu1 %vm1191_vm4, %v4177_v1  ;;  %v12194_v12 = vpop.f32.mrf.mxu0  ;;  %v4144_v1 = vld [vmem:[#allocation2 + $0x86] sm:$0xff] }
 0x359   : > { %14011 = vst [vmem:[#allocation133_spill] sm:$0xff] %v12194_v12  ;;  %v2581_v21 = vpop.f32.mrf.mxu1 }
 0x35a   : > { %v12197_v31 = vadd.f32 %v2581_v21, %v11950_v36  ;;  %v12199_v50 = vpop.f32.mrf.mxu0  ;;  %v4178_v36 = vpack.c.bf16 %v4145_v6, %v4144_v1  ;;  %v4146_v21 = vld [vmem:[#allocation2 + $0x96] sm:$0xff] }
 0x35b   : > { %14012 = vst [vmem:[#allocation134_spill] sm:$0xff] %v12199_v50  ;;  %v9676_v52 = vpop.f32.mrf.mxu1  ;;  %v4179_v15 = vpack.c.bf16 %v4147_v35, %v4146_v21  ;;  %v6777_v6 = vld [vmem:[#allocation2 + $0x274] sm:$0xff] }
 0x35c   : > { %v12202_v59 = vadd.f32 %v9676_v52, %v11956_v63  ;;  %v12204_v46 = vpop.f32.mrf.mxu0  ;;  %10198 = vmatmul.mubr.msk.bf16.gmra.mxu0 %vm1191_vm4, %v6796_v38  ;;  %v6774_v63 = vld [vmem:[#allocation2 + $0x25c] sm:$0xff]  ;;  %v4149_v21 = vld [vmem:[#allocation2 + $0xae] sm:$0xff] }
 0x35d   : > { %14013 = vst [vmem:[#allocation135_spill] sm:$0xff] %v12204_v46  ;;  %v2584_v12 = vpop.f32.mrf.mxu1  ;;  %10201 = vmatprep.mubr.msk.bf16.mxu0 %vm1191_vm4, %v6797_v9  ;;  %v6776_v9 = vld [vmem:[#allocation2 + $0x26c] sm:$0xff]  ;;  %v6798_v35 = vpack.c.bf16 %v6775_v42, %v6774_v63  ;;  %v4151_v46 = vld [vmem:[#allocation2 + $0xbe] sm:$0xff] }
 0x35e   : > { %v12209_v50 = vadd.f32 %v2584_v12, %v11964_v30  ;;  %v12211_v7 = vpop.f32.mrf.mxu0 }
 0x35f   : > { %14014 = vst [vmem:[#allocation136_spill] sm:$0xff] %v12211_v7  ;;  %v9679_v53 = vpop.f32.mrf.mxu1  ;;  %9874 = vmatmul.mubr.msk.bf16.gmra.mxu1 %vm1191_vm4, %v4178_v36  ;;  %v6799_v7 = vpack.c.bf16 %v6777_v6, %v6776_v9  ;;  %v6780_v9 = vld [vmem:[#allocation2 + $0x28c] sm:$0xff]  ;;  %v6781_v6 = vld [vmem:[#allocation2 + $0x294] sm:$0xff] }
 0x360   : > { %v12215_v52 = vadd.f32 %v9679_v53, %v11971_v28  ;;  %9877 = vmatprep.mubr.msk.bf16.mxu1 %vm1191_vm4, %v4179_v15  ;;  %v12218_v38 = vpop.f32.mrf.mxu0  ;;  %v4148_v15 = vld [vmem:[#allocation2 + $0xa6] sm:$0xff] }
 0x361   : > { %14015 = vst [vmem:[#allocation137_spill] sm:$0xff] %v12218_v38  ;;  %v2597_v1 = vpop.f32.mrf.mxu1 }
 0x362   : > { %v12221_v30 = vadd.f32 %v2597_v1, %v11978_v37  ;;  %v12223_v12 = vpop.f32.mrf.mxu0  ;;  %v4180_v37 = vpack.c.bf16 %v4149_v21, %v4148_v15  ;;  %v4150_v1 = vld [vmem:[#allocation2 + $0xb6] sm:$0xff] }
 0x363   : > { %14016 = vst [vmem:[#allocation138_spill] sm:$0xff] %v12223_v12  ;;  %v9680_v36 = vpop.f32.mrf.mxu1  ;;  %v4181_v42 = vpack.c.bf16 %v4151_v46, %v4150_v1  ;;  %v4153_v1 = vld [vmem:[#allocation2 + $0xce] sm:$0xff] }
 0x364   : > { %v12226_v28 = vadd.f32 %v9680_v36, %v11984_v48  ;;  %v12228_v53 = vpop.f32.mrf.mxu0  ;;  %10202 = vmatmul.mubr.msk.bf16.gmra.mxu0 %vm1191_vm4, %v6798_v35  ;;  %v6778_v36 = vld [vmem:[#allocation2 + $0x27c] sm:$0xff] }
 0x365   : > { %14017 = vst [vmem:[#allocation139_spill] sm:$0xff] %v12228_v53  ;;  %v2600_v38 = vpop.f32.mrf.mxu1  ;;  %10205 = vmatprep.mubr.msk.bf16.mxu0 %vm1191_vm4, %v6799_v7  ;;  %v6779_v53 = vld [vmem:[#allocation2 + $0x284] sm:$0xff] }
 0x366   : > { %v12233_v12 = vadd.f32 %v2600_v38, %v11992_v54  ;;  %v12235_v63 = vpop.f32.mrf.mxu0  ;;  %v6801_v54 = vpack.c.bf16 %v6781_v6, %v6780_v9  ;;  %v6800_v15 = vpack.c.bf16 %v6779_v53, %v6778_v36 }
 0x367   : > { %14018 = vst [vmem:[#allocation140_spill] sm:$0xff] %v12235_v63  ;;  %v9683_v48 = vpop.f32.mrf.mxu1  ;;  %9878 = vmatmul.mubr.msk.bf16.gmra.mxu1 %vm1191_vm4, %v4180_v37  ;;  %v4155_v37 = vld [vmem:[#allocation2 + $0xde] sm:$0xff] }
 0x368   : > { %v12239_v35 = vadd.f32 %v9683_v48, %v11999_v41  ;;  %9881 = vmatprep.mubr.msk.bf16.mxu1 %vm1191_vm4, %v4181_v42  ;;  %v12242_v7 = vpop.f32.mrf.mxu0  ;;  %v4152_v41 = vld [vmem:[#allocation2 + $0xc6] sm:$0xff]  ;;  %v4183_v6 = vpack.c.bf16 %v4155_v37, %v4154_v34  ;;  %v4157_v37 = vld [vmem:[#allocation2 + $0xee] sm:$0xff] }
 0x369   : > { %14019 = vst [vmem:[#allocation141_spill] sm:$0xff] %v12242_v7  ;;  %v2613_v21 = vpop.f32.mrf.mxu1  ;;  %v4182_v42 = vpack.c.bf16 %v4153_v1, %v4152_v41  ;;  %v7477_v1 = vld [vmem:[#allocation2 + $0x176] sm:$0xff]  ;;  %v4631_v7 = vld [vmem:[#allocation2 + $0x160] sm:$0xff] }
 0x36a   : > { %v12245_v38 = vadd.f32 %v2613_v21, %v12004_v8  ;;  %v12247_v46 = vpop.f32.mrf.mxu0 }
 0x36b   : > { %14020 = vst [vmem:[#allocation142_spill] sm:$0xff] %v12247_v46  ;;  %v9684_v63 = vpop.f32.mrf.mxu1  ;;  %v4170_v46 = vld [vmem:[#allocation2 + $0x156] sm:$0xff] }
 0x36c   : > { %v12249_v23 = vpop.f32.mrf.mxu0  ;;  %10206 = vmatmul.mubr.msk.bf16.gmra.mxu0 %vm1191_vm4, %v6800_v15  ;;  %v6782_v63 = vld [vmem:[#allocation2 + $0x29c] sm:$0xff]  ;;  %v7476_v15 = vld [vmem:[#allocation2 + $0x16e] sm:$0xff] }
 0x36d   : > { %14021 = vst [vmem:[#allocation143_spill] sm:$0xff] %v12249_v23  ;;  %v2616_v48 = vpop.f32.mrf.mxu1  ;;  %10209 = vmatprep.mubr.msk.bf16.mxu0 %vm1191_vm4, %v6801_v54  ;;  %v6802_v34 = vpack.c.bf16 %v6782_v63, %v6782_v63  ;;  %v4163_v23 = vld [vmem:[#allocation2 + $0x11e] sm:$0xff] }
 0x36e   : > { %v12254_v9 = vadd.f32 %v2616_v48, %v12014_v29  ;;  %v12256_v8 = vpop.f32.mrf.mxu0 }
 0x36f   : > { %14022 = vst [vmem:[#allocation144_spill] sm:$0xff] %v12256_v8  ;;  %v9691_v53 = vpop.f32.mrf.mxu1  ;;  %9882 = vmatmul.mubr.msk.bf16.gmra.mxu1 %vm1191_vm4, %v4182_v42  ;;  %v7515_v42 = vpack.c.bf16 %v7477_v1, %v7476_v15  ;;  %v4159_v8 = vld [vmem:[#allocation2 + $0xfe] sm:$0xff] }
 0x370   : > { %v12260_v36 = vadd.f32 %v9691_v53, %v12020_v56  ;;  %9885 = vmatprep.mubr.msk.bf16.mxu1 %vm1191_vm4, %v4183_v6  ;;  %v12263_v21 = vpop.f32.mrf.mxu0  ;;  %v4156_v6 = vld [vmem:[#allocation2 + $0xe6] sm:$0xff] }
 0x371   : > { %14023 = vst [vmem:[#allocation145_spill] sm:$0xff] %v12263_v21  ;;  %v2836_v54 = vpop.f32.mrf.mxu1 }
 0x372   : > { %v12266_v29 = vadd.f32 %v2836_v54, %v12026_v33  ;;  %v12268_v41 = vpop.f32.mrf.mxu0  ;;  %v4184_v33 = vpack.c.bf16 %v4157_v37, %v4156_v6  ;;  %v4158_v54 = vld [vmem:[#allocation2 + $0xf6] sm:$0xff]  ;;  %v7480_v37 = vld [vmem:[#allocation2 + $0x18e] sm:$0xff] }
 0x373   : > { %14024 = vst [vmem:[#allocation146_spill] sm:$0xff] %v12268_v41  ;;  %v9692_v48 = vpop.f32.mrf.mxu1  ;;  %v4185_v15 = vpack.c.bf16 %v4159_v8, %v4158_v54  ;;  %v4161_v54 = vld [vmem:[#allocation2 + $0x10e] sm:$0xff] }
 0x374   : > { %v12271_v56 = vadd.f32 %v9692_v48, %v12031_v4  ;;  %v12273_v53 = vpop.f32.mrf.mxu0  ;;  %10210 = vmatmul.mubr.msk.bf16.gmra.mxu0 %vm1191_vm4, %v6802_v34  ;;  %v7478_v4 = vld [vmem:[#allocation2 + $0x17e] sm:$0xff]  ;;  %v7479_v48 = vld [vmem:[#allocation2 + $0x186] sm:$0xff] }
 0x375   : > { %14025 = vst [vmem:[#allocation147_spill] sm:$0xff] %v12273_v53  ;;  %v2839_v21 = vpop.f32.mrf.mxu1  ;;  %10261 = vmatprep.mubr.msk.bf16.mxu0 %vm1191_vm4, %v7515_v42  ;;  %v7481_v42 = vld [vmem:[#allocation2 + $0x196] sm:$0xff]  ;;  %v7516_v8 = vpack.c.bf16 %v7479_v48, %v7478_v4 }
 0x376   : > { %v12278_v41 = vadd.f32 %v2839_v21, %v12038_v45  ;;  %v12280_v63 = vpop.f32.mrf.mxu0 }
 0x377   : > { %14026 = vst [vmem:[#allocation148_spill] sm:$0xff] %v12280_v63  ;;  %v9695_v1 = vpop.f32.mrf.mxu1  ;;  %9886 = vmatmul.mubr.msk.bf16.gmra.mxu1 %vm1191_vm4, %v4184_v33  ;;  %v7517_v63 = vpack.c.bf16 %v7481_v42, %v7480_v37  ;;  %v7483_v42 = vld [vmem:[#allocation2 + $0x1a6] sm:$0xff] }
 0x378   : > { %v12284_v53 = vadd.f32 %v9695_v1, %v12044_v61  ;;  %9889 = vmatprep.mubr.msk.bf16.mxu1 %vm1191_vm4, %v4185_v15  ;;  %v12287_v34 = vpop.f32.mrf.mxu0  ;;  %v4160_v15 = vld [vmem:[#allocation2 + $0x106] sm:$0xff] }
 0x379   : > { %14027 = vst [vmem:[#allocation149_spill] sm:$0xff] %v12287_v34  ;;  %v2852_v6 = vpop.f32.mrf.mxu1 }
 0x37a   : > { %v12290_v45 = vadd.f32 %v2852_v6, %v12050_v55  ;;  %v12292_v21 = vpop.f32.mrf.mxu0  ;;  %v4186_v55 = vpack.c.bf16 %v4161_v54, %v4160_v15  ;;  %v4162_v6 = vld [vmem:[#allocation2 + $0x116] sm:$0xff] }
 0x37b   : > { %14028 = vst [vmem:[#allocation150_spill] sm:$0xff] %v12292_v21  ;;  %v9696_v33 = vpop.f32.mrf.mxu1  ;;  %v4187_v48 = vpack.c.bf16 %v4163_v23, %v4162_v6  ;;  %v7485_v54 = vld [vmem:[#allocation2 + $0x1b6] sm:$0xff]  ;;  %v4165_v6 = vld [vmem:[#allocation2 + $0x12e] sm:$0xff] }
 0x37c   : > { %v12295_v61 = vadd.f32 %v9696_v33, %v12055_v24  ;;  %v12297_v1 = vpop.f32.mrf.mxu0  ;;  %10262 = vmatmul.mubr.msk.bf16.vlgmr.msra.gmra.mxu0 %vm1191_vm4, %v7516_v8  ;;  %v7482_v24 = vld [vmem:[#allocation2 + $0x19e] sm:$0xff] }
 0x37d   : > { %14029 = vst [vmem:[#allocation151_spill] sm:$0xff] %v12297_v1  ;;  %v2855_v34 = vpop.f32.mrf.mxu1  ;;  %10265 = vmatprep.mubr.msk.bf16.mxu0 %vm1191_vm4, %v7517_v63  ;;  %v7484_v63 = vld [vmem:[#allocation2 + $0x1ae] sm:$0xff]  ;;  %v7518_v23 = vpack.c.bf16 %v7483_v42, %v7482_v24  ;;  %v4167_v1 = vld [vmem:[#allocation2 + $0x13e] sm:$0xff] }
 0x37e   : > { %v12302_v21 = vadd.f32 %v2855_v34, %v12063_v39  ;;  %v12304_v4 = vpop.f32.mrf.mxu0 }
 0x37f   : > { %14030 = vst [vmem:[#allocation152_spill] sm:$0xff] %v12304_v4  ;;  %v9699_v37 = vpop.f32.mrf.mxu1  ;;  %9890 = vmatmul.mubr.msk.bf16.gmra.mxu1 %vm1191_vm4, %v4186_v55  ;;  %v7519_v4 = vpack.c.bf16 %v7485_v54, %v7484_v63  ;;  %v7487_v54 = vld [vmem:[#allocation2 + $0x1c6] sm:$0xff] }
 0x380   : > { %v12308_v33 = vadd.f32 %v9699_v37, %v12069_v27  ;;  %9893 = vmatprep.mubr.msk.bf16.mxu1 %vm1191_vm4, %v4187_v48  ;;  %v12311_v8 = vpop.f32.mrf.mxu0  ;;  %v4164_v48 = vld [vmem:[#allocation2 + $0x126] sm:$0xff] }
 0x381   : > { %14031 = vst [vmem:[#allocation153_spill] sm:$0xff] %v12311_v8  ;;  %v2868_v15 = vpop.f32.mrf.mxu1 }
 0x382   : > { %v12314_v39 = vadd.f32 %v2868_v15, %v12075_v32  ;;  %v12316_v34 = vpop.f32.mrf.mxu0  ;;  %v4188_v32 = vpack.c.bf16 %v4165_v6, %v4164_v48  ;;  %v4166_v15 = vld [vmem:[#allocation2 + $0x136] sm:$0xff] }
 0x383   : > { %14032 = vst [vmem:[#allocation154_spill] sm:$0xff] %v12316_v34  ;;  %v9700_v55 = vpop.f32.mrf.mxu1  ;;  %v4189_v42 = vpack.c.bf16 %v4167_v1, %v4166_v15  ;;  %v7489_v6 = vld [vmem:[#allocation2 + $0x1d6] sm:$0xff]  ;;  %v4168_v15 = vld [vmem:[#allocation2 + $0x146] sm:$0xff] }
 0x384   : > { %v12319_v27 = vadd.f32 %v9700_v55, %v12080_v58  ;;  %v12321_v37 = vpop.f32.mrf.mxu0  ;;  %10266 = vmatmul.mubr.msk.bf16.gmra.mxu0 %vm1191_vm4, %v7518_v23  ;;  %v7486_v58 = vld [vmem:[#allocation2 + $0x1be] sm:$0xff] }
 0x385   : > { %14033 = vst [vmem:[#allocation155_spill] sm:$0xff] %v12321_v37  ;;  %v2871_v8 = vpop.f32.mrf.mxu1  ;;  %10269 = vmatprep.mubr.msk.bf16.mxu0 %vm1191_vm4, %v7519_v4  ;;  %v7488_v4 = vld [vmem:[#allocation2 + $0x1ce] sm:$0xff]  ;;  %v7520_v1 = vpack.c.bf16 %v7487_v54, %v7486_v58 }
 0x386   : > { %v12326_v34 = vadd.f32 %v2871_v8, %v12087_v10  ;;  %v12328_v24 = vpop.f32.mrf.mxu0  ;;  %v7521_v37 = vpack.c.bf16 %v7489_v6, %v7488_v4  ;;  %v7490_v6 = vld [vmem:[#allocation2 + $0x1de] sm:$0xff] }
 0x387   : > { %14034 = vst [vmem:[#allocation156_spill] sm:$0xff] %v12328_v24  ;;  %v9703_v63 = vpop.f32.mrf.mxu1  ;;  %9894 = vmatmul.mubr.msk.bf16.gmra.mxu1 %vm1191_vm4, %v4188_v32  ;;  %v4169_v32 = vld [vmem:[#allocation2 + $0x14e] sm:$0xff] }
 0x388   : > { %v12332_v55 = vadd.f32 %v9703_v63, %v12093_v2  ;;  %9897 = vmatprep.mubr.msk.bf16.mxu1 %vm1191_vm4, %v4189_v42  ;;  %v12335_v23 = vpop.f32.mrf.mxu0  ;;  %v4171_v2 = vld [vmem:[#allocation2 + $0x15e] sm:$0xff] }
 0x389   : > { %14035 = vst [vmem:[#allocation157_spill] sm:$0xff] %v12335_v23  ;;  %v2884_v48 = vpop.f32.mrf.mxu1  ;;  %v4191_v54 = vpack.c.bf16 %v4171_v2, %v4170_v46  ;;  %v4172_v2 = vld [vmem:[#allocation2 + $0x166] sm:$0xff] }
 0x38a   : > { %v12338_v10 = vadd.f32 %v2884_v48, %v12099_v44  ;;  %v12340_v8 = vpop.f32.mrf.mxu0  ;;  %v4190_v44 = vpack.c.bf16 %v4169_v32, %v4168_v15  ;;  %v7493_v15 = vld [vmem:[#allocation2 + $0x1f6] sm:$0xff] }
 0x38b   : > { %14036 = vst [vmem:[#allocation158_spill] sm:$0xff] %v12340_v8  ;;  %v9704_v24 = vpop.f32.mrf.mxu1  ;;  %v4630_v8 = vld [vmem:[#allocation2 + $0x158] sm:$0xff] }
 0x38c   : > { %v12343_v63 = vadd.f32 %v9704_v24, %v12104_v14  ;;  %v12345_v42 = vpop.f32.mrf.mxu0  ;;  %10270 = vmatmul.mubr.msk.bf16.gmra.mxu0 %vm1191_vm4, %v7520_v1  ;;  %v7491_v14 = vld [vmem:[#allocation2 + $0x1e6] sm:$0xff] }
 0x38d   : > { %14037 = vst [vmem:[#allocation159_spill] sm:$0xff] %v12345_v42  ;;  %v2887_v23 = vpop.f32.mrf.mxu1  ;;  %10273 = vmatprep.mubr.msk.bf16.mxu0 %vm1191_vm4, %v7521_v37  ;;  %v7492_v37 = vld [vmem:[#allocation2 + $0x1ee] sm:$0xff]  ;;  %v7522_v46 = vpack.c.bf16 %v7491_v14, %v7490_v6  ;;  %v4627_v42 = vld [vmem:[#allocation2 + $0x140] sm:$0xff] }
 0x38e   : > { %v12350_v48 = vadd.f32 %v2887_v23, %v12111_v47  ;;  %v12352_v58 = vpop.f32.mrf.mxu0 }
 0x38f   : > { %14038 = vst [vmem:[#allocation160_spill] sm:$0xff] %v12352_v58  ;;  %v9707_v4 = vpop.f32.mrf.mxu1  ;;  %9898 = vmatmul.mubr.msk.bf16.gmra.mxu1 %vm1191_vm4, %v4190_v44  ;;  %v7523_v58 = vpack.c.bf16 %v7493_v15, %v7492_v37  ;;  %v7495_v15 = vld [vmem:[#allocation2 + $0x206] sm:$0xff] }
 0x390   : > { %v12356_v24 = vadd.f32 %v9707_v4, %v12117_v57  ;;  %9901 = vmatprep.mubr.msk.bf16.mxu1 %vm1191_vm4, %v4191_v54  ;;  %v12359_v1 = vpop.f32.mrf.mxu0 }
 0x391   : > { %14039 = vst [vmem:[#allocation161_spill] sm:$0xff] %v12359_v1  ;;  %v2900_v32 = vpop.f32.mrf.mxu1  ;;  %v4192_v1 = vpack.c.bf16 %v4172_v2, %v4172_v2  ;;  %v7497_v2 = vld [vmem:[#allocation2 + $0x216] sm:$0xff] }
 0x392   : > { %v12362_v47 = vadd.f32 %v2900_v32, %v12123_v43  ;;  %v12364_v23 = vpop.f32.mrf.mxu0  ;;  %v4626_v43 = vld [vmem:[#allocation2 + $0x138] sm:$0xff] }
 0x393   : > { %14040 = vst [vmem:[#allocation162_spill] sm:$0xff] %v12364_v23  ;;  %v9708_v44 = vpop.f32.mrf.mxu1  ;;  %v4665_v14 = vpack.c.bf16 %v4627_v42, %v4626_v43  ;;  %v4628_v43 = vld [vmem:[#allocation2 + $0x148] sm:$0xff] }
 0x394   : > { %v12367_v57 = vadd.f32 %v9708_v44, %v12128_v25  ;;  %v12369_v4 = vpop.f32.mrf.mxu0  ;;  %10274 = vmatmul.mubr.msk.bf16.gmra.mxu0 %vm1191_vm4, %v7522_v46  ;;  %v7494_v25 = vld [vmem:[#allocation2 + $0x1fe] sm:$0xff] }
 0x395   : > { %14041 = vst [vmem:[#allocation163_spill] sm:$0xff] %v12369_v4  ;;  %v2903_v54 = vpop.f32.mrf.mxu1  ;;  %10277 = vmatprep.mubr.msk.bf16.mxu0 %vm1191_vm4, %v7523_v58  ;;  %v7496_v58 = vld [vmem:[#allocation2 + $0x20e] sm:$0xff]  ;;  %v7524_v42 = vpack.c.bf16 %v7495_v15, %v7494_v25 }
 0x396   : > { %v12374_v32 = vadd.f32 %v2903_v54, %v12135_v0  ;;  %v12376_v6 = vpop.f32.mrf.mxu0  ;;  %v7525_v23 = vpack.c.bf16 %v7497_v2, %v7496_v58  ;;  %v7499_v2 = vld [vmem:[#allocation2 + $0x226] sm:$0xff] }
 0x397   : > { %14042 = vst [vmem:[#allocation164_spill] sm:$0xff] %v12376_v6  ;;  %v9711_v37 = vpop.f32.mrf.mxu1  ;;  %9902 = vmatmul.mubr.msk.bf16.gmra.mxu1 %vm1191_vm4, %v4192_v1  ;;  %v4629_v6 = vld [vmem:[#allocation2 + $0x150] sm:$0xff] }
 0x398   : > { %v12380_v44 = vadd.f32 %v9711_v37, %v12141_v51  ;;  %9953 = vmatprep.mubr.msk.bf16.mxu1 %vm1191_vm4, %v4665_v14  ;;  %v10036_v46 = vpop.f32.mrf.mxu0 }
 0x399   : > { %v2916_v4 = vpop.f32.mrf.mxu1  ;;  %v4667_v46 = vpack.c.bf16 %v4631_v7, %v4630_v8 }
 0x39a   : > { %v12384_v0 = vadd.f32 %v2916_v4, %v12145_v49  ;;  %v12386_v54 = vpop.f32.mrf.mxu0  ;;  %v4666_v49 = vpack.c.bf16 %v4629_v6, %v4628_v43  ;;  %v10434_v4 = vld [vmem:[#allocation9 + $0x30] sm:$0xff]   ;;  %v12408_v43 = vld [vmem:[#allocation9 + $0x58] sm:$0xff]  }
 0x39b   : > { %14043 = vst [vmem:[#allocation165_spill] sm:$0xff] %v12386_v54  ;;  %v9712_v1 = vpop.f32.mrf.mxu1  ;;  %v7500_v6 = vld [vmem:[#allocation2 + $0x22e] sm:$0xff] }
 0x39c   : > { %v12389_v51 = vadd.f32 %v9712_v1, %v12150_v26  ;;  %v12391_v14 = vpop.f32.mrf.mxu0  ;;  %10278 = vmatmul.mubr.msk.bf16.gmra.mxu0 %vm1191_vm4, %v7524_v42  ;;  %v7498_v26 = vld [vmem:[#allocation2 + $0x21e] sm:$0xff] }
 0x39d   : > { %14044 = vst [vmem:[#allocation166_spill] sm:$0xff] %v12391_v14  ;;  %v2919_v37 = vpop.f32.mrf.mxu1  ;;  %10281 = vmatprep.mubr.msk.bf16.mxu0 %vm1191_vm4, %v7525_v23 }
 0x39e   : > { %v12396_v25 = vadd.f32 %v2919_v37, %v12157_v5  ;;  %v12398_v15 = vpop.f32.mrf.mxu0  ;;  %v7501_v5 = vld [vmem:[#allocation2 + $0x236] sm:$0xff]  ;;  %v7526_v37 = vpack.c.bf16 %v7499_v2, %v7498_v26 }
 0x39f   : > { %14045 = vst [vmem:[#allocation167_spill] sm:$0xff] %v12398_v15  ;;  %v9715_v58 = vpop.f32.mrf.mxu1  ;;  %9954 = vmatmul.mubr.msk.bf16.vlgmr.msra.gmra.mxu1 %vm1191_vm4, %v4666_v49  ;;  %v4633_v49 = vld [vmem:[#allocation2 + $0x170] sm:$0xff]  ;;  %v4634_v15 = vld [vmem:[#allocation2 + $0x178] sm:$0xff] }
 0x3a0   : > { %v12402_v1 = vadd.f32 %v9715_v58, %v12163_v13  ;;  %10038 = vmatpush3.bf16.msra.mxu1 %v12169_v40  ;;  %9957 = vmatprep.mubr.msk.bf16.mxu1 %vm1191_vm4, %v4667_v46  ;;  %v12406_v23 = vpop.f32.mrf.mxu0  ;;  %v4632_v13 = vld [vmem:[#allocation2 + $0x168] sm:$0xff]  ;;  %v7527_v40 = vpack.c.bf16 %v7501_v5, %v7500_v6  ;;  %v4635_v46 = vld [vmem:[#allocation2 + $0x180] sm:$0xff] }
 0x3a1   : > { %14046 = vst [vmem:[#allocation168_spill] sm:$0xff] %v12406_v23  ;;  %v2932_v42 = vpop.f32.mrf.mxu1  ;;  %10039 = vmatprep.subr.bf16.mxu1 %v10434_v4  ;;  %v4669_v6 = vpack.c.bf16 %v4635_v46, %v4634_v15  ;;  %v4637_v46 = vld [vmem:[#allocation2 + $0x190] sm:$0xff] }
 0x3a2   : > { %v12411_v7 = vadd.f32 %v2932_v42, %v12172_v18  ;;  %v12413_v8 = vpop.f32.mrf.mxu0  ;;  %v4668_v18 = vpack.c.bf16 %v4633_v49, %v4632_v13  ;;  %v7503_v42 = vld [vmem:[#allocation2 + $0x246] sm:$0xff]  ;;  %v7504_v13 = vld [vmem:[#allocation2 + $0x24e] sm:$0xff]  ;;  %v7505_v49 = vld [vmem:[#allocation2 + $0x256] sm:$0xff] }
 0x3a3   : > { %14047 = vst [vmem:[#allocation169_spill] sm:$0xff] %v12413_v8  ;;  %v9716_v58 = vpop.f32.mrf.mxu1 }
 0x3a4   : > { %v12416_v23 = vadd.f32 %v9716_v58, %v12177_v60  ;;  %v12418_v14 = vpop.f32.mrf.mxu0  ;;  %10282 = vmatmul.mubr.msk.bf16.gmra.mxu0 %vm1191_vm4, %v7526_v37  ;;  %10040 = vmatpush3.bf16.msra.mxu1 %v10434_v4  ;;  %v7502_v60 = vld [vmem:[#allocation2 + $0x23e] sm:$0xff] }
 0x3a5   : > { %14048 = vst [vmem:[#allocation170_spill] sm:$0xff] %v12418_v14  ;;  %v2935_v54 = vpop.f32.mrf.mxu1  ;;  %10285 = vmatprep.mubr.msk.bf16.mxu0 %vm1191_vm4, %v7527_v40  ;;  %10125 = vmatprep.subr.bf16.mxu1 %v12408_v43  ;;  %v7528_v15 = vpack.c.bf16 %v7503_v42, %v7502_v60  ;;  %v4636_v40 = vld [vmem:[#allocation2 + $0x188] sm:$0xff]  ;;  %v4638_v14 = vld [vmem:[#allocation2 + $0x198] sm:$0xff] }
 0x3a6   : > { %v12424_v26 = vadd.f32 %v2935_v54, %v12185_v3  ;;  %v12426_v2 = vpop.f32.mrf.mxu0 }
 0x3a7   : > { %14049 = vst [vmem:[#allocation171_spill] sm:$0xff] %v12426_v2  ;;  %v9719_v5 = vpop.f32.mrf.mxu1  ;;  %9958 = vmatmul.mubr.msk.bf16.gmra.mxu1 %vm1191_vm4, %v4668_v18  ;;  %v7529_v2 = vpack.c.bf16 %v7505_v49, %v7504_v13  ;;  %v7506_v49 = vld [vmem:[#allocation2 + $0x25e] sm:$0xff] }
 0x3a8   : > { %v12430_v37 = vadd.f32 %v9719_v5, %v12191_v17  ;;  %9961 = vmatprep.mubr.msk.bf16.mxu1 %vm1191_vm4, %v4669_v6  ;;  %v12433_v4 = vpop.f32.mrf.mxu0  ;;  %v4639_v17 = vld [vmem:[#allocation2 + $0x1a0] sm:$0xff] }
 0x3a9   : > { %14050 = vst [vmem:[#allocation172_spill] sm:$0xff] %v12433_v4  ;;  %v2948_v58 = vpop.f32.mrf.mxu1  ;;  %v4671_v42 = vpack.c.bf16 %v4639_v17, %v4638_v14  ;;  %v4640_v17 = vld [vmem:[#allocation2 + $0x1a8] sm:$0xff] }
 0x3aa   : > { %v12436_v3 = vadd.f32 %v2948_v58, %v12197_v31  ;;  %v12438_v54 = vpop.f32.mrf.mxu0  ;;  %v4670_v31 = vpack.c.bf16 %v4637_v46, %v4636_v40  ;;  %v7509_v40 = vld [vmem:[#allocation2 + $0x276] sm:$0xff] }
 0x3ab   : > { %14051 = vst [vmem:[#allocation173_spill] sm:$0xff] %v12438_v54  ;;  %v9720_v18 = vpop.f32.mrf.mxu1  ;;  %v4642_v54 = vld [vmem:[#allocation2 + $0x1b8] sm:$0xff] }
 0x3ac   : > { %v12441_v5 = vadd.f32 %v9720_v18, %v12202_v59  ;;  %v12443_v6 = vpop.f32.mrf.mxu0  ;;  %10286 = vmatmul.mubr.msk.bf16.gmra.mxu0 %vm1191_vm4, %v7528_v15  ;;  %v7507_v59 = vld [vmem:[#allocation2 + $0x266] sm:$0xff] }
 0x3ad   : > { %14052 = vst [vmem:[#allocation174_spill] sm:$0xff] %v12443_v6  ;;  %v2951_v4 = vpop.f32.mrf.mxu1  ;;  %10289 = vmatprep.mubr.msk.bf16.mxu0 %vm1191_vm4, %v7529_v2  ;;  %v7508_v2 = vld [vmem:[#allocation2 + $0x26e] sm:$0xff]  ;;  %v7530_v14 = vpack.c.bf16 %v7507_v59, %v7506_v49 }
 0x3ae   : > { %v12448_v58 = vadd.f32 %v2951_v4, %v12209_v50  ;;  %v12450_v60 = vpop.f32.mrf.mxu0  ;;  %v7531_v6 = vpack.c.bf16 %v7509_v40, %v7508_v2  ;;  %v7510_v40 = vld [vmem:[#allocation2 + $0x27e] sm:$0xff] }
 0x3af   : > { %14053 = vst [vmem:[#allocation175_spill] sm:$0xff] %v12450_v60  ;;  %v9723_v13 = vpop.f32.mrf.mxu1  ;;  %9962 = vmatmul.mubr.msk.bf16.gmra.mxu1 %vm1191_vm4, %v4670_v31  ;;  %v4641_v31 = vld [vmem:[#allocation2 + $0x1b0] sm:$0xff] }
 0x3b0   : > { %v12454_v18 = vadd.f32 %v9723_v13, %v12215_v52  ;;  %9965 = vmatprep.mubr.msk.bf16.mxu1 %vm1191_vm4, %v4671_v42  ;;  %v12457_v15 = vpop.f32.mrf.mxu0  ;;  %v4643_v52 = vld [vmem:[#allocation2 + $0x1c0] sm:$0xff] }
 0x3b1   : > { %14054 = vst [vmem:[#allocation176_spill] sm:$0xff] %v12457_v15  ;;  %v2964_v46 = vpop.f32.mrf.mxu1  ;;  %v4673_v59 = vpack.c.bf16 %v4643_v52, %v4642_v54  ;;  %v4644_v52 = vld [vmem:[#allocation2 + $0x1c8] sm:$0xff] }
 0x3b2   : > { %v12460_v50 = vadd.f32 %v2964_v46, %v12221_v30  ;;  %v12462_v4 = vpop.f32.mrf.mxu0  ;;  %v4672_v30 = vpack.c.bf16 %v4641_v31, %v4640_v17  ;;  %v7513_v17 = vld [vmem:[#allocation2 + $0x296] sm:$0xff] }
 0x3b3   : > { %14055 = vst [vmem:[#allocation177_spill] sm:$0xff] %v12462_v4  ;;  %v9724_v60 = vpop.f32.mrf.mxu1  ;;  %v4646_v4 = vld [vmem:[#allocation2 + $0x1d8] sm:$0xff] }
 0x3b4   : > { %v12465_v13 = vadd.f32 %v9724_v60, %v12226_v28  ;;  %v12467_v42 = vpop.f32.mrf.mxu0  ;;  %10290 = vmatmul.mubr.msk.bf16.gmra.mxu0 %vm1191_vm4, %v7530_v14  ;;  %v7511_v28 = vld [vmem:[#allocation2 + $0x286] sm:$0xff] }
 0x3b5   : > { %14056 = vst [vmem:[#allocation178_spill] sm:$0xff] %v12467_v42  ;;  %v2967_v15 = vpop.f32.mrf.mxu1  ;;  %10293 = vmatprep.mubr.msk.bf16.mxu0 %vm1191_vm4, %v7531_v6  ;;  %v7512_v6 = vld [vmem:[#allocation2 + $0x28e] sm:$0xff]  ;;  %v7532_v54 = vpack.c.bf16 %v7511_v28, %v7510_v40  ;;  %v14062_v40 = vld [vmem:[#allocation33_spill] sm:$0xff] }
 0x3b6   : > { %v12472_v46 = vadd.f32 %v2967_v15, %v12233_v12  ;;  %v12474_v49 = vpop.f32.mrf.mxu0  ;;  %v7533_v42 = vpack.c.bf16 %v7513_v17, %v7512_v6  ;;  %v3363_v28 = vadd.f32 %v14062_v40, %v12260_v36  ;;  %v7514_v17 = vld [vmem:[#allocation2 + $0x29e] sm:$0xff]  ;;  %v14066_v36 = vld [vmem:[#allocation35_spill] sm:$0xff] }
 0x3b7   : > { %14057 = vst [vmem:[#allocation179_spill] sm:$0xff] %v12474_v49  ;;  %v9727_v2 = vpop.f32.mrf.mxu1  ;;  %9966 = vmatmul.mubr.msk.bf16.gmra.mxu1 %vm1191_vm4, %v4672_v30  ;;  %v4645_v30 = vld [vmem:[#allocation2 + $0x1d0] sm:$0xff] }
 0x3b8   : > { %v12478_v60 = vadd.f32 %v9727_v2, %v12239_v35  ;;  %9969 = vmatprep.mubr.msk.bf16.mxu1 %vm1191_vm4, %v4673_v59  ;;  %v12481_v14 = vpop.f32.mrf.mxu0  ;;  %v4647_v35 = vld [vmem:[#allocation2 + $0x1e0] sm:$0xff]  ;;  %v4649_v40 = vld [vmem:[#allocation2 + $0x1f0] sm:$0xff] }
 0x3b9   : > { %14058 = vst [vmem:[#allocation180_spill] sm:$0xff] %v12481_v14  ;;  %v2980_v31 = vpop.f32.mrf.mxu1  ;;  %v4674_v14 = vpack.c.bf16 %v4645_v30, %v4644_v52 }
 0x3ba   : > { %v12484_v12 = vadd.f32 %v2980_v31, %v12245_v38  ;;  %v12486_v15 = vpop.f32.mrf.mxu0 }
 0x3bb   : > { %14059 = vst [vmem:[#allocation181_spill] sm:$0xff] %v12486_v15  ;;  %v9728_v49 = vpop.f32.mrf.mxu1 }
 0x3bc   : > { %v12488_v2 = vpop.f32.mrf.mxu0  ;;  %10294 = vmatmul.mubr.msk.bf16.gmra.mxu0 %vm1191_vm4, %v7532_v54  ;;  %v4675_v49 = vpack.c.bf16 %v4647_v35, %v4646_v4  ;;  %v3364_v4 = vadd.f32 %v14066_v36, %v12271_v56  ;;  %v7534_v35 = vpack.c.bf16 %v7514_v17, %v7514_v17  ;;  %v14070_v17 = vld [vmem:[#allocation37_spill] sm:$0xff] }
 0x3bd   : > { %14060 = vst [vmem:[#allocation182_spill] sm:$0xff] %v12488_v2  ;;  %v2983_v59 = vpop.f32.mrf.mxu1  ;;  %10297 = vmatprep.mubr.msk.bf16.mxu0 %vm1191_vm4, %v7533_v42  ;;  %v14064_v42 = vld [vmem:[#allocation34_spill] sm:$0xff]  ;;  %v3367_v36 = vadd.f32 %v14070_v17, %v12284_v53  ;;  %v14074_v53 = vld [vmem:[#allocation39_spill] sm:$0xff] }
 0x3be   : > { %v12493_v38 = vadd.f32 %v2983_v59, %v12254_v9  ;;  %v12495_v31 = vpop.f32.mrf.mxu0  ;;  %v3361_v9 = vadd.f32 %v14064_v42, %v12266_v29  ;;  %v14068_v29 = vld [vmem:[#allocation36_spill] sm:$0xff] }
 0x3bf   : > { %14061 = vst [vmem:[#allocation183_spill] sm:$0xff] %v12495_v31  ;;  %v9779_v6 = vpop.f32.mrf.mxu1  ;;  %9970 = vmatmul.mubr.msk.bf16.gmra.mxu1 %vm1191_vm4, %v4674_v14  ;;  %v4648_v14 = vld [vmem:[#allocation2 + $0x1e8] sm:$0xff]  ;;  %v4651_v31 = vld [vmem:[#allocation2 + $0x200] sm:$0xff]  ;;  %v3362_v42 = vadd.f32 %v14068_v29, %v12278_v41 }
 0x3c0   : > { %v12500_v2 = vadd.f32 %v9779_v6, %v3363_v28  ;;  %9973 = vmatprep.mubr.msk.bf16.mxu1 %vm1191_vm4, %v4675_v49  ;;  %v12503_v54 = vpop.f32.mrf.mxu0  ;;  %v4650_v6 = vld [vmem:[#allocation2 + $0x1f8] sm:$0xff]  ;;  %v14072_v41 = vld [vmem:[#allocation38_spill] sm:$0xff] }
 0x3c1   : > { %14063 = vst [vmem:[#allocation33_spill] sm:$0xff] %v12503_v54  ;;  %v3570_v52 = vpop.f32.mrf.mxu1  ;;  %v4677_v15 = vpack.c.bf16 %v4651_v31, %v4650_v6  ;;  %v3368_v31 = vadd.f32 %v14074_v53, %v12295_v61  ;;  %v4652_v6 = vld [vmem:[#allocation2 + $0x208] sm:$0xff] }
 0x3c2   : > { %v12507_v30 = vadd.f32 %v3570_v52, %v3361_v9  ;;  %v12509_v59 = vpop.f32.mrf.mxu0  ;;  %v4676_v52 = vpack.c.bf16 %v4649_v40, %v4648_v14  ;;  %v3365_v14 = vadd.f32 %v14072_v41, %v12290_v45  ;;  %v14078_v61 = vld [vmem:[#allocation42_spill] sm:$0xff] }
 0x3c3   : > { %14065 = vst [vmem:[#allocation34_spill] sm:$0xff] %v12509_v59  ;;  %v9780_v28 = vpop.f32.mrf.mxu1  ;;  %v3371_v53 = vadd.f32 %v14078_v61, %v12308_v33  ;;  %v14082_v33 = vld [vmem:[#allocation45_spill] sm:$0xff] }
 0x3c4   : > { %v12513_v49 = vadd.f32 %v9780_v28, %v3364_v4  ;;  %v12515_v54 = vpop.f32.mrf.mxu0  ;;  %10298 = vmatmul.mubr.msk.bf16.gmra.mxu0 %vm1191_vm4, %v7534_v35  ;;  %v4659_v61 = vld [vmem:[#allocation2 + $0x240] sm:$0xff] }
 0x3c5   : > { %14067 = vst [vmem:[#allocation35_spill] sm:$0xff] %v12515_v54  ;;  %v3573_v9 = vpop.f32.mrf.mxu1 }
 0x3c6   : > { %v12520_v59 = vadd.f32 %v3573_v9, %v3362_v42  ;;  %v12522_v56 = vpop.f32.mrf.mxu0  ;;  %v4653_v42 = vld [vmem:[#allocation2 + $0x210] sm:$0xff] }
 0x3c7   : > { %14069 = vst [vmem:[#allocation36_spill] sm:$0xff] %v12522_v56  ;;  %v9783_v8 = vpop.f32.mrf.mxu1  ;;  %9974 = vmatmul.mubr.msk.bf16.gmra.mxu1 %vm1191_vm4, %v4676_v52  ;;  %v4655_v52 = vld [vmem:[#allocation2 + $0x220] sm:$0xff] }
 0x3c8   : > { %v12527_v4 = vadd.f32 %v9783_v8, %v3367_v36  ;;  %9977 = vmatprep.mubr.msk.bf16.mxu1 %vm1191_vm4, %v4677_v15  ;;  %v12530_v35 = vpop.f32.mrf.mxu0  ;;  %v4654_v8 = vld [vmem:[#allocation2 + $0x218] sm:$0xff] }
 0x3c9   : > { %14071 = vst [vmem:[#allocation37_spill] sm:$0xff] %v12530_v35  ;;  %v3586_v40 = vpop.f32.mrf.mxu1  ;;  %v14076_v36 = vld [vmem:[#allocation40_spill] sm:$0xff]  ;;  %v4679_v35 = vpack.c.bf16 %v4655_v52, %v4654_v8  ;;  %v3372_v8 = vadd.f32 %v14082_v33, %v12319_v27  ;;  %v4656_v52 = vld [vmem:[#allocation2 + $0x228] sm:$0xff] }
 0x3ca   : > { %v12534_v28 = vadd.f32 %v3586_v40, %v3365_v14  ;;  %v12536_v29 = vpop.f32.mrf.mxu0  ;;  %v3366_v45 = vadd.f32 %v14076_v36, %v12302_v21  ;;  %v4678_v14 = vpack.c.bf16 %v4653_v42, %v4652_v6  ;;  %v14080_v21 = vld [vmem:[#allocation44_spill] sm:$0xff] }
 0x3cb   : > { %14073 = vst [vmem:[#allocation38_spill] sm:$0xff] %v12536_v29  ;;  %v9784_v9 = vpop.f32.mrf.mxu1  ;;  %v3369_v6 = vadd.f32 %v14080_v21, %v12314_v39  ;;  %v14086_v27 = vld [vmem:[#allocation48_spill] sm:$0xff] }
 0x3cc   : > { %v12540_v17 = vadd.f32 %v9784_v9, %v3368_v31  ;;  %v12542_v15 = vpop.f32.mrf.mxu0  ;;  %v3375_v33 = vadd.f32 %v14086_v27, %v12332_v55  ;;  %v14090_v55 = vld [vmem:[#allocation52_spill] sm:$0xff]  ;;  %v4663_v27 = vld [vmem:[#allocation2 + $0x260] sm:$0xff] }
 0x3cd   : > { %14075 = vst [vmem:[#allocation39_spill] sm:$0xff] %v12542_v15  ;;  %v3589_v41 = vpop.f32.mrf.mxu1 }
 0x3ce   : > { %v12546_v40 = vadd.f32 %v3589_v41, %v3366_v45  ;;  %v12548_v29 = vpop.f32.mrf.mxu0  ;;  %v4657_v41 = vld [vmem:[#allocation2 + $0x230] sm:$0xff] }
 0x3cf   : > { %14077 = vst [vmem:[#allocation40_spill] sm:$0xff] %v12548_v29  ;;  %v9787_v56 = vpop.f32.mrf.mxu1  ;;  %9978 = vmatmul.mubr.msk.bf16.gmra.mxu1 %vm1191_vm4, %v4678_v14 }
 0x3d0   : > { %v12553_v31 = vadd.f32 %v9787_v56, %v3371_v53  ;;  %9981 = vmatprep.mubr.msk.bf16.mxu1 %vm1191_vm4, %v4679_v35  ;;  %v12556_v9 = vpop.f32.mrf.mxu0  ;;  %v4658_v56 = vld [vmem:[#allocation2 + $0x238] sm:$0xff] }
 0x3d1   : > { %14079 = vst [vmem:[#allocation42_spill] sm:$0xff] %v12556_v9  ;;  %v3602_v42 = vpop.f32.mrf.mxu1  ;;  %v14084_v9 = vld [vmem:[#allocation47_spill] sm:$0xff]  ;;  %v4681_v29 = vpack.c.bf16 %v4659_v61, %v4658_v56  ;;  %v3376_v56 = vadd.f32 %v14090_v55, %v12343_v63 }
 0x3d2   : > { %v12560_v36 = vadd.f32 %v3602_v42, %v3369_v6  ;;  %v12562_v45 = vpop.f32.mrf.mxu0  ;;  %v3370_v39 = vadd.f32 %v14084_v9, %v12326_v34  ;;  %v4680_v6 = vpack.c.bf16 %v4657_v41, %v4656_v52  ;;  %v14088_v34 = vld [vmem:[#allocation50_spill] sm:$0xff]  ;;  %v14094_v63 = vld [vmem:[#allocation55_spill] sm:$0xff] }
 0x3d3   : > { %14081 = vst [vmem:[#allocation44_spill] sm:$0xff] %v12562_v45  ;;  %v9788_v14 = vpop.f32.mrf.mxu1  ;;  %v3373_v9 = vadd.f32 %v14088_v34, %v12338_v10  ;;  %v4660_v61 = vld [vmem:[#allocation2 + $0x248] sm:$0xff]  ;;  %v3379_v55 = vadd.f32 %v14094_v63, %v12356_v24 }
 0x3d4   : > { %v12566_v53 = vadd.f32 %v9788_v14, %v3372_v8  ;;  %v12568_v35 = vpop.f32.mrf.mxu0  ;;  %v14098_v24 = vld [vmem:[#allocation58_spill] sm:$0xff] }
 0x3d5   : > { %14083 = vst [vmem:[#allocation45_spill] sm:$0xff] %v12568_v35  ;;  %v3605_v21 = vpop.f32.mrf.mxu1 }
 0x3d6   : > { %v12572_v42 = vadd.f32 %v3605_v21, %v3370_v39  ;;  %v12574_v45 = vpop.f32.mrf.mxu0  ;;  %v4661_v21 = vld [vmem:[#allocation2 + $0x250] sm:$0xff] }
 0x3d7   : > { %14085 = vst [vmem:[#allocation47_spill] sm:$0xff] %v12574_v45  ;;  %v9791_v15 = vpop.f32.mrf.mxu1  ;;  %9982 = vmatmul.mubr.msk.bf16.gmra.mxu1 %vm1191_vm4, %v4680_v6 }
 0x3d8   : > { %v12579_v8 = vadd.f32 %v9791_v15, %v3375_v33  ;;  %9985 = vmatprep.mubr.msk.bf16.mxu1 %vm1191_vm4, %v4681_v29  ;;  %v12582_v14 = vpop.f32.mrf.mxu0  ;;  %v4662_v15 = vld [vmem:[#allocation2 + $0x258] sm:$0xff] }
 0x3d9   : > { %14087 = vst [vmem:[#allocation48_spill] sm:$0xff] %v12582_v14  ;;  %v3618_v52 = vpop.f32.mrf.mxu1  ;;  %v14092_v14 = vld [vmem:[#allocation54_spill] sm:$0xff]  ;;  %v4683_v45 = vpack.c.bf16 %v4663_v27, %v4662_v15  ;;  %v3380_v15 = vadd.f32 %v14098_v24, %v12367_v57 }
 0x3da   : > { %v12586_v41 = vadd.f32 %v3618_v52, %v3373_v9  ;;  %v12588_v39 = vpop.f32.mrf.mxu0  ;;  %v3374_v10 = vadd.f32 %v14092_v14, %v12350_v48  ;;  %v4682_v9 = vpack.c.bf16 %v4661_v21, %v4660_v61  ;;  %v14096_v48 = vld [vmem:[#allocation57_spill] sm:$0xff]  ;;  %v4664_v27 = vld [vmem:[#allocation2 + $0x268] sm:$0xff] }
 0x3db   : > { %14089 = vst [vmem:[#allocation50_spill] sm:$0xff] %v12588_v39  ;;  %v9792_v6 = vpop.f32.mrf.mxu1  ;;  %v3377_v14 = vadd.f32 %v14096_v48, %v12362_v47  ;;  %v4684_v48 = vpack.c.bf16 %v4664_v27, %v4664_v27 }
 0x3dc   : > { %v12592_v33 = vadd.f32 %v9792_v6, %v3376_v56  ;;  %v12594_v29 = vpop.f32.mrf.mxu0 }
 0x3dd   : > { %14091 = vst [vmem:[#allocation52_spill] sm:$0xff] %v12594_v29  ;;  %v3621_v34 = vpop.f32.mrf.mxu1 }
 0x3de   : > { %v12598_v52 = vadd.f32 %v3621_v34, %v3374_v10  ;;  %v12600_v39 = vpop.f32.mrf.mxu0 }
 0x3df   : > { %14093 = vst [vmem:[#allocation54_spill] sm:$0xff] %v12600_v39  ;;  %v9795_v35 = vpop.f32.mrf.mxu1  ;;  %9986 = vmatmul.mubr.msk.bf16.gmra.mxu1 %vm1191_vm4, %v4682_v9  ;;  %v5646_v9 = vld [vmem:[#allocation2 + $0x152] sm:$0xff] }
 0x3e0   : > { %v12605_v56 = vadd.f32 %v9795_v35, %v3379_v55  ;;  %9989 = vmatprep.mubr.msk.bf16.mxu1 %vm1191_vm4, %v4683_v45  ;;  %v12608_v6 = vpop.f32.mrf.mxu0  ;;  %v5647_v35 = vld [vmem:[#allocation2 + $0x15a] sm:$0xff]  ;;  %v14100_v55 = vld [vmem:[#allocation59_spill] sm:$0xff] }
 0x3e1   : > { %14095 = vst [vmem:[#allocation55_spill] sm:$0xff] %v12608_v6  ;;  %v3634_v61 = vpop.f32.mrf.mxu1  ;;  %v3378_v6 = vadd.f32 %v14100_v55, %v12374_v32  ;;  %v5685_v24 = vpack.c.bf16 %v5647_v35, %v5646_v9  ;;  %v14103_v32 = vld [vmem:[#allocation61_spill] sm:$0xff]  ;;  %v5649_v9 = vld [vmem:[#allocation2 + $0x16a] sm:$0xff] }
 0x3e2   : > { %v12612_v21 = vadd.f32 %v3634_v61, %v3377_v14  ;;  %v12614_v10 = vpop.f32.mrf.mxu0  ;;  %v3381_v55 = vadd.f32 %v14103_v32, %v12384_v0 }
 0x3e3   : > { %14097 = vst [vmem:[#allocation57_spill] sm:$0xff] %v12614_v10  ;;  %v9796_v34 = vpop.f32.mrf.mxu1  ;;  %v14102_v10 = vld [vmem:[#allocation60_spill] sm:$0xff] }
 0x3e4   : > { %v12618_v63 = vadd.f32 %v9796_v34, %v3380_v15  ;;  %v12620_v45 = vpop.f32.mrf.mxu0  ;;  %v3383_v57 = vadd.f32 %v14102_v10, %v12380_v44  ;;  %v5648_v10 = vld [vmem:[#allocation2 + $0x162] sm:$0xff] }
 0x3e5   : > { %14099 = vst [vmem:[#allocation58_spill] sm:$0xff] %v12620_v45  ;;  %v3637_v47 = vpop.f32.mrf.mxu1 }
 0x3e6   : > { %v12624_v14 = vadd.f32 %v3637_v47, %v3378_v6  ;;  %v12626_v61 = vpop.f32.mrf.mxu0 }
 0x3e7   : > { %14101 = vst [vmem:[#allocation59_spill] sm:$0xff] %v12626_v61  ;;  %v9799_v39 = vpop.f32.mrf.mxu1  ;;  %9990 = vmatmul.mubr.msk.bf16.gmra.mxu1 %vm1191_vm4, %v4684_v48  ;;  %v14105_v61 = vld [vmem:[#allocation62_spill] sm:$0xff]  ;;  %v5650_v48 = vld [vmem:[#allocation2 + $0x172] sm:$0xff] }
 0x3e8   : > { %v12631_v15 = vadd.f32 %v9799_v39, %v3383_v57  ;;  %10041 = vmatprep.mubr.msk.bf16.mxu1 %vm1191_vm4, %v5685_v24  ;;  %v10124_v34 = vpop.f32.mrf.mxu0  ;;  %v3384_v44 = vadd.f32 %v14105_v61, %v12389_v51  ;;  %v5651_v39 = vld [vmem:[#allocation2 + $0x17a] sm:$0xff] }
 0x3e9   : > { %v3650_v27 = vpop.f32.mrf.mxu1  ;;  %v14107_v34 = vld [vmem:[#allocation63_spill] sm:$0xff]  ;;  %v14109_v51 = vld [vmem:[#allocation64_spill] sm:$0xff]  ;;  %v5687_v29 = vpack.c.bf16 %v5651_v39, %v5650_v48 }
 0x3ea   : > { %v12636_v6 = vadd.f32 %v3650_v27, %v3381_v55  ;;  %v12638_v47 = vpop.f32.mrf.mxu0  ;;  %v3382_v0 = vadd.f32 %v14107_v34, %v12396_v25  ;;  %v5686_v55 = vpack.c.bf16 %v5649_v9, %v5648_v10  ;;  %v10436_v27 = vld [vmem:[#allocation9 + $0x50] sm:$0xff]   ;;  %v3387_v61 = vadd.f32 %v14109_v51, %v12402_v1  ;;  %v14111_v10 = vld [vmem:[#allocation65_spill] sm:$0xff]  ;;  %v12663_v34 = vld [vmem:[#allocation9 + $0x78] sm:$0xff]  }
 0x3eb   : > { %14104 = vst [vmem:[#allocation60_spill] sm:$0xff] %v12638_v47  ;;  %v9800_v35 = vpop.f32.mrf.mxu1  ;;  %v3385_v9 = vadd.f32 %v14111_v10, %v12411_v7  ;;  %v14115_v7 = vld [vmem:[#allocation67_spill] sm:$0xff] }
 0x3ec   : > { %v12642_v57 = vadd.f32 %v9800_v35, %v3384_v44  ;;  %v12644_v24 = vpop.f32.mrf.mxu0  ;;  %v3386_v10 = vadd.f32 %v14115_v7, %v12424_v26 }
 0x3ed   : > { %14106 = vst [vmem:[#allocation61_spill] sm:$0xff] %v12644_v24  ;;  %v3653_v32 = vpop.f32.mrf.mxu1 }
 0x3ee   : > { %v12648_v45 = vadd.f32 %v3653_v32, %v3382_v0  ;;  %v12650_v47 = vpop.f32.mrf.mxu0  ;;  %v5652_v0 = vld [vmem:[#allocation2 + $0x182] sm:$0xff] }
 0x3ef   : > { %14108 = vst [vmem:[#allocation62_spill] sm:$0xff] %v12650_v47  ;;  %v9803_v54 = vpop.f32.mrf.mxu1  ;;  %10042 = vmatmul.mubr.msk.bf16.vlgmr.msra.gmra.mxu1 %vm1191_vm4, %v5686_v55  ;;  %v5655_v55 = vld [vmem:[#allocation2 + $0x19a] sm:$0xff] }
 0x3f0   : > { %v12655_v44 = vadd.f32 %v9803_v54, %v3387_v61  ;;  %10126 = vmatpush3.bf16.msra.mxu1 %v12408_v43  ;;  %10045 = vmatprep.mubr.msk.bf16.mxu1 %vm1191_vm4, %v5687_v29  ;;  %v12659_v25 = vpop.f32.mrf.mxu0  ;;  %v14113_v54 = vld [vmem:[#allocation66_spill] sm:$0xff]  ;;  %v5654_v29 = vld [vmem:[#allocation2 + $0x192] sm:$0xff] }
 0x3f1   : > { %14110 = vst [vmem:[#allocation63_spill] sm:$0xff] %v12659_v25  ;;  %v3666_v35 = vpop.f32.mrf.mxu1  ;;  %10127 = vmatprep.subr.bf16.mxu1 %v10436_v27  ;;  %v3388_v39 = vadd.f32 %v14113_v54, %v12416_v23  ;;  %v5653_v43 = vld [vmem:[#allocation2 + $0x18a] sm:$0xff]  ;;  %v14117_v54 = vld [vmem:[#allocation68_spill] sm:$0xff]  ;;  %v5689_v47 = vpack.c.bf16 %v5655_v55, %v5654_v29  ;;  %v5656_v55 = vld [vmem:[#allocation2 + $0x1a2] sm:$0xff] }
 0x3f2   : > { %v12665_v1 = vadd.f32 %v3666_v35, %v3385_v9  ;;  %v12667_v48 = vpop.f32.mrf.mxu0  ;;  %v5688_v35 = vpack.c.bf16 %v5653_v43, %v5652_v0  ;;  %v3391_v25 = vadd.f32 %v14117_v54, %v12430_v37  ;;  %v14121_v37 = vld [vmem:[#allocation70_spill] sm:$0xff]  ;;  %v5659_v54 = vld [vmem:[#allocation2 + $0x1ba] sm:$0xff] }
 0x3f3   : > { %14112 = vst [vmem:[#allocation64_spill] sm:$0xff] %v12667_v48  ;;  %v9804_v32 = vpop.f32.mrf.mxu1  ;;  %v3392_v29 = vadd.f32 %v14121_v37, %v12441_v5  ;;  %v14125_v5 = vld [vmem:[#allocation72_spill] sm:$0xff] }
 0x3f4   : > { %v12671_v51 = vadd.f32 %v9804_v32, %v3388_v39  ;;  %v12673_v61 = vpop.f32.mrf.mxu0  ;;  %10128 = vmatpush3.bf16.msra.mxu1 %v10436_v27  ;;  %v14119_v27 = vld [vmem:[#allocation69_spill] sm:$0xff]  ;;  %v3395_v37 = vadd.f32 %v14125_v5, %v12454_v18  ;;  %v14129_v18 = vld [vmem:[#allocation74_spill] sm:$0xff] }
 0x3f5   : > { %14114 = vst [vmem:[#allocation65_spill] sm:$0xff] %v12673_v61  ;;  %v3669_v9 = vpop.f32.mrf.mxu1  ;;  %10213 = vmatprep.subr.bf16.mxu1 %v12663_v34  ;;  %v3389_v0 = vadd.f32 %v14119_v27, %v12436_v3  ;;  %v5663_v5 = vld [vmem:[#allocation2 + $0x1da] sm:$0xff] }
 0x3f6   : > { %v12678_v48 = vadd.f32 %v3669_v9, %v3386_v10  ;;  %v12680_v23 = vpop.f32.mrf.mxu0  ;;  %v5657_v9 = vld [vmem:[#allocation2 + $0x1aa] sm:$0xff] }
 0x3f7   : > { %14116 = vst [vmem:[#allocation66_spill] sm:$0xff] %v12680_v23  ;;  %v9807_v39 = vpop.f32.mrf.mxu1  ;;  %10046 = vmatmul.mubr.msk.bf16.gmra.mxu1 %vm1191_vm4, %v5688_v35 }
 0x3f8   : > { %v12685_v32 = vadd.f32 %v9807_v39, %v3391_v25  ;;  %10049 = vmatprep.mubr.msk.bf16.mxu1 %vm1191_vm4, %v5689_v47  ;;  %v12688_v26 = vpop.f32.mrf.mxu0  ;;  %v5658_v25 = vld [vmem:[#allocation2 + $0x1b2] sm:$0xff] }
 0x3f9   : > { %14118 = vst [vmem:[#allocation67_spill] sm:$0xff] %v12688_v26  ;;  %v3682_v43 = vpop.f32.mrf.mxu1  ;;  %v14123_v26 = vld [vmem:[#allocation71_spill] sm:$0xff]  ;;  %v5691_v23 = vpack.c.bf16 %v5659_v54, %v5658_v25  ;;  %v3396_v25 = vadd.f32 %v14129_v18, %v12465_v13  ;;  %v5660_v54 = vld [vmem:[#allocation2 + $0x1c2] sm:$0xff]  ;;  %v14133_v13 = vld [vmem:[#allocation76_spill] sm:$0xff] }
 0x3fa   : > { %v12692_v7 = vadd.f32 %v3682_v43, %v3389_v0  ;;  %v12694_v10 = vpop.f32.mrf.mxu0  ;;  %v3390_v3 = vadd.f32 %v14123_v26, %v12448_v58  ;;  %v5690_v0 = vpack.c.bf16 %v5657_v9, %v5656_v55  ;;  %v14127_v58 = vld [vmem:[#allocation73_spill] sm:$0xff]  ;;  %v3399_v18 = vadd.f32 %v14133_v13, %v12478_v60  ;;  %v5665_v60 = vld [vmem:[#allocation2 + $0x1ea] sm:$0xff] }
 0x3fb   : > { %14120 = vst [vmem:[#allocation68_spill] sm:$0xff] %v12694_v10  ;;  %v9808_v35 = vpop.f32.mrf.mxu1  ;;  %v3393_v26 = vadd.f32 %v14127_v58, %v12460_v50  ;;  %v5667_v13 = vld [vmem:[#allocation2 + $0x1fa] sm:$0xff] }
 0x3fc   : > { %v12698_v39 = vadd.f32 %v9808_v35, %v3392_v29  ;;  %v12700_v47 = vpop.f32.mrf.mxu0 }
 0x3fd   : > { %14122 = vst [vmem:[#allocation69_spill] sm:$0xff] %v12700_v47  ;;  %v3685_v27 = vpop.f32.mrf.mxu1 }
 0x3fe   : > { %v12704_v43 = vadd.f32 %v3685_v27, %v3390_v3  ;;  %v12706_v10 = vpop.f32.mrf.mxu0  ;;  %v5661_v27 = vld [vmem:[#allocation2 + $0x1ca] sm:$0xff] }
 0x3ff   : > { %14124 = vst [vmem:[#allocation70_spill] sm:$0xff] %v12706_v10  ;;  %v9811_v61 = vpop.f32.mrf.mxu1  ;;  %10050 = vmatmul.mubr.msk.bf16.gmra.mxu1 %vm1191_vm4, %v5690_v0 }
 0x400   : > { %v12711_v29 = vadd.f32 %v9811_v61, %v3395_v37  ;;  %10053 = vmatprep.mubr.msk.bf16.mxu1 %vm1191_vm4, %v5691_v23  ;;  %v12714_v35 = vpop.f32.mrf.mxu0  ;;  %v5662_v61 = vld [vmem:[#allocation2 + $0x1d2] sm:$0xff] }
 0x401   : > { %14126 = vst [vmem:[#allocation71_spill] sm:$0xff] %v12714_v35  ;;  %v3698_v55 = vpop.f32.mrf.mxu1  ;;  %v14131_v35 = vld [vmem:[#allocation75_spill] sm:$0xff]  ;;  %v5693_v10 = vpack.c.bf16 %v5663_v5, %v5662_v61 }
 0x402   : > { %v12718_v9 = vadd.f32 %v3698_v55, %v3393_v26  ;;  %v12720_v3 = vpop.f32.mrf.mxu0  ;;  %v3394_v50 = vadd.f32 %v14131_v35, %v12472_v46  ;;  %v5692_v26 = vpack.c.bf16 %v5661_v27, %v5660_v54  ;;  %v14135_v46 = vld [vmem:[#allocation77_spill] sm:$0xff]  ;;  %v5666_v5 = vld [vmem:[#allocation2 + $0x1f2] sm:$0xff] }
 0x403   : > { %14128 = vst [vmem:[#allocation72_spill] sm:$0xff] %v12720_v3  ;;  %v9812_v0 = vpop.f32.mrf.mxu1  ;;  %v3397_v35 = vadd.f32 %v14135_v46, %v12484_v12  ;;  %v14140_v46 = vld [vmem:[#allocation79_spill] sm:$0xff] }
 0x404   : > { %v12724_v37 = vadd.f32 %v9812_v0, %v3396_v25  ;;  %v12726_v23 = vpop.f32.mrf.mxu0 }
 0x405   : > { %14130 = vst [vmem:[#allocation73_spill] sm:$0xff] %v12726_v23  ;;  %v3701_v58 = vpop.f32.mrf.mxu1  ;;  %v12758_v23 = vld [vmem:[#allocation10] ss:$0 sm:$0xff] }
 0x406   : > { %v12730_v55 = vadd.f32 %v3701_v58, %v3394_v50  ;;  %v12732_v3 = vpop.f32.mrf.mxu0  ;;  %v5664_v58 = vld [vmem:[#allocation2 + $0x1e2] sm:$0xff] }
 0x407   : > { %14132 = vst [vmem:[#allocation74_spill] sm:$0xff] %v12732_v3  ;;  %v9815_v47 = vpop.f32.mrf.mxu1  ;;  %10054 = vmatmul.mubr.msk.bf16.gmra.mxu1 %vm1191_vm4, %v5692_v26 }
 0x408   : > { %v12737_v25 = vadd.f32 %v9815_v47, %v3399_v18  ;;  %10057 = vmatprep.mubr.msk.bf16.mxu1 %vm1191_vm4, %v5693_v10  ;;  %v12740_v0 = vpop.f32.mrf.mxu0  ;;  %v14138_v47 = vld [vmem:[#allocation78_spill] sm:$0xff] }
 0x409   : > { %14134 = vst [vmem:[#allocation75_spill] sm:$0xff] %v12740_v0  ;;  %v3714_v54 = vpop.f32.mrf.mxu1  ;;  %v3398_v10 = vadd.f32 %v14138_v47, %v12493_v38  ;;  %v5694_v0 = vpack.c.bf16 %v5665_v60, %v5664_v58  ;;  %v14142_v38 = vld [vmem:[#allocation80_spill] sm:$0xff]  ;;  %v5668_v47 = vld [vmem:[#allocation2 + $0x202] sm:$0xff] }
 0x40a   : > { %v12744_v27 = vadd.f32 %v3714_v54, %v3397_v35  ;;  %v12746_v50 = vpop.f32.mrf.mxu0  ;;  %v4097_v35 = vadd.f32 %v14140_v46, %v12500_v2  ;;  %v5695_v54 = vpack.c.bf16 %v5667_v13, %v5666_v5  ;;  %v4095_v58 = vadd.f32 %v14142_v38, %v12507_v30  ;;  %v14144_v5 = vld [vmem:[#allocation81_spill] sm:$0xff]  ;;  %v5669_v46 = vld [vmem:[#allocation2 + $0x20a] sm:$0xff] }
 0x40b   : > { %14136 = vst [vmem:[#allocation76_spill] sm:$0xff] %v12746_v50  ;;  %v9816_v61 = vpop.f32.mrf.mxu1  ;;  %v4098_v13 = vadd.f32 %v14144_v5, %v12513_v49  ;;  %v14146_v38 = vld [vmem:[#allocation82_spill] sm:$0xff] }
 0x40c   : > { %v12748_v26 = vpop.f32.mrf.mxu0 }
 0x40d   : > { %14137 = vst [vmem:[#allocation77_spill] sm:$0xff] %v12748_v26  ;;  %v3717_v18 = vpop.f32.mrf.mxu1 }
 0x40e   : > { %v12752_v3 = vadd.f32 %v3717_v18, %v3398_v10  ;;  %v12754_v12 = vpop.f32.mrf.mxu0 }
 0x40f   : > { %14139 = vst [vmem:[#allocation78_spill] sm:$0xff] %v12754_v12  ;;  %v9867_v50 = vpop.f32.mrf.mxu1  ;;  %10058 = vmatmul.mubr.msk.bf16.gmra.mxu1 %vm1191_vm4, %v5694_v0  ;;  %v5670_v0 = vld [vmem:[#allocation2 + $0x212] sm:$0xff] }
 0x410   : > { %v4464_v61 = vadd.f32 %v9867_v50, %v4097_v35  ;;  %10061 = vmatprep.mubr.msk.bf16.mxu1 %vm1191_vm4, %v5695_v54  ;;  %v12762_v26 = vpop.f32.mrf.mxu0  ;;  %v5671_v50 = vld [vmem:[#allocation2 + $0x21a] sm:$0xff] }
 0x411   : > { %14141 = vst [vmem:[#allocation79_spill] sm:$0xff] %v12762_v26  ;;  %v4304_v60 = vpop.f32.mrf.mxu1 }
 0x412   : > { %v4510_v10 = vadd.f32 %v12758_v23, %v4464_v61  ;;  %v4462_v18 = vadd.f32 %v4304_v60, %v4095_v58  ;;  %v12767_v2 = vpop.f32.mrf.mxu0  ;;  %v4096_v61 = vadd.f32 %v14146_v38, %v12520_v59  ;;  %v5696_v60 = vpack.c.bf16 %v5669_v46, %v5668_v47 }
 0x413   : > { %14143 = vst [vmem:[#allocation80_spill] sm:$0xff] %v12767_v2  ;;  %v9868_v35 = vpop.f32.mrf.mxu1  ;;  %v5697_v2 = vpack.c.bf16 %v5671_v50, %v5670_v0 }
 0x414   : > { %v4549_v54 = vmax.f32 %v4510_v10, 0.0  ;;  %v4508_v26 = vadd.f32 %v12758_v23, %v4462_v18  ;;  %v4465_v12 = vadd.f32 %v9868_v35, %v4098_v13  ;;  %v12772_v30 = vpop.f32.mrf.mxu0  ;;  %v14148_v10 = vld [vmem:[#allocation83_spill] sm:$0xff]  ;;  %v5672_v35 = vld [vmem:[#allocation2 + $0x222] sm:$0xff] }
 0x415   : > { %14145 = vst [vmem:[#allocation81_spill] sm:$0xff] %v12772_v30  ;;  %v4307_v58 = vpop.f32.mrf.mxu1  ;;  %v4101_v18 = vadd.f32 %v14148_v10, %v12527_v4 }
 0x416   : > { %4589 = vst.msk [vmem:[#allocation3 + $0x10] sm:$0xff] %vm4586_vm5, %v4549_v54  ;;  %v4547_v49 = vmax.f32 %v4508_v26, 0.0  ;;  %v4511_v5 = vadd.f32 %v12758_v23, %v4465_v12  ;;  %v4463_v24 = vadd.f32 %v4307_v58, %v4096_v61  ;;  %v12778_v62 = vpop.f32.mrf.mxu0  ;;  %v14150_v12 = vld [vmem:[#allocation84_spill] sm:$0xff] }
 0x417   : > { %14147 = vst [vmem:[#allocation82_spill] sm:$0xff] %v12778_v62  ;;  %v9871_v13 = vpop.f32.mrf.mxu1  ;;  %10062 = vmatmul.mubr.msk.bf16.gmra.mxu1 %vm1191_vm4, %v5696_v60  ;;  %v4099_v0 = vadd.f32 %v14150_v12, %v12534_v28  ;;  %v5673_v60 = vld [vmem:[#allocation2 + $0x22a] sm:$0xff] }
 0x418   : > { %4587 = vst.msk [vmem:[#allocation3] sm:$0xff] %vm4586_vm5, %v4547_v49  ;;  %v4550_v59 = vmax.f32 %v4511_v5, 0.0  ;;  %v4509_v47 = vadd.f32 %v12758_v23, %v4463_v24  ;;  %v4468_v46 = vadd.f32 %v9871_v13, %v4101_v18  ;;  %10065 = vmatprep.mubr.msk.bf16.mxu1 %vm1191_vm4, %v5697_v2  ;;  %v12786_v26 = vpop.f32.mrf.mxu0  ;;  %v14152_v24 = vld [vmem:[#allocation85_spill] sm:$0xff]  ;;  %v5674_v2 = vld [vmem:[#allocation2 + $0x232] sm:$0xff]  ;;  %v5698_v12 = vpack.c.bf16 %v5673_v60, %v5672_v35 }
 0x419   : > { %14149 = vst [vmem:[#allocation83_spill] sm:$0xff] %v12786_v26  ;;  %v4320_v50 = vpop.f32.mrf.mxu1  ;;  %v4102_v58 = vadd.f32 %v14152_v24, %v12540_v17  ;;  %v5675_v49 = vld [vmem:[#allocation2 + $0x23a] sm:$0xff] }
 0x41a   : > { %4590 = vst.msk [vmem:[#allocation3 + $0x18] sm:$0xff] %vm4586_vm5, %v4550_v59  ;;  %v4548_v4 = vmax.f32 %v4509_v47, 0.0  ;;  %v4514_v54 = vadd.f32 %v12758_v23, %v4468_v46  ;;  %v4466_v38 = vadd.f32 %v4320_v50, %v4099_v0  ;;  %v12792_v61 = vpop.f32.mrf.mxu0  ;;  %v14154_v59 = vld [vmem:[#allocation86_spill] sm:$0xff]  ;;  %v5699_v0 = vpack.c.bf16 %v5675_v49, %v5674_v2  ;;  %v14158_v2 = vld [vmem:[#allocation89_spill] sm:$0xff] }
 0x41b   : > { %14151 = vst [vmem:[#allocation84_spill] sm:$0xff] %v12792_v61  ;;  %v9872_v5 = vpop.f32.mrf.mxu1  ;;  %v4100_v47 = vadd.f32 %v14154_v59, %v12546_v40  ;;  %v4103_v49 = vadd.f32 %v14158_v2, %v12560_v36  ;;  %v5676_v59 = vld [vmem:[#allocation2 + $0x242] sm:$0xff] }
 0x41c   : > { %4588 = vst.msk [vmem:[#allocation3 + $0x8] sm:$0xff] %vm4586_vm5, %v4548_v4  ;;  %v4553_v28 = vmax.f32 %v4514_v54, 0.0  ;;  %v4512_v10 = vadd.f32 %v12758_v23, %v4466_v38  ;;  %v4469_v18 = vadd.f32 %v9872_v5, %v4102_v58  ;;  %v12798_v13 = vpop.f32.mrf.mxu0  ;;  %v14156_v4 = vld [vmem:[#allocation87_spill] sm:$0xff]  ;;  %v14161_v2 = vld [vmem:[#allocation93_spill] sm:$0xff] }
 0x41d   : > { %14153 = vst [vmem:[#allocation85_spill] sm:$0xff] %v12798_v13  ;;  %v4323_v46 = vpop.f32.mrf.mxu1  ;;  %v4105_v54 = vadd.f32 %v14156_v4, %v12553_v31  ;;  %v14159_v31 = vld [vmem:[#allocation91_spill] sm:$0xff]  ;;  %v5679_v4 = vld [vmem:[#allocation2 + $0x25a] sm:$0xff] }
 0x41e   : > { %4593 = vst.msk [vmem:[#allocation3 + $0x30] sm:$0xff] %vm4586_vm5, %v4553_v28  ;;  %v4551_v17 = vmax.f32 %v4512_v10, 0.0  ;;  %v4515_v50 = vadd.f32 %v12758_v23, %v4469_v18  ;;  %v4467_v24 = vadd.f32 %v4323_v46, %v4100_v47  ;;  %v12804_v61 = vpop.f32.mrf.mxu0  ;;  %v4106_v18 = vadd.f32 %v14159_v31, %v12566_v53  ;;  %v7119_v13 = vld [vmem:[#allocation2 + $0x1b5] sm:$0xff] }
 0x41f   : > { %14155 = vst [vmem:[#allocation86_spill] sm:$0xff] %v12804_v61  ;;  %v9875_v38 = vpop.f32.mrf.mxu1  ;;  %10066 = vmatmul.mubr.msk.bf16.gmra.mxu1 %vm1191_vm4, %v5698_v12  ;;  %v7115_v61 = vld [vmem:[#allocation2 + $0x195] sm:$0xff] }
 0x420   : > { %4591 = vst.msk [vmem:[#allocation3 + $0x20] sm:$0xff] %vm4586_vm5, %v4551_v17  ;;  %v4554_v40 = vmax.f32 %v4515_v50, 0.0  ;;  %v4513_v35 = vadd.f32 %v12758_v23, %v4467_v24  ;;  %v4472_v58 = vadd.f32 %v9875_v38, %v4105_v54  ;;  %10069 = vmatprep.mubr.msk.bf16.mxu1 %vm1191_vm4, %v5699_v0  ;;  %v12812_v60 = vpop.f32.mrf.mxu0  ;;  %v5677_v50 = vld [vmem:[#allocation2 + $0x24a] sm:$0xff]  ;;  %v5678_v24 = vld [vmem:[#allocation2 + $0x252] sm:$0xff] }
 0x421   : > { %14157 = vst [vmem:[#allocation87_spill] sm:$0xff] %v12812_v60  ;;  %v7968_v5 = vld [vmem:[#allocation3 + $0x10] ss:$2 sm:$0xff]  ;;  %v8046_v28 = vld [vmem:[#allocation3 + $0x11] ss:$2 sm:$0xff]  ;;  %v4336_v10 = vpop.f32.mrf.mxu1  ;;  %v4104_v60 = vadd.f32 %v14161_v2, %v12572_v42 }
 0x422   : > { %v8122_v47 = vmax.f32 %v7968_v5, %v8046_v28  ;;  %4594 = vst.msk [vmem:[#allocation3 + $0x38] sm:$0xff] %vm4586_vm5, %v4554_v40  ;;  %v4552_v46 = vmax.f32 %v4513_v35, 0.0  ;;  %v4518_v12 = vadd.f32 %v12758_v23, %v4472_v58  ;;  %v4470_v17 = vadd.f32 %v4336_v10, %v4103_v49  ;;  %v12820_v0 = vpop.f32.mrf.mxu0 }
 0x423   : > { %14160 = vst [vmem:[#allocation89_spill] sm:$0xff] %v12820_v0  ;;  %v7966_v36 = vld [vmem:[#allocation3] ss:$2 sm:$0xff]  ;;  %v8044_v54 = vld [vmem:[#allocation3 + $0x1] ss:$2 sm:$0xff]  ;;  %v9876_v38 = vpop.f32.mrf.mxu1  ;;  %v5700_v28 = vpack.c.bf16 %v5677_v50, %v5676_v59  ;;  %v5701_v10 = vpack.c.bf16 %v5679_v4, %v5678_v24 }
 0x424   : > { %8161 = vst.msk [vmem:[#allocation4 + $0x8] sm:$0xff] %vm4586_vm5, %v8122_v47  ;;  %v8121_v53 = vmax.f32 %v7966_v36, %v8044_v54  ;;  %4592 = vst.msk [vmem:[#allocation3 + $0x28] sm:$0xff] %vm4586_vm5, %v4552_v46  ;;  %v4557_v40 = vmax.f32 %v4518_v12, 0.0  ;;  %v4516_v35 = vadd.f32 %v12758_v23, %v4470_v17  ;;  %v4473_v58 = vadd.f32 %v9876_v38, %v4106_v18  ;;  %v12827_v49 = vpop.f32.mrf.mxu0  ;;  %v14164_v46 = vld [vmem:[#allocation95_spill] sm:$0xff] }
 0x425   : > { %14162 = vst [vmem:[#allocation91_spill] sm:$0xff] %v12827_v49  ;;  %v4339_v5 = vpop.f32.mrf.mxu1  ;;  %v4109_v12 = vadd.f32 %v14164_v46, %v12579_v8  ;;  %v14167_v8 = vld [vmem:[#allocation99_spill] sm:$0xff]  ;;  %v6416_v49 = vld [vmem:[#allocation2 + $0x284] sm:$0xff] }
 0x426   : > { %8160 = vst.msk [vmem:[#allocation4] sm:$0xff] %vm4586_vm5, %v8121_v53  ;;  %4597 = vst.msk [vmem:[#allocation3 + $0x50] sm:$0xff] %vm4586_vm5, %v4557_v40  ;;  %v4555_v31 = vmax.f32 %v4516_v35, 0.0  ;;  %v4519_v42 = vadd.f32 %v12758_v23, %v4473_v58  ;;  %v4471_v47 = vadd.f32 %v4339_v5, %v4104_v60  ;;  %v12832_v36 = vpop.f32.mrf.mxu0  ;;  %v14166_v60 = vld [vmem:[#allocation97_spill] sm:$0xff]  ;;  %v4110_v53 = vadd.f32 %v14167_v8, %v12592_v33  ;;  %v7113_v0 = vld [vmem:[#allocation2 + $0x185] sm:$0xff] }
 0x427   : > { %14163 = vst [vmem:[#allocation93_spill] sm:$0xff] %v12832_v36  ;;  %v9879_v17 = vpop.f32.mrf.mxu1  ;;  %10070 = vmatmul.mubr.msk.bf16.gmra.mxu1 %vm1191_vm4, %v5700_v28  ;;  %v4107_v4 = vadd.f32 %v14166_v60, %v12586_v41  ;;  %v5680_v40 = vld [vmem:[#allocation2 + $0x262] sm:$0xff] }
 0x428   : > { %4595 = vst.msk [vmem:[#allocation3 + $0x40] sm:$0xff] %vm4586_vm5, %v4555_v31  ;;  %v4558_v18 = vmax.f32 %v4519_v42, 0.0  ;;  %v4517_v59 = vadd.f32 %v12758_v23, %v4471_v47  ;;  %v4476_v50 = vadd.f32 %v9879_v17, %v4109_v12  ;;  %10073 = vmatprep.mubr.msk.bf16.mxu1 %vm1191_vm4, %v5701_v10  ;;  %v12840_v24 = vpop.f32.mrf.mxu0  ;;  %v5681_v31 = vld [vmem:[#allocation2 + $0x26a] sm:$0xff]  ;;  %v5682_v42 = vld [vmem:[#allocation2 + $0x272] sm:$0xff]  ;;  %v5683_v47 = vld [vmem:[#allocation2 + $0x27a] sm:$0xff] }
 0x429   : > { %14165 = vst [vmem:[#allocation95_spill] sm:$0xff] %v12840_v24  ;;  %v7972_v54 = vld [vmem:[#allocation3 + $0x30] ss:$2 sm:$0xff]  ;;  %v8050_v38 = vld [vmem:[#allocation3 + $0x31] ss:$2 sm:$0xff]  ;;  %v4352_v2 = vpop.f32.mrf.mxu1 }
 0x42a   : > { %v8124_v35 = vmax.f32 %v7972_v54, %v8050_v38  ;;  %4598 = vst.msk [vmem:[#allocation3 + $0x58] sm:$0xff] %vm4586_vm5, %v4558_v18  ;;  %v4556_v58 = vmax.f32 %v4517_v59, 0.0  ;;  %v4522_v5 = vadd.f32 %v12758_v23, %v4476_v50  ;;  %v4474_v28 = vadd.f32 %v4352_v2, %v4107_v4  ;;  %v12848_v10 = vpop.f32.mrf.mxu0  ;;  %v14169_v17 = vld [vmem:[#allocation100_spill] sm:$0xff]  ;;  %v6412_v36 = vld [vmem:[#allocation2 + $0x264] sm:$0xff] }
 0x42b   : > { %14168 = vst [vmem:[#allocation97_spill] sm:$0xff] %v12848_v10  ;;  %v7970_v41 = vld [vmem:[#allocation3 + $0x20] ss:$2 sm:$0xff]  ;;  %v8048_v46 = vld [vmem:[#allocation3 + $0x21] ss:$2 sm:$0xff]  ;;  %v9880_v12 = vpop.f32.mrf.mxu1  ;;  %v4108_v60 = vadd.f32 %v14169_v17, %v12598_v52  ;;  %v5702_v38 = vpack.c.bf16 %v5681_v31, %v5680_v40  ;;  %v5703_v2 = vpack.c.bf16 %v5683_v47, %v5682_v42  ;;  %v4111_v47 = vadd.f32 %v11736_v16, %v12612_v21 }
 0x42c   : > { %8163 = vst.msk [vmem:[#allocation4 + $0x18] sm:$0xff] %vm4586_vm5, %v8124_v35  ;;  %v8123_v33 = vmax.f32 %v7970_v41, %v8048_v46  ;;  %4596 = vst.msk [vmem:[#allocation3 + $0x48] sm:$0xff] %vm4586_vm5, %v4556_v58  ;;  %v4561_v18 = vmax.f32 %v4522_v5, 0.0  ;;  %v4520_v59 = vadd.f32 %v12758_v23, %v4474_v28  ;;  %v4477_v50 = vadd.f32 %v9880_v12, %v4110_v53  ;;  %v12855_v4 = vpop.f32.mrf.mxu0  ;;  %v14172_v58 = vld [vmem:[#allocation101_spill] sm:$0xff]  ;;  %v6378_v46 = vld [vmem:[#allocation2 + $0x154] sm:$0xff] }
 0x42d   : > { %14170 = vst [vmem:[#allocation99_spill] sm:$0xff] %v12855_v4  ;;  %v4355_v54 = vpop.f32.mrf.mxu1  ;;  %v4113_v5 = vadd.f32 %v14172_v58, %v12605_v56  ;;  %v6379_v12 = vld [vmem:[#allocation2 + $0x15c] sm:$0xff] }
 0x42e   : > { %8162 = vst.msk [vmem:[#allocation4 + $0x10] sm:$0xff] %vm4586_vm5, %v8123_v33  ;;  %4601 = vst.msk [vmem:[#allocation3 + $0x70] sm:$0xff] %vm4586_vm5, %v4561_v18  ;;  %v4559_v8 = vmax.f32 %v4520_v59, 0.0  ;;  %v4523_v52 = vadd.f32 %v12758_v23, %v4477_v50  ;;  %v4475_v35 = vadd.f32 %v4355_v54, %v4108_v60  ;;  %v12860_v41 = vpop.f32.mrf.mxu0  ;;  %v14174_v33 = vld [vmem:[#allocation102_spill] sm:$0xff]  ;;  %v8200_v58 = vld [vmem:[#allocation4 + $0x8] sm:$0xf] }
 0x42f   : > { %14171 = vst [vmem:[#allocation100_spill] sm:$0xff] %v12860_v41  ;;  %v9883_v53 = vpop.f32.mrf.mxu1  ;;  %10074 = vmatmul.mubr.msk.bf16.gmra.mxu1 %vm1191_vm4, %v5702_v38  ;;  %v4114_v18 = vadd.f32 %v14174_v33, %v12618_v63 }
 0x430   : > { %4599 = vst.msk [vmem:[#allocation3 + $0x60] sm:$0xff] %vm4586_vm5, %v4559_v8  ;;  %v4562_v40 = vmax.f32 %v4523_v52, 0.0  ;;  %v4521_v28 = vadd.f32 %v12758_v23, %v4475_v35  ;;  %v4480_v31 = vadd.f32 %v9883_v53, %v4113_v5  ;;  %10077 = vmatprep.mubr.msk.bf16.mxu1 %vm1191_vm4, %v5703_v2  ;;  %v12868_v42 = vpop.f32.mrf.mxu0  ;;  %v5684_v8 = vld [vmem:[#allocation2 + $0x282] sm:$0xff]  ;;  %v6417_v35 = vpack.c.bf16 %v6379_v12, %v6378_v46 }
 0x431   : > { %14173 = vst [vmem:[#allocation101_spill] sm:$0xff] %v12868_v42  ;;  %v7976_v56 = vld [vmem:[#allocation3 + $0x50] ss:$2 sm:$0xff]  ;;  %v8054_v17 = vld [vmem:[#allocation3 + $0x51] ss:$2 sm:$0xff]  ;;  %v4368_v60 = vpop.f32.mrf.mxu1  ;;  %v4112_v12 = vadd.f32 %v11750_v20, %v12624_v14  ;;  %v5704_v33 = vpack.c.bf16 %v5684_v8, %v5684_v8 }
 0x432   : > { %v8126_v59 = vmax.f32 %v7976_v56, %v8054_v17  ;;  %4602 = vst.msk [vmem:[#allocation3 + $0x78] sm:$0xff] %vm4586_vm5, %v4562_v40  ;;  %v4560_v50 = vmax.f32 %v4521_v28, 0.0  ;;  %v4526_v54 = vadd.f32 %v12758_v23, %v4480_v31  ;;  %v4478_v38 = vadd.f32 %v4368_v60, %v4111_v47  ;;  %v12877_v2 = vpop.f32.mrf.mxu0  ;;  %v8199_v31 = vld [vmem:[#allocation4] sm:$0xff]  ;;  %v14177_v17 = vld [vmem:[#allocation103_spill] sm:$0xff] }
 0x433   : > { %14175 = vst [vmem:[#allocation102_spill] sm:$0xff] %v12877_v2  ;;  %v7974_v16 = vld [vmem:[#allocation3 + $0x40] ss:$2 sm:$0xff]  ;;  %v8052_v21 = vld [vmem:[#allocation3 + $0x41] ss:$2 sm:$0xff]  ;;  %v9884_v52 = vpop.f32.mrf.mxu1  ;;  %v4117_v60 = vadd.f32 %v14177_v17, %v12631_v15 }
 0x434   : > { %8165 = vst.msk [vmem:[#allocation4 + $0x28] sm:$0xff] %vm4586_vm5, %v8126_v59  ;;  %v8125_v5 = vmax.f32 %v7974_v16, %v8052_v21  ;;  %4600 = vst.msk [vmem:[#allocation3 + $0x68] sm:$0xff] %vm4586_vm5, %v4560_v50  ;;  %v4565_v63 = vmax.f32 %v4526_v54, 0.0  ;;  %v4524_v53 = vadd.f32 %v12758_v23, %v4478_v38  ;;  %v4481_v40 = vadd.f32 %v9884_v52, %v4114_v18  ;;  %v12882_v28 = vpop.f32.mrf.mxu0  ;;  %v14179_v8 = vld [vmem:[#allocation104_spill] sm:$0xff] }
 0x435   : > { %14176 = vst [vmem:[#allocation184_spill] sm:$0xff] %v12882_v28  ;;  %v8201_v47 = vld [vmem:[#allocation4 + $0xd] sm:$0xff]  ;;  %v8202_v46 = vld [vmem:[#allocation4 + $0x15] sm:$0xf]  ;;  %v4371_v56 = vpop.f32.mrf.mxu1  ;;  %v4115_v52 = vadd.f32 %v14179_v8, %v12636_v6  ;;  %v6382_v17 = vld [vmem:[#allocation2 + $0x174] sm:$0xff] }
 0x436   : > { %v8203_v18 = vmax.f32 %v8199_v31, %v8201_v47  ;;  %v8204_v59 = vmax.f32 %v8200_v58, %v8202_v46  ;;  %8164 = vst.msk [vmem:[#allocation4 + $0x20] sm:$0xff] %vm4586_vm5, %v8125_v5  ;;  %4605 = vst.msk [vmem:[#allocation3 + $0x90] sm:$0xff] %vm4586_vm5, %v4565_v63  ;;  %v4563_v50 = vmax.f32 %v4524_v53, 0.0  ;;  %v4527_v54 = vadd.f32 %v12758_v23, %v4481_v40  ;;  %v12896_v38 = vpop.f32.mrf.mxu0  ;;  %v6380_v40 = vld [vmem:[#allocation2 + $0x164] sm:$0xff]  ;;  %v6383_v6 = vld [vmem:[#allocation2 + $0x17c] sm:$0xff] }
 0x437   : > { %14178 = vst [vmem:[#allocation103_spill] sm:$0xff] %v12896_v38  ;;  %v4479_v16 = vadd.f32 %v4371_v56, %v4112_v12  ;;  %v9887_v21 = vpop.f32.mrf.mxu1  ;;  %10078 = vmatmul.mubr.msk.bf16.gmra.mxu1 %vm1191_vm4, %v5704_v33  ;;  %v6381_v56 = vld [vmem:[#allocation2 + $0x16c] sm:$0xff] }
 0x438   : > { %8205 = vst.msk [vmem:[%s12887_s29] sm:$0xff] %vm4586_vm5, %v8203_v18  ;;  %4603 = vst.msk [vmem:[#allocation3 + $0x80] sm:$0xff] %vm4586_vm5, %v4563_v50  ;;  %v4566_v20 = vmax.f32 %v4527_v54, 0.0  ;;  %v4484_v14 = vadd.f32 %v9887_v21, %v4117_v60  ;;  %10129 = vmatprep.mubr.msk.bf16.mxu1 %vm1191_vm4, %v6417_v35  ;;  %v10212_v15 = vpop.f32.mrf.mxu0  ;;  %v4118_v35 = vadd.f32 %v11772_v11, %v12642_v57  ;;  %v14181_v50 = vld [vmem:[#allocation105_spill] sm:$0xff] }
 0x439   : > { %8207 = vst.msk [vmem:[%s12887_s29 + $0x8] sm:$0xf] %vm8206_vm6, %v8204_v59  ;;  %v7980_v58 = vld [vmem:[#allocation3 + $0x70] ss:$2 sm:$0xff]  ;;  %v8058_v5 = vld [vmem:[#allocation3 + $0x71] ss:$2 sm:$0xff]  ;;  %v4525_v63 = vadd.f32 %v12758_v23, %v4479_v16  ;;  %v4384_v53 = vpop.f32.mrf.mxu1  ;;  %v4116_v54 = vadd.f32 %v14181_v50, %v12648_v45  ;;  %v6419_v45 = vpack.c.bf16 %v6383_v6, %v6382_v17 }
 0x43a   : > { %v8128_v31 = vmax.f32 %v7980_v58, %v8058_v5  ;;  %4606 = vst.msk [vmem:[#allocation3 + $0x98] sm:$0xff] %vm4586_vm5, %v4566_v20  ;;  %v4530_v47 = vadd.f32 %v12758_v23, %v4484_v14  ;;  %v4482_v46 = vadd.f32 %v4384_v53, %v4115_v52  ;;  %v12910_v12 = vpop.f32.mrf.mxu0  ;;  %v14182_v52 = vld [vmem:[#allocation15_spill] sm:$0xff]  ;;  %v6418_v5 = vpack.c.bf16 %v6381_v56, %v6380_v40  ;;  %v14183_v6 = vld [vmem:[#allocation16_spill] sm:$0xff] }
 0x43b   : > { %14180 = vst [vmem:[#allocation104_spill] sm:$0xff] %v12910_v12  ;;  %v7978_v60 = vld [vmem:[#allocation3 + $0x60] ss:$2 sm:$0xff]  ;;  %v8056_v33 = vld [vmem:[#allocation3 + $0x61] ss:$2 sm:$0xff]  ;;  %v4564_v18 = vmax.f32 %v4525_v63, 0.0  ;;  %v9888_v59 = vpop.f32.mrf.mxu1  ;;  %v4121_v58 = vadd.f32 %v14182_v52, %v12655_v44 }
 0x43c   : > { %8167 = vst.msk [vmem:[#allocation4 + $0x38] sm:$0xff] %vm4586_vm5, %v8128_v31  ;;  %v8127_v16 = vmax.f32 %v7978_v60, %v8056_v33  ;;  %v4569_v21 = vmax.f32 %v4530_v47, 0.0  ;;  %v4528_v20 = vadd.f32 %v12758_v23, %v4482_v46  ;;  %v4485_v14 = vadd.f32 %v9888_v59, %v4118_v35  ;;  %v12918_v15 = vpop.f32.mrf.mxu0  ;;  %v10438_v63 = vld [vmem:[#allocation9 + $0x70] sm:$0xff]   ;;  %v6386_v52 = vld [vmem:[#allocation2 + $0x194] sm:$0xff] }
 0x43d   : > { %v8208_v11 = vld [vmem:[#allocation4 + $0x1a] sm:$0xff]  ;;  %v8210_v57 = vld [vmem:[#allocation4 + $0x27] sm:$0xff]  ;;  %4604 = vst.msk [vmem:[#allocation3 + $0x88] sm:$0xff] %vm4586_vm5, %v4564_v18  ;;  %v4387_v8 = vpop.f32.mrf.mxu1  ;;  %v4119_v33 = vadd.f32 %v14183_v6, %v12665_v1 }
 0x43e   : > { %v8212_v53 = vmax.f32 %v8208_v11, %v8210_v57  ;;  %8166 = vst.msk [vmem:[#allocation4 + $0x30] sm:$0xff] %vm4586_vm5, %v8127_v16  ;;  %4609 = vst.msk [vmem:[#allocation3 + $0xb0] sm:$0xff] %vm4586_vm5, %v4569_v21  ;;  %v4567_v31 = vmax.f32 %v4528_v20, 0.0  ;;  %v4531_v47 = vadd.f32 %v12758_v23, %v4485_v14  ;;  %v4483_v46 = vadd.f32 %v4387_v8, %v4116_v54  ;;  %v12926_v35 = vpop.f32.mrf.mxu0  ;;  %v14184_v54 = vld [vmem:[#allocation17_spill] sm:$0xff]  ;;  %v6384_v21 = vld [vmem:[#allocation2 + $0x184] sm:$0xff] }
 0x43f   : > { %v9891_v60 = vpop.f32.mrf.mxu1  ;;  %10130 = vmatmul.mubr.msk.bf16.vlgmr.msra.gmra.mxu1 %vm1191_vm4, %v6418_v5  ;;  %v4122_v16 = vadd.f32 %v14184_v54, %v12671_v51  ;;  %v6385_v8 = vld [vmem:[#allocation2 + $0x18c] sm:$0xff]  ;;  %v6387_v1 = vld [vmem:[#allocation2 + $0x19c] sm:$0xff] }
 0x440   : > { %8214 = vst.msk [vmem:[%s12887_s29 + $0xc] sm:$0xff] %vm4586_vm5, %v8212_v53  ;;  %4607 = vst.msk [vmem:[#allocation3 + $0xa0] sm:$0xff] %vm4586_vm5, %v4567_v31  ;;  %v4570_v44 = vmax.f32 %v4531_v47, 0.0  ;;  %v4529_v40 = vadd.f32 %v12758_v23, %v4483_v46  ;;  %v4488_v56 = vadd.f32 %v9891_v60, %v4121_v58  ;;  %10214 = vmatpush3.bf16.msra.mxu1 %v12663_v34  ;;  %10133 = vmatprep.mubr.msk.bf16.mxu1 %vm1191_vm4, %v6419_v45  ;;  %v12935_v17 = vpop.f32.mrf.mxu0  ;;  %v14185_v46 = vld [vmem:[#allocation18_spill] sm:$0xff] }
 0x441   : > { %v7984_v18 = vld [vmem:[#allocation3 + $0x90] ss:$2 sm:$0xff]  ;;  %v8062_v59 = vld [vmem:[#allocation3 + $0x91] ss:$2 sm:$0xff]  ;;  %v4400_v50 = vpop.f32.mrf.mxu1  ;;  %10215 = vmatprep.subr.bf16.mxu1 %v10438_v63  ;;  %v4120_v60 = vadd.f32 %v14185_v46, %v12678_v48 }
 0x442   : > { %v8130_v20 = vmax.f32 %v7984_v18, %v8062_v59  ;;  %4610 = vst.msk [vmem:[#allocation3 + $0xb8] sm:$0xff] %vm4586_vm5, %v4570_v44  ;;  %v4568_v14 = vmax.f32 %v4529_v40, 0.0  ;;  %v4534_v34 = vadd.f32 %v12758_v23, %v4488_v56  ;;  %v4486_v11 = vadd.f32 %v4400_v50, %v4119_v33  ;;  %v12943_v57 = vpop.f32.mrf.mxu0  ;;  %v8209_v44 = vld [vmem:[#allocation4 + $0x22] sm:$0xf]  ;;  %v14186_v33 = vld [vmem:[#allocation19_spill] sm:$0xff] }
 0x443   : > { %v9892_v58 = vpop.f32.mrf.mxu1  ;;  %v4125_v18 = vadd.f32 %v14186_v33, %v12685_v32  ;;  %v6420_v59 = vpack.c.bf16 %v6385_v8, %v6384_v21  ;;  %v6421_v50 = vpack.c.bf16 %v6387_v1, %v6386_v52  ;;  %v14189_v8 = vld [vmem:[#allocation20_spill] sm:$0xff]  ;;  %v6388_v1 = vld [vmem:[#allocation2 + $0x1a4] sm:$0xff] }
 0x444   : > { %8169 = vst.msk [vmem:[#allocation4 + $0x48] sm:$0xff] %vm4586_vm5, %v8130_v20  ;;  %v7982_v5 = vld [vmem:[#allocation3 + $0x80] ss:$2 sm:$0xff]  ;;  %v8060_v45 = vld [vmem:[#allocation3 + $0x81] ss:$2 sm:$0xff]  ;;  %4608 = vst.msk [vmem:[#allocation3 + $0xa8] sm:$0xff] %vm4586_vm5, %v4568_v14  ;;  %v4532_v53 = vadd.f32 %v12758_v23, %v4486_v11  ;;  %v4489_v31 = vadd.f32 %v9892_v58, %v4122_v16  ;;  %v12948_v47 = vpop.f32.mrf.mxu0  ;;  %10216 = vmatpush3.bf16.msra.mxu1 %v10438_v63  ;;  %v4123_v52 = vadd.f32 %v14189_v8, %v12692_v7 }
 0x445   : > { %v4573_v51 = vmax.f32 %v4534_v34, 0.0  ;;  %v8211_v40 = vld [vmem:[#allocation4 + $0x2f] sm:$0xf]  ;;  %v8129_v56 = vmax.f32 %v7982_v5, %v8060_v45  ;;  %v4403_v6 = vpop.f32.mrf.mxu1 }
 0x446   : > { %v8213_v54 = vmax.f32 %v8209_v44, %v8211_v40  ;;  %v4571_v16 = vmax.f32 %v4532_v53, 0.0  ;;  %v4535_v20 = vadd.f32 %v12758_v23, %v4489_v31  ;;  %v4487_v14 = vadd.f32 %v4403_v6, %v4120_v60  ;;  %v12956_v34 = vpop.f32.mrf.mxu0  ;;  %v8217_v53 = vld [vmem:[#allocation4 + $0x3c] sm:$0xf]  ;;  %v6391_v6 = vld [vmem:[#allocation2 + $0x1bc] sm:$0xff] }
 0x447   : > { %4613 = vst.msk [vmem:[#allocation3 + $0xd0] sm:$0xff] %vm4586_vm5, %v4573_v51  ;;  %14187 = vst [vmem:[#allocation105_spill] sm:$0xff] %v12956_v34  ;;  %v9895_v48 = vpop.f32.mrf.mxu1  ;;  %10134 = vmatmul.mubr.msk.bf16.gmra.mxu1 %vm1191_vm4, %v6420_v59  ;;  %v6389_v51 = vld [vmem:[#allocation2 + $0x1ac] sm:$0xff]  ;;  %v14191_v59 = vld [vmem:[#allocation21_spill] sm:$0xff] }
 0x448   : > { %8168 = vst.msk [vmem:[#allocation4 + $0x40] sm:$0xff] %vm4586_vm5, %v8129_v56  ;;  %4611 = vst.msk [vmem:[#allocation3 + $0xc0] sm:$0xff] %vm4586_vm5, %v4571_v16  ;;  %v4574_v32 = vmax.f32 %v4535_v20, 0.0  ;;  %v4533_v63 = vadd.f32 %v12758_v23, %v4487_v14  ;;  %v4492_v21 = vadd.f32 %v9895_v48, %v4125_v18  ;;  %10137 = vmatprep.mubr.msk.bf16.mxu1 %vm1191_vm4, %v6421_v50  ;;  %v12965_v11 = vpop.f32.mrf.mxu0  ;;  %v6390_v56 = vld [vmem:[#allocation2 + $0x1b4] sm:$0xff]  ;;  %v14192_v16 = vld [vmem:[#allocation22_spill] sm:$0xff] }
 0x449   : > { %8215 = vst.msk [vmem:[%s12887_s29 + $0x14] sm:$0xf] %vm8206_vm6, %v8213_v54  ;;  %14188 = vst [vmem:[#allocation15_spill] sm:$0xff] %v12965_v11  ;;  %v7988_v58 = vld [vmem:[#allocation3 + $0xb0] ss:$2 sm:$0xff]  ;;  %v4416_v45 = vpop.f32.mrf.mxu1  ;;  %v4126_v50 = vadd.f32 %v14191_v59, %v12698_v39  ;;  %v4124_v20 = vadd.f32 %v14192_v16, %v12704_v43 }
 0x44a   : > { %v8066_v5 = vld [vmem:[#allocation3 + $0xb1] ss:$2 sm:$0xff]  ;;  %4614 = vst.msk [vmem:[#allocation3 + $0xd8] sm:$0xff] %vm4586_vm5, %v4574_v32  ;;  %v4572_v46 = vmax.f32 %v4533_v63, 0.0  ;;  %v4538_v60 = vadd.f32 %v12758_v23, %v4492_v21  ;;  %v4490_v44 = vadd.f32 %v4416_v45, %v4123_v52  ;;  %v12971_v40 = vpop.f32.mrf.mxu0 }
 0x44b   : > { %v8132_v31 = vmax.f32 %v7988_v58, %v8066_v5  ;;  %14190 = vst [vmem:[#allocation16_spill] sm:$0xff] %v12971_v40  ;;  %v8219_v33 = vld [vmem:[#allocation4 + $0x49] sm:$0xf]  ;;  %v7986_v18 = vld [vmem:[#allocation3 + $0xa0] ss:$2 sm:$0xff]  ;;  %v9896_v54 = vpop.f32.mrf.mxu1  ;;  %v6422_v58 = vpack.c.bf16 %v6389_v51, %v6388_v1 }
 0x44c   : > { %v8064_v7 = vld [vmem:[#allocation3 + $0xa1] ss:$2 sm:$0xff]  ;;  %v8221_v14 = vmax.f32 %v8217_v53, %v8219_v33  ;;  %4612 = vst.msk [vmem:[#allocation3 + $0xc8] sm:$0xff] %vm4586_vm5, %v4572_v46  ;;  %v4577_v32 = vmax.f32 %v4538_v60, 0.0  ;;  %v4536_v63 = vadd.f32 %v12758_v23, %v4490_v44  ;;  %v12980_v21 = vpop.f32.mrf.mxu0  ;;  %v4493_v8 = vadd.f32 %v9896_v54, %v4126_v50  ;;  %v14238_v11 = vld [vmem:[#allocation109_spill] sm:$0xff] }
 0x44d   : > { %8171 = vst.msk [vmem:[#allocation4 + $0x58] sm:$0xff] %vm4586_vm5, %v8132_v31  ;;  %v8131_v48 = vmax.f32 %v7986_v18, %v8064_v7  ;;  %14193 = vst [vmem:[#allocation17_spill] sm:$0xff] %v12980_v21  ;;  %v4419_v52 = vpop.f32.mrf.mxu1  ;;  %v8216_v5 = vld [vmem:[#allocation4 + $0x34] sm:$0xff]  ;;  %v6423_v60 = vpack.c.bf16 %v6391_v6, %v6390_v56  ;;  %v14197_v59 = vld [vmem:[#allocation24_spill] sm:$0xff] }
 0x44e   : > { %8223 = vst.msk [vmem:[%s12887_s29 + $0x20] sm:$0xf] %vm8206_vm6, %v8221_v14  ;;  %v4575_v43 = vmax.f32 %v4536_v63, 0.0  ;;  %v4491_v45 = vadd.f32 %v4419_v52, %v4124_v20  ;;  %v12986_v53 = vpop.f32.mrf.mxu0  ;;  %v14195_v31 = vld [vmem:[#allocation23_spill] sm:$0xff]  ;;  %v4539_v1 = vadd.f32 %v12758_v23, %v4493_v8  ;;  %v4127_v50 = vadd.f32 %v14197_v59, %v12718_v9  ;;  %v14198_v16 = vld [vmem:[#allocation106_spill] sm:$0xff]  ;;  %v6395_v9 = vld [vmem:[#allocation2 + $0x1dc] sm:$0xff] }
 0x44f   : > { %v8218_v39 = vld [vmem:[#allocation4 + $0x41] sm:$0xff]  ;;  %8170 = vst.msk [vmem:[#allocation4 + $0x50] sm:$0xff] %vm4586_vm5, %v8131_v48  ;;  %4617 = vst.msk [vmem:[#allocation3 + $0xf0] sm:$0xff] %vm4586_vm5, %v4577_v32  ;;  %v4129_v46 = vadd.f32 %v14195_v31, %v12711_v29  ;;  %v9899_v51 = vpop.f32.mrf.mxu1  ;;  %10138 = vmatmul.mubr.msk.bf16.gmra.mxu1 %vm1191_vm4, %v6422_v58  ;;  %v4130_v20 = vadd.f32 %v14198_v16, %v12724_v37  ;;  %v6392_v14 = vld [vmem:[#allocation2 + $0x1c4] sm:$0xff] }
 0x450   : > { %14194 = vst [vmem:[#allocation18_spill] sm:$0xff] %v12986_v53  ;;  %v8220_v44 = vmax.f32 %v8216_v5, %v8218_v39  ;;  %4615 = vst.msk [vmem:[#allocation3 + $0xe0] sm:$0xff] %vm4586_vm5, %v4575_v43  ;;  %v4537_v33 = vadd.f32 %v12758_v23, %v4491_v45  ;;  %10141 = vmatprep.mubr.msk.bf16.mxu1 %vm1191_vm4, %v6423_v60  ;;  %v12995_v7 = vpop.f32.mrf.mxu0  ;;  %v4578_v6 = vmax.f32 %v4539_v1, 0.0  ;;  %v6393_v58 = vld [vmem:[#allocation2 + $0x1cc] sm:$0xff]  ;;  %v6394_v5 = vld [vmem:[#allocation2 + $0x1d4] sm:$0xff] }
 0x451   : > { %v4496_v18 = vadd.f32 %v9899_v51, %v4129_v46  ;;  %14196 = vst [vmem:[#allocation19_spill] sm:$0xff] %v12995_v7  ;;  %v7992_v29 = vld [vmem:[#allocation3 + $0xd0] ss:$2 sm:$0xff]  ;;  %v8070_v56 = vld [vmem:[#allocation3 + $0xd1] ss:$2 sm:$0xff]  ;;  %v4432_v54 = vpop.f32.mrf.mxu1  ;;  %v6425_v59 = vpack.c.bf16 %v6395_v9, %v6394_v5  ;;  %v6397_v9 = vld [vmem:[#allocation2 + $0x1ec] sm:$0xff] }
 0x452   : > { %8222 = vst.msk [vmem:[%s12887_s29 + $0x18] sm:$0xff] %vm4586_vm5, %v8220_v44  ;;  %v8134_v48 = vmax.f32 %v7992_v29, %v8070_v56  ;;  %v4576_v32 = vmax.f32 %v4537_v33, 0.0  ;;  %v4494_v8 = vadd.f32 %v4432_v54, %v4127_v50  ;;  %v13004_v52 = vpop.f32.mrf.mxu0  ;;  %4618 = vst.msk [vmem:[#allocation3 + $0xf8] sm:$0xff] %vm4586_vm5, %v4578_v6  ;;  %v14200_v31 = vld [vmem:[#allocation25_spill] sm:$0xff]  ;;  %v14203_v6 = vld [vmem:[#allocation26_spill] sm:$0xff] }
 0x453   : > { %v4542_v63 = vadd.f32 %v12758_v23, %v4496_v18  ;;  %14199 = vst [vmem:[#allocation20_spill] sm:$0xff] %v13004_v52  ;;  %v7990_v39 = vld [vmem:[#allocation3 + $0xc0] ss:$2 sm:$0xff]  ;;  %v8068_v43 = vld [vmem:[#allocation3 + $0xc1] ss:$2 sm:$0xff]  ;;  %v9900_v45 = vpop.f32.mrf.mxu1  ;;  %v4128_v46 = vadd.f32 %v14200_v31, %v12730_v55  ;;  %v6424_v18 = vpack.c.bf16 %v6393_v58, %v6392_v14  ;;  %v4133_v54 = vadd.f32 %v14203_v6, %v12737_v25 }
 0x454   : > { %8173 = vst.msk [vmem:[#allocation4 + $0x68] sm:$0xff] %vm4586_vm5, %v8134_v48  ;;  %v8133_v37 = vmax.f32 %v7990_v39, %v8068_v43  ;;  %4616 = vst.msk [vmem:[#allocation3 + $0xe8] sm:$0xff] %vm4586_vm5, %v4576_v32  ;;  %v4540_v44 = vadd.f32 %v12758_v23, %v4494_v8  ;;  %v4497_v1 = vadd.f32 %v9900_v45, %v4130_v20  ;;  %v13012_v51 = vpop.f32.mrf.mxu0  ;;  %v6396_v5 = vld [vmem:[#allocation2 + $0x1e4] sm:$0xff]  ;;  %v6398_v25 = vld [vmem:[#allocation2 + $0x1f4] sm:$0xff] }
 0x455   : > { %v4581_v60 = vmax.f32 %v4542_v63, 0.0  ;;  %14201 = vst [vmem:[#allocation21_spill] sm:$0xff] %v13012_v51  ;;  %v4435_v33 = vpop.f32.mrf.mxu1  ;;  %v14205_v63 = vld [vmem:[#allocation27_spill] sm:$0xff]  ;;  %v14208_v6 = vld [vmem:[#allocation28_spill] sm:$0xff]  ;;  %v14231_v7 = vld [vmem:[#allocation30_spill] sm:$0xff] }
 0x456   : > { %8172 = vst.msk [vmem:[#allocation4 + $0x60] sm:$0xff] %vm4586_vm5, %v8133_v37  ;;  %v4579_v50 = vmax.f32 %v4540_v44, 0.0  ;;  %v4543_v55 = vadd.f32 %v12758_v23, %v4497_v1  ;;  %v4495_v29 = vadd.f32 %v4435_v33, %v4128_v46  ;;  %v13017_v56 = vpop.f32.mrf.mxu0  ;;  %v4131_v8 = vadd.f32 %v14205_v63, %v12744_v27  ;;  %v8224_v27 = vld [vmem:[#allocation4 + $0x4e] sm:$0xff]  ;;  %v7131_v52 = vld [vmem:[#allocation2 + $0x215] sm:$0xff] }
 0x457   : > { %4621 = vst.msk [vmem:[#allocation3 + $0x110] sm:$0xff] %vm4586_vm5, %v4581_v60  ;;  %14202 = vst [vmem:[#allocation22_spill] sm:$0xff] %v13017_v56  ;;  %v9903_v16 = vpop.f32.mrf.mxu1  ;;  %10142 = vmatmul.mubr.msk.bf16.gmra.mxu1 %vm1191_vm4, %v6424_v18  ;;  %v6399_v60 = vld [vmem:[#allocation2 + $0x1fc] sm:$0xff]  ;;  %v6426_v63 = vpack.c.bf16 %v6397_v9, %v6396_v5  ;;  %v7130_v51 = vld [vmem:[#allocation2 + $0x20d] sm:$0xff] }
 0x458   : > { %4619 = vst.msk [vmem:[#allocation3 + $0x100] sm:$0xff] %vm4586_vm5, %v4579_v50  ;;  %v4582_v20 = vmax.f32 %v4543_v55, 0.0  ;;  %v4541_v14 = vadd.f32 %v12758_v23, %v4495_v29  ;;  %v4500_v48 = vadd.f32 %v9903_v16, %v4133_v54  ;;  %10145 = vmatprep.mubr.msk.bf16.mxu1 %vm1191_vm4, %v6425_v59  ;;  %v13025_v32 = vpop.f32.mrf.mxu0  ;;  %v4132_v54 = vadd.f32 %v14208_v6, %v12752_v3  ;;  %v8225_v16 = vld [vmem:[#allocation4 + $0x56] sm:$0xf]  ;;  %v7135_v40 = vld [vmem:[#allocation2 + $0x235] sm:$0xff]  ;;  %v14240_v34 = vld [vmem:[#allocation110_spill] sm:$0xff] }
 0x459   : > { %14204 = vst [vmem:[#allocation23_spill] sm:$0xff] %v13025_v32  ;;  %v4448_v58 = vpop.f32.mrf.mxu1  ;;  %v7996_v39 = vld [vmem:[#allocation3 + $0xf0] ss:$2 sm:$0xff]  ;;  %v8074_v43 = vld [vmem:[#allocation3 + $0xf1] ss:$2 sm:$0xff]  ;;  %v7159_v53 = vpack.c.bf16 %v7131_v52, %v7130_v51 }
 0x45a   : > { %4622 = vst.msk [vmem:[#allocation3 + $0x118] sm:$0xff] %vm4586_vm5, %v4582_v20  ;;  %v4580_v45 = vmax.f32 %v4541_v14, 0.0  ;;  %v4546_v31 = vadd.f32 %v12758_v23, %v4500_v48  ;;  %v4498_v46 = vadd.f32 %v4448_v58, %v4131_v8  ;;  %v13031_v37 = vpop.f32.mrf.mxu0  ;;  %v8136_v44 = vmax.f32 %v7996_v39, %v8074_v43  ;;  %v7132_v51 = vld [vmem:[#allocation2 + $0x21d] sm:$0xff] }
 0x45b   : > { %14206 = vst [vmem:[#allocation24_spill] sm:$0xff] %v13031_v37  ;;  %v7994_v1 = vld [vmem:[#allocation3 + $0xe0] ss:$2 sm:$0xff]  ;;  %v8072_v33 = vld [vmem:[#allocation3 + $0xe1] ss:$2 sm:$0xff]  ;;  %v9904_v18 = vpop.f32.mrf.mxu1  ;;  %v6427_v8 = vpack.c.bf16 %v6399_v60, %v6398_v25 }
 0x45c   : > { %v8135_v59 = vmax.f32 %v7994_v1, %v8072_v33  ;;  %4620 = vst.msk [vmem:[#allocation3 + $0x108] sm:$0xff] %vm4586_vm5, %v4580_v45  ;;  %v4585_v50 = vmax.f32 %v4546_v31, 0.0  ;;  %v4544_v55 = vadd.f32 %v12758_v23, %v4498_v46  ;;  %v13035_v29 = vpop.f32.mrf.mxu0  ;;  %8175 = vst.msk [vmem:[#allocation4 + $0x78] sm:$0xff] %vm4586_vm5, %v8136_v44  ;;  %v6400_v18 = vld [vmem:[#allocation2 + $0x204] sm:$0xff] }
 0x45d   : > { %14207 = vst [vmem:[#allocation106_spill] sm:$0xff] %v13035_v29  ;;  %v8226_v20 = vld [vmem:[#allocation4 + $0x5b] sm:$0xff]  ;;  %v8227_v14 = vld [vmem:[#allocation4 + $0x63] sm:$0xf]  ;;  %v4451_v48 = vpop.f32.mrf.mxu1 }
 0x45e   : > { %v8228_v58 = vmax.f32 %v8224_v27, %v8226_v20  ;;  %v8229_v39 = vmax.f32 %v8225_v16, %v8227_v14  ;;  %8174 = vst.msk [vmem:[#allocation4 + $0x70] sm:$0xff] %vm4586_vm5, %v8135_v59  ;;  %4625 = vst.msk [vmem:[#allocation3 + $0x130] sm:$0xff] %vm4586_vm5, %v4585_v50  ;;  %v4583_v43 = vmax.f32 %v4544_v55, 0.0  ;;  %v4499_v45 = vadd.f32 %v4451_v48, %v4132_v54  ;;  %v13042_v31 = vpop.f32.mrf.mxu0  ;;  %v6401_v27 = vld [vmem:[#allocation2 + $0x20c] sm:$0xff]  ;;  %v6402_v59 = vld [vmem:[#allocation2 + $0x214] sm:$0xff] }
 0x45f   : > { %14209 = vst [vmem:[#allocation25_spill] sm:$0xff] %v13042_v31  ;;  %v13044_v3 = vpop.f32.mrf.mxu1  ;;  %10146 = vmatmul.mubr.msk.bf16.gmra.mxu1 %vm1191_vm4, %v6426_v63  ;;  %v8232_v20 = vld [vmem:[#allocation4 + $0x68] sm:$0xff]  ;;  %v6428_v63 = vpack.c.bf16 %v6401_v27, %v6400_v18  ;;  %v7127_v31 = vld [vmem:[#allocation2 + $0x1f5] sm:$0xff] }
 0x460   : > { %8230 = vst.msk [vmem:[%s12887_s29 + $0x24] sm:$0xff] %vm4586_vm5, %v8228_v58  ;;  %4623 = vst.msk [vmem:[#allocation3 + $0x120] sm:$0xff] %vm4586_vm5, %v4583_v43  ;;  %v4545_v5 = vadd.f32 %v12758_v23, %v4499_v45  ;;  %10149 = vmatprep.mubr.msk.bf16.mxu1 %vm1191_vm4, %v6427_v8  ;;  %v13054_v9 = vpop.f32.mrf.mxu0  ;;  %v6403_v23 = vld [vmem:[#allocation2 + $0x21c] sm:$0xff] }
 0x461   : > { %8231 = vst.msk [vmem:[%s12887_s29 + $0x2c] sm:$0xf] %vm8206_vm6, %v8229_v39  ;;  %14210 = vst [vmem:[#allocation26_spill] sm:$0xff] %v13054_v9  ;;  %v8000_v25 = vld [vmem:[#allocation3 + $0x110] ss:$2 sm:$0xff]  ;;  %v13056_v60 = vpop.f32.mrf.mxu1  ;;  %v6429_v39 = vpack.c.bf16 %v6403_v23, %v6402_v59 }
 0x462   : > { %v8078_v46 = vld [vmem:[#allocation3 + $0x111] ss:$2 sm:$0xff]  ;;  %v4584_v1 = vmax.f32 %v4545_v5, 0.0  ;;  %v13058_v33 = vpop.f32.mrf.mxu0 }
 0x463   : > { %v8138_v44 = vmax.f32 %v8000_v25, %v8078_v46  ;;  %14211 = vst [vmem:[#allocation27_spill] sm:$0xff] %v13058_v33  ;;  %v7998_v50 = vld [vmem:[#allocation3 + $0x100] ss:$2 sm:$0xff]  ;;  %v8076_v55 = vld [vmem:[#allocation3 + $0x101] ss:$2 sm:$0xff]  ;;  %v13060_v6 = vpop.f32.mrf.mxu1 }
 0x464   : > { %v8137_v54 = vmax.f32 %v7998_v50, %v8076_v55  ;;  %4624 = vst.msk [vmem:[#allocation3 + $0x128] sm:$0xff] %vm4586_vm5, %v4584_v1  ;;  %v13064_v16 = vpop.f32.mrf.mxu0  ;;  %v6404_v46 = vld [vmem:[#allocation2 + $0x224] sm:$0xff]  ;;  %v6406_v1 = vld [vmem:[#allocation2 + $0x234] sm:$0xff]  ;;  %v6407_v50 = vld [vmem:[#allocation2 + $0x23c] sm:$0xff] }
 0x465   : > { %8177 = vst.msk [vmem:[#allocation4 + $0x88] sm:$0xff] %vm4586_vm5, %v8138_v44  ;;  %14212 = vst [vmem:[#allocation28_spill] sm:$0xff] %v13064_v16  ;;  %v8234_v14 = vld [vmem:[#allocation4 + $0x75] sm:$0xff]  ;;  %v13066_v48 = vpop.f32.mrf.mxu1  ;;  %v6431_v12 = vpack.c.bf16 %v6407_v50, %v6406_v1  ;;  %v6411_v50 = vld [vmem:[#allocation2 + $0x25c] sm:$0xff] }
 0x466   : > { %v8236_v8 = vmax.f32 %v8232_v20, %v8234_v14  ;;  %8176 = vst.msk [vmem:[#allocation4 + $0x80] sm:$0xff] %vm4586_vm5, %v8137_v54  ;;  %v13069_v58 = vpop.f32.mrf.mxu0  ;;  %v6405_v44 = vld [vmem:[#allocation2 + $0x22c] sm:$0xff]  ;;  %v8233_v54 = vld [vmem:[#allocation4 + $0x70] sm:$0xf]  ;;  %v6410_v1 = vld [vmem:[#allocation2 + $0x254] sm:$0xff] }
 0x467   : > { %14213 = vst [vmem:[#allocation185_spill] sm:$0xff] %v13069_v58  ;;  %v13071_v43 = vpop.f32.mrf.mxu1  ;;  %10150 = vmatmul.mubr.msk.bf16.gmra.mxu1 %vm1191_vm4, %v6428_v63  ;;  %v6430_v63 = vpack.c.bf16 %v6405_v44, %v6404_v46  ;;  %v6408_v46 = vld [vmem:[#allocation2 + $0x244] sm:$0xff]  ;;  %v6409_v44 = vld [vmem:[#allocation2 + $0x24c] sm:$0xff]  ;;  %v6433_v41 = vpack.c.bf16 %v6411_v50, %v6410_v1  ;;  %v6415_v1 = vld [vmem:[#allocation2 + $0x27c] sm:$0xff] }
 0x468   : > { %8238 = vst.msk [vmem:[%s12887_s29 + $0x30] sm:$0xff] %vm4586_vm5, %v8236_v8  ;;  %10153 = vmatprep.mubr.msk.bf16.mxu1 %vm1191_vm4, %v6429_v39  ;;  %v13077_v45 = vpop.f32.mrf.mxu0  ;;  %v7123_v33 = vld [vmem:[#allocation2 + $0x1d5] sm:$0xff] }
 0x469   : > { %14214 = vst [vmem:[#allocation186_spill] sm:$0xff] %v13077_v45  ;;  %v13079_v5 = vpop.f32.mrf.mxu1  ;;  %v7118_v45 = vld [vmem:[#allocation2 + $0x1ad] sm:$0xff] }
 0x46a   : > { %v13081_v25 = vpop.f32.mrf.mxu0  ;;  %v7153_v26 = vpack.c.bf16 %v7119_v13, %v7118_v45 }
 0x46b   : > { %14215 = vst [vmem:[#allocation187_spill] sm:$0xff] %v13081_v25  ;;  %v8002_v18 = vld [vmem:[#allocation3 + $0x120] ss:$2 sm:$0xff]  ;;  %v8080_v27 = vld [vmem:[#allocation3 + $0x121] ss:$2 sm:$0xff]  ;;  %v13083_v59 = vpop.f32.mrf.mxu1 }
 0x46c   : > { %v8139_v55 = vmax.f32 %v8002_v18, %v8080_v27  ;;  %v13085_v23 = vpop.f32.mrf.mxu0 }
 0x46d   : > { %14216 = vst [vmem:[#allocation188_spill] sm:$0xff] %v13085_v23  ;;  %v8235_v20 = vld [vmem:[#allocation4 + $0x7d] sm:$0xf]  ;;  %v13087_v14 = vpop.f32.mrf.mxu1 }
 0x46e   : > { %v8237_v8 = vmax.f32 %v8233_v54, %v8235_v20  ;;  %8178 = vst.msk [vmem:[#allocation4 + $0x90] sm:$0xff] %vm4586_vm5, %v8139_v55  ;;  %v13090_v39 = vpop.f32.mrf.mxu0  ;;  %v8240_v20 = vld [vmem:[#allocation4 + $0x82] sm:$0xff] }
 0x46f   : > { %14217 = vst [vmem:[#allocation189_spill] sm:$0xff] %v13090_v39  ;;  %v13092_v38 = vpop.f32.mrf.mxu1  ;;  %10154 = vmatmul.mubr.msk.bf16.gmra.mxu1 %vm1191_vm4, %v6430_v63  ;;  %v7112_v39 = vld [vmem:[#allocation2 + $0x17d] sm:$0xff] }
 0x470   : > { %8239 = vst.msk [vmem:[%s12887_s29 + $0x38] sm:$0xf] %vm8206_vm6, %v8237_v8  ;;  %10157 = vmatprep.mubr.msk.bf16.mxu1 %vm1191_vm4, %v6431_v12  ;;  %v13098_v18 = vpop.f32.mrf.mxu0  ;;  %v6432_v12 = vpack.c.bf16 %v6409_v44, %v6408_v46  ;;  %v6413_v46 = vld [vmem:[#allocation2 + $0x26c] sm:$0xff] }
 0x471   : > { %14218 = vst [vmem:[#allocation190_spill] sm:$0xff] %v13098_v18  ;;  %v13100_v27 = vpop.f32.mrf.mxu1  ;;  %v7110_v18 = vld [vmem:[#allocation2 + $0x16d] sm:$0xff] }
 0x472   : > { %v13102_v28 = vpop.f32.mrf.mxu0 }
 0x473   : > { %14219 = vst [vmem:[#allocation191_spill] sm:$0xff] %v13102_v28  ;;  %v13104_v55 = vpop.f32.mrf.mxu1 }
 0x474   : > { %v13106_v54 = vpop.f32.mrf.mxu0 }
 0x475   : > { %14220 = vst [vmem:[#allocation192_spill] sm:$0xff] %v13106_v54  ;;  %v8242_v63 = vld [vmem:[#allocation4 + $0x8f] sm:$0xff]  ;;  %v13108_v8 = vpop.f32.mrf.mxu1 }
 0x476   : > { %v8244_v2 = vmax.f32 %v8240_v20, %v8242_v63  ;;  %v13110_v42 = vpop.f32.mrf.mxu0  ;;  %v6414_v20 = vld [vmem:[#allocation2 + $0x274] sm:$0xff] }
 0x477   : > { %14221 = vst [vmem:[#allocation193_spill] sm:$0xff] %v13110_v42  ;;  %v13112_v4 = vpop.f32.mrf.mxu1  ;;  %10158 = vmatmul.mubr.msk.bf16.gmra.mxu1 %vm1191_vm4, %v6432_v12  ;;  %v6434_v12 = vpack.c.bf16 %v6413_v46, %v6412_v36  ;;  %v7111_v36 = vld [vmem:[#allocation2 + $0x175] sm:$0xff] }
 0x478   : > { %8246 = vst.msk [vmem:[%s12887_s29 + $0x3c] sm:$0xff] %vm4586_vm5, %v8244_v2  ;;  %10161 = vmatprep.mubr.msk.bf16.mxu1 %vm1191_vm4, %v6433_v41  ;;  %v13118_v10 = vpop.f32.mrf.mxu0  ;;  %v6435_v41 = vpack.c.bf16 %v6415_v1, %v6414_v20  ;;  %v6436_v1 = vpack.c.bf16 %v6416_v49, %v6416_v49  ;;  %v7150_v49 = vpack.c.bf16 %v7113_v0, %v7112_v39  ;;  %v7120_v39 = vld [vmem:[#allocation2 + $0x1bd] sm:$0xff] }
 0x479   : > { %14222 = vst [vmem:[#allocation194_spill] sm:$0xff] %v13118_v10  ;;  %v13120_v54 = vpop.f32.mrf.mxu1 }
 0x47a   : > { %v13122_v24 = vpop.f32.mrf.mxu0 }
 0x47b   : > { %14223 = vst [vmem:[#allocation195_spill] sm:$0xff] %v13122_v24  ;;  %v13124_v44 = vpop.f32.mrf.mxu1 }
 0x47c   : > { %v13126_v50 = vpop.f32.mrf.mxu0 }
 0x47d   : > { %14224 = vst [vmem:[#allocation196_spill] sm:$0xff] %v13126_v50  ;;  %v13128_v63 = vpop.f32.mrf.mxu1 }
 0x47e   : > { %v13130_v2 = vpop.f32.mrf.mxu0 }
 0x47f   : > { %14225 = vst [vmem:[#allocation197_spill] sm:$0xff] %v13130_v2  ;;  %v13132_v42 = vpop.f32.mrf.mxu1  ;;  %10162 = vmatmul.mubr.msk.bf16.gmra.mxu1 %vm1191_vm4, %v6434_v12  ;;  %v7149_v12 = vpack.c.bf16 %v7111_v36, %v7110_v18 }
 0x480   : > { %10165 = vmatprep.mubr.msk.bf16.mxu1 %vm1191_vm4, %v6435_v41  ;;  %v13136_v24 = vpop.f32.mrf.mxu0 }
 0x481   : > { %14226 = vst [vmem:[#allocation198_spill] sm:$0xff] %v13136_v24  ;;  %v13138_v10 = vpop.f32.mrf.mxu1 }
 0x482   : > { %v13140_v28 = vpop.f32.mrf.mxu0 }
 0x483   : > { %14227 = vst [vmem:[#allocation199_spill] sm:$0xff] %v13140_v28  ;;  %v13142_v50 = vpop.f32.mrf.mxu1 }
 0x484   : > { %v13144_v46 = vpop.f32.mrf.mxu0 }
 0x485   : > { %14228 = vst [vmem:[#allocation200_spill] sm:$0xff] %v13144_v46  ;;  %v13146_v20 = vpop.f32.mrf.mxu1  ;;  %v7114_v46 = vld [vmem:[#allocation2 + $0x18d] sm:$0xff] }
 0x486   : > { %v13148_v2 = vpop.f32.mrf.mxu0 }
 0x487   : > { %14229 = vst [vmem:[#allocation201_spill] sm:$0xff] %v13148_v2  ;;  %v13150_v41 = vpop.f32.mrf.mxu1  ;;  %10166 = vmatmul.mubr.msk.bf16.gmra.mxu1 %vm1191_vm4, %v6436_v1  ;;  %v7151_v2 = vpack.c.bf16 %v7115_v61, %v7114_v46  ;;  %v7117_v1 = vld [vmem:[#allocation2 + $0x1a5] sm:$0xff] }
 0x488   : > { %10217 = vmatprep.mubr.msk.bf16.mxu1 %vm1191_vm4, %v7149_v12  ;;  %v10300_v28 = vpop.f32.mrf.mxu0 }
 0x489   : > { %v13154_v24 = vpop.f32.mrf.mxu1  ;;  %v7116_v28 = vld [vmem:[#allocation2 + $0x19d] sm:$0xff] }
 0x48a   : > { %v7152_v16 = vpack.c.bf16 %v7117_v1, %v7116_v28  ;;  %v7126_v1 = vld [vmem:[#allocation2 + $0x1ed] sm:$0xff] }
 0x48b   : > { %v13156_v23 = vpop.f32.mrf.mxu1  ;;  %v7157_v32 = vpack.c.bf16 %v7127_v31, %v7126_v1  ;;  %v14232_v1 = vld [vmem:[#allocation31_spill] sm:$0xff] }
 0x48d   : > { %v13158_v25 = vpop.f32.mrf.mxu1 }
 0x48f   : > { %v13160_v18 = vpop.f32.mrf.mxu1  ;;  %10218 = vmatmul.mubr.msk.bf16.vlgmr.msra.gmra.mxu1 %vm1191_vm4, %v7150_v49  ;;  %v7122_v49 = vld [vmem:[#allocation2 + $0x1cd] sm:$0xff] }
 0x490   : > { %10221 = vmatprep.mubr.msk.bf16.mxu1 %vm1191_vm4, %v7151_v2  ;;  %v7121_v2 = vld [vmem:[#allocation2 + $0x1c5] sm:$0xff]  ;;  %v7155_v9 = vpack.c.bf16 %v7123_v33, %v7122_v49 }
 0x491   : > { %v13164_v36 = vpop.f32.mrf.mxu1  ;;  %v7154_v30 = vpack.c.bf16 %v7121_v2, %v7120_v39  ;;  %v7128_v2 = vld [vmem:[#allocation2 + $0x1fd] sm:$0xff]  ;;  %v7129_v49 = vld [vmem:[#allocation2 + $0x205] sm:$0xff] }
 0x493   : > { %v13166_v12 = vpop.f32.mrf.mxu1 }
 0x495   : > { %v13168_v58 = vpop.f32.mrf.mxu1 }
 0x497   : > { %v13170_v0 = vpop.f32.mrf.mxu1  ;;  %10222 = vmatmul.mubr.msk.bf16.gmra.mxu1 %vm1191_vm4, %v7152_v16  ;;  %v7125_v16 = vld [vmem:[#allocation2 + $0x1e5] sm:$0xff] }
 0x498   : > { %10225 = vmatprep.mubr.msk.bf16.mxu1 %vm1191_vm4, %v7153_v26  ;;  %v7124_v26 = vld [vmem:[#allocation2 + $0x1dd] sm:$0xff] }
 0x499   : > { %v13174_v61 = vpop.f32.mrf.mxu1  ;;  %v7156_v37 = vpack.c.bf16 %v7125_v16, %v7124_v26  ;;  %v5123_v26 = vadd.f32 %v13056_v60, %v14231_v7  ;;  %v7158_v16 = vpack.c.bf16 %v7129_v49, %v7128_v2  ;;  %v14234_v2 = vld [vmem:[#allocation107_spill] sm:$0xff] }
 0x49a   : > { %v5147_v49 = vadd.f32 %v13071_v43, %v14234_v2  ;;  %v5150_v43 = vadd.f32 %v13083_v59, %v14238_v11 }
 0x49b   : > { %v13176_v46 = vpop.f32.mrf.mxu1  ;;  %v5607_v7 = vadd.f32 %v12159_v22, %v5123_v26 }
 0x49d   : > { %v13178_v62 = vpop.f32.mrf.mxu1 }
 0x49f   : > { %v13180_v28 = vpop.f32.mrf.mxu1  ;;  %10226 = vmatmul.mubr.msk.bf16.gmra.mxu1 %vm1191_vm4, %v7154_v30 }
 0x4a0   : > { %10229 = vmatprep.mubr.msk.bf16.mxu1 %vm1191_vm4, %v7155_v9  ;;  %v14230_v9 = vld [vmem:[#allocation29_spill] sm:$0xff] }
 0x4a1   : > { %v13184_v13 = vpop.f32.mrf.mxu1  ;;  %v5131_v33 = vadd.f32 %v13044_v3, %v14230_v9  ;;  %v14233_v3 = vld [vmem:[#allocation32_spill] sm:$0xff] }
 0x4a3   : > { %v13186_v45 = vpop.f32.mrf.mxu1 }
 0x4a5   : > { %v13188_v29 = vpop.f32.mrf.mxu1 }
 0x4a7   : > { %v13190_v39 = vpop.f32.mrf.mxu1  ;;  %10230 = vmatmul.mubr.msk.bf16.gmra.mxu1 %vm1191_vm4, %v7156_v37  ;;  %v5134_v37 = vadd.f32 %v13060_v6, %v14232_v1  ;;  %v7134_v1 = vld [vmem:[#allocation2 + $0x22d] sm:$0xff] }
 0x4a8   : > { %10233 = vmatprep.mubr.msk.bf16.mxu1 %vm1191_vm4, %v7157_v32  ;;  %v5609_v32 = vadd.f32 %v12152_v19, %v5131_v33  ;;  %v14235_v19 = vld [vmem:[#allocation129_spill] sm:$0xff]  ;;  %v7133_v33 = vld [vmem:[#allocation2 + $0x225] sm:$0xff]  ;;  %v7161_v2 = vpack.c.bf16 %v7135_v40, %v7134_v1 }
 0x4a9   : > { %v13194_v30 = vpop.f32.mrf.mxu1  ;;  %v5610_v52 = vadd.f32 %v14235_v19, %v5134_v37  ;;  %v14239_v37 = vld [vmem:[#allocation131_spill] sm:$0xff]  ;;  %v7136_v1 = vld [vmem:[#allocation2 + $0x23d] sm:$0xff] }
 0x4ab   : > { %v9992_v56 = vpop.f32.mrf.mxu1 }
 0x4ac   : > { %v5126_v56 = vadd.f32 %v13066_v48, %v14233_v3  ;;  %v14236_v48 = vld [vmem:[#allocation108_spill] sm:$0xff]  ;;  %v7160_v3 = vpack.c.bf16 %v7133_v33, %v7132_v51 }
 0x4ad   : > { %v13200_v31 = vpop.f32.mrf.mxu1 }
 0x4af   : > { %v10043_v21 = vpop.f32.mrf.mxu1  ;;  %10234 = vmatmul.mubr.msk.bf16.gmra.mxu1 %vm1191_vm4, %v7158_v16 }
 0x4b0   : > { %v13208_v9 = vadd.f32 %v10043_v21, %v5609_v32  ;;  %10237 = vmatprep.mubr.msk.bf16.mxu1 %vm1191_vm4, %v7159_v53  ;;  %v5139_v21 = vadd.f32 %v13079_v5, %v14236_v48  ;;  %v14237_v53 = vld [vmem:[#allocation130_spill] sm:$0xff]  ;;  %v5142_v5 = vadd.f32 %v13087_v14, %v14240_v34  ;;  %v14244_v34 = vld [vmem:[#allocation41_spill] sm:$0xff] }
 0x4b1   : > { %v5815_v60 = vpop.f32.mrf.mxu1  ;;  %v5608_v22 = vadd.f32 %v14237_v53, %v5126_v56  ;;  %v14241_v56 = vld [vmem:[#allocation132_spill] sm:$0xff]  ;;  %v7137_v48 = vld [vmem:[#allocation2 + $0x245] sm:$0xff]  ;;  %v5155_v14 = vadd.f32 %v13100_v27, %v14244_v34 }
 0x4b2   : > { %v13214_v6 = vadd.f32 %v5815_v60, %v5607_v7  ;;  %v5613_v60 = vadd.f32 %v14239_v37, %v5147_v49  ;;  %v5611_v51 = vadd.f32 %v14241_v56, %v5139_v21  ;;  %v14243_v49 = vld [vmem:[#allocation133_spill] sm:$0xff]  ;;  %v14245_v37 = vld [vmem:[#allocation134_spill] sm:$0xff] }
 0x4b3   : > { %v10044_v16 = vpop.f32.mrf.mxu1  ;;  %v5614_v40 = vadd.f32 %v14243_v49, %v5150_v43  ;;  %v5612_v21 = vadd.f32 %v14245_v37, %v5142_v5  ;;  %v14247_v43 = vld [vmem:[#allocation135_spill] sm:$0xff]  ;;  %v14249_v5 = vld [vmem:[#allocation136_spill] sm:$0xff] }
 0x4b4   : > { %v13219_v32 = vadd.f32 %v10044_v16, %v5610_v52  ;;  %v14242_v16 = vld [vmem:[#allocation88_spill] sm:$0xff]  ;;  %v14248_v49 = vld [vmem:[#allocation43_spill] sm:$0xff] }
 0x4b5   : > { %v5818_v26 = vpop.f32.mrf.mxu1  ;;  %v5163_v11 = vadd.f32 %v13092_v38, %v14242_v16  ;;  %v5158_v27 = vadd.f32 %v13108_v8, %v14248_v49  ;;  %v7141_v37 = vld [vmem:[#allocation2 + $0x265] sm:$0xff] }
 0x4b6   : > { %v13224_v7 = vadd.f32 %v5818_v26, %v5608_v22  ;;  %v7138_v22 = vld [vmem:[#allocation2 + $0x24d] sm:$0xff]  ;;  %v7139_v26 = vld [vmem:[#allocation2 + $0x255] sm:$0xff]  ;;  %v14252_v8 = vld [vmem:[#allocation46_spill] sm:$0xff] }
 0x4b7   : > { %v10047_v19 = vpop.f32.mrf.mxu1  ;;  %10238 = vmatmul.mubr.msk.bf16.gmra.mxu1 %vm1191_vm4, %v7160_v3  ;;  %v14254_v49 = vld [vmem:[#allocation94_spill] sm:$0xff] }
 0x4b8   : > { %v13230_v52 = vadd.f32 %v10047_v19, %v5613_v60  ;;  %10241 = vmatprep.mubr.msk.bf16.mxu1 %vm1191_vm4, %v7161_v2  ;;  %v7162_v2 = vpack.c.bf16 %v7137_v48, %v7136_v1  ;;  %v14246_v19 = vld [vmem:[#allocation90_spill] sm:$0xff]  ;;  %v5615_v1 = vadd.f32 %v14249_v5, %v5155_v14 }
 0x4b9   : > { %v5831_v33 = vpop.f32.mrf.mxu1  ;;  %v5166_v38 = vadd.f32 %v13104_v55, %v14246_v19  ;;  %v5171_v19 = vadd.f32 %v13120_v54, %v14252_v8 }
 0x4ba   : > { %v13236_v59 = vadd.f32 %v5831_v33, %v5611_v51  ;;  %v5617_v51 = vadd.f32 %v14247_v43, %v5163_v11  ;;  %v7163_v33 = vpack.c.bf16 %v7139_v26, %v7138_v22  ;;  %v14251_v11 = vld [vmem:[#allocation137_spill] sm:$0xff] }
 0x4bb   : > { %v10048_v53 = vpop.f32.mrf.mxu1  ;;  %v5618_v22 = vadd.f32 %v14251_v11, %v5166_v38  ;;  %v7140_v26 = vld [vmem:[#allocation2 + $0x25d] sm:$0xff]  ;;  %v14255_v38 = vld [vmem:[#allocation139_spill] sm:$0xff] }
 0x4bc   : > { %v13241_v3 = vadd.f32 %v10048_v53, %v5614_v40  ;;  %v14250_v53 = vld [vmem:[#allocation92_spill] sm:$0xff]  ;;  %v14256_v11 = vld [vmem:[#allocation49_spill] sm:$0xff] }
 0x4bd   : > { %v5834_v60 = vpop.f32.mrf.mxu1  ;;  %v5179_v55 = vadd.f32 %v13112_v4, %v14250_v53  ;;  %v5182_v4 = vadd.f32 %v13124_v44, %v14254_v49  ;;  %v5174_v54 = vadd.f32 %v13128_v63, %v14256_v11  ;;  %v14260_v63 = vld [vmem:[#allocation51_spill] sm:$0xff]  ;;  %v14262_v11 = vld [vmem:[#allocation98_spill] sm:$0xff] }
 0x4be   : > { %v13246_v56 = vadd.f32 %v5834_v60, %v5612_v21  ;;  %v7142_v60 = vld [vmem:[#allocation2 + $0x26d] sm:$0xff]  ;;  %v5187_v49 = vadd.f32 %v13138_v10, %v14260_v63 }
 0x4bf   : > { %v10051_v16 = vpop.f32.mrf.mxu1  ;;  %10242 = vmatmul.mubr.msk.bf16.gmra.mxu1 %vm1191_vm4, %v7162_v2  ;;  %v7143_v2 = vld [vmem:[#allocation2 + $0x275] sm:$0xff] }
 0x4c0   : > { %v13252_v40 = vadd.f32 %v10051_v16, %v5617_v51  ;;  %10245 = vmatprep.mubr.msk.bf16.mxu1 %vm1191_vm4, %v7163_v33  ;;  %v14253_v51 = vld [vmem:[#allocation138_spill] sm:$0xff]  ;;  %v7164_v16 = vpack.c.bf16 %v7141_v37, %v7140_v26 }
 0x4c1   : > { %v5847_v48 = vpop.f32.mrf.mxu1  ;;  %v5616_v14 = vadd.f32 %v14253_v51, %v5158_v27  ;;  %v14257_v27 = vld [vmem:[#allocation140_spill] sm:$0xff]  ;;  %v7145_v51 = vld [vmem:[#allocation2 + $0x285] sm:$0xff] }
 0x4c2   : > { %v13258_v34 = vadd.f32 %v5847_v48, %v5615_v1  ;;  %v5621_v1 = vadd.f32 %v14255_v38, %v5179_v55  ;;  %v7165_v48 = vpack.c.bf16 %v7143_v2, %v7142_v60  ;;  %v5619_v26 = vadd.f32 %v14257_v27, %v5171_v19  ;;  %v14259_v55 = vld [vmem:[#allocation141_spill] sm:$0xff] }
 0x4c3   : > { %v10052_v21 = vpop.f32.mrf.mxu1  ;;  %v5622_v60 = vadd.f32 %v14259_v55, %v5182_v4  ;;  %v7144_v2 = vld [vmem:[#allocation2 + $0x27d] sm:$0xff]  ;;  %v14263_v4 = vld [vmem:[#allocation143_spill] sm:$0xff] }
 0x4c4   : > { %v13263_v43 = vadd.f32 %v10052_v21, %v5618_v22  ;;  %v14258_v21 = vld [vmem:[#allocation96_spill] sm:$0xff]  ;;  %v14264_v55 = vld [vmem:[#allocation53_spill] sm:$0xff] }
 0x4c5   : > { %v5850_v33 = vpop.f32.mrf.mxu1  ;;  %v5195_v44 = vadd.f32 %v13132_v42, %v14258_v21  ;;  %v5198_v42 = vadd.f32 %v13142_v50, %v14262_v11  ;;  %v5190_v10 = vadd.f32 %v13146_v20, %v14264_v55 }
 0x4c6   : > { %v13268_v5 = vadd.f32 %v5850_v33, %v5616_v14  ;;  %v7146_v33 = vld [vmem:[#allocation2 + $0x28d] sm:$0xff] }
 0x4c7   : > { %v10055_v53 = vpop.f32.mrf.mxu1  ;;  %10246 = vmatmul.mubr.msk.bf16.gmra.mxu1 %vm1191_vm4, %v7164_v16  ;;  %v7147_v16 = vld [vmem:[#allocation2 + $0x295] sm:$0xff] }
 0x4c8   : > { %v13274_v22 = vadd.f32 %v10055_v53, %v5621_v1  ;;  %10249 = vmatprep.mubr.msk.bf16.mxu1 %vm1191_vm4, %v7165_v48  ;;  %v14261_v1 = vld [vmem:[#allocation142_spill] sm:$0xff]  ;;  %v7166_v53 = vpack.c.bf16 %v7145_v51, %v7144_v2 }
 0x4c9   : > { %v5863_v37 = vpop.f32.mrf.mxu1  ;;  %v5620_v19 = vadd.f32 %v14261_v1, %v5174_v54  ;;  %v14265_v54 = vld [vmem:[#allocation144_spill] sm:$0xff] }
 0x4ca   : > { %v13280_v8 = vadd.f32 %v5863_v37, %v5619_v26  ;;  %v5625_v26 = vadd.f32 %v14263_v4, %v5195_v44  ;;  %v7167_v37 = vpack.c.bf16 %v7147_v16, %v7146_v33  ;;  %v5623_v2 = vadd.f32 %v14265_v54, %v5187_v49  ;;  %v14267_v44 = vld [vmem:[#allocation145_spill] sm:$0xff]  ;;  %v14270_v49 = vld [vmem:[#allocation112_spill] sm:$0xff] }
 0x4cb   : > { %v10056_v14 = vpop.f32.mrf.mxu1  ;;  %v5626_v33 = vadd.f32 %v14267_v44, %v5198_v42  ;;  %v7148_v16 = vld [vmem:[#allocation2 + $0x29d] sm:$0xff] }
 0x4cc   : > { %v13285_v38 = vadd.f32 %v10056_v14, %v5622_v60  ;;  %v14266_v14 = vld [vmem:[#allocation56_spill] sm:$0xff]  ;;  %v14272_v42 = vld [vmem:[#allocation113_spill] sm:$0xff]  ;;  %v14274_v44 = vld [vmem:[#allocation114_spill] sm:$0xff] }
 0x4cd   : > { %v5866_v48 = vpop.f32.mrf.mxu1  ;;  %v5211_v50 = vadd.f32 %v13150_v41, %v14266_v14  ;;  %v14271_v41 = vld [vmem:[#allocation147_spill] sm:$0xff] }
 0x4ce   : > { %v13290_v27 = vadd.f32 %v5866_v48, %v5620_v19  ;;  %v14268_v19 = vld [vmem:[#allocation111_spill] sm:$0xff] }
 0x4cf   : > { %v10059_v21 = vpop.f32.mrf.mxu1  ;;  %10250 = vmatmul.mubr.msk.bf16.gmra.mxu1 %vm1191_vm4, %v7166_v53  ;;  %v5203_v48 = vadd.f32 %v13154_v24, %v14268_v19  ;;  %v14269_v53 = vld [vmem:[#allocation146_spill] sm:$0xff]  ;;  %v5629_v55 = vadd.f32 %v14271_v41, %v5211_v50  ;;  %v14276_v50 = vld [vmem:[#allocation115_spill] sm:$0xff] }
 0x4d0   : > { %v13296_v60 = vadd.f32 %v10059_v21, %v5625_v26  ;;  %10253 = vmatprep.mubr.msk.bf16.mxu1 %vm1191_vm4, %v7167_v37  ;;  %v5624_v11 = vadd.f32 %v14269_v53, %v5190_v10  ;;  %v7168_v26 = vpack.c.bf16 %v7148_v16, %v7148_v16  ;;  %v5214_v37 = vadd.f32 %v13156_v23, %v14270_v49  ;;  %v14275_v23 = vld [vmem:[#allocation149_spill] sm:$0xff]  ;;  %v14278_v49 = vld [vmem:[#allocation116_spill] sm:$0xff] }
 0x4d1   : > { %v5879_v51 = vpop.f32.mrf.mxu1  ;;  %v5219_v53 = vadd.f32 %v13164_v36, %v14276_v50  ;;  %v14284_v50 = vld [vmem:[#allocation119_spill] sm:$0xff] }
 0x4d2   : > { %v13302_v63 = vadd.f32 %v5879_v51, %v5623_v2  ;;  %v5206_v2 = vadd.f32 %v13158_v25, %v14272_v42  ;;  %v14273_v51 = vld [vmem:[#allocation148_spill] sm:$0xff]  ;;  %v14280_v42 = vld [vmem:[#allocation117_spill] sm:$0xff] }
 0x4d3   : > { %v10060_v1 = vpop.f32.mrf.mxu1  ;;  %v5627_v14 = vadd.f32 %v14273_v51, %v5203_v48  ;;  %v5230_v48 = vadd.f32 %v13166_v12, %v14278_v49  ;;  %v14286_v49 = vld [vmem:[#allocation120_spill] sm:$0xff] }
 0x4d4   : > { %v13307_v20 = vadd.f32 %v10060_v1, %v5626_v33  ;;  %v5227_v33 = vadd.f32 %v13160_v18, %v14274_v44  ;;  %v5630_v1 = vadd.f32 %v14275_v23, %v5214_v37  ;;  %v5222_v37 = vadd.f32 %v13168_v58, %v14280_v42  ;;  %v14282_v44 = vld [vmem:[#allocation118_spill] sm:$0xff]  ;;  %v14288_v42 = vld [vmem:[#allocation121_spill] sm:$0xff] }
 0x4d5   : > { %v5882_v4 = vpop.f32.mrf.mxu1 }
 0x4d6   : > { %v13312_v21 = vadd.f32 %v5882_v4, %v5624_v11  ;;  %v14277_v4 = vld [vmem:[#allocation150_spill] sm:$0xff] }
 0x4d7   : > { %v10063_v54 = vpop.f32.mrf.mxu1  ;;  %10254 = vmatmul.mubr.msk.bf16.gmra.mxu1 %vm1191_vm4, %v7168_v26  ;;  %v5628_v25 = vadd.f32 %v14277_v4, %v5206_v2  ;;  %v5243_v2 = vadd.f32 %v13170_v0, %v14282_v44  ;;  %v14290_v44 = vld [vmem:[#allocation122_spill] sm:$0xff] }
 0x4d8   : > { %v13318_v24 = vadd.f32 %v10063_v54, %v5629_v55  ;;  %v14279_v55 = vld [vmem:[#allocation151_spill] sm:$0xff] }
 0x4d9   : > { %v5895_v10 = vpop.f32.mrf.mxu1  ;;  %v5633_v18 = vadd.f32 %v14279_v55, %v5227_v33  ;;  %v5235_v33 = vadd.f32 %v13174_v61, %v14284_v50  ;;  %v14292_v50 = vld [vmem:[#allocation123_spill] sm:$0xff] }
 0x4da   : > { %v13323_v16 = vadd.f32 %v5895_v10, %v5627_v14  ;;  %v14281_v14 = vld [vmem:[#allocation152_spill] sm:$0xff] }
 0x4db   : > { %v10064_v19 = vpop.f32.mrf.mxu1  ;;  %v5631_v36 = vadd.f32 %v14281_v14, %v5219_v53  ;;  %v5246_v53 = vadd.f32 %v13176_v46, %v14286_v49  ;;  %v14294_v49 = vld [vmem:[#allocation124_spill] sm:$0xff] }
 0x4dc   : > { %v13328_v11 = vadd.f32 %v10064_v19, %v5630_v1  ;;  %v14283_v1 = vld [vmem:[#allocation153_spill] sm:$0xff] }
 0x4dd   : > { %v5898_v26 = vpop.f32.mrf.mxu1  ;;  %v5634_v12 = vadd.f32 %v14283_v1, %v5230_v48  ;;  %v5238_v48 = vadd.f32 %v13178_v62, %v14288_v42  ;;  %v14296_v42 = vld [vmem:[#allocation125_spill] sm:$0xff] }
 0x4de   : > { %v13333_v41 = vadd.f32 %v5898_v26, %v5628_v25  ;;  %v14285_v25 = vld [vmem:[#allocation154_spill] sm:$0xff] }
 0x4df   : > { %v10067_v54 = vpop.f32.mrf.mxu1  ;;  %v5632_v58 = vadd.f32 %v14285_v25, %v5222_v37  ;;  %v5259_v37 = vadd.f32 %v13180_v28, %v14290_v44  ;;  %v14298_v44 = vld [vmem:[#allocation126_spill] sm:$0xff] }
 0x4e0   : > { %v13338_v51 = vadd.f32 %v10067_v54, %v5633_v18  ;;  %v14287_v18 = vld [vmem:[#allocation155_spill] sm:$0xff] }
 0x4e1   : > { %v5911_v10 = vpop.f32.mrf.mxu1  ;;  %v5637_v0 = vadd.f32 %v14287_v18, %v5243_v2  ;;  %v5251_v2 = vadd.f32 %v13184_v13, %v14292_v50  ;;  %v14300_v50 = vld [vmem:[#allocation127_spill] sm:$0xff] }
 0x4e2   : > { %v13343_v23 = vadd.f32 %v5911_v10, %v5631_v36  ;;  %v14289_v36 = vld [vmem:[#allocation156_spill] sm:$0xff] }
 0x4e3   : > { %v10068_v19 = vpop.f32.mrf.mxu1  ;;  %v5635_v61 = vadd.f32 %v14289_v36, %v5235_v33  ;;  %v5262_v33 = vadd.f32 %v13186_v45, %v14294_v49 }
 0x4e4   : > { %v13348_v4 = vadd.f32 %v10068_v19, %v5634_v12  ;;  %v14291_v12 = vld [vmem:[#allocation157_spill] sm:$0xff] }
 0x4e5   : > { %v5914_v26 = vpop.f32.mrf.mxu1  ;;  %v5638_v46 = vadd.f32 %v14291_v12, %v5246_v53  ;;  %v5254_v53 = vadd.f32 %v13188_v29, %v14296_v42 }
 0x4e6   : > { %v13353_v55 = vadd.f32 %v5914_v26, %v5632_v58  ;;  %v14293_v58 = vld [vmem:[#allocation158_spill] sm:$0xff] }
 0x4e7   : > { %v10071_v54 = vpop.f32.mrf.mxu1  ;;  %v5636_v62 = vadd.f32 %v14293_v58, %v5238_v48  ;;  %v5275_v48 = vadd.f32 %v13190_v39, %v14298_v44  ;;  %v14305_v44 = vld [vmem:[#allocation165_spill] sm:$0xff] }
 0x4e8   : > { %v13358_v14 = vadd.f32 %v10071_v54, %v5637_v0  ;;  %v14295_v0 = vld [vmem:[#allocation159_spill] sm:$0xff] }
 0x4e9   : > { %v5927_v10 = vpop.f32.mrf.mxu1  ;;  %v5641_v28 = vadd.f32 %v14295_v0, %v5259_v37  ;;  %v5267_v37 = vadd.f32 %v13194_v30, %v14300_v50 }
 0x4ea   : > { %v13363_v1 = vadd.f32 %v5927_v10, %v5635_v61  ;;  %v14297_v61 = vld [vmem:[#allocation160_spill] sm:$0xff] }
 0x4eb   : > { %v10072_v19 = vpop.f32.mrf.mxu1  ;;  %v5639_v13 = vadd.f32 %v14297_v61, %v5251_v2  ;;  %v14302_v2 = vld [vmem:[#allocation163_spill] sm:$0xff] }
 0x4ec   : > { %v13368_v25 = vadd.f32 %v10072_v19, %v5638_v46  ;;  %v14299_v46 = vld [vmem:[#allocation161_spill] sm:$0xff]  ;;  %v5645_v0 = vadd.f32 %v14302_v2, %v5275_v48  ;;  %v14308_v2 = vld [vmem:[#allocation168_spill] sm:$0xff] }
 0x4ed   : > { %v5930_v26 = vpop.f32.mrf.mxu1  ;;  %v5642_v45 = vadd.f32 %v14299_v46, %v5262_v33  ;;  %v14304_v33 = vld [vmem:[#allocation164_spill] sm:$0xff] }
 0x4ee   : > { %v13373_v18 = vadd.f32 %v5930_v26, %v5636_v62  ;;  %v14301_v62 = vld [vmem:[#allocation162_spill] sm:$0xff]  ;;  %v5643_v61 = vadd.f32 %v14304_v33, %v5267_v37 }
 0x4ef   : > { %v10075_v54 = vpop.f32.mrf.mxu1  ;;  %v5640_v29 = vadd.f32 %v14301_v62, %v5254_v53 }
 0x4f0   : > { %v13378_v36 = vadd.f32 %v10075_v54, %v5641_v28  ;;  %v14303_v54 = vld [vmem:[#allocation128_spill] sm:$0xff] }
 0x4f1   : > { %v5943_v10 = vpop.f32.mrf.mxu1  ;;  %v5270_v39 = vadd.f32 %v13200_v31, %v14303_v54  ;;  %v14307_v31 = vld [vmem:[#allocation167_spill] sm:$0xff] }
 0x4f2   : > { %v13383_v12 = vadd.f32 %v5943_v10, %v5639_v13 }
 0x4f3   : > { %v10076_v19 = vpop.f32.mrf.mxu1  ;;  %v5644_v46 = vadd.f32 %v14305_v44, %v5270_v39  ;;  %v14309_v39 = vld [vmem:[#allocation169_spill] sm:$0xff] }
 0x4f4   : > { %v13388_v58 = vadd.f32 %v10076_v19, %v5642_v45  ;;  %v14306_v19 = vld [vmem:[#allocation166_spill] sm:$0xff]  ;;  %v6340_v33 = vadd.f32 %v14309_v39, %v13224_v7 }
 0x4f5   : > { %v5946_v26 = vpop.f32.mrf.mxu1  ;;  %v6341_v48 = vadd.f32 %v14306_v19, %v13208_v9 }
 0x4f6   : > { %v13391_v49 = vadd.f32 %v5946_v26, %v5640_v29  ;;  %v6339_v29 = vadd.f32 %v14307_v31, %v13214_v6 }
 0x4f7   : > { %v10079_v28 = vpop.f32.mrf.mxu1 }
 0x4f8   : > { %v13396_v42 = vadd.f32 %v10079_v28, %v5645_v0  ;;  %v6342_v0 = vadd.f32 %v14308_v2, %v13219_v32 }
 0x4f9   : > { %v5959_v13 = vpop.f32.mrf.mxu1 }
 0x4fa   : > { %v13399_v10 = vadd.f32 %v5959_v13, %v5643_v61  ;;  %v14310_v13 = vld [vmem:[#allocation170_spill] sm:$0xff] }
 0x4fb   : > { %v10080_v30 = vpop.f32.mrf.mxu1 }
 0x4fc   : > { %v6345_v30 = vadd.f32 %v14310_v13, %v13230_v52 }
 0x4fd   : > { %v5962_v53 = vpop.f32.mrf.mxu1 }
 0x4fe   : > { %v13402_v45 = vadd.f32 %v5962_v53, %v5644_v46  ;;  %v14311_v46 = vld [vmem:[#allocation171_spill] sm:$0xff] }
 0x4ff   : > { %v10131_v50 = vpop.f32.mrf.mxu1  ;;  %v6343_v53 = vadd.f32 %v14311_v46, %v13236_v59 }
 0x500   : > { %v13406_v62 = vadd.f32 %v10131_v50, %v6341_v48  ;;  %v14312_v48 = vld [vmem:[#allocation172_spill] sm:$0xff] }
 0x501   : > { %v6547_v26 = vpop.f32.mrf.mxu1  ;;  %v6346_v50 = vadd.f32 %v14312_v48, %v13241_v3 }
 0x502   : > { %v13410_v37 = vadd.f32 %v6547_v26, %v6339_v29  ;;  %v14313_v29 = vld [vmem:[#allocation173_spill] sm:$0xff] }
 0x503   : > { %v10132_v28 = vpop.f32.mrf.mxu1  ;;  %v6344_v26 = vadd.f32 %v14313_v29, %v13246_v56 }
 0x504   : > { %v13414_v54 = vadd.f32 %v10132_v28, %v6342_v0  ;;  %v14314_v0 = vld [vmem:[#allocation174_spill] sm:$0xff] }
 0x505   : > { %v6550_v61 = vpop.f32.mrf.mxu1  ;;  %v6349_v28 = vadd.f32 %v14314_v0, %v13252_v40 }
 0x506   : > { %v13418_v9 = vadd.f32 %v6550_v61, %v6340_v33  ;;  %v14315_v33 = vld [vmem:[#allocation175_spill] sm:$0xff] }
 0x507   : > { %v10135_v44 = vpop.f32.mrf.mxu1  ;;  %v6347_v61 = vadd.f32 %v14315_v33, %v13258_v34 }
 0x508   : > { %v13422_v6 = vadd.f32 %v10135_v44, %v6345_v30  ;;  %v14316_v30 = vld [vmem:[#allocation176_spill] sm:$0xff] }
 0x509   : > { %v6563_v19 = vpop.f32.mrf.mxu1  ;;  %v6350_v44 = vadd.f32 %v14316_v30, %v13263_v43 }
 0x50a   : > { %v13426_v32 = vadd.f32 %v6563_v19, %v6343_v53  ;;  %v14317_v53 = vld [vmem:[#allocation177_spill] sm:$0xff] }
 0x50b   : > { %v10136_v31 = vpop.f32.mrf.mxu1  ;;  %v6348_v19 = vadd.f32 %v14317_v53, %v13268_v5 }
 0x50c   : > { %v13430_v7 = vadd.f32 %v10136_v31, %v6346_v50  ;;  %v14318_v50 = vld [vmem:[#allocation178_spill] sm:$0xff] }
 0x50d   : > { %v6566_v2 = vpop.f32.mrf.mxu1  ;;  %v6353_v31 = vadd.f32 %v14318_v50, %v13274_v22 }
 0x50e   : > { %v13434_v52 = vadd.f32 %v6566_v2, %v6344_v26  ;;  %v14319_v26 = vld [vmem:[#allocation179_spill] sm:$0xff] }
 0x50f   : > { %v10139_v39 = vpop.f32.mrf.mxu1  ;;  %v6351_v2 = vadd.f32 %v14319_v26, %v13280_v8 }
 0x510   : > { %v13438_v59 = vadd.f32 %v10139_v39, %v6349_v28  ;;  %v14320_v28 = vld [vmem:[#allocation180_spill] sm:$0xff] }
 0x511   : > { %v6579_v13 = vpop.f32.mrf.mxu1  ;;  %v6354_v39 = vadd.f32 %v14320_v28, %v13285_v38 }
 0x512   : > { %v13442_v3 = vadd.f32 %v6579_v13, %v6347_v61  ;;  %v14321_v61 = vld [vmem:[#allocation181_spill] sm:$0xff] }
 0x513   : > { %v10140_v46 = vpop.f32.mrf.mxu1  ;;  %v6352_v13 = vadd.f32 %v14321_v61, %v13290_v27 }
 0x514   : > { %v13446_v56 = vadd.f32 %v10140_v46, %v6350_v44  ;;  %v14322_v44 = vld [vmem:[#allocation182_spill] sm:$0xff] }
 0x515   : > { %v6582_v48 = vpop.f32.mrf.mxu1  ;;  %v6357_v46 = vadd.f32 %v14322_v44, %v13296_v60 }
 0x516   : > { %v13450_v40 = vadd.f32 %v6582_v48, %v6348_v19  ;;  %v14323_v19 = vld [vmem:[#allocation183_spill] sm:$0xff] }
 0x517   : > { %v10143_v29 = vpop.f32.mrf.mxu1  ;;  %v6355_v48 = vadd.f32 %v14323_v19, %v13302_v63 }
 0x518   : > { %v13454_v34 = vadd.f32 %v10143_v29, %v6353_v31  ;;  %v14324_v31 = vld [vmem:[#allocation33_spill] sm:$0xff] }
 0x519   : > { %v6595_v0 = vpop.f32.mrf.mxu1  ;;  %v6358_v29 = vadd.f32 %v14324_v31, %v13307_v20 }
 0x51a   : > { %v13458_v43 = vadd.f32 %v6595_v0, %v6351_v2  ;;  %v14325_v2 = vld [vmem:[#allocation34_spill] sm:$0xff] }
 0x51b   : > { %v10144_v33 = vpop.f32.mrf.mxu1  ;;  %v6356_v0 = vadd.f32 %v14325_v2, %v13312_v21 }
 0x51c   : > { %v13462_v5 = vadd.f32 %v10144_v33, %v6354_v39  ;;  %v14326_v39 = vld [vmem:[#allocation35_spill] sm:$0xff] }
 0x51d   : > { %v6598_v30 = vpop.f32.mrf.mxu1  ;;  %v6361_v33 = vadd.f32 %v14326_v39, %v13318_v24 }
 0x51e   : > { %v13466_v22 = vadd.f32 %v6598_v30, %v6352_v13  ;;  %v14327_v13 = vld [vmem:[#allocation36_spill] sm:$0xff] }
 0x51f   : > { %v10147_v53 = vpop.f32.mrf.mxu1  ;;  %v6359_v30 = vadd.f32 %v14327_v13, %v13323_v16 }
 0x520   : > { %v13470_v8 = vadd.f32 %v10147_v53, %v6357_v46  ;;  %v14328_v46 = vld [vmem:[#allocation37_spill] sm:$0xff] }
 0x521   : > { %v6611_v50 = vpop.f32.mrf.mxu1  ;;  %v6362_v53 = vadd.f32 %v14328_v46, %v13328_v11 }
 0x522   : > { %v13474_v38 = vadd.f32 %v6611_v50, %v6355_v48  ;;  %v14329_v48 = vld [vmem:[#allocation38_spill] sm:$0xff] }
 0x523   : > { %v10148_v26 = vpop.f32.mrf.mxu1  ;;  %v6360_v50 = vadd.f32 %v14329_v48, %v13333_v41 }
 0x524   : > { %v13478_v27 = vadd.f32 %v10148_v26, %v6358_v29  ;;  %v14330_v29 = vld [vmem:[#allocation39_spill] sm:$0xff] }
 0x525   : > { %v6614_v28 = vpop.f32.mrf.mxu1  ;;  %v6365_v26 = vadd.f32 %v14330_v29, %v13338_v51 }
 0x526   : > { %v13482_v60 = vadd.f32 %v6614_v28, %v6356_v0  ;;  %v14331_v0 = vld [vmem:[#allocation40_spill] sm:$0xff] }
 0x527   : > { %v10151_v61 = vpop.f32.mrf.mxu1  ;;  %v6363_v28 = vadd.f32 %v14331_v0, %v13343_v23 }
 0x528   : > { %v13486_v63 = vadd.f32 %v10151_v61, %v6361_v33  ;;  %v14332_v33 = vld [vmem:[#allocation42_spill] sm:$0xff] }
 0x529   : > { %v6627_v44 = vpop.f32.mrf.mxu1  ;;  %v6366_v61 = vadd.f32 %v14332_v33, %v13348_v4 }
 0x52a   : > { %v13490_v20 = vadd.f32 %v6627_v44, %v6359_v30  ;;  %v14333_v30 = vld [vmem:[#allocation44_spill] sm:$0xff] }
 0x52b   : > { %v10152_v19 = vpop.f32.mrf.mxu1  ;;  %v6364_v44 = vadd.f32 %v14333_v30, %v13353_v55 }
 0x52c   : > { %v13494_v21 = vadd.f32 %v10152_v19, %v6362_v53  ;;  %v14334_v53 = vld [vmem:[#allocation45_spill] sm:$0xff] }
 0x52d   : > { %v6630_v31 = vpop.f32.mrf.mxu1  ;;  %v6369_v19 = vadd.f32 %v14334_v53, %v13358_v14 }
 0x52e   : > { %v13498_v24 = vadd.f32 %v6630_v31, %v6360_v50  ;;  %v14335_v50 = vld [vmem:[#allocation47_spill] sm:$0xff] }
 0x52f   : > { %v10155_v2 = vpop.f32.mrf.mxu1  ;;  %v6367_v31 = vadd.f32 %v14335_v50, %v13363_v1 }
 0x530   : > { %v13502_v16 = vadd.f32 %v10155_v2, %v6365_v26  ;;  %v14336_v26 = vld [vmem:[#allocation48_spill] sm:$0xff] }
 0x531   : > { %v6643_v39 = vpop.f32.mrf.mxu1  ;;  %v6370_v2 = vadd.f32 %v14336_v26, %v13368_v25 }
 0x532   : > { %v13506_v11 = vadd.f32 %v6643_v39, %v6363_v28  ;;  %v14337_v28 = vld [vmem:[#allocation50_spill] sm:$0xff] }
 0x533   : > { %v10156_v13 = vpop.f32.mrf.mxu1  ;;  %v6368_v39 = vadd.f32 %v14337_v28, %v13373_v18 }
 0x534   : > { %v13510_v41 = vadd.f32 %v10156_v13, %v6366_v61  ;;  %v14338_v61 = vld [vmem:[#allocation52_spill] sm:$0xff] }
 0x535   : > { %v6646_v46 = vpop.f32.mrf.mxu1  ;;  %v6373_v13 = vadd.f32 %v14338_v61, %v13378_v36 }
 0x536   : > { %v13514_v51 = vadd.f32 %v6646_v46, %v6364_v44  ;;  %v14339_v44 = vld [vmem:[#allocation54_spill] sm:$0xff] }
 0x537   : > { %v10159_v48 = vpop.f32.mrf.mxu1  ;;  %v6371_v46 = vadd.f32 %v14339_v44, %v13383_v12 }
 0x538   : > { %v13518_v23 = vadd.f32 %v10159_v48, %v6369_v19  ;;  %v14340_v19 = vld [vmem:[#allocation55_spill] sm:$0xff] }
 0x539   : > { %v6659_v29 = vpop.f32.mrf.mxu1  ;;  %v6374_v48 = vadd.f32 %v14340_v19, %v13388_v58 }
 0x53a   : > { %v13522_v4 = vadd.f32 %v6659_v29, %v6367_v31  ;;  %v14341_v31 = vld [vmem:[#allocation57_spill] sm:$0xff] }
 0x53b   : > { %v10160_v0 = vpop.f32.mrf.mxu1  ;;  %v6372_v29 = vadd.f32 %v14341_v31, %v13391_v49 }
 0x53c   : > { %v13526_v55 = vadd.f32 %v10160_v0, %v6370_v2  ;;  %v14342_v2 = vld [vmem:[#allocation58_spill] sm:$0xff] }
 0x53d   : > { %v6662_v33 = vpop.f32.mrf.mxu1  ;;  %v6377_v0 = vadd.f32 %v14342_v2, %v13396_v42 }
 0x53e   : > { %v13530_v14 = vadd.f32 %v6662_v33, %v6368_v39  ;;  %v14343_v39 = vld [vmem:[#allocation59_spill] sm:$0xff] }
 0x53f   : > { %v10163_v30 = vpop.f32.mrf.mxu1  ;;  %v6375_v33 = vadd.f32 %v14343_v39, %v13399_v10 }
 0x540   : > { %v13534_v1 = vadd.f32 %v10163_v30, %v6373_v13  ;;  %v14344_v30 = vld [vmem:[#allocation60_spill] sm:$0xff] }
 0x541   : > { %v6675_v53 = vpop.f32.mrf.mxu1  ;;  %v6376_v44 = vadd.f32 %v14344_v30, %v13402_v45 }
 0x542   : > { %v13538_v25 = vadd.f32 %v6675_v53, %v6371_v46  ;;  %v14345_v53 = vld [vmem:[#allocation61_spill] sm:$0xff] }
 0x543   : > { %v10164_v50 = vpop.f32.mrf.mxu1  ;;  %v7073_v19 = vadd.f32 %v14345_v53, %v13406_v62 }
 0x544   : > { %v13542_v18 = vadd.f32 %v10164_v50, %v6374_v48  ;;  %v14346_v50 = vld [vmem:[#allocation62_spill] sm:$0xff] }
 0x545   : > { %v6678_v26 = vpop.f32.mrf.mxu1  ;;  %v7071_v31 = vadd.f32 %v14346_v50, %v13410_v37  ;;  %v14349_v37 = vld [vmem:[#allocation65_spill] sm:$0xff] }
 0x546   : > { %v13546_v36 = vadd.f32 %v6678_v26, %v6372_v29  ;;  %v13564_v29 = vld [vmem:[#allocation10] ss:$0 sm:$0xff] }
 0x547   : > { %v10167_v28 = vpop.f32.mrf.mxu1 }
 0x548   : > { %v13550_v12 = vadd.f32 %v10167_v28, %v6377_v0  ;;  %v14347_v0 = vld [vmem:[#allocation63_spill] sm:$0xff] }
 0x549   : > { %v6691_v61 = vpop.f32.mrf.mxu1  ;;  %v7074_v45 = vadd.f32 %v14347_v0, %v13414_v54 }
 0x54a   : > { %v13554_v58 = vadd.f32 %v6691_v61, %v6375_v33  ;;  %v14348_v61 = vld [vmem:[#allocation64_spill] sm:$0xff] }
 0x54b   : > { %v10168_v13 = vpop.f32.mrf.mxu1 }
 0x54c   : > { %v7072_v13 = vadd.f32 %v14348_v61, %v13418_v9 }
 0x54d   : > { %v6694_v49 = vpop.f32.mrf.mxu1 }
 0x54e   : > { %v13558_v46 = vadd.f32 %v6694_v49, %v6376_v44  ;;  %v7077_v44 = vadd.f32 %v14349_v37, %v13422_v6  ;;  %v14351_v6 = vld [vmem:[#allocation67_spill] sm:$0xff] }
 0x54f   : > { %v10219_v42 = vpop.f32.mrf.mxu1 }
 0x550   : > { %v7439_v48 = vadd.f32 %v10219_v42, %v7073_v19  ;;  %v14350_v42 = vld [vmem:[#allocation66_spill] sm:$0xff] }
 0x551   : > { %v7279_v10 = vpop.f32.mrf.mxu1 }
 0x552   : > { %v7805_v26 = vadd.f32 %v12918_v15, %v7439_v48  ;;  %v7437_v2 = vadd.f32 %v7279_v10, %v7071_v31  ;;  %v7075_v48 = vadd.f32 %v14350_v42, %v13426_v32  ;;  %v14356_v42 = vld [vmem:[#allocation16_spill] sm:$0xff] }
 0x553   : > { %v10220_v28 = vpop.f32.mrf.mxu1 }
 0x554   : > { %v7851_v39 = vadd.f32 %v13564_v29, %v7805_v26  ;;  %v7803_v33 = vadd.f32 %v12926_v35, %v7437_v2  ;;  %v7440_v62 = vadd.f32 %v10220_v28, %v7074_v45  ;;  %v7078_v26 = vadd.f32 %v14351_v6, %v13430_v7  ;;  %v14352_v28 = vld [vmem:[#allocation68_spill] sm:$0xff]  ;;  %v14358_v6 = vld [vmem:[#allocation71_spill] sm:$0xff] }
 0x555   : > { %v7282_v30 = vpop.f32.mrf.mxu1 }
 0x556   : > { %v7890_v49 = vmax.f32 %v7851_v39, 0.0  ;;  %v7849_v15 = vadd.f32 %v13564_v29, %v7803_v33  ;;  %v7806_v53 = vadd.f32 %v12935_v17, %v7440_v62  ;;  %v7438_v19 = vadd.f32 %v7282_v30, %v7072_v13  ;;  %v14353_v62 = vld [vmem:[#allocation105_spill] sm:$0xff] }
 0x557   : > { %v10223_v54 = vpop.f32.mrf.mxu1  ;;  %v7076_v39 = vadd.f32 %v14352_v28, %v13434_v52  ;;  %v14354_v30 = vld [vmem:[#allocation69_spill] sm:$0xff] }
 0x558   : > { %7929 = vst.msk [vmem:[#allocation3 + $0x148] sm:$0xff] %vm4586_vm5, %v7890_v49  ;;  %v7888_v35 = vmax.f32 %v7849_v15, 0.0  ;;  %v7852_v50 = vadd.f32 %v13564_v29, %v7806_v53  ;;  %v7804_v9 = vadd.f32 %v12943_v57, %v7438_v19  ;;  %v7443_v31 = vadd.f32 %v10223_v54, %v7077_v44  ;;  %v14355_v49 = vld [vmem:[#allocation15_spill] sm:$0xff] }
 0x559   : > { %v7295_v10 = vpop.f32.mrf.mxu1  ;;  %v7081_v37 = vadd.f32 %v14354_v30, %v13438_v59  ;;  %v14357_v59 = vld [vmem:[#allocation70_spill] sm:$0xff] }
 0x55a   : > { %7927 = vst.msk [vmem:[#allocation3 + $0x138] sm:$0xff] %vm4586_vm5, %v7888_v35  ;;  %v7891_v17 = vmax.f32 %v7852_v50, 0.0  ;;  %v7850_v2 = vadd.f32 %v13564_v29, %v7804_v9  ;;  %v7809_v0 = vadd.f32 %v12948_v47, %v7443_v31  ;;  %v7441_v32 = vadd.f32 %v7295_v10, %v7075_v48 }
 0x55b   : > { %v10224_v45 = vpop.f32.mrf.mxu1  ;;  %v7079_v31 = vadd.f32 %v14357_v59, %v13442_v3 }
 0x55c   : > { %7930 = vst.msk [vmem:[#allocation3 + $0x150] sm:$0xff] %vm4586_vm5, %v7891_v17  ;;  %v7889_v57 = vmax.f32 %v7850_v2, 0.0  ;;  %v7855_v33 = vadd.f32 %v13564_v29, %v7809_v0  ;;  %v7807_v61 = vadd.f32 %v14353_v62, %v7441_v32  ;;  %v7444_v7 = vadd.f32 %v10224_v45, %v7078_v26  ;;  %v14359_v32 = vld [vmem:[#allocation17_spill] sm:$0xff] }
 0x55d   : > { %v7298_v13 = vpop.f32.mrf.mxu1  ;;  %v7082_v26 = vadd.f32 %v14358_v6, %v13446_v56  ;;  %v14360_v56 = vld [vmem:[#allocation72_spill] sm:$0xff] }
 0x55e   : > { %7928 = vst.msk [vmem:[#allocation3 + $0x140] sm:$0xff] %vm4586_vm5, %v7889_v57  ;;  %v7894_v47 = vmax.f32 %v7855_v33, 0.0  ;;  %v7853_v44 = vadd.f32 %v13564_v29, %v7807_v61  ;;  %v7810_v15 = vadd.f32 %v14355_v49, %v7444_v7  ;;  %v7442_v52 = vadd.f32 %v7298_v13, %v7076_v39  ;;  %v14361_v13 = vld [vmem:[#allocation18_spill] sm:$0xff] }
 0x55f   : > { %v10227_v53 = vpop.f32.mrf.mxu1  ;;  %v7080_v62 = vadd.f32 %v14360_v56, %v13450_v40  ;;  %v14368_v56 = vld [vmem:[#allocation76_spill] sm:$0xff] }
 0x560   : > { %7933 = vst.msk [vmem:[#allocation3 + $0x168] sm:$0xff] %vm4586_vm5, %v7894_v47  ;;  %v7892_v19 = vmax.f32 %v7853_v44, 0.0  ;;  %v7856_v54 = vadd.f32 %v13564_v29, %v7810_v15  ;;  %v7808_v48 = vadd.f32 %v14356_v42, %v7442_v52  ;;  %v7447_v35 = vadd.f32 %v10227_v53, %v7081_v37  ;;  %v14362_v47 = vld [vmem:[#allocation73_spill] sm:$0xff]  ;;  %v14363_v52 = vld [vmem:[#allocation19_spill] sm:$0xff] }
 0x561   : > { %v8004_v50 = vld [vmem:[#allocation3 + $0x130] ss:$2 sm:$0xff]  ;;  %v8082_v9 = vld [vmem:[#allocation3 + $0x131] ss:$2 sm:$0xff]  ;;  %v7311_v10 = vpop.f32.mrf.mxu1  ;;  %v7085_v44 = vadd.f32 %v14362_v47, %v13454_v34 }
 0x562   : > { %v8140_v17 = vmax.f32 %v8004_v50, %v8082_v9  ;;  %7931 = vst.msk [vmem:[#allocation3 + $0x158] sm:$0xff] %vm4586_vm5, %v7892_v19  ;;  %v7895_v2 = vmax.f32 %v7856_v54, 0.0  ;;  %v7854_v0 = vadd.f32 %v13564_v29, %v7808_v48  ;;  %v7813_v45 = vadd.f32 %v14359_v32, %v7447_v35  ;;  %v14364_v48 = vld [vmem:[#allocation20_spill] sm:$0xff] }
 0x563   : > { %v7445_v28 = vadd.f32 %v7311_v10, %v7079_v31  ;;  %v10228_v39 = vpop.f32.mrf.mxu1  ;;  %v14365_v31 = vld [vmem:[#allocation74_spill] sm:$0xff] }
 0x564   : > { %8179 = vst.msk [vmem:[#allocation4 + $0x98] sm:$0xff] %vm4586_vm5, %v8140_v17  ;;  %7934 = vst.msk [vmem:[#allocation3 + $0x170] sm:$0xff] %vm4586_vm5, %v7895_v2  ;;  %v7893_v57 = vmax.f32 %v7854_v0, 0.0  ;;  %v7859_v3 = vadd.f32 %v13564_v29, %v7813_v45  ;;  %v7448_v33 = vadd.f32 %v10228_v39, %v7082_v26  ;;  %v7083_v10 = vadd.f32 %v14365_v31, %v13458_v43  ;;  %v14366_v26 = vld [vmem:[#allocation75_spill] sm:$0xff]  ;;  %v14367_v45 = vld [vmem:[#allocation21_spill] sm:$0xff] }
 0x565   : > { %v8006_v61 = vld [vmem:[#allocation3 + $0x140] ss:$2 sm:$0xff]  ;;  %v8084_v7 = vld [vmem:[#allocation3 + $0x141] ss:$2 sm:$0xff]  ;;  %v7811_v30 = vadd.f32 %v14361_v13, %v7445_v28  ;;  %v7314_v37 = vpop.f32.mrf.mxu1  ;;  %v7086_v17 = vadd.f32 %v14366_v26, %v13462_v5  ;;  %v8241_v39 = vld [vmem:[#allocation4 + $0x8a] sm:$0xf]  ;;  %v7084_v43 = vadd.f32 %v14368_v56, %v13466_v22 }
 0x566   : > { %v8141_v49 = vmax.f32 %v8006_v61, %v8084_v7  ;;  %7932 = vst.msk [vmem:[#allocation3 + $0x160] sm:$0xff] %vm4586_vm5, %v7893_v57  ;;  %v7898_v15 = vmax.f32 %v7859_v3, 0.0  ;;  %v7814_v53 = vadd.f32 %v14363_v52, %v7448_v33  ;;  %v7446_v19 = vadd.f32 %v7314_v37, %v7080_v62  ;;  %v14369_v37 = vld [vmem:[#allocation22_spill] sm:$0xff] }
 0x567   : > { %v7857_v54 = vadd.f32 %v13564_v29, %v7811_v30  ;;  %v10231_v42 = vpop.f32.mrf.mxu1 }
 0x568   : > { %8180 = vst.msk [vmem:[#allocation4 + $0xa0] sm:$0xff] %vm4586_vm5, %v8141_v49  ;;  %7937 = vst.msk [vmem:[#allocation3 + $0x188] sm:$0xff] %vm4586_vm5, %v7898_v15  ;;  %v7860_v40 = vadd.f32 %v13564_v29, %v7814_v53  ;;  %v7812_v35 = vadd.f32 %v14364_v48, %v7446_v19  ;;  %v7451_v50 = vadd.f32 %v10231_v42, %v7085_v44  ;;  %v14370_v49 = vld [vmem:[#allocation77_spill] sm:$0xff]  ;;  %v14371_v53 = vld [vmem:[#allocation23_spill] sm:$0xff] }
 0x569   : > { %v8008_v34 = vld [vmem:[#allocation3 + $0x150] ss:$2 sm:$0xff]  ;;  %v8086_v9 = vld [vmem:[#allocation3 + $0x151] ss:$2 sm:$0xff]  ;;  %v7896_v59 = vmax.f32 %v7857_v54, 0.0  ;;  %v7327_v6 = vpop.f32.mrf.mxu1  ;;  %v7089_v15 = vadd.f32 %v14370_v49, %v13470_v8 }
 0x56a   : > { %v8142_v2 = vmax.f32 %v8008_v34, %v8086_v9  ;;  %v7899_v0 = vmax.f32 %v7860_v40, 0.0  ;;  %v7858_v32 = vadd.f32 %v13564_v29, %v7812_v35  ;;  %v7817_v28 = vadd.f32 %v14367_v45, %v7451_v50  ;;  %v14372_v35 = vld [vmem:[#allocation24_spill] sm:$0xff]  ;;  %v14373_v34 = vld [vmem:[#allocation78_spill] sm:$0xff] }
 0x56b   : > { %v8243_v57 = vld [vmem:[#allocation4 + $0x97] sm:$0xf]  ;;  %7935 = vst.msk [vmem:[#allocation3 + $0x178] sm:$0xff] %vm4586_vm5, %v7896_v59  ;;  %v7449_v3 = vadd.f32 %v7327_v6, %v7083_v10  ;;  %v10232_v33 = vpop.f32.mrf.mxu1  ;;  %v7087_v9 = vadd.f32 %v14373_v34, %v13474_v38 }
 0x56c   : > { %v8245_v62 = vmax.f32 %v8241_v39, %v8243_v57  ;;  %8181 = vst.msk [vmem:[#allocation4 + $0xa8] sm:$0xff] %vm4586_vm5, %v8142_v2  ;;  %7938 = vst.msk [vmem:[#allocation3 + $0x190] sm:$0xff] %vm4586_vm5, %v7899_v0  ;;  %v7897_v5 = vmax.f32 %v7858_v32, 0.0  ;;  %v7863_v61 = vadd.f32 %v13564_v29, %v7817_v28  ;;  %v7452_v7 = vadd.f32 %v10232_v33, %v7086_v17  ;;  %v14374_v10 = vld [vmem:[#allocation79_spill] sm:$0xff]  ;;  %v14375_v32 = vld [vmem:[#allocation106_spill] sm:$0xff] }
 0x56d   : > { %v8010_v13 = vld [vmem:[#allocation3 + $0x160] ss:$2 sm:$0xff]  ;;  %v8088_v30 = vld [vmem:[#allocation3 + $0x161] ss:$2 sm:$0xff]  ;;  %v7815_v47 = vadd.f32 %v14369_v37, %v7449_v3  ;;  %v7330_v44 = vpop.f32.mrf.mxu1  ;;  %v7090_v6 = vadd.f32 %v14374_v10, %v13478_v27  ;;  %v14376_v33 = vld [vmem:[#allocation25_spill] sm:$0xff] }
 0x56e   : > { %8247 = vst.msk [vmem:[%s12887_s29 + $0x44] sm:$0xf] %vm8206_vm6, %v8245_v62  ;;  %v8143_v22 = vmax.f32 %v8010_v13, %v8088_v30  ;;  %v7902_v52 = vmax.f32 %v7863_v61, 0.0  ;;  %v7818_v19 = vadd.f32 %v14371_v53, %v7452_v7  ;;  %v7450_v54 = vadd.f32 %v7330_v44, %v7084_v43  ;;  %v14378_v44 = vld [vmem:[#allocation26_spill] sm:$0xff]  ;;  %v14381_v34 = vld [vmem:[#allocation27_spill] sm:$0xff] }
 0x56f   : > { %7936 = vst.msk [vmem:[#allocation3 + $0x180] sm:$0xff] %vm4586_vm5, %v7897_v5  ;;  %v7861_v42 = vadd.f32 %v13564_v29, %v7815_v47  ;;  %v10235_v40 = vpop.f32.mrf.mxu1  ;;  %v14377_v5 = vld [vmem:[#allocation80_spill] sm:$0xff] }
 0x570   : > { %8182 = vst.msk [vmem:[#allocation4 + $0xb0] sm:$0xff] %vm4586_vm5, %v8143_v22  ;;  %7941 = vst.msk [vmem:[#allocation3 + $0x1a8] sm:$0xff] %vm4586_vm5, %v7902_v52  ;;  %v7864_v48 = vadd.f32 %v13564_v29, %v7818_v19  ;;  %v7816_v8 = vadd.f32 %v14372_v35, %v7450_v54  ;;  %v7455_v50 = vadd.f32 %v10235_v40, %v7089_v15  ;;  %v8248_v13 = vld [vmem:[#allocation4 + $0x9c] sm:$0xff]  ;;  %v8249_v15 = vld [vmem:[#allocation4 + $0xa4] sm:$0xf] }
 0x571   : > { %v7900_v59 = vmax.f32 %v7861_v42, 0.0  ;;  %v7343_v31 = vpop.f32.mrf.mxu1  ;;  %v7088_v61 = vadd.f32 %v14377_v5, %v13482_v60  ;;  %v14379_v19 = vld [vmem:[#allocation81_spill] sm:$0xff]  ;;  %v14380_v42 = vld [vmem:[#allocation82_spill] sm:$0xff] }
 0x572   : > { %v8012_v26 = vld [vmem:[#allocation3 + $0x170] ss:$2 sm:$0xff]  ;;  %v8090_v17 = vld [vmem:[#allocation3 + $0x171] ss:$2 sm:$0xff]  ;;  %v7903_v2 = vmax.f32 %v7864_v48, 0.0  ;;  %v7862_v0 = vadd.f32 %v13564_v29, %v7816_v8  ;;  %v7821_v45 = vadd.f32 %v14375_v32, %v7455_v50  ;;  %v7453_v28 = vadd.f32 %v7343_v31, %v7087_v9 }
 0x573   : > { %v8144_v39 = vmax.f32 %v8012_v26, %v8090_v17  ;;  %7939 = vst.msk [vmem:[#allocation3 + $0x198] sm:$0xff] %vm4586_vm5, %v7900_v59  ;;  %v10236_v57 = vpop.f32.mrf.mxu1  ;;  %v7093_v54 = vadd.f32 %v14379_v19, %v13486_v63  ;;  %v7091_v40 = vadd.f32 %v14380_v42, %v13490_v20  ;;  %v14382_v26 = vld [vmem:[#allocation83_spill] sm:$0xff]  ;;  %v14383_v32 = vld [vmem:[#allocation28_spill] sm:$0xff]  ;;  %v14386_v5 = vld [vmem:[#allocation85_spill] sm:$0xff] }
 0x574   : > { %7942 = vst.msk [vmem:[#allocation3 + $0x1b0] sm:$0xff] %vm4586_vm5, %v7903_v2  ;;  %v7901_v38 = vmax.f32 %v7862_v0, 0.0  ;;  %v7867_v3 = vadd.f32 %v13564_v29, %v7821_v45  ;;  %v7819_v56 = vadd.f32 %v14376_v33, %v7453_v28  ;;  %v7456_v27 = vadd.f32 %v10236_v57, %v7090_v6 }
 0x575   : > { %8183 = vst.msk [vmem:[#allocation4 + $0xb8] sm:$0xff] %vm4586_vm5, %v8144_v39  ;;  %v7346_v7 = vpop.f32.mrf.mxu1  ;;  %v7094_v17 = vadd.f32 %v14382_v26, %v13494_v21  ;;  %v14384_v39 = vld [vmem:[#allocation185_spill] sm:$0xff] }
 0x576   : > { %v8014_v43 = vld [vmem:[#allocation3 + $0x180] ss:$2 sm:$0xff]  ;;  %v8092_v62 = vld [vmem:[#allocation3 + $0x181] ss:$2 sm:$0xff]  ;;  %7940 = vst.msk [vmem:[#allocation3 + $0x1a0] sm:$0xff] %vm4586_vm5, %v7901_v38  ;;  %v7906_v37 = vmax.f32 %v7867_v3, 0.0  ;;  %v7865_v47 = vadd.f32 %v13564_v29, %v7819_v56  ;;  %v7822_v49 = vadd.f32 %v14378_v44, %v7456_v27  ;;  %v7454_v53 = vadd.f32 %v7346_v7, %v7088_v61 }
 0x577   : > { %v8145_v30 = vmax.f32 %v8014_v43, %v8092_v62  ;;  %v8250_v22 = vld [vmem:[#allocation4 + $0xa9] sm:$0xff]  ;;  %v8251_v52 = vld [vmem:[#allocation4 + $0xb1] sm:$0xf]  ;;  %v10239_v60 = vpop.f32.mrf.mxu1  ;;  %v14385_v3 = vld [vmem:[#allocation84_spill] sm:$0xff]  ;;  %v7097_v61 = vadd.f32 %v14386_v5, %v13502_v16 }
 0x578   : > { %v8252_v48 = vmax.f32 %v8248_v13, %v8250_v22  ;;  %v8253_v35 = vmax.f32 %v8249_v15, %v8251_v52  ;;  %7945 = vst.msk [vmem:[#allocation3 + $0x1c8] sm:$0xff] %vm4586_vm5, %v7906_v37  ;;  %v7904_v8 = vmax.f32 %v7865_v47, 0.0  ;;  %v7868_v50 = vadd.f32 %v13564_v29, %v7822_v49  ;;  %v14388_v22 = vld [vmem:[#allocation187_spill] sm:$0xff] }
 0x579   : > { %8184 = vst.msk [vmem:[#allocation4 + $0xc0] sm:$0xff] %vm4586_vm5, %v8145_v30  ;;  %v7820_v9 = vadd.f32 %v14381_v34, %v7454_v53  ;;  %v7459_v59 = vadd.f32 %v10239_v60, %v7093_v54  ;;  %v7359_v31 = vpop.f32.mrf.mxu1  ;;  %v7092_v33 = vadd.f32 %v14385_v3, %v13498_v24  ;;  %v14387_v30 = vld [vmem:[#allocation186_spill] sm:$0xff]  ;;  %v14391_v34 = vld [vmem:[#allocation188_spill] sm:$0xff] }
 0x57a   : > { %8254 = vst.msk [vmem:[%s12887_s29 + $0x48] sm:$0xff] %vm4586_vm5, %v8252_v48  ;;  %v8016_v63 = vld [vmem:[#allocation3 + $0x190] ss:$2 sm:$0xff]  ;;  %v8094_v10 = vld [vmem:[#allocation3 + $0x191] ss:$2 sm:$0xff]  ;;  %7943 = vst.msk [vmem:[#allocation3 + $0x1b8] sm:$0xff] %vm4586_vm5, %v7904_v8  ;;  %v7457_v6 = vadd.f32 %v7359_v31, %v7091_v40 }
 0x57b   : > { %8255 = vst.msk [vmem:[%s12887_s29 + $0x50] sm:$0xf] %vm8206_vm6, %v8253_v35  ;;  %v7907_v20 = vmax.f32 %v7868_v50, 0.0  ;;  %v8146_v2 = vmax.f32 %v8016_v63, %v8094_v10  ;;  %v7866_v0 = vadd.f32 %v13564_v29, %v7820_v9  ;;  %v7825_v45 = vadd.f32 %v14383_v32, %v7459_v59  ;;  %v10240_v28 = vpop.f32.mrf.mxu1  ;;  %v14389_v54 = vld [vmem:[#allocation86_spill] sm:$0xff]  ;;  %v14390_v40 = vld [vmem:[#allocation87_spill] sm:$0xff] }
 0x57c   : > { %v7823_v57 = vadd.f32 %v14384_v39, %v7457_v6  ;;  %v7460_v38 = vadd.f32 %v10240_v28, %v7094_v17  ;;  %v7095_v60 = vadd.f32 %v14389_v54, %v13506_v11  ;;  %v7098_v48 = vadd.f32 %v14390_v40, %v13510_v41  ;;  %v8256_v59 = vld [vmem:[#allocation4 + $0xb6] sm:$0xff]  ;;  %v14392_v17 = vld [vmem:[#allocation89_spill] sm:$0xff] }
 0x57d   : > { %7946 = vst.msk [vmem:[#allocation3 + $0x1d0] sm:$0xff] %vm4586_vm5, %v7907_v20  ;;  %8185 = vst.msk [vmem:[#allocation4 + $0xc8] sm:$0xff] %vm4586_vm5, %v8146_v2  ;;  %v8018_v56 = vld [vmem:[#allocation3 + $0x1a0] ss:$2 sm:$0xff]  ;;  %v8096_v27 = vld [vmem:[#allocation3 + $0x1a1] ss:$2 sm:$0xff]  ;;  %v7871_v21 = vadd.f32 %v13564_v29, %v7825_v45  ;;  %v7362_v62 = vpop.f32.mrf.mxu1  ;;  %v7096_v2 = vadd.f32 %v14392_v17, %v13514_v51 }
 0x57e   : > { %v7905_v43 = vmax.f32 %v7866_v0, 0.0  ;;  %v8147_v7 = vmax.f32 %v8018_v56, %v8096_v27  ;;  %v7869_v13 = vadd.f32 %v13564_v29, %v7823_v57  ;;  %v7826_v37 = vadd.f32 %v14387_v30, %v7460_v38  ;;  %v14393_v45 = vld [vmem:[#allocation189_spill] sm:$0xff] }
 0x57f   : > { %v7458_v47 = vadd.f32 %v7362_v62, %v7092_v33  ;;  %v7910_v24 = vmax.f32 %v7871_v21, 0.0  ;;  %v10243_v44 = vpop.f32.mrf.mxu1  ;;  %v14394_v33 = vld [vmem:[#allocation190_spill] sm:$0xff] }
 0x580   : > { %7944 = vst.msk [vmem:[#allocation3 + $0x1c0] sm:$0xff] %vm4586_vm5, %v7905_v43  ;;  %8186 = vst.msk [vmem:[#allocation4 + $0xd0] sm:$0xff] %vm4586_vm5, %v8147_v7  ;;  %v7908_v49 = vmax.f32 %v7869_v13, 0.0  ;;  %v7872_v15 = vadd.f32 %v13564_v29, %v7826_v37  ;;  %v7463_v53 = vadd.f32 %v10243_v44, %v7097_v61  ;;  %v8257_v10 = vld [vmem:[#allocation4 + $0xbe] sm:$0xf]  ;;  %v14395_v43 = vld [vmem:[#allocation91_spill] sm:$0xff] }
 0x581   : > { %v7824_v52 = vadd.f32 %v14388_v22, %v7458_v47  ;;  %v8020_v19 = vld [vmem:[#allocation3 + $0x1b0] ss:$2 sm:$0xff]  ;;  %v8098_v16 = vld [vmem:[#allocation3 + $0x1b1] ss:$2 sm:$0xff]  ;;  %7949 = vst.msk [vmem:[#allocation3 + $0x1e8] sm:$0xff] %vm4586_vm5, %v7910_v24  ;;  %v7375_v42 = vpop.f32.mrf.mxu1  ;;  %v7101_v21 = vadd.f32 %v14395_v43, %v13518_v23  ;;  %v14396_v7 = vld [vmem:[#allocation191_spill] sm:$0xff] }
 0x582   : > { %v8148_v35 = vmax.f32 %v8020_v19, %v8098_v16  ;;  %7947 = vst.msk [vmem:[#allocation3 + $0x1d8] sm:$0xff] %vm4586_vm5, %v7908_v49  ;;  %v7911_v8 = vmax.f32 %v7872_v15, 0.0  ;;  %v7829_v9 = vadd.f32 %v14391_v34, %v7463_v53  ;;  %v7461_v31 = vadd.f32 %v7375_v42, %v7095_v60  ;;  %v14397_v24 = vld [vmem:[#allocation93_spill] sm:$0xff]  ;;  %v14398_v15 = vld [vmem:[#allocation95_spill] sm:$0xff]  ;;  %v14399_v16 = vld [vmem:[#allocation192_spill] sm:$0xff] }
 0x583   : > { %v7870_v50 = vadd.f32 %v13564_v29, %v7824_v52  ;;  %v10244_v63 = vpop.f32.mrf.mxu1  ;;  %v7099_v44 = vadd.f32 %v14397_v24, %v13522_v4  ;;  %v7102_v22 = vadd.f32 %v14398_v15, %v13526_v55  ;;  %v14400_v55 = vld [vmem:[#allocation97_spill] sm:$0xff] }
 0x584   : > { %v8258_v20 = vld [vmem:[#allocation4 + $0xc3] sm:$0xff]  ;;  %v8259_v6 = vld [vmem:[#allocation4 + $0xcb] sm:$0xf]  ;;  %8187 = vst.msk [vmem:[#allocation4 + $0xd8] sm:$0xff] %vm4586_vm5, %v8148_v35  ;;  %7950 = vst.msk [vmem:[#allocation3 + $0x1f0] sm:$0xff] %vm4586_vm5, %v7911_v8  ;;  %v7875_v41 = vadd.f32 %v13564_v29, %v7829_v9  ;;  %v7464_v26 = vadd.f32 %v10244_v63, %v7098_v48  ;;  %v7827_v28 = vadd.f32 %v14393_v45, %v7461_v31 }
 0x585   : > { %v7909_v11 = vmax.f32 %v7870_v50, 0.0  ;;  %v8260_v0 = vmax.f32 %v8256_v59, %v8258_v20  ;;  %v8261_v32 = vmax.f32 %v8257_v10, %v8259_v6  ;;  %v7378_v39 = vpop.f32.mrf.mxu1  ;;  %v7100_v35 = vadd.f32 %v14400_v55, %v13530_v14  ;;  %v14401_v34 = vld [vmem:[#allocation193_spill] sm:$0xff]  ;;  %v14402_v31 = vld [vmem:[#allocation99_spill] sm:$0xff]  ;;  %v14403_v6 = vld [vmem:[#allocation194_spill] sm:$0xff] }
 0x586   : > { %v7914_v3 = vmax.f32 %v7875_v41, 0.0  ;;  %v7830_v56 = vadd.f32 %v14394_v33, %v7464_v26  ;;  %v7462_v27 = vadd.f32 %v7378_v39, %v7096_v2  ;;  %v7873_v62 = vadd.f32 %v13564_v29, %v7827_v28  ;;  %v14405_v28 = vld [vmem:[#allocation100_spill] sm:$0xff] }
 0x587   : > { %v8022_v57 = vld [vmem:[#allocation3 + $0x1c0] ss:$2 sm:$0xff]  ;;  %v8100_v38 = vld [vmem:[#allocation3 + $0x1c1] ss:$2 sm:$0xff]  ;;  %7948 = vst.msk [vmem:[#allocation3 + $0x1e0] sm:$0xff] %vm4586_vm5, %v7909_v11  ;;  %8262 = vst.msk [vmem:[%s12887_s29 + $0x54] sm:$0xff] %vm4586_vm5, %v8260_v0  ;;  %v10247_v5 = vpop.f32.mrf.mxu1  ;;  %v7105_v63 = vadd.f32 %v14402_v31, %v13534_v1  ;;  %v7103_v39 = vadd.f32 %v14405_v28, %v13538_v25 }
 0x588   : > { %8263 = vst.msk [vmem:[%s12887_s29 + $0x5c] sm:$0xf] %vm8206_vm6, %v8261_v32  ;;  %v8149_v51 = vmax.f32 %v8022_v57, %v8100_v38  ;;  %v7876_v61 = vadd.f32 %v13564_v29, %v7830_v56  ;;  %v7828_v13 = vadd.f32 %v14396_v7, %v7462_v27  ;;  %v7467_v30 = vadd.f32 %v10247_v5, %v7101_v21  ;;  %v8264_v2 = vld [vmem:[#allocation4 + $0xd0] sm:$0xff]  ;;  %v14406_v21 = vld [vmem:[#allocation196_spill] sm:$0xff]  ;;  %v14407_v25 = vld [vmem:[#allocation101_spill] sm:$0xff] }
 0x589   : > { %7953 = vst.msk [vmem:[#allocation3 + $0x208] sm:$0xff] %vm4586_vm5, %v7914_v3  ;;  %v8024_v37 = vld [vmem:[#allocation3 + $0x1d0] ss:$2 sm:$0xff]  ;;  %v8102_v47 = vld [vmem:[#allocation3 + $0x1d1] ss:$2 sm:$0xff]  ;;  %v7912_v23 = vmax.f32 %v7873_v62, 0.0  ;;  %v7391_v49 = vpop.f32.mrf.mxu1 }
 0x58a   : > { %8188 = vst.msk [vmem:[#allocation4 + $0xe0] sm:$0xff] %vm4586_vm5, %v8149_v51  ;;  %v8150_v52 = vmax.f32 %v8024_v37, %v8102_v47  ;;  %v7915_v53 = vmax.f32 %v7876_v61, 0.0  ;;  %v7874_v19 = vadd.f32 %v13564_v29, %v7828_v13  ;;  %v7833_v54 = vadd.f32 %v14399_v16, %v7467_v30  ;;  %v14404_v1 = vld [vmem:[#allocation195_spill] sm:$0xff]  ;;  %v14408_v37 = vld [vmem:[#allocation102_spill] sm:$0xff] }
 0x58b   : > { %7951 = vst.msk [vmem:[#allocation3 + $0x1f8] sm:$0xff] %vm4586_vm5, %v7912_v23  ;;  %v7465_v60 = vadd.f32 %v7391_v49, %v7099_v44  ;;  %v10248_v42 = vpop.f32.mrf.mxu1  ;;  %v8265_v5 = vld [vmem:[#allocation4 + $0xd8] sm:$0xf]  ;;  %v7106_v13 = vadd.f32 %v14407_v25, %v13542_v18  ;;  %v7104_v47 = vadd.f32 %v14408_v37, %v13546_v36  ;;  %v14409_v49 = vld [vmem:[#allocation197_spill] sm:$0xff]  ;;  %v14410_v18 = vld [vmem:[#allocation184_spill] sm:$0xff] }
 0x58c   : > { %8189 = vst.msk [vmem:[#allocation4 + $0xe8] sm:$0xff] %vm4586_vm5, %v8150_v52  ;;  %7954 = vst.msk [vmem:[#allocation3 + $0x210] sm:$0xff] %vm4586_vm5, %v7915_v53  ;;  %v7913_v40 = vmax.f32 %v7874_v19, 0.0  ;;  %v7879_v4 = vadd.f32 %v13564_v29, %v7833_v54  ;;  %v7468_v48 = vadd.f32 %v10248_v42, %v7102_v22  ;;  %v7109_v16 = vadd.f32 %v14410_v18, %v13550_v12 }
 0x58d   : > { %v7831_v9 = vadd.f32 %v14401_v34, %v7465_v60  ;;  %v7394_v59 = vpop.f32.mrf.mxu1 }
 0x58e   : > { %v8026_v8 = vld [vmem:[#allocation3 + $0x1e0] ss:$2 sm:$0xff]  ;;  %v8104_v50 = vld [vmem:[#allocation3 + $0x1e1] ss:$2 sm:$0xff]  ;;  %7952 = vst.msk [vmem:[#allocation3 + $0x200] sm:$0xff] %vm4586_vm5, %v7913_v40  ;;  %v7918_v20 = vmax.f32 %v7879_v4, 0.0  ;;  %v7834_v11 = vadd.f32 %v14403_v6, %v7468_v48  ;;  %v7466_v41 = vadd.f32 %v7394_v59, %v7100_v35 }
 0x58f   : > { %v8151_v10 = vmax.f32 %v8026_v8, %v8104_v50  ;;  %v7877_v26 = vadd.f32 %v13564_v29, %v7831_v9  ;;  %v10251_v17 = vpop.f32.mrf.mxu1  ;;  %v14411_v40 = vld [vmem:[#allocation198_spill] sm:$0xff]  ;;  %v14412_v35 = vld [vmem:[#allocation199_spill] sm:$0xff] }
 0x590   : > { %7957 = vst.msk [vmem:[#allocation3 + $0x228] sm:$0xff] %vm4586_vm5, %v7918_v20  ;;  %v7880_v0 = vadd.f32 %v13564_v29, %v7834_v11  ;;  %v7832_v32 = vadd.f32 %v14404_v1, %v7466_v41  ;;  %v7471_v45 = vadd.f32 %v10251_v17, %v7105_v63  ;;  %v14413_v50 = vld [vmem:[#allocation103_spill] sm:$0xff]  ;;  %v14414_v20 = vld [vmem:[#allocation200_spill] sm:$0xff]  ;;  %v14415_v1 = vld [vmem:[#allocation201_spill] sm:$0xff] }
 0x591   : > { %v8266_v14 = vld [vmem:[#allocation4 + $0xdd] sm:$0xff]  ;;  %8190 = vst.msk [vmem:[#allocation4 + $0xf0] sm:$0xff] %vm4586_vm5, %v8151_v10  ;;  %v7916_v38 = vmax.f32 %v7877_v26, 0.0  ;;  %v7407_v3 = vpop.f32.mrf.mxu1  ;;  %v7107_v34 = vadd.f32 %v14413_v50, %v13554_v58 }
 0x592   : > { %v8268_v57 = vmax.f32 %v8264_v2, %v8266_v14  ;;  %v8028_v33 = vld [vmem:[#allocation3 + $0x1f0] ss:$2 sm:$0xff]  ;;  %v8106_v56 = vld [vmem:[#allocation3 + $0x1f1] ss:$2 sm:$0xff]  ;;  %v7919_v27 = vmax.f32 %v7880_v0, 0.0  ;;  %v7878_v43 = vadd.f32 %v13564_v29, %v7832_v32  ;;  %v7837_v51 = vadd.f32 %v14406_v21, %v7471_v45  ;;  %v7792_v21 = vpop.f32.mrf.mxu0 }
 0x593   : > { %v7469_v62 = vadd.f32 %v7407_v3, %v7103_v39  ;;  %v8267_v61 = vld [vmem:[#allocation4 + $0xe5] sm:$0xf]  ;;  %v8152_v7 = vmax.f32 %v8028_v33, %v8106_v56  ;;  %7955 = vst.msk [vmem:[#allocation3 + $0x218] sm:$0xff] %vm4586_vm5, %v7916_v38  ;;  %v10252_v30 = vpop.f32.mrf.mxu1  ;;  %v14416_v45 = vld [vmem:[#allocation104_spill] sm:$0xff] }
 0x594   : > { %8270 = vst.msk [vmem:[%s12887_s29 + $0x60] sm:$0xff] %vm4586_vm5, %v8268_v57  ;;  %v8269_v23 = vmax.f32 %v8265_v5, %v8267_v61  ;;  %7958 = vst.msk [vmem:[#allocation3 + $0x230] sm:$0xff] %vm4586_vm5, %v7919_v27  ;;  %v7917_v24 = vmax.f32 %v7878_v43, 0.0  ;;  %v7883_v44 = vadd.f32 %v13564_v29, %v7837_v51  ;;  %v7472_v53 = vadd.f32 %v10252_v30, %v7106_v13 }
 0x595   : > { %v7835_v15 = vadd.f32 %v14409_v49, %v7469_v62  ;;  %8191 = vst.msk [vmem:[#allocation4 + $0xf8] sm:$0xff] %vm4586_vm5, %v8152_v7  ;;  %v8030_v22 = vld [vmem:[#allocation3 + $0x200] ss:$2 sm:$0xff]  ;;  %v8108_v52 = vld [vmem:[#allocation3 + $0x201] ss:$2 sm:$0xff]  ;;  %v7410_v19 = vpop.f32.mrf.mxu1  ;;  %v7108_v28 = vadd.f32 %v14416_v45, %v13558_v46 }
 0x596   : > { %8271 = vst.msk [vmem:[%s12887_s29 + $0x68] sm:$0xf] %vm8206_vm6, %v8269_v23  ;;  %v8153_v36 = vmax.f32 %v8030_v22, %v8108_v52  ;;  %v7922_v54 = vmax.f32 %v7883_v44, 0.0  ;;  %v7470_v42 = vadd.f32 %v7410_v19, %v7104_v47  ;;  %v7838_v4 = vadd.f32 %v14411_v40, %v7472_v53 }
 0x597   : > { %7956 = vst.msk [vmem:[#allocation3 + $0x220] sm:$0xff] %vm4586_vm5, %v7917_v24  ;;  %v7881_v60 = vadd.f32 %v13564_v29, %v7835_v15  ;;  %v10255_v48 = vpop.f32.mrf.mxu1 }
 0x598   : > { %8192 = vst.msk [vmem:[#allocation4 + $0x100] sm:$0xff] %vm4586_vm5, %v8153_v36  ;;  %7961 = vst.msk [vmem:[#allocation3 + $0x248] sm:$0xff] %vm4586_vm5, %v7922_v54  ;;  %v7836_v8 = vadd.f32 %v14412_v35, %v7470_v42  ;;  %v7475_v12 = vadd.f32 %v10255_v48, %v7109_v16  ;;  %v7884_v9 = vadd.f32 %v13564_v29, %v7838_v4  ;;  %v8272_v2 = vld [vmem:[#allocation4 + $0xea] sm:$0xff]  ;;  %v8273_v51 = vld [vmem:[#allocation4 + $0xf2] sm:$0xf] }
 0x599   : > { %v7920_v55 = vmax.f32 %v7881_v60, 0.0  ;;  %v7423_v59 = vpop.f32.mrf.mxu1 }
 0x59a   : > { %v8032_v31 = vld [vmem:[#allocation3 + $0x210] ss:$2 sm:$0xff]  ;;  %v8110_v63 = vld [vmem:[#allocation3 + $0x211] ss:$2 sm:$0xff]  ;;  %v7882_v10 = vadd.f32 %v13564_v29, %v7836_v8  ;;  %v7841_v6 = vadd.f32 %v14414_v20, %v7475_v12  ;;  %v7473_v11 = vadd.f32 %v7423_v59, %v7107_v34  ;;  %v7923_v26 = vmax.f32 %v7884_v9, 0.0 }
 0x59b   : > { %7959 = vst.msk [vmem:[#allocation3 + $0x238] sm:$0xff] %vm4586_vm5, %v7920_v55  ;;  %v8154_v41 = vmax.f32 %v8032_v31, %v8110_v63  ;;  %v10256_v17 = vpop.f32.mrf.mxu1 }
 0x59c   : > { %v8274_v14 = vld [vmem:[#allocation4 + $0xf7] sm:$0xff]  ;;  %v7921_v0 = vmax.f32 %v7882_v10, 0.0  ;;  %v7887_v58 = vadd.f32 %v13564_v29, %v7841_v6  ;;  %v7839_v32 = vadd.f32 %v14415_v1, %v7473_v11  ;;  %7962 = vst.msk [vmem:[#allocation3 + $0x250] sm:$0xff] %vm4586_vm5, %v7923_v26 }
 0x59d   : > { %v8276_v39 = vmax.f32 %v8272_v2, %v8274_v14  ;;  %8193 = vst.msk [vmem:[#allocation4 + $0x108] sm:$0xff] %vm4586_vm5, %v8154_v41  ;;  %v7426_v3 = vpop.f32.mrf.mxu1 }
 0x59e   : > { %v8034_v57 = vld [vmem:[#allocation3 + $0x220] ss:$2 sm:$0xff]  ;;  %v8112_v38 = vld [vmem:[#allocation3 + $0x221] ss:$2 sm:$0xff]  ;;  %7960 = vst.msk [vmem:[#allocation3 + $0x240] sm:$0xff] %vm4586_vm5, %v7921_v0  ;;  %v7926_v56 = vmax.f32 %v7887_v58, 0.0  ;;  %v7885_v27 = vadd.f32 %v13564_v29, %v7839_v32  ;;  %v7474_v43 = vadd.f32 %v7426_v3, %v7108_v28 }
 0x59f   : > { %v8155_v33 = vmax.f32 %v8034_v57, %v8112_v38  ;;  %8278 = vst.msk [vmem:[%s12887_s29 + $0x6c] sm:$0xff] %vm4586_vm5, %v8276_v39  ;;  %v8275_v46 = vld [vmem:[#allocation4 + $0xff] sm:$0xf] }
 0x5a0   : > { %v8277_v62 = vmax.f32 %v8273_v51, %v8275_v46  ;;  %7965 = vst.msk [vmem:[#allocation3 + $0x268] sm:$0xff] %vm4586_vm5, %v7926_v56  ;;  %v7924_v5 = vmax.f32 %v7885_v27, 0.0  ;;  %v7840_v61 = vadd.f32 %v7792_v21, %v7474_v43 }
 0x5a1   : > { %8194 = vst.msk [vmem:[#allocation4 + $0x110] sm:$0xff] %vm4586_vm5, %v8155_v33 }
 0x5a2   : > { %v8036_v7 = vld [vmem:[#allocation3 + $0x230] ss:$2 sm:$0xff]  ;;  %v8114_v25 = vld [vmem:[#allocation3 + $0x231] ss:$2 sm:$0xff]  ;;  %8279 = vst.msk [vmem:[%s12887_s29 + $0x74] sm:$0xf] %vm8206_vm6, %v8277_v62  ;;  %v7886_v30 = vadd.f32 %v13564_v29, %v7840_v61 }
 0x5a3   : > { %v8156_v13 = vmax.f32 %v8036_v7, %v8114_v25  ;;  %7963 = vst.msk [vmem:[#allocation3 + $0x258] sm:$0xff] %vm4586_vm5, %v7924_v5 }
 0x5a4   : > { %v7925_v37 = vmax.f32 %v7886_v30, 0.0  ;;  %v8280_v15 = vld [vmem:[#allocation4 + $0x104] sm:$0xff]  ;;  %v8281_v52 = vld [vmem:[#allocation4 + $0x10c] sm:$0xf] }
 0x5a5   : > { %8195 = vst.msk [vmem:[#allocation4 + $0x118] sm:$0xff] %vm4586_vm5, %v8156_v13  ;;  %v8038_v47 = vld [vmem:[#allocation3 + $0x240] ss:$2 sm:$0xff]  ;;  %v8116_v23 = vld [vmem:[#allocation3 + $0x241] ss:$2 sm:$0xff] }
 0x5a6   : > { %v8157_v24 = vmax.f32 %v8038_v47, %v8116_v23  ;;  %7964 = vst.msk [vmem:[#allocation3 + $0x260] sm:$0xff] %vm4586_vm5, %v7925_v37 }
 0x5a8   : > { %8196 = vst.msk [vmem:[#allocation4 + $0x120] sm:$0xff] %vm4586_vm5, %v8157_v24 }
 0x5aa   : > { %v8040_v44 = vld [vmem:[#allocation3 + $0x250] ss:$2 sm:$0xff]  ;;  %v8118_v49 = vld [vmem:[#allocation3 + $0x251] ss:$2 sm:$0xff] }
 0x5ab   : > { %v8158_v22 = vmax.f32 %v8040_v44, %v8118_v49 }
 0x5ac   : > { %v8282_v53 = vld [vmem:[#allocation4 + $0x111] sm:$0xff]  ;;  %v8283_v19 = vld [vmem:[#allocation4 + $0x119] sm:$0xf] }
 0x5ad   : > { %v8284_v29 = vmax.f32 %v8280_v15, %v8282_v53  ;;  %v8285_v18 = vmax.f32 %v8281_v52, %v8283_v19  ;;  %8197 = vst.msk [vmem:[#allocation4 + $0x128] sm:$0xff] %vm4586_vm5, %v8158_v22  ;;  %v8042_v16 = vld [vmem:[#allocation3 + $0x260] ss:$2 sm:$0xff]  ;;  %v8120_v36 = vld [vmem:[#allocation3 + $0x261] ss:$2 sm:$0xff] }
 0x5ae   : > { %v8159_v54 = vmax.f32 %v8042_v16, %v8120_v36 }
 0x5af   : > { %8286 = vst.msk [vmem:[%s12887_s29 + $0x78] sm:$0xff] %vm4586_vm5, %v8284_v29  ;;  %v8288_v60 = vld [vmem:[#allocation4 + $0x11e] sm:$0xff] }
 0x5b0   : > { %8287 = vst.msk [vmem:[%s12887_s29 + $0x80] sm:$0xf] %vm8206_vm6, %v8285_v18 }
 0x5b1   : > { %8198 = vst.msk [vmem:[#allocation4 + $0x130] sm:$0xff] %vm4586_vm5, %v8159_v54 }
 0x5b4   : > { %v8289_v42 = vld [vmem:[#allocation4 + $0x126] sm:$0xf] }
 0x5b8   : > { %v8290_v40 = vld [vmem:[#allocation4 + $0x12b] sm:$0xff]  ;;  %v8291_v4 = vld [vmem:[#allocation4 + $0x133] sm:$0xf] }
 0x5b9   : > { %v8292_v48 = vmax.f32 %v8288_v60, %v8290_v40  ;;  %v8293_v55 = vmax.f32 %v8289_v42, %v8291_v4 }
 0x5bb   : > { %8294 = vst.msk [vmem:[%s12887_s29 + $0x84] sm:$0xff] %vm4586_vm5, %v8292_v48 }
 0x5bc   : > { %8295 = vst.msk [vmem:[%s12887_s29 + $0x8c] sm:$0xf] %vm8206_vm6, %v8293_v55 }
 0x5bd PF: > { %s18_s18 = sadd.s32 1, %s10597_s18  }
 0x5be   : > { %p15_p2 = scmp.ge.s32.totalorder %s18_s18, 4  }
 0x5c0   :  { %17 = sbr.rel (!%p15_p2) target bundleno = 3 (0x3), region = 172 }
 0x5c5   :  { %8317 = vsyncpa [#allocation6], 1 }
 0x5c6   :  { %8319 = vsyncpa [#allocation6 + $0x1], 1 }
 0x5c7   :  { %8320 = vsyncpa [#allocation8], 1 }
 0x5c8   :  { %8321 = vsyncpa [#allocation11], 1 }

// kernel: mnist_cnn_forward.3
= control target key start
LH: loop header
LB: loop body
LE: loop exit
PB: predicated region body
PF: predicated region fallthrough
CT: control target
= control target key end

     0   :  { %v62_v28 = vlaneseq  ;;  %v8727_v36 = vmov 1983009808   ;;  %s10647_s0 = inlined_call_operand.vmem [shape: f32[2,9216], index: 0, kind: input, shape index: {}]   ;;  %s10648_s1 = inlined_call_operand.vmem [shape: bf16[9216,128], index: 1, kind: input, shape index: {}]   ;;  %s10649_s2 = inlined_call_operand.vmem [shape: f32[1,128], index: 2, kind: input, shape index: {}]   ;;  %s10650_s3 = inlined_call_operand.vmem [shape: bf16[128,10], index: 3, kind: input, shape index: {}]   ;;  %s10651_s4 = inlined_call_operand.vmem [shape: f32[1,10], index: 4, kind: input, shape index: {}]   ;;  %s10652_s5 = inlined_call_operand.hbm [shape: f32[2,10], index: 5, kind: output, shape index: {}]  }
   0x1   :  { %v8103_v0 = vld [vmem:[%s10648_s1 + $0x78] sm:$0xff]   ;;  %v8107_v4 = vld [vmem:[%s10648_s1 + $0x70] sm:$0xff]   ;;  %v8111_v8 = vld [vmem:[%s10648_s1 + $0x68] sm:$0xff]   ;;  %v60_v37 = vunpack.c.l.s4 %v8727_v36 }
   0x2   :  { %v8104_v1 = vld [vmem:[%s10648_s1 + $0xf8] sm:$0xff]   ;;  %7278 = vmatprep.subr.bf16.mxu0 %v8103_v0  ;;  %v8108_v5 = vld [vmem:[%s10648_s1 + $0xf0] sm:$0xff]   ;;  %v8112_v9 = vld [vmem:[%s10648_s1 + $0xe8] sm:$0xff]   ;;  %v63_v33 = vshrl.u32 %v62_v28, 7 }
   0x3   :  { %v8105_v2 = vld [vmem:[%s10648_s1 + $0x38] sm:$0xff]   ;;  %7300 = vmatprep.subr.bf16.mxu1 %v8104_v1  ;;  %v8109_v6 = vld [vmem:[%s10648_s1 + $0x30] sm:$0xff]   ;;  %v8113_v10 = vld [vmem:[%s10648_s1 + $0x28] sm:$0xff]   ;;  %v61_v39 = vunpack.c.0.s8 %v60_v37 }
   0x4   :  { %v8106_v3 = vld [vmem:[%s10648_s1 + $0xb8] sm:$0xff]   ;;  %7279 = vmatpush3.bf16.msra.mxu0 %v8105_v2  ;;  %v8110_v7 = vld [vmem:[%s10648_s1 + $0xb0] sm:$0xff]   ;;  %v8114_v11 = vld [vmem:[%s10648_s1 + $0xa8] sm:$0xff]  }
   0x5   :  { %7301 = vmatpush3.bf16.msra.mxu1 %v8106_v3  ;;  %7280 = vmatprep.subr.bf16.mxu0 %v8107_v4  ;;  %v8115_v12 = vld [vmem:[%s10648_s1 + $0x60] sm:$0xff]   ;;  %v8119_v16 = vld [vmem:[%s10648_s1 + $0x58] sm:$0xff]   ;;  %v8123_v20 = vld [vmem:[%s10648_s1 + $0x50] sm:$0xff]   ;;  %v8866_v41 = vsub.s32 %v61_v39, %v63_v33 }
   0x6   :  { %7302 = vmatprep.subr.bf16.mxu1 %v8108_v5  ;;  %v8116_v13 = vld [vmem:[%s10648_s1 + $0xe0] sm:$0xff]   ;;  %v8120_v17 = vld [vmem:[%s10648_s1 + $0xd8] sm:$0xff]   ;;  %v8124_v21 = vld [vmem:[%s10648_s1 + $0xd0] sm:$0xff]  }
   0x7   :  { %v8117_v14 = vld [vmem:[%s10648_s1 + $0x20] sm:$0xff]   ;;  %v8121_v18 = vld [vmem:[%s10648_s1 + $0x18] sm:$0xff]   ;;  %v8125_v22 = vld [vmem:[%s10648_s1 + $0x10] sm:$0xff]  }
   0x8   :  { %7281 = vmatpush3.bf16.msra.mxu0 %v8109_v6  ;;  %v8118_v15 = vld [vmem:[%s10648_s1 + $0xa0] sm:$0xff]   ;;  %v8122_v19 = vld [vmem:[%s10648_s1 + $0x98] sm:$0xff]   ;;  %v8126_v23 = vld [vmem:[%s10648_s1 + $0x90] sm:$0xff]  }
   0x9   :  { %7303 = vmatpush3.bf16.msra.mxu1 %v8110_v7  ;;  %7282 = vmatprep.subr.bf16.mxu0 %v8111_v8  ;;  %v8127_v24 = vld [vmem:[%s10648_s1 + $0x48] sm:$0xff]   ;;  %v8131_v29 = vld [vmem:[%s10648_s1 + $0x40] sm:$0xff]   ;;  %v8136_v35 = vld [vmem:[%s10648_s1 + $0x178] sm:$0xff]  }
   0xa   :  { %7304 = vmatprep.subr.bf16.mxu1 %v8112_v9  ;;  %v8128_v25 = vld [vmem:[%s10648_s1 + $0xc8] sm:$0xff]   ;;  %v8132_v30 = vld [vmem:[%s10648_s1 + $0xc0] sm:$0xff]   ;;  %v8137_v38 = vld [vmem:[%s10648_s1 + $0x1f8] sm:$0xff]  }
   0xb   :  { %v8129_v26 = vld [vmem:[%s10648_s1 + $0x8] sm:$0xff]   ;;  %v8133_v31 = vld [vmem:[%s10648_s1] sm:$0xff]   ;;  %v8138_v46 = vld [vmem:[%s10648_s1 + $0x138] sm:$0xff]  }
   0xc   :  { %7283 = vmatpush3.bf16.msra.mxu0 %v8113_v10  ;;  %v8130_v27 = vld [vmem:[%s10648_s1 + $0x88] sm:$0xff]   ;;  %v8134_v32 = vld [vmem:[%s10648_s1 + $0x80] sm:$0xff]   ;;  %v8139_v49 = vld [vmem:[%s10648_s1 + $0x1b8] sm:$0xff]  }
   0xd   :  { %7305 = vmatpush3.bf16.msra.mxu1 %v8114_v11  ;;  %7284 = vmatprep.subr.bf16.mxu0 %v8115_v12  ;;  %v22_v34 = vld [vmem:[%s10647_s0] sm:$0xff]  ;;  %v8140_v52 = vld [vmem:[%s10648_s1 + $0x170] sm:$0xff]   ;;  %v8144_v56 = vld [vmem:[%s10648_s1 + $0x168] sm:$0xff]  }
   0xe   :  { %7306 = vmatprep.subr.bf16.mxu1 %v8116_v13  ;;  %v58_v40 = vcombine.high %v22_v34, %v22_v34  ;;  %v65_v42 = vrot.slane %v22_v34, %v8866_v41  ;;  %v8141_v53 = vld [vmem:[%s10648_s1 + $0x1f0] sm:$0xff]   ;;  %v8145_v57 = vld [vmem:[%s10648_s1 + $0x1e8] sm:$0xff]   ;;  %v8148_v60 = vld [vmem:[%s10648_s1 + $0x160] sm:$0xff]  }
   0xf   :  { %v8142_v54 = vld [vmem:[%s10648_s1 + $0x130] sm:$0xff]   ;;  %v8146_v58 = vld [vmem:[%s10648_s1 + $0x128] sm:$0xff]   ;;  %v8149_v61 = vld [vmem:[%s10648_s1 + $0x1e0] sm:$0xff]  }
  0x10   :  { %7285 = vmatpush3.bf16.msra.mxu0 %v8117_v14  ;;  %v72_v43 = vrot.slane %v58_v40, %v8866_v41  ;;  %v73_v44 = vcombine.high %v65_v42, %v65_v42  ;;  %v436_v47 = vpack.c.bf16 %v65_v42, %v65_v42  ;;  %v8143_v55 = vld [vmem:[%s10648_s1 + $0x1b0] sm:$0xff]   ;;  %v8147_v59 = vld [vmem:[%s10648_s1 + $0x1a8] sm:$0xff]   ;;  %v8150_v62 = vld [vmem:[%s10648_s1 + $0x120] sm:$0xff]  }
  0x11   :  { %7307 = vmatpush3.bf16.msra.mxu1 %v8118_v15  ;;  %7286 = vmatprep.subr.bf16.mxu0 %v8119_v16  ;;  %v8151_v63 = vld [vmem:[%s10648_s1 + $0x1a0] sm:$0xff]   ;;  %v8152_v0 = vld [vmem:[%s10648_s1 + $0x158] sm:$0xff]   ;;  %v8156_v4 = vld [vmem:[%s10648_s1 + $0x150] sm:$0xff]  }
  0x12   :  { %7308 = vmatprep.subr.bf16.mxu1 %v8120_v17  ;;  %v74_v45 = vcombine.high %v72_v43, %v72_v43  ;;  %v438_v48 = vpack.c.bf16 %v72_v43, %v72_v43  ;;  %v437_v50 = vpack.c.bf16 %v73_v44, %v73_v44  ;;  %v8153_v1 = vld [vmem:[%s10648_s1 + $0x1d8] sm:$0xff]   ;;  %v8157_v5 = vld [vmem:[%s10648_s1 + $0x1d0] sm:$0xff]   ;;  %v8160_v8 = vld [vmem:[%s10648_s1 + $0x148] sm:$0xff]  }
  0x13   :  { %v8154_v2 = vld [vmem:[%s10648_s1 + $0x118] sm:$0xff]   ;;  %v8158_v6 = vld [vmem:[%s10648_s1 + $0x110] sm:$0xff]   ;;  %v8161_v9 = vld [vmem:[%s10648_s1 + $0x1c8] sm:$0xff]  }
  0x14   :  { %7287 = vmatpush3.bf16.msra.mxu0 %v8121_v18  ;;  %v439_v51 = vpack.c.bf16 %v74_v45, %v74_v45  ;;  %5155 = vmatprep.mubr.bf16.mxu0 %v437_v50  ;;  %v8155_v3 = vld [vmem:[%s10648_s1 + $0x198] sm:$0xff]   ;;  %v8159_v7 = vld [vmem:[%s10648_s1 + $0x190] sm:$0xff]   ;;  %v23_v10 = vld [vmem:[%s10647_s0 + $0x8] sm:$0xff] }
  0x15   :  { %7309 = vmatpush3.bf16.msra.mxu1 %v8122_v19  ;;  %7288 = vmatprep.subr.bf16.mxu0 %v8123_v20  ;;  %v8162_v11 = vld [vmem:[%s10648_s1 + $0x108] sm:$0xff]   ;;  %v82_v12 = vrot.slane %v23_v10, %v8866_v41  ;;  %v75_v13 = vcombine.high %v23_v10, %v23_v10  ;;  %v8164_v15 = vld [vmem:[%s10648_s1 + $0x140] sm:$0xff]   ;;  %v8176_v33 = vld [vmem:[%s10648_s1 + $0x2b0] sm:$0xff]  }
  0x16   :  { %7310 = vmatprep.subr.bf16.mxu1 %v8124_v21  ;;  %5195 = vmatprep.mubr.bf16.mxu1 %v439_v51  ;;  %v8163_v14 = vld [vmem:[%s10648_s1 + $0x188] sm:$0xff]   ;;  %v8165_v18 = vld [vmem:[%s10648_s1 + $0x1c0] sm:$0xff]   ;;  %v8185_v43 = vld [vmem:[%s10648_s1 + $0x258] sm:$0xff]  }
  0x17   :  { %v90_v16 = vcombine.high %v82_v12, %v82_v12  ;;  %v89_v17 = vrot.slane %v75_v13, %v8866_v41  ;;  %v8166_v19 = vld [vmem:[%s10648_s1 + $0x100] sm:$0xff]   ;;  %v8177_v34 = vld [vmem:[%s10648_s1 + $0x268] sm:$0xff]   ;;  %v8186_v44 = vld [vmem:[%s10648_s1 + $0x2d8] sm:$0xff]  }
  0x18   :  { %7289 = vmatpush3.bf16.msra.mxu0 %v8125_v22  ;;  %v8167_v22 = vld [vmem:[%s10648_s1 + $0x180] sm:$0xff]   ;;  %v8179_v36 = vld [vmem:[%s10648_s1 + $0x228] sm:$0xff]   ;;  %v8187_v45 = vld [vmem:[%s10648_s1 + $0x218] sm:$0xff]  }
  0x19   :  { %7311 = vmatpush3.bf16.msra.mxu1 %v8126_v23  ;;  %7290 = vmatprep.subr.bf16.mxu0 %v8127_v24  ;;  %v441_v20 = vpack.c.bf16 %v90_v16, %v90_v16  ;;  %v91_v21 = vcombine.high %v89_v17, %v89_v17  ;;  %v8169_v24 = vld [vmem:[%s10648_s1 + $0x278] sm:$0xff]   ;;  %v442_v28 = vpack.c.bf16 %v89_v17, %v89_v17  ;;  %v8180_v37 = vld [vmem:[%s10648_s1 + $0x2a8] sm:$0xff]   ;;  %v8182_v39 = vld [vmem:[%s10648_s1 + $0x2e0] sm:$0xff]  }
  0x1a   :  { %7312 = vmatprep.subr.bf16.mxu1 %v8128_v25  ;;  %v8170_v25 = vld [vmem:[%s10648_s1 + $0x2f8] sm:$0xff]   ;;  %v8183_v40 = vld [vmem:[%s10648_s1 + $0x220] sm:$0xff]   ;;  %v8192_v50 = vld [vmem:[%s10648_s1 + $0x290] sm:$0xff]  }
  0x1b   :  { %v443_v23 = vpack.c.bf16 %v91_v21, %v91_v21  ;;  %v8184_v42 = vld [vmem:[%s10648_s1 + $0x2a0] sm:$0xff]   ;;  %v8193_v51 = vld [vmem:[%s10648_s1 + $0x248] sm:$0xff]   ;;  %v8207_v10 = vld [vmem:[%s10648_s1 + $0x3f0] sm:$0xff]  }
  0x1c   :  { %7291 = vmatpush3.bf16.msra.mxu0 %v8129_v26  ;;  %v8171_v26 = vld [vmem:[%s10648_s1 + $0x238] sm:$0xff]   ;;  %v8210_v13 = vld [vmem:[%s10648_s1 + $0x368] sm:$0xff]   ;;  %v8214_v17 = vld [vmem:[%s10648_s1 + $0x360] sm:$0xff]  }
  0x1d   :  { %7313 = vmatpush3.bf16.msra.mxu1 %v8130_v27  ;;  %7292 = vmatprep.subr.bf16.mxu0 %v8131_v29  ;;  %v440_v27 = vpack.c.bf16 %v82_v12, %v82_v12  ;;  %v8172_v29 = vld [vmem:[%s10648_s1 + $0x2b8] sm:$0xff]   ;;  %v8209_v12 = vld [vmem:[%s10648_s1 + $0x3b0] sm:$0xff]   ;;  %v8213_v16 = vld [vmem:[%s10648_s1 + $0x3a8] sm:$0xff]  }
  0x1e   :  { %7314 = vmatprep.subr.bf16.mxu1 %v8132_v30  ;;  %v8173_v30 = vld [vmem:[%s10648_s1 + $0x270] sm:$0xff]   ;;  %v8218_v21 = vld [vmem:[%s10648_s1 + $0x358] sm:$0xff]  }
  0x20   :  { %7293 = vmatpush3.bf16.msra.mxu0 %v8133_v31  ;;  %v8174_v31 = vld [vmem:[%s10648_s1 + $0x2f0] sm:$0xff]  }
  0x21   :  { %7315 = vmatpush3.bf16.msra.mxu1 %v8134_v32  ;;  %7322 = vmatprep.subr.bf16.mxu0 %v8136_v35  ;;  %v8175_v32 = vld [vmem:[%s10648_s1 + $0x230] sm:$0xff]   ;;  %v8178_v35 = vld [vmem:[%s10648_s1 + $0x2e8] sm:$0xff]  }
  0x22   :  { %7344 = vmatprep.subr.bf16.mxu1 %v8137_v38  ;;  %v8181_v38 = vld [vmem:[%s10648_s1 + $0x260] sm:$0xff]  }
  0x23   :  { %5156 = vmatmul.mubr.bf16.vlgmr.msra.gmra.mxu0 %v436_v47  ;;  %v8189_v47 = vld [vmem:[%s10648_s1 + $0x250] sm:$0xff]  }
  0x24   :  { %5196 = vmatmul.mubr.bf16.vlgmr.msra.gmra.mxu1 %v438_v48  ;;  %7323 = vmatpush3.bf16.msra.mxu0 %v8138_v46  ;;  %v8188_v46 = vld [vmem:[%s10648_s1 + $0x298] sm:$0xff]   ;;  %v8190_v48 = vld [vmem:[%s10648_s1 + $0x2d0] sm:$0xff]  }
  0x25   :  { %7345 = vmatpush3.bf16.msra.mxu1 %v8139_v49  ;;  %7324 = vmatprep.subr.bf16.mxu0 %v8140_v52  ;;  %v8191_v49 = vld [vmem:[%s10648_s1 + $0x210] sm:$0xff]   ;;  %v8194_v52 = vld [vmem:[%s10648_s1 + $0x2c8] sm:$0xff]  }
  0x26   :  { %7346 = vmatprep.subr.bf16.mxu1 %v8141_v53  ;;  %5235 = vmatprep.mubr.bf16.mxu0 %v441_v20  ;;  %v24_v53 = vld [vmem:[%s10647_s0 + $0x10] sm:$0xff]  ;;  %v8217_v20 = vld [vmem:[%s10648_s1 + $0x3a0] sm:$0xff]  }
  0x27   :  { %5275 = vmatprep.mubr.bf16.mxu1 %v443_v23  ;;  %v8220_v23 = vld [vmem:[%s10648_s1 + $0x318] sm:$0xff]  }
  0x28   :  { %7325 = vmatpush3.bf16.msra.mxu0 %v8142_v54  ;;  %v8195_v54 = vld [vmem:[%s10648_s1 + $0x208] sm:$0xff]  }
  0x29   :  { %7347 = vmatpush3.bf16.msra.mxu1 %v8143_v55  ;;  %7326 = vmatprep.subr.bf16.mxu0 %v8144_v56  ;;  %v99_v55 = vrot.slane %v24_v53, %v8866_v41  ;;  %v92_v56 = vcombine.high %v24_v53, %v24_v53  ;;  %v8240_v53 = vld [vmem:[%s10648_s1 + $0x4f0] sm:$0xff]  }
  0x2a   :  { %7348 = vmatprep.subr.bf16.mxu1 %v8145_v57  ;;  %v8196_v57 = vld [vmem:[%s10648_s1 + $0x288] sm:$0xff]  }
  0x2c   :  { %7327 = vmatpush3.bf16.msra.mxu0 %v8146_v58  ;;  %v8197_v58 = vld [vmem:[%s10648_s1 + $0x240] sm:$0xff]  }
  0x2d   :  { %7349 = vmatpush3.bf16.msra.mxu1 %v8147_v59  ;;  %7328 = vmatprep.subr.bf16.mxu0 %v8148_v60  ;;  %v107_v59 = vcombine.high %v99_v55, %v99_v55  ;;  %v106_v60 = vrot.slane %v92_v56, %v8866_v41  ;;  %v8243_v56 = vld [vmem:[%s10648_s1 + $0x468] sm:$0xff]  }
  0x2e   :  { %7350 = vmatprep.subr.bf16.mxu1 %v8149_v61  ;;  %v8198_v61 = vld [vmem:[%s10648_s1 + $0x2c0] sm:$0xff]  }
  0x30   :  { %7329 = vmatpush3.bf16.msra.mxu0 %v8150_v62  ;;  %v8199_v62 = vld [vmem:[%s10648_s1 + $0x200] sm:$0xff]  }
  0x31   :  { %7351 = vmatpush3.bf16.msra.mxu1 %v8151_v63  ;;  %7330 = vmatprep.subr.bf16.mxu0 %v8152_v0  ;;  %v445_v63 = vpack.c.bf16 %v107_v59, %v107_v59  ;;  %v108_v0 = vcombine.high %v106_v60, %v106_v60  ;;  %v8246_v59 = vld [vmem:[%s10648_s1 + $0x4a8] sm:$0xff]  }
  0x32   :  { %7352 = vmatprep.subr.bf16.mxu1 %v8153_v1  ;;  %v8200_v1 = vld [vmem:[%s10648_s1 + $0x280] sm:$0xff]  }
  0x34   :  { %7331 = vmatpush3.bf16.msra.mxu0 %v8154_v2  ;;  %v447_v2 = vpack.c.bf16 %v108_v0, %v108_v0  ;;  %v8251_v0 = vld [vmem:[%s10648_s1 + $0x458] sm:$0xff]  }
  0x35   :  { %7353 = vmatpush3.bf16.msra.mxu1 %v8155_v3  ;;  %7332 = vmatprep.subr.bf16.mxu0 %v8156_v4  ;;  %v8202_v3 = vld [vmem:[%s10648_s1 + $0x378] sm:$0xff]  }
  0x36   :  { %7354 = vmatprep.subr.bf16.mxu1 %v8157_v5  ;;  %v8203_v4 = vld [vmem:[%s10648_s1 + $0x3f8] sm:$0xff]  }
  0x37   :  { %v8204_v5 = vld [vmem:[%s10648_s1 + $0x338] sm:$0xff]  }
  0x38   :  { %7333 = vmatpush3.bf16.msra.mxu0 %v8158_v6  ;;  %v444_v6 = vpack.c.bf16 %v99_v55, %v99_v55  ;;  %v8242_v55 = vld [vmem:[%s10648_s1 + $0x4b0] sm:$0xff]  }
  0x39   :  { %7355 = vmatpush3.bf16.msra.mxu1 %v8159_v7  ;;  %7334 = vmatprep.subr.bf16.mxu0 %v8160_v8  ;;  %v446_v7 = vpack.c.bf16 %v106_v60, %v106_v60  ;;  %v8205_v8 = vld [vmem:[%s10648_s1 + $0x3b8] sm:$0xff]   ;;  %v8247_v60 = vld [vmem:[%s10648_s1 + $0x460] sm:$0xff]  }
  0x3a   :  { %7356 = vmatprep.subr.bf16.mxu1 %v8161_v9  ;;  %v8206_v9 = vld [vmem:[%s10648_s1 + $0x370] sm:$0xff]  }
  0x3c   :  { %7335 = vmatpush3.bf16.msra.mxu0 %v8162_v11  ;;  %v8208_v11 = vld [vmem:[%s10648_s1 + $0x330] sm:$0xff]  }
  0x3d   :  { %7357 = vmatpush3.bf16.msra.mxu1 %v8163_v14  ;;  %7336 = vmatprep.subr.bf16.mxu0 %v8164_v15  ;;  %v8211_v14 = vld [vmem:[%s10648_s1 + $0x3e8] sm:$0xff]  }
  0x3e   :  { %7358 = vmatprep.subr.bf16.mxu1 %v8165_v18  ;;  %v8212_v15 = vld [vmem:[%s10648_s1 + $0x328] sm:$0xff]   ;;  %v8215_v18 = vld [vmem:[%s10648_s1 + $0x3e0] sm:$0xff]  }
  0x40   :  { %7337 = vmatpush3.bf16.msra.mxu0 %v8166_v19  ;;  %v8216_v19 = vld [vmem:[%s10648_s1 + $0x320] sm:$0xff]  }
  0x41   :  { %7359 = vmatpush3.bf16.msra.mxu1 %v8167_v22  ;;  %7366 = vmatprep.subr.bf16.mxu0 %v8169_v24  ;;  %v8219_v22 = vld [vmem:[%s10648_s1 + $0x3d8] sm:$0xff]  }
  0x42   :  { %7388 = vmatprep.subr.bf16.mxu1 %v8170_v25  ;;  %v8221_v24 = vld [vmem:[%s10648_s1 + $0x398] sm:$0xff]   ;;  %v8222_v25 = vld [vmem:[%s10648_s1 + $0x350] sm:$0xff]  }
  0x43   :  { %5236 = vmatmul.mubr.bf16.vlgmr.msra.gmra.mxu0 %v440_v27  ;;  %v8224_v27 = vld [vmem:[%s10648_s1 + $0x310] sm:$0xff]  }
  0x44   :  { %5276 = vmatmul.mubr.bf16.vlgmr.msra.gmra.mxu1 %v442_v28  ;;  %7367 = vmatpush3.bf16.msra.mxu0 %v8171_v26  ;;  %v8223_v26 = vld [vmem:[%s10648_s1 + $0x3d0] sm:$0xff]  }
  0x45   :  { %7389 = vmatpush3.bf16.msra.mxu1 %v8172_v29  ;;  %7368 = vmatprep.subr.bf16.mxu0 %v8173_v30  ;;  %v8225_v28 = vld [vmem:[%s10648_s1 + $0x390] sm:$0xff]   ;;  %v8226_v29 = vld [vmem:[%s10648_s1 + $0x348] sm:$0xff]  }
  0x46   :  { %7390 = vmatprep.subr.bf16.mxu1 %v8174_v31  ;;  %5315 = vmatprep.mubr.bf16.mxu0 %v445_v63  ;;  %v8227_v30 = vld [vmem:[%s10648_s1 + $0x3c8] sm:$0xff]   ;;  %v8250_v63 = vld [vmem:[%s10648_s1 + $0x4a0] sm:$0xff]  }
  0x47   :  { %5355 = vmatprep.mubr.bf16.mxu1 %v447_v2  ;;  %v8228_v31 = vld [vmem:[%s10648_s1 + $0x308] sm:$0xff]   ;;  %v8253_v2 = vld [vmem:[%s10648_s1 + $0x418] sm:$0xff]  }
  0x48   :  { %7369 = vmatpush3.bf16.msra.mxu0 %v8175_v32  ;;  %v25_v32 = vld [vmem:[%s10647_s0 + $0x18] sm:$0xff] }
  0x49   :  { %7391 = vmatpush3.bf16.msra.mxu1 %v8176_v33  ;;  %7370 = vmatprep.subr.bf16.mxu0 %v8177_v34  ;;  %v8229_v33 = vld [vmem:[%s10648_s1 + $0x388] sm:$0xff]   ;;  %v116_v34 = vrot.slane %v25_v32, %v8866_v41 }
  0x4a   :  { %7392 = vmatprep.subr.bf16.mxu1 %v8178_v35  ;;  %v109_v35 = vcombine.high %v25_v32, %v25_v32  ;;  %v8274_v32 = vld [vmem:[%s10648_s1 + $0x530] sm:$0xff]  }
  0x4c   :  { %7371 = vmatpush3.bf16.msra.mxu0 %v8179_v36  ;;  %v8230_v36 = vld [vmem:[%s10648_s1 + $0x340] sm:$0xff]  }
  0x4d   :  { %7393 = vmatpush3.bf16.msra.mxu1 %v8180_v37  ;;  %7372 = vmatprep.subr.bf16.mxu0 %v8181_v38  ;;  %v8231_v37 = vld [vmem:[%s10648_s1 + $0x3c0] sm:$0xff]   ;;  %v124_v38 = vcombine.high %v116_v34, %v116_v34 }
  0x4e   :  { %7394 = vmatprep.subr.bf16.mxu1 %v8182_v39  ;;  %v123_v39 = vrot.slane %v109_v35, %v8866_v41  ;;  %v8277_v35 = vld [vmem:[%s10648_s1 + $0x5e8] sm:$0xff]  }
  0x50   :  { %7373 = vmatpush3.bf16.msra.mxu0 %v8183_v40  ;;  %v8232_v40 = vld [vmem:[%s10648_s1 + $0x300] sm:$0xff]  }
  0x51   :  { %7395 = vmatpush3.bf16.msra.mxu1 %v8184_v42  ;;  %7374 = vmatprep.subr.bf16.mxu0 %v8185_v43  ;;  %v8233_v42 = vld [vmem:[%s10648_s1 + $0x380] sm:$0xff]   ;;  %v449_v43 = vpack.c.bf16 %v124_v38, %v124_v38 }
  0x52   :  { %7396 = vmatprep.subr.bf16.mxu1 %v8186_v44  ;;  %v125_v44 = vcombine.high %v123_v39, %v123_v39  ;;  %v8280_v38 = vld [vmem:[%s10648_s1 + $0x560] sm:$0xff]  }
  0x54   :  { %7375 = vmatpush3.bf16.msra.mxu0 %v8187_v45  ;;  %v8235_v45 = vld [vmem:[%s10648_s1 + $0x478] sm:$0xff]  }
  0x55   :  { %7397 = vmatpush3.bf16.msra.mxu1 %v8188_v46  ;;  %7376 = vmatprep.subr.bf16.mxu0 %v8189_v47  ;;  %v451_v46 = vpack.c.bf16 %v125_v44, %v125_v44  ;;  %v8236_v47 = vld [vmem:[%s10648_s1 + $0x4f8] sm:$0xff]  }
  0x56   :  { %7398 = vmatprep.subr.bf16.mxu1 %v8190_v48  ;;  %v8237_v48 = vld [vmem:[%s10648_s1 + $0x438] sm:$0xff]  }
  0x57   :  { %v8285_v44 = vld [vmem:[%s10648_s1 + $0x5d8] sm:$0xff]  }
  0x58   :  { %7377 = vmatpush3.bf16.msra.mxu0 %v8191_v49  ;;  %v448_v49 = vpack.c.bf16 %v116_v34, %v116_v34  ;;  %v8276_v34 = vld [vmem:[%s10648_s1 + $0x568] sm:$0xff]  }
  0x59   :  { %7399 = vmatpush3.bf16.msra.mxu1 %v8192_v50  ;;  %7378 = vmatprep.subr.bf16.mxu0 %v8193_v51  ;;  %v450_v50 = vpack.c.bf16 %v123_v39, %v123_v39  ;;  %v8238_v51 = vld [vmem:[%s10648_s1 + $0x4b8] sm:$0xff]   ;;  %v8281_v39 = vld [vmem:[%s10648_s1 + $0x5e0] sm:$0xff]  }
  0x5a   :  { %7400 = vmatprep.subr.bf16.mxu1 %v8194_v52  ;;  %v8239_v52 = vld [vmem:[%s10648_s1 + $0x470] sm:$0xff]  }
  0x5c   :  { %7379 = vmatpush3.bf16.msra.mxu0 %v8195_v54  ;;  %v8241_v54 = vld [vmem:[%s10648_s1 + $0x430] sm:$0xff]  }
  0x5d   :  { %7401 = vmatpush3.bf16.msra.mxu1 %v8196_v57  ;;  %7380 = vmatprep.subr.bf16.mxu0 %v8197_v58  ;;  %v8244_v57 = vld [vmem:[%s10648_s1 + $0x4e8] sm:$0xff]  }
  0x5e   :  { %7402 = vmatprep.subr.bf16.mxu1 %v8198_v61  ;;  %v8245_v58 = vld [vmem:[%s10648_s1 + $0x428] sm:$0xff]   ;;  %v8248_v61 = vld [vmem:[%s10648_s1 + $0x4e0] sm:$0xff]  }
  0x60   :  { %7381 = vmatpush3.bf16.msra.mxu0 %v8199_v62  ;;  %v8249_v62 = vld [vmem:[%s10648_s1 + $0x420] sm:$0xff]  }
  0x61   :  { %7403 = vmatpush3.bf16.msra.mxu1 %v8200_v1  ;;  %7410 = vmatprep.subr.bf16.mxu0 %v8202_v3  ;;  %v8252_v1 = vld [vmem:[%s10648_s1 + $0x4d8] sm:$0xff]  }
  0x62   :  { %7432 = vmatprep.subr.bf16.mxu1 %v8203_v4  ;;  %v8254_v3 = vld [vmem:[%s10648_s1 + $0x498] sm:$0xff]   ;;  %v8255_v4 = vld [vmem:[%s10648_s1 + $0x450] sm:$0xff]  }
  0x63   :  { %5316 = vmatmul.mubr.bf16.vlgmr.msra.gmra.mxu0 %v444_v6  ;;  %v8257_v6 = vld [vmem:[%s10648_s1 + $0x410] sm:$0xff]  }
  0x64   :  { %5356 = vmatmul.mubr.bf16.vlgmr.msra.gmra.mxu1 %v446_v7  ;;  %7411 = vmatpush3.bf16.msra.mxu0 %v8204_v5  ;;  %v8256_v5 = vld [vmem:[%s10648_s1 + $0x4d0] sm:$0xff]  }
  0x65   :  { %7433 = vmatpush3.bf16.msra.mxu1 %v8205_v8  ;;  %7412 = vmatprep.subr.bf16.mxu0 %v8206_v9  ;;  %v8258_v7 = vld [vmem:[%s10648_s1 + $0x490] sm:$0xff]   ;;  %v8259_v8 = vld [vmem:[%s10648_s1 + $0x448] sm:$0xff]  }
  0x66   :  { %7434 = vmatprep.subr.bf16.mxu1 %v8207_v10  ;;  %5395 = vmatprep.mubr.bf16.mxu0 %v449_v43  ;;  %v8260_v9 = vld [vmem:[%s10648_s1 + $0x4c8] sm:$0xff]   ;;  %v8284_v43 = vld [vmem:[%s10648_s1 + $0x558] sm:$0xff]  }
  0x67   :  { %5435 = vmatprep.mubr.bf16.mxu1 %v451_v46  ;;  %v8261_v10 = vld [vmem:[%s10648_s1 + $0x408] sm:$0xff]   ;;  %v8287_v46 = vld [vmem:[%s10648_s1 + $0x598] sm:$0xff]  }
  0x68   :  { %7413 = vmatpush3.bf16.msra.mxu0 %v8208_v11  ;;  %v26_v11 = vld [vmem:[%s10647_s0 + $0x20] sm:$0xff] }
  0x69   :  { %7435 = vmatpush3.bf16.msra.mxu1 %v8209_v12  ;;  %7414 = vmatprep.subr.bf16.mxu0 %v8210_v13  ;;  %v8262_v12 = vld [vmem:[%s10648_s1 + $0x488] sm:$0xff]   ;;  %v133_v13 = vrot.slane %v26_v11, %v8866_v41 }
  0x6a   :  { %7436 = vmatprep.subr.bf16.mxu1 %v8211_v14  ;;  %v126_v14 = vcombine.high %v26_v11, %v26_v11  ;;  %v8307_v11 = vld [vmem:[%s10648_s1 + $0x630] sm:$0xff]  }
  0x6c   :  { %7415 = vmatpush3.bf16.msra.mxu0 %v8212_v15  ;;  %v8263_v15 = vld [vmem:[%s10648_s1 + $0x440] sm:$0xff]  }
  0x6d   :  { %7437 = vmatpush3.bf16.msra.mxu1 %v8213_v16  ;;  %7416 = vmatprep.subr.bf16.mxu0 %v8214_v17  ;;  %v8264_v16 = vld [vmem:[%s10648_s1 + $0x4c0] sm:$0xff]   ;;  %v141_v17 = vcombine.high %v133_v13, %v133_v13 }
  0x6e   :  { %7438 = vmatprep.subr.bf16.mxu1 %v8215_v18  ;;  %v140_v18 = vrot.slane %v126_v14, %v8866_v41  ;;  %v8310_v14 = vld [vmem:[%s10648_s1 + $0x6e8] sm:$0xff]  }
  0x70   :  { %7417 = vmatpush3.bf16.msra.mxu0 %v8216_v19  ;;  %v8265_v19 = vld [vmem:[%s10648_s1 + $0x400] sm:$0xff]  }
  0x71   :  { %7439 = vmatpush3.bf16.msra.mxu1 %v8217_v20  ;;  %7418 = vmatprep.subr.bf16.mxu0 %v8218_v21  ;;  %v8266_v20 = vld [vmem:[%s10648_s1 + $0x480] sm:$0xff]   ;;  %v453_v21 = vpack.c.bf16 %v141_v17, %v141_v17 }
  0x72   :  { %7440 = vmatprep.subr.bf16.mxu1 %v8219_v22  ;;  %v142_v22 = vcombine.high %v140_v18, %v140_v18  ;;  %v8313_v17 = vld [vmem:[%s10648_s1 + $0x660] sm:$0xff]  }
  0x74   :  { %7419 = vmatpush3.bf16.msra.mxu0 %v8220_v23  ;;  %v8268_v23 = vld [vmem:[%s10648_s1 + $0x578] sm:$0xff]  }
  0x75   :  { %7441 = vmatpush3.bf16.msra.mxu1 %v8221_v24  ;;  %7420 = vmatprep.subr.bf16.mxu0 %v8222_v25  ;;  %v455_v24 = vpack.c.bf16 %v142_v22, %v142_v22  ;;  %v8269_v25 = vld [vmem:[%s10648_s1 + $0x5f8] sm:$0xff]  }
  0x76   :  { %7442 = vmatprep.subr.bf16.mxu1 %v8223_v26  ;;  %v8270_v26 = vld [vmem:[%s10648_s1 + $0x538] sm:$0xff]  }
  0x77   :  { %v8318_v22 = vld [vmem:[%s10648_s1 + $0x6d8] sm:$0xff]  }
  0x78   :  { %7421 = vmatpush3.bf16.msra.mxu0 %v8224_v27  ;;  %v452_v27 = vpack.c.bf16 %v133_v13, %v133_v13  ;;  %v8309_v13 = vld [vmem:[%s10648_s1 + $0x668] sm:$0xff]  }
  0x79   :  { %7443 = vmatpush3.bf16.msra.mxu1 %v8225_v28  ;;  %7422 = vmatprep.subr.bf16.mxu0 %v8226_v29  ;;  %v454_v28 = vpack.c.bf16 %v140_v18, %v140_v18  ;;  %v8271_v29 = vld [vmem:[%s10648_s1 + $0x5b8] sm:$0xff]   ;;  %v8314_v18 = vld [vmem:[%s10648_s1 + $0x6e0] sm:$0xff]  }
  0x7a   :  { %7444 = vmatprep.subr.bf16.mxu1 %v8227_v30  ;;  %v8272_v30 = vld [vmem:[%s10648_s1 + $0x570] sm:$0xff]  }
  0x7c   :  { %7423 = vmatpush3.bf16.msra.mxu0 %v8228_v31  ;;  %v8273_v31 = vld [vmem:[%s10648_s1 + $0x5f0] sm:$0xff]  }
  0x7d   :  { %7445 = vmatpush3.bf16.msra.mxu1 %v8229_v33  ;;  %7424 = vmatprep.subr.bf16.mxu0 %v8230_v36  ;;  %v8275_v33 = vld [vmem:[%s10648_s1 + $0x5b0] sm:$0xff]   ;;  %v8278_v36 = vld [vmem:[%s10648_s1 + $0x528] sm:$0xff]  }
  0x7e   :  { %7446 = vmatprep.subr.bf16.mxu1 %v8231_v37  ;;  %v8279_v37 = vld [vmem:[%s10648_s1 + $0x5a8] sm:$0xff]  }
  0x80   :  { %7425 = vmatpush3.bf16.msra.mxu0 %v8232_v40  ;;  %v8282_v40 = vld [vmem:[%s10648_s1 + $0x520] sm:$0xff]  }
  0x81   :  { %7447 = vmatpush3.bf16.msra.mxu1 %v8233_v42  ;;  %7454 = vmatprep.subr.bf16.mxu0 %v8235_v45  ;;  %v8283_v42 = vld [vmem:[%s10648_s1 + $0x5a0] sm:$0xff]   ;;  %v8286_v45 = vld [vmem:[%s10648_s1 + $0x518] sm:$0xff]  }
  0x82   :  { %7476 = vmatprep.subr.bf16.mxu1 %v8236_v47  ;;  %v8288_v47 = vld [vmem:[%s10648_s1 + $0x550] sm:$0xff]  }
  0x83   :  { %5396 = vmatmul.mubr.bf16.vlgmr.msra.gmra.mxu0 %v448_v49  ;;  %v8290_v49 = vld [vmem:[%s10648_s1 + $0x510] sm:$0xff]  }
  0x84   :  { %5436 = vmatmul.mubr.bf16.vlgmr.msra.gmra.mxu1 %v450_v50  ;;  %7455 = vmatpush3.bf16.msra.mxu0 %v8237_v48  ;;  %v8289_v48 = vld [vmem:[%s10648_s1 + $0x5d0] sm:$0xff]  }
  0x85   :  { %7477 = vmatpush3.bf16.msra.mxu1 %v8238_v51  ;;  %7456 = vmatprep.subr.bf16.mxu0 %v8239_v52  ;;  %v8291_v50 = vld [vmem:[%s10648_s1 + $0x590] sm:$0xff]   ;;  %v8292_v51 = vld [vmem:[%s10648_s1 + $0x548] sm:$0xff]  }
  0x86   :  { %7478 = vmatprep.subr.bf16.mxu1 %v8240_v53  ;;  %5475 = vmatprep.mubr.bf16.mxu0 %v453_v21  ;;  %v8293_v52 = vld [vmem:[%s10648_s1 + $0x5c8] sm:$0xff]   ;;  %v8317_v21 = vld [vmem:[%s10648_s1 + $0x658] sm:$0xff]  }
  0x87   :  { %5515 = vmatprep.mubr.bf16.mxu1 %v455_v24  ;;  %v8294_v53 = vld [vmem:[%s10648_s1 + $0x508] sm:$0xff]   ;;  %v8320_v24 = vld [vmem:[%s10648_s1 + $0x698] sm:$0xff]  }
  0x88   :  { %7457 = vmatpush3.bf16.msra.mxu0 %v8241_v54  ;;  %v27_v54 = vld [vmem:[%s10647_s0 + $0x28] sm:$0xff] }
  0x89   :  { %7479 = vmatpush3.bf16.msra.mxu1 %v8242_v55  ;;  %7458 = vmatprep.subr.bf16.mxu0 %v8243_v56  ;;  %v8295_v55 = vld [vmem:[%s10648_s1 + $0x588] sm:$0xff]   ;;  %v150_v56 = vrot.slane %v27_v54, %v8866_v41 }
  0x8a   :  { %7480 = vmatprep.subr.bf16.mxu1 %v8244_v57  ;;  %v143_v57 = vcombine.high %v27_v54, %v27_v54  ;;  %v8340_v54 = vld [vmem:[%s10648_s1 + $0x730] sm:$0xff]  }
  0x8c   :  { %7459 = vmatpush3.bf16.msra.mxu0 %v8245_v58  ;;  %v8296_v58 = vld [vmem:[%s10648_s1 + $0x540] sm:$0xff]  }
  0x8d   :  { %7481 = vmatpush3.bf16.msra.mxu1 %v8246_v59  ;;  %7460 = vmatprep.subr.bf16.mxu0 %v8247_v60  ;;  %v8297_v59 = vld [vmem:[%s10648_s1 + $0x5c0] sm:$0xff]   ;;  %v158_v60 = vcombine.high %v150_v56, %v150_v56 }
  0x8e   :  { %7482 = vmatprep.subr.bf16.mxu1 %v8248_v61  ;;  %v157_v61 = vrot.slane %v143_v57, %v8866_v41  ;;  %v6692_v57 = vld [vmem:[%s10649_s2] ss:$0 sm:$0xff] }
  0x90   :  { %7461 = vmatpush3.bf16.msra.mxu0 %v8249_v62  ;;  %v8298_v62 = vld [vmem:[%s10648_s1 + $0x500] sm:$0xff]  }
  0x91   :  { %7483 = vmatpush3.bf16.msra.mxu1 %v8250_v63  ;;  %7462 = vmatprep.subr.bf16.mxu0 %v8251_v0  ;;  %v8299_v63 = vld [vmem:[%s10648_s1 + $0x580] sm:$0xff]   ;;  %v457_v0 = vpack.c.bf16 %v158_v60, %v158_v60 }
  0x92   :  { %7484 = vmatprep.subr.bf16.mxu1 %v8252_v1  ;;  %v159_v1 = vcombine.high %v157_v61, %v157_v61 }
  0x94   :  { %7463 = vmatpush3.bf16.msra.mxu0 %v8253_v2  ;;  %v8301_v2 = vld [vmem:[%s10648_s1 + $0x678] sm:$0xff]  }
  0x95   :  { %7485 = vmatpush3.bf16.msra.mxu1 %v8254_v3  ;;  %7464 = vmatprep.subr.bf16.mxu0 %v8255_v4  ;;  %v459_v3 = vpack.c.bf16 %v159_v1, %v159_v1  ;;  %v8302_v4 = vld [vmem:[%s10648_s1 + $0x6f8] sm:$0xff]   ;;  %v8344_v1 = vld [vmem:[%s10648_s1 + $0x728] sm:$0xff]  }
  0x96   :  { %7486 = vmatprep.subr.bf16.mxu1 %v8256_v5  ;;  %v8303_v5 = vld [vmem:[%s10648_s1 + $0x638] sm:$0xff]  }
  0x98   :  { %7465 = vmatpush3.bf16.msra.mxu0 %v8257_v6  ;;  %v456_v6 = vpack.c.bf16 %v150_v56, %v150_v56 }
  0x99   :  { %7487 = vmatpush3.bf16.msra.mxu1 %v8258_v7  ;;  %7466 = vmatprep.subr.bf16.mxu0 %v8259_v8  ;;  %v458_v7 = vpack.c.bf16 %v157_v61, %v157_v61  ;;  %v8304_v8 = vld [vmem:[%s10648_s1 + $0x6b8] sm:$0xff]  }
  0x9a   :  { %7488 = vmatprep.subr.bf16.mxu1 %v8260_v9  ;;  %v8305_v9 = vld [vmem:[%s10648_s1 + $0x670] sm:$0xff]  }
  0x9c   :  { %7467 = vmatpush3.bf16.msra.mxu0 %v8261_v10  ;;  %v8306_v10 = vld [vmem:[%s10648_s1 + $0x6f0] sm:$0xff]  }
  0x9d   :  { %7489 = vmatpush3.bf16.msra.mxu1 %v8262_v12  ;;  %7468 = vmatprep.subr.bf16.mxu0 %v8263_v15  ;;  %v8308_v12 = vld [vmem:[%s10648_s1 + $0x6b0] sm:$0xff]   ;;  %v8311_v15 = vld [vmem:[%s10648_s1 + $0x628] sm:$0xff]  }
  0x9e   :  { %7490 = vmatprep.subr.bf16.mxu1 %v8264_v16  ;;  %v8312_v16 = vld [vmem:[%s10648_s1 + $0x6a8] sm:$0xff]  }
  0xa0   :  { %7469 = vmatpush3.bf16.msra.mxu0 %v8265_v19  ;;  %v8315_v19 = vld [vmem:[%s10648_s1 + $0x620] sm:$0xff]  }
  0xa1   :  { %7491 = vmatpush3.bf16.msra.mxu1 %v8266_v20  ;;  %7498 = vmatprep.subr.bf16.mxu0 %v8268_v23  ;;  %v8316_v20 = vld [vmem:[%s10648_s1 + $0x6a0] sm:$0xff]   ;;  %v8319_v23 = vld [vmem:[%s10648_s1 + $0x618] sm:$0xff]  }
  0xa2   :  { %7520 = vmatprep.subr.bf16.mxu1 %v8269_v25  ;;  %v8321_v25 = vld [vmem:[%s10648_s1 + $0x650] sm:$0xff]  }
  0xa3   :  { %5476 = vmatmul.mubr.bf16.vlgmr.msra.gmra.mxu0 %v452_v27  ;;  %v8323_v27 = vld [vmem:[%s10648_s1 + $0x610] sm:$0xff]  }
  0xa4   :  { %5516 = vmatmul.mubr.bf16.vlgmr.msra.gmra.mxu1 %v454_v28  ;;  %7499 = vmatpush3.bf16.msra.mxu0 %v8270_v26  ;;  %v8322_v26 = vld [vmem:[%s10648_s1 + $0x6d0] sm:$0xff]  }
  0xa5   :  { %7521 = vmatpush3.bf16.msra.mxu1 %v8271_v29  ;;  %7500 = vmatprep.subr.bf16.mxu0 %v8272_v30  ;;  %v8324_v28 = vld [vmem:[%s10648_s1 + $0x690] sm:$0xff]   ;;  %v8325_v29 = vld [vmem:[%s10648_s1 + $0x648] sm:$0xff]  }
  0xa6   :  { %7522 = vmatprep.subr.bf16.mxu1 %v8273_v31  ;;  %5555 = vmatprep.mubr.bf16.mxu0 %v457_v0  ;;  %v8326_v30 = vld [vmem:[%s10648_s1 + $0x6c8] sm:$0xff]  }
  0xa7   :  { %5595 = vmatprep.mubr.bf16.mxu1 %v459_v3  ;;  %v8327_v31 = vld [vmem:[%s10648_s1 + $0x608] sm:$0xff]  }
  0xa8   :  { %7501 = vmatpush3.bf16.msra.mxu0 %v8274_v32  ;;  %v8328_v32 = vld [vmem:[%s10648_s1 + $0x688] sm:$0xff]  }
  0xa9   :  { %7523 = vmatpush3.bf16.msra.mxu1 %v8275_v33  ;;  %7502 = vmatprep.subr.bf16.mxu0 %v8276_v34  ;;  %v28_v33 = vld [vmem:[%s10647_s0 + $0x30] sm:$0xff]  ;;  %v8329_v34 = vld [vmem:[%s10648_s1 + $0x640] sm:$0xff]  }
  0xaa   :  { %7524 = vmatprep.subr.bf16.mxu1 %v8277_v35  ;;  %v167_v35 = vrot.slane %v28_v33, %v8866_v41 }
  0xac   :  { %7503 = vmatpush3.bf16.msra.mxu0 %v8278_v36  ;;  %v160_v36 = vcombine.high %v28_v33, %v28_v33  ;;  %v8365_v33 = vld [vmem:[%s10648_s1 + $0x780] sm:$0xff]  }
  0xad   :  { %7525 = vmatpush3.bf16.msra.mxu1 %v8279_v37  ;;  %7504 = vmatprep.subr.bf16.mxu0 %v8280_v38  ;;  %v8330_v37 = vld [vmem:[%s10648_s1 + $0x6c0] sm:$0xff]   ;;  %v175_v38 = vcombine.high %v167_v35, %v167_v35 }
  0xae   :  { %7526 = vmatprep.subr.bf16.mxu1 %v8281_v39  ;;  %v174_v39 = vrot.slane %v160_v36, %v8866_v41  ;;  %v8367_v36 = vld [vmem:[%s10648_s1 + $0x878] sm:$0xff]  }
  0xb0   :  { %7505 = vmatpush3.bf16.msra.mxu0 %v8282_v40  ;;  %v8331_v40 = vld [vmem:[%s10648_s1 + $0x600] sm:$0xff]  }
  0xb1   :  { %7527 = vmatpush3.bf16.msra.mxu1 %v8283_v42  ;;  %7506 = vmatprep.subr.bf16.mxu0 %v8284_v43  ;;  %v8332_v42 = vld [vmem:[%s10648_s1 + $0x680] sm:$0xff]   ;;  %v461_v43 = vpack.c.bf16 %v175_v38, %v175_v38 }
  0xb2   :  { %7528 = vmatprep.subr.bf16.mxu1 %v8285_v44  ;;  %v176_v44 = vcombine.high %v174_v39, %v174_v39 }
  0xb4   :  { %7507 = vmatpush3.bf16.msra.mxu0 %v8286_v45  ;;  %v8334_v45 = vld [vmem:[%s10648_s1 + $0x778] sm:$0xff]  }
  0xb5   :  { %7529 = vmatpush3.bf16.msra.mxu1 %v8287_v46  ;;  %7508 = vmatprep.subr.bf16.mxu0 %v8288_v47  ;;  %v8335_v46 = vld [vmem:[%s10648_s1 + $0x7f8] sm:$0xff]   ;;  %v463_v47 = vpack.c.bf16 %v176_v44, %v176_v44  ;;  %v8371_v44 = vld [vmem:[%s10648_s1 + $0x870] sm:$0xff]  }
  0xb6   :  { %7530 = vmatprep.subr.bf16.mxu1 %v8289_v48  ;;  %v8336_v48 = vld [vmem:[%s10648_s1 + $0x738] sm:$0xff]  }
  0xb8   :  { %7509 = vmatpush3.bf16.msra.mxu0 %v8290_v49  ;;  %v460_v49 = vpack.c.bf16 %v167_v35, %v167_v35 }
  0xb9   :  { %7531 = vmatpush3.bf16.msra.mxu1 %v8291_v50  ;;  %7510 = vmatprep.subr.bf16.mxu0 %v8292_v51  ;;  %v462_v50 = vpack.c.bf16 %v174_v39, %v174_v39  ;;  %v8337_v51 = vld [vmem:[%s10648_s1 + $0x7b8] sm:$0xff]  }
  0xba   :  { %7532 = vmatprep.subr.bf16.mxu1 %v8293_v52  ;;  %v8338_v52 = vld [vmem:[%s10648_s1 + $0x770] sm:$0xff]   ;;  %v8369_v39 = vld [vmem:[%s10648_s1 + $0x838] sm:$0xff]  }
  0xbc   :  { %7511 = vmatpush3.bf16.msra.mxu0 %v8294_v53  ;;  %v8339_v53 = vld [vmem:[%s10648_s1 + $0x7f0] sm:$0xff]  }
  0xbd   :  { %7533 = vmatpush3.bf16.msra.mxu1 %v8295_v55  ;;  %7512 = vmatprep.subr.bf16.mxu0 %v8296_v58  ;;  %v8341_v58 = vld [vmem:[%s10648_s1 + $0x7b0] sm:$0xff]  }
  0xbe   :  { %7534 = vmatprep.subr.bf16.mxu1 %v8297_v59  ;;  %v8342_v59 = vld [vmem:[%s10648_s1 + $0x768] sm:$0xff]  }
  0xc0   :  { %7513 = vmatpush3.bf16.msra.mxu0 %v8298_v62  ;;  %v8343_v62 = vld [vmem:[%s10648_s1 + $0x7e8] sm:$0xff]  }
  0xc1   :  { %7535 = vmatpush3.bf16.msra.mxu1 %v8299_v63  ;;  %7542 = vmatprep.subr.bf16.mxu0 %v8301_v2 }
  0xc2   :  { %7564 = vmatprep.subr.bf16.mxu1 %v8302_v4  ;;  %v8345_v4 = vld [vmem:[%s10648_s1 + $0x7a8] sm:$0xff]  }
  0xc3   :  { %5556 = vmatmul.mubr.bf16.vlgmr.msra.gmra.mxu0 %v456_v6  ;;  %v8346_v6 = vld [vmem:[%s10648_s1 + $0x760] sm:$0xff]  }
  0xc4   :  { %5596 = vmatmul.mubr.bf16.vlgmr.msra.gmra.mxu1 %v458_v7  ;;  %7543 = vmatpush3.bf16.msra.mxu0 %v8303_v5 }
  0xc5   :  { %7565 = vmatpush3.bf16.msra.mxu1 %v8304_v8  ;;  %7544 = vmatprep.subr.bf16.mxu0 %v8305_v9  ;;  %v8347_v9 = vld [vmem:[%s10648_s1 + $0x7e0] sm:$0xff]  }
  0xc6   :  { %7566 = vmatprep.subr.bf16.mxu1 %v8306_v10  ;;  %5635 = vmatprep.mubr.bf16.mxu0 %v461_v43  ;;  %v8370_v43 = vld [vmem:[%s10648_s1 + $0x8b8] sm:$0xff]  }
  0xc7   :  { %5675 = vmatprep.mubr.bf16.mxu1 %v463_v47 }
  0xc8   :  { %7545 = vmatpush3.bf16.msra.mxu0 %v8307_v11  ;;  %v8348_v11 = vld [vmem:[%s10648_s1 + $0x720] sm:$0xff]  }
  0xc9   :  { %7567 = vmatpush3.bf16.msra.mxu1 %v8308_v12  ;;  %7546 = vmatprep.subr.bf16.mxu0 %v8309_v13  ;;  %v8349_v12 = vld [vmem:[%s10648_s1 + $0x7a0] sm:$0xff]   ;;  %v8350_v13 = vld [vmem:[%s10648_s1 + $0x758] sm:$0xff]  }
  0xca   :  { %7568 = vmatprep.subr.bf16.mxu1 %v8310_v14  ;;  %v8351_v14 = vld [vmem:[%s10648_s1 + $0x7d8] sm:$0xff]  }
  0xcc   :  { %7547 = vmatpush3.bf16.msra.mxu0 %v8311_v15  ;;  %v8352_v15 = vld [vmem:[%s10648_s1 + $0x718] sm:$0xff]  }
  0xcd   :  { %7569 = vmatpush3.bf16.msra.mxu1 %v8312_v16  ;;  %7548 = vmatprep.subr.bf16.mxu0 %v8313_v17  ;;  %v8353_v16 = vld [vmem:[%s10648_s1 + $0x798] sm:$0xff]   ;;  %v8354_v17 = vld [vmem:[%s10648_s1 + $0x750] sm:$0xff]  }
  0xce   :  { %7570 = vmatprep.subr.bf16.mxu1 %v8314_v18  ;;  %v8355_v18 = vld [vmem:[%s10648_s1 + $0x7d0] sm:$0xff]  }
  0xd0   :  { %7549 = vmatpush3.bf16.msra.mxu0 %v8315_v19  ;;  %v8356_v19 = vld [vmem:[%s10648_s1 + $0x710] sm:$0xff]  }
  0xd1   :  { %7571 = vmatpush3.bf16.msra.mxu1 %v8316_v20  ;;  %7550 = vmatprep.subr.bf16.mxu0 %v8317_v21  ;;  %v8357_v20 = vld [vmem:[%s10648_s1 + $0x790] sm:$0xff]   ;;  %v8358_v21 = vld [vmem:[%s10648_s1 + $0x748] sm:$0xff]  }
  0xd2   :  { %7572 = vmatprep.subr.bf16.mxu1 %v8318_v22  ;;  %v8359_v22 = vld [vmem:[%s10648_s1 + $0x7c8] sm:$0xff]  }
  0xd4   :  { %7551 = vmatpush3.bf16.msra.mxu0 %v8319_v23  ;;  %v8360_v23 = vld [vmem:[%s10648_s1 + $0x708] sm:$0xff]  }
  0xd5   :  { %7573 = vmatpush3.bf16.msra.mxu1 %v8320_v24  ;;  %7552 = vmatprep.subr.bf16.mxu0 %v8321_v25  ;;  %v8361_v24 = vld [vmem:[%s10648_s1 + $0x788] sm:$0xff]   ;;  %v29_v25 = vld [vmem:[%s10647_s0 + $0x38] sm:$0xff] }
  0xd6   :  { %7574 = vmatprep.subr.bf16.mxu1 %v8322_v26  ;;  %v8362_v26 = vld [vmem:[%s10648_s1 + $0x740] sm:$0xff]  }
  0xd8   :  { %7553 = vmatpush3.bf16.msra.mxu0 %v8323_v27  ;;  %v184_v27 = vrot.slane %v29_v25, %v8866_v41 }
  0xd9   :  { %7575 = vmatpush3.bf16.msra.mxu1 %v8324_v28  ;;  %7554 = vmatprep.subr.bf16.mxu0 %v8325_v29  ;;  %v177_v28 = vcombine.high %v29_v25, %v29_v25  ;;  %v8363_v29 = vld [vmem:[%s10648_s1 + $0x7c0] sm:$0xff]   ;;  %v8400_v25 = vld [vmem:[%s10648_s1 + $0x978] sm:$0xff]  }
  0xda   :  { %7576 = vmatprep.subr.bf16.mxu1 %v8326_v30  ;;  %v8364_v30 = vld [vmem:[%s10648_s1 + $0x700] sm:$0xff]  }
  0xdc   :  { %7555 = vmatpush3.bf16.msra.mxu0 %v8327_v31  ;;  %v192_v31 = vcombine.high %v184_v27, %v184_v27 }
  0xdd   :  { %7577 = vmatpush3.bf16.msra.mxu1 %v8328_v32  ;;  %7556 = vmatprep.subr.bf16.mxu0 %v8329_v34  ;;  %v191_v32 = vrot.slane %v177_v28, %v8866_v41  ;;  %v8401_v28 = vld [vmem:[%s10648_s1 + $0x9f8] sm:$0xff]  }
  0xde   :  { %7578 = vmatprep.subr.bf16.mxu1 %v8330_v37  ;;  %v465_v34 = vpack.c.bf16 %v192_v31, %v192_v31  ;;  %v8368_v37 = vld [vmem:[%s10648_s1 + $0x8f8] sm:$0xff]  }
  0xdf   :  { %v193_v35 = vcombine.high %v191_v32, %v191_v32 }
  0xe0   :  { %7557 = vmatpush3.bf16.msra.mxu0 %v8331_v40  ;;  %v464_v40 = vpack.c.bf16 %v184_v27, %v184_v27 }
  0xe1   :  { %7579 = vmatpush3.bf16.msra.mxu1 %v8332_v42  ;;  %7586 = vmatprep.subr.bf16.mxu0 %v8334_v45  ;;  %v467_v38 = vpack.c.bf16 %v193_v35, %v193_v35  ;;  %v466_v42 = vpack.c.bf16 %v191_v32, %v191_v32  ;;  %v8372_v45 = vld [vmem:[%s10648_s1 + $0x8f0] sm:$0xff]  }
  0xe2   :  { %7608 = vmatprep.subr.bf16.mxu1 %v8335_v46  ;;  %v8373_v46 = vld [vmem:[%s10648_s1 + $0x830] sm:$0xff]  }
  0xe3   :  { %v7294_v55 = vpop.f32.mrf.mxu0  ;;  %5636 = vmatmul.mubr.bf16.vlgmr.msra.gmra.mxu0 %v460_v49  ;;  %v8374_v49 = vld [vmem:[%s10648_s1 + $0x8b0] sm:$0xff]  }
  0xe4   :  { %v7316_v56 = vpop.f32.mrf.mxu1  ;;  %5676 = vmatmul.mubr.bf16.vlgmr.msra.gmra.mxu1 %v462_v50  ;;  %7587 = vmatpush3.bf16.msra.mxu0 %v8336_v48  ;;  %v8375_v50 = vld [vmem:[%s10648_s1 + $0x868] sm:$0xff]   ;;  %v8405_v35 = vld [vmem:[%s10648_s1 + $0x9f0] sm:$0xff]  }
  0xe5   :  { %7609 = vmatpush3.bf16.msra.mxu1 %v8337_v51  ;;  %v7295_v60 = vpop.f32.mrf.mxu0  ;;  %7588 = vmatprep.subr.bf16.mxu0 %v8338_v52 }
  0xe6   :  { %v7317_v61 = vpop.f32.mrf.mxu1  ;;  %7610 = vmatprep.subr.bf16.mxu1 %v8339_v53  ;;  %v7296_v63 = vadd.f32 %v7295_v60, %v7294_v55  ;;  %5715 = vmatprep.mubr.bf16.mxu0 %v465_v34  ;;  %v8376_v53 = vld [vmem:[%s10648_s1 + $0x8e8] sm:$0xff]   ;;  %v8404_v34 = vld [vmem:[%s10648_s1 + $0x970] sm:$0xff]  }
  0xe7   :  { %v7318_v0 = vadd.f32 %v7317_v61, %v7316_v56  ;;  %v7297_v2 = vpop.f32.mrf.mxu0  ;;  %5755 = vmatprep.mubr.bf16.mxu1 %v467_v38  ;;  %v8377_v56 = vld [vmem:[%s10648_s1 + $0x828] sm:$0xff]   ;;  %v8379_v61 = vld [vmem:[%s10648_s1 + $0x860] sm:$0xff]  }
  0xe8   :  { %v7319_v3 = vpop.f32.mrf.mxu1  ;;  %v5158_v5 = vadd.f32 %v7296_v63, %v6692_v57  ;;  %7589 = vmatpush3.bf16.msra.mxu0 %v8340_v54  ;;  %v8381_v2 = vld [vmem:[%s10648_s1 + $0x820] sm:$0xff]  }
  0xe9   :  { %7611 = vmatpush3.bf16.msra.mxu1 %v8341_v58  ;;  %v7298_v7 = vpop.f32.mrf.mxu0  ;;  %7590 = vmatprep.subr.bf16.mxu0 %v8342_v59  ;;  %v8378_v59 = vld [vmem:[%s10648_s1 + $0x8a8] sm:$0xff]   ;;  %v8382_v3 = vld [vmem:[%s10648_s1 + $0x8a0] sm:$0xff]  }
  0xea   :  { %v7320_v8 = vpop.f32.mrf.mxu1  ;;  %7612 = vmatprep.subr.bf16.mxu1 %v8343_v62  ;;  %v9515_v10 = vadd.f32 %v7318_v0, %v5158_v5  ;;  %v8380_v0 = vld [vmem:[%s10648_s1 + $0x8e0] sm:$0xff]   ;;  %v8384_v5 = vld [vmem:[%s10648_s1 + $0x8d8] sm:$0xff]  }
  0xeb   :  { %v8386_v7 = vld [vmem:[%s10648_s1 + $0x898] sm:$0xff]   ;;  %v8387_v8 = vld [vmem:[%s10648_s1 + $0x850] sm:$0xff]  }
  0xec   :  { %7591 = vmatpush3.bf16.msra.mxu0 %v8344_v1 }
  0xed   :  { %7613 = vmatpush3.bf16.msra.mxu1 %v8345_v4  ;;  %7592 = vmatprep.subr.bf16.mxu0 %v8346_v6  ;;  %v8383_v4 = vld [vmem:[%s10648_s1 + $0x858] sm:$0xff]  }
  0xee   :  { %7614 = vmatprep.subr.bf16.mxu1 %v8347_v9  ;;  %v8385_v6 = vld [vmem:[%s10648_s1 + $0x818] sm:$0xff]   ;;  %v8388_v9 = vld [vmem:[%s10648_s1 + $0x8d0] sm:$0xff]  }
  0xf0   :  { %7593 = vmatpush3.bf16.msra.mxu0 %v8348_v11  ;;  %v8390_v11 = vld [vmem:[%s10648_s1 + $0x890] sm:$0xff]  }
  0xf1   :  { %7615 = vmatpush3.bf16.msra.mxu1 %v8349_v12  ;;  %7594 = vmatprep.subr.bf16.mxu0 %v8350_v13  ;;  %v8391_v12 = vld [vmem:[%s10648_s1 + $0x848] sm:$0xff]  }
  0xf2   :  { %7616 = vmatprep.subr.bf16.mxu1 %v8351_v14  ;;  %v8392_v13 = vld [vmem:[%s10648_s1 + $0x8c8] sm:$0xff]  }
  0xf3   :  { %v8393_v14 = vld [vmem:[%s10648_s1 + $0x808] sm:$0xff]  }
  0xf4   :  { %7595 = vmatpush3.bf16.msra.mxu0 %v8352_v15  ;;  %v8394_v15 = vld [vmem:[%s10648_s1 + $0x888] sm:$0xff]  }
  0xf5   :  { %7617 = vmatpush3.bf16.msra.mxu1 %v8353_v16  ;;  %7596 = vmatprep.subr.bf16.mxu0 %v8354_v17  ;;  %v8395_v16 = vld [vmem:[%s10648_s1 + $0x840] sm:$0xff]  }
  0xf6   :  { %7618 = vmatprep.subr.bf16.mxu1 %v8355_v18  ;;  %v30_v17 = vld [vmem:[%s10647_s0 + $0x40] sm:$0xff] }
  0xf7   :  { %v8396_v18 = vld [vmem:[%s10648_s1 + $0x8c0] sm:$0xff]  }
  0xf8   :  { %7597 = vmatpush3.bf16.msra.mxu0 %v8356_v19  ;;  %v201_v19 = vrot.slane %v30_v17, %v8866_v41 }
  0xf9   :  { %7619 = vmatpush3.bf16.msra.mxu1 %v8357_v20  ;;  %7598 = vmatprep.subr.bf16.mxu0 %v8358_v21  ;;  %v194_v20 = vcombine.high %v30_v17, %v30_v17  ;;  %v8397_v21 = vld [vmem:[%s10648_s1 + $0x800] sm:$0xff]  }
  0xfa   :  { %7620 = vmatprep.subr.bf16.mxu1 %v8359_v22  ;;  %v8398_v22 = vld [vmem:[%s10648_s1 + $0x880] sm:$0xff]   ;;  %v468_v31 = vpack.c.bf16 %v201_v19, %v201_v19 }
  0xfc   :  { %7599 = vmatpush3.bf16.msra.mxu0 %v8360_v23  ;;  %v209_v23 = vcombine.high %v201_v19, %v201_v19  ;;  %v8434_v19 = vld [vmem:[%s10648_s1 + $0xaf8] sm:$0xff]  }
  0xfd   :  { %7621 = vmatpush3.bf16.msra.mxu1 %v8361_v24  ;;  %7600 = vmatprep.subr.bf16.mxu0 %v8362_v26  ;;  %v208_v24 = vrot.slane %v194_v20, %v8866_v41  ;;  %v8435_v20 = vld [vmem:[%s10648_s1 + $0xa38] sm:$0xff]  }
  0xfe   :  { %7622 = vmatprep.subr.bf16.mxu1 %v8363_v29  ;;  %v469_v26 = vpack.c.bf16 %v209_v23, %v209_v23  ;;  %v8402_v29 = vld [vmem:[%s10648_s1 + $0x938] sm:$0xff]  }
  0xff   :  { %v210_v27 = vcombine.high %v208_v24, %v208_v24  ;;  %v470_v32 = vpack.c.bf16 %v208_v24, %v208_v24  ;;  %v8436_v24 = vld [vmem:[%s10648_s1 + $0xab8] sm:$0xff]  }
 0x100   :  { %7601 = vmatpush3.bf16.msra.mxu0 %v8364_v30 }
 0x101   :  { %7623 = vmatpush3.bf16.msra.mxu1 %v8365_v33  ;;  %7630 = vmatprep.subr.bf16.mxu0 %v8367_v36  ;;  %v471_v30 = vpack.c.bf16 %v210_v27, %v210_v27  ;;  %v8403_v33 = vld [vmem:[%s10648_s1 + $0x9b8] sm:$0xff]   ;;  %v8406_v36 = vld [vmem:[%s10648_s1 + $0x930] sm:$0xff]  }
 0x102   :  { %7652 = vmatprep.subr.bf16.mxu1 %v8368_v37  ;;  %v8439_v27 = vld [vmem:[%s10648_s1 + $0xa30] sm:$0xff]  }
 0x103   :  { %v7338_v47 = vpop.f32.mrf.mxu0  ;;  %5716 = vmatmul.mubr.bf16.vlgmr.msra.gmra.mxu0 %v464_v40  ;;  %v8408_v40 = vld [vmem:[%s10648_s1 + $0x968] sm:$0xff]  }
 0x104   :  { %v7360_v48 = vpop.f32.mrf.mxu1  ;;  %5756 = vmatmul.mubr.bf16.vlgmr.msra.gmra.mxu1 %v466_v42  ;;  %7631 = vmatpush3.bf16.msra.mxu0 %v8369_v39  ;;  %v8407_v39 = vld [vmem:[%s10648_s1 + $0x9b0] sm:$0xff]  }
 0x105   :  { %7653 = vmatpush3.bf16.msra.mxu1 %v8370_v43  ;;  %v7339_v51 = vpop.f32.mrf.mxu0  ;;  %7632 = vmatprep.subr.bf16.mxu0 %v8371_v44  ;;  %v8409_v44 = vld [vmem:[%s10648_s1 + $0x9e8] sm:$0xff]  }
 0x106   :  { %v7361_v52 = vpop.f32.mrf.mxu1  ;;  %7654 = vmatprep.subr.bf16.mxu1 %v8372_v45  ;;  %v7340_v54 = vadd.f32 %v7339_v51, %v7338_v47  ;;  %5795 = vmatprep.mubr.bf16.mxu0 %v469_v26  ;;  %v8410_v47 = vld [vmem:[%s10648_s1 + $0x928] sm:$0xff]   ;;  %v8438_v26 = vld [vmem:[%s10648_s1 + $0xaf0] sm:$0xff]  }
 0x107   :  { %v7362_v55 = vadd.f32 %v7361_v52, %v7360_v48  ;;  %v7341_v57 = vpop.f32.mrf.mxu0  ;;  %5835 = vmatprep.mubr.bf16.mxu1 %v471_v30  ;;  %v8412_v52 = vld [vmem:[%s10648_s1 + $0x960] sm:$0xff]   ;;  %v8440_v30 = vld [vmem:[%s10648_s1 + $0xab0] sm:$0xff]  }
 0x108   :  { %v7363_v58 = vpop.f32.mrf.mxu1  ;;  %v5238_v60 = vadd.f32 %v7340_v54, %v9515_v10  ;;  %7633 = vmatpush3.bf16.msra.mxu0 %v8373_v46  ;;  %v8389_v10 = vld [vmem:[%s10648_s1 + $0x810] sm:$0xff]   ;;  %v8414_v57 = vld [vmem:[%s10648_s1 + $0x920] sm:$0xff]  }
 0x109   :  { %7655 = vmatpush3.bf16.msra.mxu1 %v8374_v49  ;;  %v7342_v62 = vpop.f32.mrf.mxu0  ;;  %7634 = vmatprep.subr.bf16.mxu0 %v8375_v50  ;;  %v8411_v50 = vld [vmem:[%s10648_s1 + $0x9a8] sm:$0xff]   ;;  %v8415_v58 = vld [vmem:[%s10648_s1 + $0x9a0] sm:$0xff]  }
 0x10a   :  { %v7364_v63 = vpop.f32.mrf.mxu1  ;;  %7656 = vmatprep.subr.bf16.mxu1 %v8376_v53  ;;  %v9619_v1 = vadd.f32 %v7362_v55, %v5238_v60  ;;  %v8413_v55 = vld [vmem:[%s10648_s1 + $0x9e0] sm:$0xff]   ;;  %v8417_v60 = vld [vmem:[%s10648_s1 + $0x9d8] sm:$0xff]  }
 0x10b   :  { %v8419_v62 = vld [vmem:[%s10648_s1 + $0x998] sm:$0xff]   ;;  %v8420_v63 = vld [vmem:[%s10648_s1 + $0x950] sm:$0xff]  }
 0x10c   :  { %7635 = vmatpush3.bf16.msra.mxu0 %v8377_v56 }
 0x10d   :  { %7657 = vmatpush3.bf16.msra.mxu1 %v8378_v59  ;;  %7636 = vmatprep.subr.bf16.mxu0 %v8379_v61  ;;  %v8416_v59 = vld [vmem:[%s10648_s1 + $0x958] sm:$0xff]  }
 0x10e   :  { %7658 = vmatprep.subr.bf16.mxu1 %v8380_v0  ;;  %v8418_v61 = vld [vmem:[%s10648_s1 + $0x918] sm:$0xff]   ;;  %v8421_v0 = vld [vmem:[%s10648_s1 + $0x9d0] sm:$0xff]  }
 0x110   :  { %7637 = vmatpush3.bf16.msra.mxu0 %v8381_v2  ;;  %v8423_v2 = vld [vmem:[%s10648_s1 + $0x990] sm:$0xff]  }
 0x111   :  { %7659 = vmatpush3.bf16.msra.mxu1 %v8382_v3  ;;  %7638 = vmatprep.subr.bf16.mxu0 %v8383_v4  ;;  %v8424_v3 = vld [vmem:[%s10648_s1 + $0x948] sm:$0xff]  }
 0x112   :  { %7660 = vmatprep.subr.bf16.mxu1 %v8384_v5  ;;  %v8425_v4 = vld [vmem:[%s10648_s1 + $0x9c8] sm:$0xff]  }
 0x113   :  { %v8426_v5 = vld [vmem:[%s10648_s1 + $0x908] sm:$0xff]  }
 0x114   :  { %7639 = vmatpush3.bf16.msra.mxu0 %v8385_v6  ;;  %v8427_v6 = vld [vmem:[%s10648_s1 + $0x988] sm:$0xff]  }
 0x115   :  { %7661 = vmatpush3.bf16.msra.mxu1 %v8386_v7  ;;  %7640 = vmatprep.subr.bf16.mxu0 %v8387_v8  ;;  %v8428_v7 = vld [vmem:[%s10648_s1 + $0x940] sm:$0xff]   ;;  %v31_v8 = vld [vmem:[%s10647_s0 + $0x48] sm:$0xff] }
 0x116   :  { %7662 = vmatprep.subr.bf16.mxu1 %v8388_v9  ;;  %v8429_v9 = vld [vmem:[%s10648_s1 + $0x9c0] sm:$0xff]  }
 0x118   :  { %7641 = vmatpush3.bf16.msra.mxu0 %v8389_v10  ;;  %v218_v10 = vrot.slane %v31_v8, %v8866_v41 }
 0x119   :  { %7663 = vmatpush3.bf16.msra.mxu1 %v8390_v11  ;;  %7642 = vmatprep.subr.bf16.mxu0 %v8391_v12  ;;  %v211_v11 = vcombine.high %v31_v8, %v31_v8  ;;  %v8430_v12 = vld [vmem:[%s10648_s1 + $0x900] sm:$0xff]  }
 0x11a   :  { %7664 = vmatprep.subr.bf16.mxu1 %v8392_v13  ;;  %v8431_v13 = vld [vmem:[%s10648_s1 + $0x980] sm:$0xff]  }
 0x11c   :  { %7643 = vmatpush3.bf16.msra.mxu0 %v8393_v14  ;;  %v226_v14 = vcombine.high %v218_v10, %v218_v10 }
 0x11d   :  { %7665 = vmatpush3.bf16.msra.mxu1 %v8394_v15  ;;  %7644 = vmatprep.subr.bf16.mxu0 %v8395_v16  ;;  %v225_v15 = vrot.slane %v211_v11, %v8866_v41  ;;  %v8433_v16 = vld [vmem:[%s10648_s1 + $0xa78] sm:$0xff]  }
 0x11e   :  { %7666 = vmatprep.subr.bf16.mxu1 %v8396_v18  ;;  %v473_v17 = vpack.c.bf16 %v226_v14, %v226_v14  ;;  %v8468_v11 = vld [vmem:[%s10648_s1 + $0xb38] sm:$0xff]  }
 0x11f   :  { %v227_v18 = vcombine.high %v225_v15, %v225_v15  ;;  %v474_v23 = vpack.c.bf16 %v225_v15, %v225_v15  ;;  %v8469_v15 = vld [vmem:[%s10648_s1 + $0xbb8] sm:$0xff]  }
 0x120   :  { %7645 = vmatpush3.bf16.msra.mxu0 %v8397_v21 }
 0x121   :  { %7667 = vmatpush3.bf16.msra.mxu1 %v8398_v22  ;;  %7674 = vmatprep.subr.bf16.mxu0 %v8400_v25  ;;  %v475_v21 = vpack.c.bf16 %v227_v18, %v227_v18  ;;  %v472_v22 = vpack.c.bf16 %v218_v10, %v218_v10  ;;  %v8437_v25 = vld [vmem:[%s10648_s1 + $0xa70] sm:$0xff]   ;;  %v8467_v10 = vld [vmem:[%s10648_s1 + $0xbf8] sm:$0xff]  }
 0x122   :  { %7696 = vmatprep.subr.bf16.mxu1 %v8401_v28  ;;  %v8472_v18 = vld [vmem:[%s10648_s1 + $0xb30] sm:$0xff]  }
 0x123   :  { %v7382_v37 = vpop.f32.mrf.mxu0  ;;  %5796 = vmatmul.mubr.bf16.vlgmr.msra.gmra.mxu0 %v468_v31  ;;  %v8441_v31 = vld [vmem:[%s10648_s1 + $0xa68] sm:$0xff]  }
 0x124   :  { %v7404_v38 = vpop.f32.mrf.mxu1  ;;  %5836 = vmatmul.mubr.bf16.vlgmr.msra.gmra.mxu1 %v470_v32  ;;  %7675 = vmatpush3.bf16.msra.mxu0 %v8402_v29 }
 0x125   :  { %7697 = vmatpush3.bf16.msra.mxu1 %v8403_v33  ;;  %v7383_v42 = vpop.f32.mrf.mxu0  ;;  %7676 = vmatprep.subr.bf16.mxu0 %v8404_v34  ;;  %v8442_v34 = vld [vmem:[%s10648_s1 + $0xae8] sm:$0xff]  }
 0x126   :  { %v7405_v43 = vpop.f32.mrf.mxu1  ;;  %7698 = vmatprep.subr.bf16.mxu1 %v8405_v35  ;;  %v7384_v45 = vadd.f32 %v7383_v42, %v7382_v37  ;;  %5875 = vmatprep.mubr.bf16.mxu0 %v473_v17  ;;  %v8443_v37 = vld [vmem:[%s10648_s1 + $0xa28] sm:$0xff]   ;;  %v8471_v17 = vld [vmem:[%s10648_s1 + $0xbf0] sm:$0xff]  }
 0x127   :  { %v7406_v46 = vadd.f32 %v7405_v43, %v7404_v38  ;;  %v7385_v48 = vpop.f32.mrf.mxu0  ;;  %5915 = vmatprep.mubr.bf16.mxu1 %v475_v21  ;;  %v8445_v43 = vld [vmem:[%s10648_s1 + $0xa60] sm:$0xff]   ;;  %v8473_v21 = vld [vmem:[%s10648_s1 + $0xbb0] sm:$0xff]  }
 0x128   :  { %v7407_v49 = vpop.f32.mrf.mxu1  ;;  %v5318_v51 = vadd.f32 %v7384_v45, %v9619_v1  ;;  %7677 = vmatpush3.bf16.msra.mxu0 %v8406_v36  ;;  %v8422_v1 = vld [vmem:[%s10648_s1 + $0x910] sm:$0xff]   ;;  %v8447_v48 = vld [vmem:[%s10648_s1 + $0xa20] sm:$0xff]  }
 0x129   :  { %7699 = vmatpush3.bf16.msra.mxu1 %v8407_v39  ;;  %v7386_v53 = vpop.f32.mrf.mxu0  ;;  %7678 = vmatprep.subr.bf16.mxu0 %v8408_v40  ;;  %v8444_v40 = vld [vmem:[%s10648_s1 + $0xaa8] sm:$0xff]   ;;  %v8448_v49 = vld [vmem:[%s10648_s1 + $0xaa0] sm:$0xff]  }
 0x12a   :  { %v7408_v54 = vpop.f32.mrf.mxu1  ;;  %7700 = vmatprep.subr.bf16.mxu1 %v8409_v44  ;;  %v9723_v56 = vadd.f32 %v7406_v46, %v5318_v51  ;;  %v8446_v46 = vld [vmem:[%s10648_s1 + $0xae0] sm:$0xff]   ;;  %v8450_v51 = vld [vmem:[%s10648_s1 + $0xad8] sm:$0xff]  }
 0x12b   :  { %v8452_v53 = vld [vmem:[%s10648_s1 + $0xa98] sm:$0xff]   ;;  %v8453_v54 = vld [vmem:[%s10648_s1 + $0xa50] sm:$0xff]  }
 0x12c   :  { %7679 = vmatpush3.bf16.msra.mxu0 %v8410_v47 }
 0x12d   :  { %7701 = vmatpush3.bf16.msra.mxu1 %v8411_v50  ;;  %7680 = vmatprep.subr.bf16.mxu0 %v8412_v52  ;;  %v8449_v50 = vld [vmem:[%s10648_s1 + $0xa58] sm:$0xff]  }
 0x12e   :  { %7702 = vmatprep.subr.bf16.mxu1 %v8413_v55  ;;  %v8451_v52 = vld [vmem:[%s10648_s1 + $0xa18] sm:$0xff]   ;;  %v8454_v55 = vld [vmem:[%s10648_s1 + $0xad0] sm:$0xff]  }
 0x130   :  { %7681 = vmatpush3.bf16.msra.mxu0 %v8414_v57  ;;  %v8456_v57 = vld [vmem:[%s10648_s1 + $0xa90] sm:$0xff]  }
 0x131   :  { %7703 = vmatpush3.bf16.msra.mxu1 %v8415_v58  ;;  %7682 = vmatprep.subr.bf16.mxu0 %v8416_v59  ;;  %v8457_v58 = vld [vmem:[%s10648_s1 + $0xa48] sm:$0xff]  }
 0x132   :  { %7704 = vmatprep.subr.bf16.mxu1 %v8417_v60  ;;  %v8458_v59 = vld [vmem:[%s10648_s1 + $0xac8] sm:$0xff]  }
 0x133   :  { %v8459_v60 = vld [vmem:[%s10648_s1 + $0xa08] sm:$0xff]  }
 0x134   :  { %7683 = vmatpush3.bf16.msra.mxu0 %v8418_v61  ;;  %v8460_v61 = vld [vmem:[%s10648_s1 + $0xa88] sm:$0xff]  }
 0x135   :  { %7705 = vmatpush3.bf16.msra.mxu1 %v8419_v62  ;;  %7684 = vmatprep.subr.bf16.mxu0 %v8420_v63  ;;  %v8461_v62 = vld [vmem:[%s10648_s1 + $0xa40] sm:$0xff]   ;;  %v32_v63 = vld [vmem:[%s10647_s0 + $0x50] sm:$0xff] }
 0x136   :  { %7706 = vmatprep.subr.bf16.mxu1 %v8421_v0  ;;  %v8462_v0 = vld [vmem:[%s10648_s1 + $0xac0] sm:$0xff]  }
 0x138   :  { %7685 = vmatpush3.bf16.msra.mxu0 %v8422_v1  ;;  %v235_v1 = vrot.slane %v32_v63, %v8866_v41 }
 0x139   :  { %7707 = vmatpush3.bf16.msra.mxu1 %v8423_v2  ;;  %7686 = vmatprep.subr.bf16.mxu0 %v8424_v3  ;;  %v228_v2 = vcombine.high %v32_v63, %v32_v63  ;;  %v8463_v3 = vld [vmem:[%s10648_s1 + $0xa00] sm:$0xff]   ;;  %v8500_v63 = vld [vmem:[%s10648_s1 + $0xcf8] sm:$0xff]  }
 0x13a   :  { %7708 = vmatprep.subr.bf16.mxu1 %v8425_v4  ;;  %v8464_v4 = vld [vmem:[%s10648_s1 + $0xa80] sm:$0xff]  }
 0x13c   :  { %7687 = vmatpush3.bf16.msra.mxu0 %v8426_v5  ;;  %v243_v5 = vcombine.high %v235_v1, %v235_v1 }
 0x13d   :  { %7709 = vmatpush3.bf16.msra.mxu1 %v8427_v6  ;;  %7688 = vmatprep.subr.bf16.mxu0 %v8428_v7  ;;  %v242_v6 = vrot.slane %v228_v2, %v8866_v41  ;;  %v8466_v7 = vld [vmem:[%s10648_s1 + $0xb78] sm:$0xff]  }
 0x13e   :  { %7710 = vmatprep.subr.bf16.mxu1 %v8429_v9  ;;  %v477_v8 = vpack.c.bf16 %v243_v5, %v243_v5  ;;  %v8501_v2 = vld [vmem:[%s10648_s1 + $0xc38] sm:$0xff]  }
 0x13f   :  { %v244_v9 = vcombine.high %v242_v6, %v242_v6  ;;  %v478_v14 = vpack.c.bf16 %v242_v6, %v242_v6  ;;  %v8502_v5 = vld [vmem:[%s10648_s1 + $0xcb8] sm:$0xff]  }
 0x140   :  { %7689 = vmatpush3.bf16.msra.mxu0 %v8430_v12 }
 0x141   :  { %7711 = vmatpush3.bf16.msra.mxu1 %v8431_v13  ;;  %7718 = vmatprep.subr.bf16.mxu0 %v8433_v16  ;;  %v479_v12 = vpack.c.bf16 %v244_v9, %v244_v9  ;;  %v476_v13 = vpack.c.bf16 %v235_v1, %v235_v1  ;;  %v8470_v16 = vld [vmem:[%s10648_s1 + $0xb70] sm:$0xff]  }
 0x142   :  { %7740 = vmatprep.subr.bf16.mxu1 %v8434_v19  ;;  %v8505_v9 = vld [vmem:[%s10648_s1 + $0xc30] sm:$0xff]  }
 0x143   :  { %v7426_v28 = vpop.f32.mrf.mxu0  ;;  %5876 = vmatmul.mubr.bf16.vlgmr.msra.gmra.mxu0 %v472_v22  ;;  %v8474_v22 = vld [vmem:[%s10648_s1 + $0xb68] sm:$0xff]  }
 0x144   :  { %v7448_v29 = vpop.f32.mrf.mxu1  ;;  %5916 = vmatmul.mubr.bf16.vlgmr.msra.gmra.mxu1 %v474_v23  ;;  %7719 = vmatpush3.bf16.msra.mxu0 %v8435_v20 }
 0x145   :  { %7741 = vmatpush3.bf16.msra.mxu1 %v8436_v24  ;;  %v7427_v32 = vpop.f32.mrf.mxu0  ;;  %7720 = vmatprep.subr.bf16.mxu0 %v8437_v25  ;;  %v8475_v25 = vld [vmem:[%s10648_s1 + $0xbe8] sm:$0xff]  }
 0x146   :  { %v7449_v33 = vpop.f32.mrf.mxu1  ;;  %7742 = vmatprep.subr.bf16.mxu1 %v8438_v26  ;;  %v7428_v35 = vadd.f32 %v7427_v32, %v7426_v28  ;;  %5955 = vmatprep.mubr.bf16.mxu0 %v477_v8  ;;  %v8476_v28 = vld [vmem:[%s10648_s1 + $0xb28] sm:$0xff]   ;;  %v8504_v8 = vld [vmem:[%s10648_s1 + $0xcf0] sm:$0xff]  }
 0x147   :  { %v7450_v36 = vadd.f32 %v7449_v33, %v7448_v29  ;;  %v7429_v38 = vpop.f32.mrf.mxu0  ;;  %5995 = vmatprep.mubr.bf16.mxu1 %v479_v12  ;;  %v8478_v33 = vld [vmem:[%s10648_s1 + $0xb60] sm:$0xff]   ;;  %v8506_v12 = vld [vmem:[%s10648_s1 + $0xcb0] sm:$0xff]  }
 0x148   :  { %v7451_v39 = vpop.f32.mrf.mxu1  ;;  %v5398_v42 = vadd.f32 %v7428_v35, %v9723_v56  ;;  %7721 = vmatpush3.bf16.msra.mxu0 %v8439_v27  ;;  %v8455_v56 = vld [vmem:[%s10648_s1 + $0xa10] sm:$0xff]   ;;  %v8480_v38 = vld [vmem:[%s10648_s1 + $0xb20] sm:$0xff]  }
 0x149   :  { %7743 = vmatpush3.bf16.msra.mxu1 %v8440_v30  ;;  %v7430_v44 = vpop.f32.mrf.mxu0  ;;  %7722 = vmatprep.subr.bf16.mxu0 %v8441_v31  ;;  %v8477_v31 = vld [vmem:[%s10648_s1 + $0xba8] sm:$0xff]   ;;  %v8481_v39 = vld [vmem:[%s10648_s1 + $0xba0] sm:$0xff]  }
 0x14a   :  { %v7452_v45 = vpop.f32.mrf.mxu1  ;;  %7744 = vmatprep.subr.bf16.mxu1 %v8442_v34  ;;  %v9827_v47 = vadd.f32 %v7450_v36, %v5398_v42  ;;  %v8479_v36 = vld [vmem:[%s10648_s1 + $0xbe0] sm:$0xff]   ;;  %v8483_v42 = vld [vmem:[%s10648_s1 + $0xbd8] sm:$0xff]  }
 0x14b   :  { %v8485_v44 = vld [vmem:[%s10648_s1 + $0xb98] sm:$0xff]   ;;  %v8486_v45 = vld [vmem:[%s10648_s1 + $0xb50] sm:$0xff]  }
 0x14c   :  { %7723 = vmatpush3.bf16.msra.mxu0 %v8443_v37 }
 0x14d   :  { %7745 = vmatpush3.bf16.msra.mxu1 %v8444_v40  ;;  %7724 = vmatprep.subr.bf16.mxu0 %v8445_v43  ;;  %v8482_v40 = vld [vmem:[%s10648_s1 + $0xb58] sm:$0xff]  }
 0x14e   :  { %7746 = vmatprep.subr.bf16.mxu1 %v8446_v46  ;;  %v8484_v43 = vld [vmem:[%s10648_s1 + $0xb18] sm:$0xff]   ;;  %v8487_v46 = vld [vmem:[%s10648_s1 + $0xbd0] sm:$0xff]  }
 0x150   :  { %7725 = vmatpush3.bf16.msra.mxu0 %v8447_v48  ;;  %v8489_v48 = vld [vmem:[%s10648_s1 + $0xb90] sm:$0xff]  }
 0x151   :  { %7747 = vmatpush3.bf16.msra.mxu1 %v8448_v49  ;;  %7726 = vmatprep.subr.bf16.mxu0 %v8449_v50  ;;  %v8490_v49 = vld [vmem:[%s10648_s1 + $0xb48] sm:$0xff]  }
 0x152   :  { %7748 = vmatprep.subr.bf16.mxu1 %v8450_v51  ;;  %v8491_v50 = vld [vmem:[%s10648_s1 + $0xbc8] sm:$0xff]  }
 0x153   :  { %v8492_v51 = vld [vmem:[%s10648_s1 + $0xb08] sm:$0xff]  }
 0x154   :  { %7727 = vmatpush3.bf16.msra.mxu0 %v8451_v52  ;;  %v8493_v52 = vld [vmem:[%s10648_s1 + $0xb88] sm:$0xff]  }
 0x155   :  { %7749 = vmatpush3.bf16.msra.mxu1 %v8452_v53  ;;  %7728 = vmatprep.subr.bf16.mxu0 %v8453_v54  ;;  %v8494_v53 = vld [vmem:[%s10648_s1 + $0xb40] sm:$0xff]  }
 0x156   :  { %7750 = vmatprep.subr.bf16.mxu1 %v8454_v55  ;;  %v8495_v54 = vld [vmem:[%s10648_s1 + $0xbc0] sm:$0xff]   ;;  %v33_v55 = vld [vmem:[%s10647_s0 + $0x58] sm:$0xff] }
 0x158   :  { %7729 = vmatpush3.bf16.msra.mxu0 %v8455_v56  ;;  %v8496_v56 = vld [vmem:[%s10648_s1 + $0xb00] sm:$0xff]  }
 0x159   :  { %7751 = vmatpush3.bf16.msra.mxu1 %v8456_v57  ;;  %7730 = vmatprep.subr.bf16.mxu0 %v8457_v58  ;;  %v252_v57 = vrot.slane %v33_v55, %v8866_v41  ;;  %v245_v58 = vcombine.high %v33_v55, %v33_v55 }
 0x15a   :  { %7752 = vmatprep.subr.bf16.mxu1 %v8458_v59  ;;  %v8497_v59 = vld [vmem:[%s10648_s1 + $0xb80] sm:$0xff]  }
 0x15c   :  { %7731 = vmatpush3.bf16.msra.mxu0 %v8459_v60  ;;  %v260_v60 = vcombine.high %v252_v57, %v252_v57 }
 0x15d   :  { %7753 = vmatpush3.bf16.msra.mxu1 %v8460_v61  ;;  %7732 = vmatprep.subr.bf16.mxu0 %v8461_v62  ;;  %v259_v61 = vrot.slane %v245_v58, %v8866_v41  ;;  %v8499_v62 = vld [vmem:[%s10648_s1 + $0xc78] sm:$0xff]  }
 0x15e   :  { %7754 = vmatprep.subr.bf16.mxu1 %v8462_v0  ;;  %v481_v0 = vpack.c.bf16 %v260_v60, %v260_v60  ;;  %v8535_v60 = vld [vmem:[%s10648_s1 + $0xdb8] sm:$0xff]  }
 0x15f   :  { %v261_v1 = vcombine.high %v259_v61, %v259_v61 }
 0x160   :  { %7733 = vmatpush3.bf16.msra.mxu0 %v8463_v3  ;;  %v480_v3 = vpack.c.bf16 %v252_v57, %v252_v57  ;;  %v8534_v57 = vld [vmem:[%s10648_s1 + $0xd38] sm:$0xff]  }
 0x161   :  { %7755 = vmatpush3.bf16.msra.mxu1 %v8464_v4  ;;  %7762 = vmatprep.subr.bf16.mxu0 %v8466_v7  ;;  %v482_v4 = vpack.c.bf16 %v259_v61, %v259_v61  ;;  %v483_v6 = vpack.c.bf16 %v261_v1, %v261_v1  ;;  %v8503_v7 = vld [vmem:[%s10648_s1 + $0xc70] sm:$0xff]  }
 0x162   :  { %7784 = vmatprep.subr.bf16.mxu1 %v8467_v10 }
 0x163   :  { %v7470_v19 = vpop.f32.mrf.mxu0  ;;  %5956 = vmatmul.mubr.bf16.vlgmr.msra.gmra.mxu0 %v476_v13  ;;  %v8507_v13 = vld [vmem:[%s10648_s1 + $0xc68] sm:$0xff]  }
 0x164   :  { %v7492_v20 = vpop.f32.mrf.mxu1  ;;  %5996 = vmatmul.mubr.bf16.vlgmr.msra.gmra.mxu1 %v478_v14  ;;  %7763 = vmatpush3.bf16.msra.mxu0 %v8468_v11 }
 0x165   :  { %7785 = vmatpush3.bf16.msra.mxu1 %v8469_v15  ;;  %v7471_v23 = vpop.f32.mrf.mxu0  ;;  %7764 = vmatprep.subr.bf16.mxu0 %v8470_v16  ;;  %v8508_v16 = vld [vmem:[%s10648_s1 + $0xce8] sm:$0xff]  }
 0x166   :  { %v7493_v24 = vpop.f32.mrf.mxu1  ;;  %7786 = vmatprep.subr.bf16.mxu1 %v8471_v17  ;;  %v7472_v26 = vadd.f32 %v7471_v23, %v7470_v19  ;;  %6035 = vmatprep.mubr.bf16.mxu0 %v481_v0  ;;  %v8509_v19 = vld [vmem:[%s10648_s1 + $0xc28] sm:$0xff]   ;;  %v8538_v0 = vld [vmem:[%s10648_s1 + $0xd30] sm:$0xff]  }
 0x167   :  { %v7494_v27 = vadd.f32 %v7493_v24, %v7492_v20  ;;  %v7473_v29 = vpop.f32.mrf.mxu0  ;;  %6075 = vmatprep.mubr.bf16.mxu1 %v483_v6  ;;  %v8511_v24 = vld [vmem:[%s10648_s1 + $0xc60] sm:$0xff]  }
 0x168   :  { %v7495_v30 = vpop.f32.mrf.mxu1  ;;  %v5478_v32 = vadd.f32 %v7472_v26, %v9827_v47  ;;  %7765 = vmatpush3.bf16.msra.mxu0 %v8472_v18  ;;  %v8488_v47 = vld [vmem:[%s10648_s1 + $0xb10] sm:$0xff]   ;;  %v8513_v29 = vld [vmem:[%s10648_s1 + $0xc20] sm:$0xff]  }
 0x169   :  { %7787 = vmatpush3.bf16.msra.mxu1 %v8473_v21  ;;  %v7474_v34 = vpop.f32.mrf.mxu0  ;;  %7766 = vmatprep.subr.bf16.mxu0 %v8474_v22  ;;  %v8510_v22 = vld [vmem:[%s10648_s1 + $0xca8] sm:$0xff]   ;;  %v8514_v30 = vld [vmem:[%s10648_s1 + $0xca0] sm:$0xff]  }
 0x16a   :  { %v7496_v35 = vpop.f32.mrf.mxu1  ;;  %7788 = vmatprep.subr.bf16.mxu1 %v8475_v25  ;;  %v9931_v37 = vadd.f32 %v7494_v27, %v5478_v32  ;;  %v8512_v27 = vld [vmem:[%s10648_s1 + $0xce0] sm:$0xff]   ;;  %v8516_v32 = vld [vmem:[%s10648_s1 + $0xcd8] sm:$0xff]  }
 0x16b   :  { %v8518_v34 = vld [vmem:[%s10648_s1 + $0xc98] sm:$0xff]   ;;  %v8519_v35 = vld [vmem:[%s10648_s1 + $0xc50] sm:$0xff]  }
 0x16c   :  { %7767 = vmatpush3.bf16.msra.mxu0 %v8476_v28 }
 0x16d   :  { %7789 = vmatpush3.bf16.msra.mxu1 %v8477_v31  ;;  %7768 = vmatprep.subr.bf16.mxu0 %v8478_v33  ;;  %v8515_v31 = vld [vmem:[%s10648_s1 + $0xc58] sm:$0xff]  }
 0x16e   :  { %7790 = vmatprep.subr.bf16.mxu1 %v8479_v36  ;;  %v8517_v33 = vld [vmem:[%s10648_s1 + $0xc18] sm:$0xff]   ;;  %v8520_v36 = vld [vmem:[%s10648_s1 + $0xcd0] sm:$0xff]  }
 0x170   :  { %7769 = vmatpush3.bf16.msra.mxu0 %v8480_v38  ;;  %v8522_v38 = vld [vmem:[%s10648_s1 + $0xc90] sm:$0xff]  }
 0x171   :  { %7791 = vmatpush3.bf16.msra.mxu1 %v8481_v39  ;;  %7770 = vmatprep.subr.bf16.mxu0 %v8482_v40  ;;  %v8523_v39 = vld [vmem:[%s10648_s1 + $0xc48] sm:$0xff]  }
 0x172   :  { %7792 = vmatprep.subr.bf16.mxu1 %v8483_v42  ;;  %v8524_v40 = vld [vmem:[%s10648_s1 + $0xcc8] sm:$0xff]  }
 0x173   :  { %v8525_v42 = vld [vmem:[%s10648_s1 + $0xc08] sm:$0xff]  }
 0x174   :  { %7771 = vmatpush3.bf16.msra.mxu0 %v8484_v43  ;;  %v8526_v43 = vld [vmem:[%s10648_s1 + $0xc88] sm:$0xff]  }
 0x175   :  { %7793 = vmatpush3.bf16.msra.mxu1 %v8485_v44  ;;  %7772 = vmatprep.subr.bf16.mxu0 %v8486_v45  ;;  %v8527_v44 = vld [vmem:[%s10648_s1 + $0xc40] sm:$0xff]  }
 0x176   :  { %7794 = vmatprep.subr.bf16.mxu1 %v8487_v46  ;;  %v8528_v45 = vld [vmem:[%s10648_s1 + $0xcc0] sm:$0xff]  }
 0x177   :  { %v34_v46 = vld [vmem:[%s10647_s0 + $0x60] sm:$0xff] }
 0x178   :  { %7773 = vmatpush3.bf16.msra.mxu0 %v8488_v47  ;;  %v8529_v47 = vld [vmem:[%s10648_s1 + $0xc00] sm:$0xff]  }
 0x179   :  { %7795 = vmatpush3.bf16.msra.mxu1 %v8489_v48  ;;  %7774 = vmatprep.subr.bf16.mxu0 %v8490_v49  ;;  %v269_v48 = vrot.slane %v34_v46, %v8866_v41  ;;  %v262_v49 = vcombine.high %v34_v46, %v34_v46 }
 0x17a   :  { %7796 = vmatprep.subr.bf16.mxu1 %v8491_v50  ;;  %v8530_v50 = vld [vmem:[%s10648_s1 + $0xc80] sm:$0xff]  }
 0x17b   :  { %v484_v58 = vpack.c.bf16 %v269_v48, %v269_v48 }
 0x17c   :  { %7775 = vmatpush3.bf16.msra.mxu0 %v8492_v51  ;;  %v277_v51 = vcombine.high %v269_v48, %v269_v48  ;;  %v8567_v48 = vld [vmem:[%s10648_s1 + $0xe38] sm:$0xff]  }
 0x17d   :  { %7797 = vmatpush3.bf16.msra.mxu1 %v8493_v52  ;;  %7776 = vmatprep.subr.bf16.mxu0 %v8494_v53  ;;  %v276_v52 = vrot.slane %v262_v49, %v8866_v41  ;;  %v8532_v53 = vld [vmem:[%s10648_s1 + $0xd78] sm:$0xff]  }
 0x17e   :  { %7798 = vmatprep.subr.bf16.mxu1 %v8495_v54  ;;  %v8533_v54 = vld [vmem:[%s10648_s1 + $0xdf8] sm:$0xff]   ;;  %v485_v55 = vpack.c.bf16 %v277_v51, %v277_v51 }
 0x17f   :  { %v8568_v51 = vld [vmem:[%s10648_s1 + $0xeb8] sm:$0xff]  }
 0x180   :  { %7777 = vmatpush3.bf16.msra.mxu0 %v8496_v56  ;;  %v278_v56 = vcombine.high %v276_v52, %v276_v52 }
 0x181   :  { %7799 = vmatpush3.bf16.msra.mxu1 %v8497_v59  ;;  %7806 = vmatprep.subr.bf16.mxu0 %v8499_v62  ;;  %v486_v59 = vpack.c.bf16 %v276_v52, %v276_v52  ;;  %v8536_v62 = vld [vmem:[%s10648_s1 + $0xd70] sm:$0xff]  }
 0x182   :  { %7828 = vmatprep.subr.bf16.mxu1 %v8500_v63  ;;  %v487_v61 = vpack.c.bf16 %v278_v56, %v278_v56  ;;  %v8537_v63 = vld [vmem:[%s10648_s1 + $0xdf0] sm:$0xff]  }
 0x183   :  { %v7514_v10 = vpop.f32.mrf.mxu0  ;;  %6036 = vmatmul.mubr.bf16.vlgmr.msra.gmra.mxu0 %v480_v3  ;;  %v8539_v3 = vld [vmem:[%s10648_s1 + $0xdb0] sm:$0xff]  }
 0x184   :  { %v7536_v11 = vpop.f32.mrf.mxu1  ;;  %6076 = vmatmul.mubr.bf16.vlgmr.msra.gmra.mxu1 %v482_v4  ;;  %7807 = vmatpush3.bf16.msra.mxu0 %v8501_v2  ;;  %v8540_v4 = vld [vmem:[%s10648_s1 + $0xd68] sm:$0xff]  }
 0x185   :  { %7829 = vmatpush3.bf16.msra.mxu1 %v8502_v5  ;;  %v7515_v14 = vpop.f32.mrf.mxu0  ;;  %7808 = vmatprep.subr.bf16.mxu0 %v8503_v7  ;;  %v8541_v7 = vld [vmem:[%s10648_s1 + $0xde8] sm:$0xff]  }
 0x186   :  { %v7537_v15 = vpop.f32.mrf.mxu1  ;;  %7830 = vmatprep.subr.bf16.mxu1 %v8504_v8  ;;  %v7516_v17 = vadd.f32 %v7515_v14, %v7514_v10  ;;  %6115 = vmatprep.mubr.bf16.mxu0 %v485_v55  ;;  %v8542_v10 = vld [vmem:[%s10648_s1 + $0xd28] sm:$0xff]   ;;  %v8571_v55 = vld [vmem:[%s10648_s1 + $0xe30] sm:$0xff]  }
 0x187   :  { %v7538_v18 = vadd.f32 %v7537_v15, %v7536_v11  ;;  %v7517_v20 = vpop.f32.mrf.mxu0  ;;  %6155 = vmatprep.mubr.bf16.mxu1 %v487_v61  ;;  %v8544_v15 = vld [vmem:[%s10648_s1 + $0xd60] sm:$0xff]  }
 0x188   :  { %v7539_v21 = vpop.f32.mrf.mxu1  ;;  %v5558_v23 = vadd.f32 %v7516_v17, %v9931_v37  ;;  %7809 = vmatpush3.bf16.msra.mxu0 %v8505_v9  ;;  %v8521_v37 = vld [vmem:[%s10648_s1 + $0xc10] sm:$0xff]   ;;  %v8546_v20 = vld [vmem:[%s10648_s1 + $0xd20] sm:$0xff]  }
 0x189   :  { %7831 = vmatpush3.bf16.msra.mxu1 %v8506_v12  ;;  %v7518_v25 = vpop.f32.mrf.mxu0  ;;  %7810 = vmatprep.subr.bf16.mxu0 %v8507_v13  ;;  %v8543_v13 = vld [vmem:[%s10648_s1 + $0xda8] sm:$0xff]   ;;  %v8547_v21 = vld [vmem:[%s10648_s1 + $0xda0] sm:$0xff]  }
 0x18a   :  { %v7540_v26 = vpop.f32.mrf.mxu1  ;;  %7832 = vmatprep.subr.bf16.mxu1 %v8508_v16  ;;  %v10035_v28 = vadd.f32 %v7538_v18, %v5558_v23  ;;  %v8545_v18 = vld [vmem:[%s10648_s1 + $0xde0] sm:$0xff]   ;;  %v8549_v23 = vld [vmem:[%s10648_s1 + $0xdd8] sm:$0xff]  }
 0x18b   :  { %v8551_v25 = vld [vmem:[%s10648_s1 + $0xd98] sm:$0xff]   ;;  %v8552_v26 = vld [vmem:[%s10648_s1 + $0xd50] sm:$0xff]  }
 0x18c   :  { %7811 = vmatpush3.bf16.msra.mxu0 %v8509_v19 }
 0x18d   :  { %7833 = vmatpush3.bf16.msra.mxu1 %v8510_v22  ;;  %7812 = vmatprep.subr.bf16.mxu0 %v8511_v24  ;;  %v8548_v22 = vld [vmem:[%s10648_s1 + $0xd58] sm:$0xff]  }
 0x18e   :  { %7834 = vmatprep.subr.bf16.mxu1 %v8512_v27  ;;  %v8550_v24 = vld [vmem:[%s10648_s1 + $0xd18] sm:$0xff]   ;;  %v8553_v27 = vld [vmem:[%s10648_s1 + $0xdd0] sm:$0xff]  }
 0x190   :  { %7813 = vmatpush3.bf16.msra.mxu0 %v8513_v29  ;;  %v8555_v29 = vld [vmem:[%s10648_s1 + $0xd90] sm:$0xff]  }
 0x191   :  { %7835 = vmatpush3.bf16.msra.mxu1 %v8514_v30  ;;  %7814 = vmatprep.subr.bf16.mxu0 %v8515_v31  ;;  %v8556_v30 = vld [vmem:[%s10648_s1 + $0xd48] sm:$0xff]  }
 0x192   :  { %7836 = vmatprep.subr.bf16.mxu1 %v8516_v32  ;;  %v8557_v31 = vld [vmem:[%s10648_s1 + $0xdc8] sm:$0xff]  }
 0x193   :  { %v8558_v32 = vld [vmem:[%s10648_s1 + $0xd08] sm:$0xff]  }
 0x194   :  { %7815 = vmatpush3.bf16.msra.mxu0 %v8517_v33  ;;  %v8559_v33 = vld [vmem:[%s10648_s1 + $0xd88] sm:$0xff]  }
 0x195   :  { %7837 = vmatpush3.bf16.msra.mxu1 %v8518_v34  ;;  %7816 = vmatprep.subr.bf16.mxu0 %v8519_v35  ;;  %v8560_v34 = vld [vmem:[%s10648_s1 + $0xd40] sm:$0xff]  }
 0x196   :  { %7838 = vmatprep.subr.bf16.mxu1 %v8520_v36  ;;  %v8561_v35 = vld [vmem:[%s10648_s1 + $0xdc0] sm:$0xff]   ;;  %v35_v36 = vld [vmem:[%s10647_s0 + $0x68] sm:$0xff] }
 0x198   :  { %7817 = vmatpush3.bf16.msra.mxu0 %v8521_v37  ;;  %v8562_v37 = vld [vmem:[%s10648_s1 + $0xd00] sm:$0xff]  }
 0x199   :  { %7839 = vmatpush3.bf16.msra.mxu1 %v8522_v38  ;;  %7818 = vmatprep.subr.bf16.mxu0 %v8523_v39  ;;  %v286_v38 = vrot.slane %v35_v36, %v8866_v41  ;;  %v279_v39 = vcombine.high %v35_v36, %v35_v36  ;;  %v8600_v36 = vld [vmem:[%s10648_s1 + $0xf38] sm:$0xff]  }
 0x19a   :  { %7840 = vmatprep.subr.bf16.mxu1 %v8524_v40  ;;  %v8563_v40 = vld [vmem:[%s10648_s1 + $0xd80] sm:$0xff]  }
 0x19b   :  { %v488_v49 = vpack.c.bf16 %v286_v38, %v286_v38 }
 0x19c   :  { %7819 = vmatpush3.bf16.msra.mxu0 %v8525_v42  ;;  %v294_v42 = vcombine.high %v286_v38, %v286_v38 }
 0x19d   :  { %7841 = vmatpush3.bf16.msra.mxu1 %v8526_v43  ;;  %7820 = vmatprep.subr.bf16.mxu0 %v8527_v44  ;;  %v293_v43 = vrot.slane %v279_v39, %v8866_v41  ;;  %v8565_v44 = vld [vmem:[%s10648_s1 + $0xe78] sm:$0xff]  }
 0x19e   :  { %7842 = vmatprep.subr.bf16.mxu1 %v8528_v45  ;;  %v8566_v45 = vld [vmem:[%s10648_s1 + $0xef8] sm:$0xff]   ;;  %v489_v46 = vpack.c.bf16 %v294_v42, %v294_v42 }
 0x1a0   :  { %7821 = vmatpush3.bf16.msra.mxu0 %v8529_v47  ;;  %v295_v47 = vcombine.high %v293_v43, %v293_v43 }
 0x1a1   :  { %7843 = vmatpush3.bf16.msra.mxu1 %v8530_v50  ;;  %7850 = vmatprep.subr.bf16.mxu0 %v8532_v53  ;;  %v490_v50 = vpack.c.bf16 %v293_v43, %v293_v43  ;;  %v8569_v53 = vld [vmem:[%s10648_s1 + $0xe70] sm:$0xff]  }
 0x1a2   :  { %7872 = vmatprep.subr.bf16.mxu1 %v8533_v54  ;;  %v491_v52 = vpack.c.bf16 %v295_v47, %v295_v47  ;;  %v8570_v54 = vld [vmem:[%s10648_s1 + $0xef0] sm:$0xff]  }
 0x1a3   :  { %v7558_v1 = vpop.f32.mrf.mxu0  ;;  %6116 = vmatmul.mubr.bf16.vlgmr.msra.gmra.mxu0 %v484_v58  ;;  %v8572_v58 = vld [vmem:[%s10648_s1 + $0xeb0] sm:$0xff]  }
 0x1a4   :  { %v7580_v2 = vpop.f32.mrf.mxu1  ;;  %6156 = vmatmul.mubr.bf16.vlgmr.msra.gmra.mxu1 %v486_v59  ;;  %7851 = vmatpush3.bf16.msra.mxu0 %v8534_v57  ;;  %v8573_v59 = vld [vmem:[%s10648_s1 + $0xe68] sm:$0xff]   ;;  %v8602_v43 = vld [vmem:[%s10648_s1 + $0xf70] sm:$0xff]  }
 0x1a5   :  { %7873 = vmatpush3.bf16.msra.mxu1 %v8535_v60  ;;  %v7559_v5 = vpop.f32.mrf.mxu0  ;;  %7852 = vmatprep.subr.bf16.mxu0 %v8536_v62  ;;  %v8574_v62 = vld [vmem:[%s10648_s1 + $0xee8] sm:$0xff]  }
 0x1a6   :  { %v7581_v6 = vpop.f32.mrf.mxu1  ;;  %7874 = vmatprep.subr.bf16.mxu1 %v8537_v63  ;;  %v7560_v8 = vadd.f32 %v7559_v5, %v7558_v1  ;;  %6195 = vmatprep.mubr.bf16.mxu0 %v489_v46  ;;  %v8575_v1 = vld [vmem:[%s10648_s1 + $0xe28] sm:$0xff]   ;;  %v8604_v46 = vld [vmem:[%s10648_s1 + $0xf30] sm:$0xff]  }
 0x1a7   :  { %v7582_v9 = vadd.f32 %v7581_v6, %v7580_v2  ;;  %v7561_v11 = vpop.f32.mrf.mxu0  ;;  %6235 = vmatprep.mubr.bf16.mxu1 %v491_v52  ;;  %v8577_v6 = vld [vmem:[%s10648_s1 + $0xe60] sm:$0xff]  }
 0x1a8   :  { %v7583_v12 = vpop.f32.mrf.mxu1  ;;  %v5638_v14 = vadd.f32 %v7560_v8, %v10035_v28  ;;  %7853 = vmatpush3.bf16.msra.mxu0 %v8538_v0  ;;  %v8554_v28 = vld [vmem:[%s10648_s1 + $0xd10] sm:$0xff]   ;;  %v8579_v11 = vld [vmem:[%s10648_s1 + $0xe20] sm:$0xff]  }
 0x1a9   :  { %7875 = vmatpush3.bf16.msra.mxu1 %v8539_v3  ;;  %v7562_v16 = vpop.f32.mrf.mxu0  ;;  %7854 = vmatprep.subr.bf16.mxu0 %v8540_v4  ;;  %v8576_v4 = vld [vmem:[%s10648_s1 + $0xea8] sm:$0xff]   ;;  %v8580_v12 = vld [vmem:[%s10648_s1 + $0xea0] sm:$0xff]  }
 0x1aa   :  { %v7584_v17 = vpop.f32.mrf.mxu1  ;;  %7876 = vmatprep.subr.bf16.mxu1 %v8541_v7  ;;  %v10139_v19 = vadd.f32 %v7582_v9, %v5638_v14  ;;  %v8578_v9 = vld [vmem:[%s10648_s1 + $0xee0] sm:$0xff]   ;;  %v8582_v14 = vld [vmem:[%s10648_s1 + $0xed8] sm:$0xff]  }
 0x1ab   :  { %v8584_v16 = vld [vmem:[%s10648_s1 + $0xe98] sm:$0xff]   ;;  %v8585_v17 = vld [vmem:[%s10648_s1 + $0xe50] sm:$0xff]  }
 0x1ac   :  { %7855 = vmatpush3.bf16.msra.mxu0 %v8542_v10 }
 0x1ad   :  { %7877 = vmatpush3.bf16.msra.mxu1 %v8543_v13  ;;  %7856 = vmatprep.subr.bf16.mxu0 %v8544_v15  ;;  %v8581_v13 = vld [vmem:[%s10648_s1 + $0xe58] sm:$0xff]  }
 0x1ae   :  { %7878 = vmatprep.subr.bf16.mxu1 %v8545_v18  ;;  %v8583_v15 = vld [vmem:[%s10648_s1 + $0xe18] sm:$0xff]   ;;  %v8586_v18 = vld [vmem:[%s10648_s1 + $0xed0] sm:$0xff]  }
 0x1b0   :  { %7857 = vmatpush3.bf16.msra.mxu0 %v8546_v20  ;;  %v8588_v20 = vld [vmem:[%s10648_s1 + $0xe90] sm:$0xff]  }
 0x1b1   :  { %7879 = vmatpush3.bf16.msra.mxu1 %v8547_v21  ;;  %7858 = vmatprep.subr.bf16.mxu0 %v8548_v22  ;;  %v8589_v21 = vld [vmem:[%s10648_s1 + $0xe48] sm:$0xff]  }
 0x1b2   :  { %7880 = vmatprep.subr.bf16.mxu1 %v8549_v23  ;;  %v8590_v22 = vld [vmem:[%s10648_s1 + $0xec8] sm:$0xff]  }
 0x1b3   :  { %v8591_v23 = vld [vmem:[%s10648_s1 + $0xe08] sm:$0xff]  }
 0x1b4   :  { %7859 = vmatpush3.bf16.msra.mxu0 %v8550_v24  ;;  %v8592_v24 = vld [vmem:[%s10648_s1 + $0xe88] sm:$0xff]  }
 0x1b5   :  { %7881 = vmatpush3.bf16.msra.mxu1 %v8551_v25  ;;  %7860 = vmatprep.subr.bf16.mxu0 %v8552_v26  ;;  %v8593_v25 = vld [vmem:[%s10648_s1 + $0xe40] sm:$0xff]  }
 0x1b6   :  { %7882 = vmatprep.subr.bf16.mxu1 %v8553_v27  ;;  %v8594_v26 = vld [vmem:[%s10648_s1 + $0xec0] sm:$0xff]  }
 0x1b7   :  { %v8595_v27 = vld [vmem:[%s10648_s1 + $0xe00] sm:$0xff]  }
 0x1b8   :  { %7861 = vmatpush3.bf16.msra.mxu0 %v8554_v28  ;;  %v36_v28 = vld [vmem:[%s10647_s0 + $0x70] sm:$0xff] }
 0x1b9   :  { %7883 = vmatpush3.bf16.msra.mxu1 %v8555_v29  ;;  %7862 = vmatprep.subr.bf16.mxu0 %v8556_v30  ;;  %v8596_v29 = vld [vmem:[%s10648_s1 + $0xe80] sm:$0xff]   ;;  %v303_v30 = vrot.slane %v36_v28, %v8866_v41 }
 0x1ba   :  { %7884 = vmatprep.subr.bf16.mxu1 %v8557_v31  ;;  %v296_v31 = vcombine.high %v36_v28, %v36_v28 }
 0x1bb   :  { %v492_v39 = vpack.c.bf16 %v303_v30, %v303_v30 }
 0x1bc   :  { %7863 = vmatpush3.bf16.msra.mxu0 %v8558_v32  ;;  %v8598_v32 = vld [vmem:[%s10648_s1 + $0xf78] sm:$0xff]  }
 0x1bd   :  { %7885 = vmatpush3.bf16.msra.mxu1 %v8559_v33  ;;  %7864 = vmatprep.subr.bf16.mxu0 %v8560_v34  ;;  %v311_v33 = vcombine.high %v303_v30, %v303_v30  ;;  %v310_v34 = vrot.slane %v296_v31, %v8866_v41  ;;  %v8634_v31 = vld [vmem:[%s10648_s1 + $0x10b8] sm:$0xff]  }
 0x1be   :  { %7886 = vmatprep.subr.bf16.mxu1 %v8561_v35  ;;  %v8599_v35 = vld [vmem:[%s10648_s1 + $0xff8] sm:$0xff]  }
 0x1bf   :  { %v312_v38 = vcombine.high %v310_v34, %v310_v34  ;;  %v494_v42 = vpack.c.bf16 %v310_v34, %v310_v34 }
 0x1c0   :  { %7865 = vmatpush3.bf16.msra.mxu0 %v8562_v37  ;;  %v493_v37 = vpack.c.bf16 %v311_v33, %v311_v33  ;;  %v8635_v33 = vld [vmem:[%s10648_s1 + $0x1070] sm:$0xff]  }
 0x1c1   :  { %7887 = vmatpush3.bf16.msra.mxu1 %v8563_v40  ;;  %7894 = vmatprep.subr.bf16.mxu0 %v8565_v44  ;;  %v8601_v40 = vld [vmem:[%s10648_s1 + $0xfb8] sm:$0xff]   ;;  %v495_v44 = vpack.c.bf16 %v312_v38, %v312_v38 }
 0x1c2   :  { %7916 = vmatprep.subr.bf16.mxu1 %v8566_v45  ;;  %v8603_v45 = vld [vmem:[%s10648_s1 + $0xff0] sm:$0xff]  }
 0x1c3   :  { %v7602_v56 = vpop.f32.mrf.mxu0  ;;  %6196 = vmatmul.mubr.bf16.vlgmr.msra.gmra.mxu0 %v488_v49  ;;  %v8605_v49 = vld [vmem:[%s10648_s1 + $0xfb0] sm:$0xff]  }
 0x1c4   :  { %v7624_v57 = vpop.f32.mrf.mxu1  ;;  %6236 = vmatmul.mubr.bf16.vlgmr.msra.gmra.mxu1 %v490_v50  ;;  %7895 = vmatpush3.bf16.msra.mxu0 %v8567_v48  ;;  %v8606_v50 = vld [vmem:[%s10648_s1 + $0xf68] sm:$0xff]  }
 0x1c5   :  { %7917 = vmatpush3.bf16.msra.mxu1 %v8568_v51  ;;  %v7603_v60 = vpop.f32.mrf.mxu0  ;;  %7896 = vmatprep.subr.bf16.mxu0 %v8569_v53  ;;  %v8607_v53 = vld [vmem:[%s10648_s1 + $0xfe8] sm:$0xff]  }
 0x1c6   :  { %v7625_v61 = vpop.f32.mrf.mxu1  ;;  %7918 = vmatprep.subr.bf16.mxu1 %v8570_v54  ;;  %v7604_v63 = vadd.f32 %v7603_v60, %v7602_v56  ;;  %6275 = vmatprep.mubr.bf16.mxu0 %v493_v37  ;;  %v8608_v56 = vld [vmem:[%s10648_s1 + $0xf28] sm:$0xff]  }
 0x1c7   :  { %v7626_v0 = vadd.f32 %v7625_v61, %v7624_v57  ;;  %v7605_v2 = vpop.f32.mrf.mxu0  ;;  %6315 = vmatprep.mubr.bf16.mxu1 %v495_v44  ;;  %v8610_v61 = vld [vmem:[%s10648_s1 + $0xf60] sm:$0xff]   ;;  %v8640_v44 = vld [vmem:[%s10648_s1 + $0x10e8] sm:$0xff]  }
 0x1c8   :  { %v7627_v3 = vpop.f32.mrf.mxu1  ;;  %v5718_v5 = vadd.f32 %v7604_v63, %v10139_v19  ;;  %7897 = vmatpush3.bf16.msra.mxu0 %v8571_v55  ;;  %v8587_v19 = vld [vmem:[%s10648_s1 + $0xe10] sm:$0xff]   ;;  %v8612_v2 = vld [vmem:[%s10648_s1 + $0xf20] sm:$0xff]  }
 0x1c9   :  { %7919 = vmatpush3.bf16.msra.mxu1 %v8572_v58  ;;  %v7606_v7 = vpop.f32.mrf.mxu0  ;;  %7898 = vmatprep.subr.bf16.mxu0 %v8573_v59  ;;  %v8609_v59 = vld [vmem:[%s10648_s1 + $0xfa8] sm:$0xff]   ;;  %v8613_v3 = vld [vmem:[%s10648_s1 + $0xfa0] sm:$0xff]  }
 0x1ca   :  { %v7628_v8 = vpop.f32.mrf.mxu1  ;;  %7920 = vmatprep.subr.bf16.mxu1 %v8574_v62  ;;  %v10243_v10 = vadd.f32 %v7626_v0, %v5718_v5  ;;  %v8611_v0 = vld [vmem:[%s10648_s1 + $0xfe0] sm:$0xff]   ;;  %v8615_v5 = vld [vmem:[%s10648_s1 + $0xfd8] sm:$0xff]  }
 0x1cb   :  { %v8617_v7 = vld [vmem:[%s10648_s1 + $0xf98] sm:$0xff]   ;;  %v8618_v8 = vld [vmem:[%s10648_s1 + $0xf50] sm:$0xff]  }
 0x1cc   :  { %7899 = vmatpush3.bf16.msra.mxu0 %v8575_v1 }
 0x1cd   :  { %7921 = vmatpush3.bf16.msra.mxu1 %v8576_v4  ;;  %7900 = vmatprep.subr.bf16.mxu0 %v8577_v6  ;;  %v8614_v4 = vld [vmem:[%s10648_s1 + $0xf58] sm:$0xff]  }
 0x1ce   :  { %7922 = vmatprep.subr.bf16.mxu1 %v8578_v9  ;;  %v8616_v6 = vld [vmem:[%s10648_s1 + $0xf18] sm:$0xff]   ;;  %v8619_v9 = vld [vmem:[%s10648_s1 + $0xfd0] sm:$0xff]  }
 0x1d0   :  { %7901 = vmatpush3.bf16.msra.mxu0 %v8579_v11  ;;  %v8621_v11 = vld [vmem:[%s10648_s1 + $0xf90] sm:$0xff]  }
 0x1d1   :  { %7923 = vmatpush3.bf16.msra.mxu1 %v8580_v12  ;;  %7902 = vmatprep.subr.bf16.mxu0 %v8581_v13  ;;  %v8622_v12 = vld [vmem:[%s10648_s1 + $0xf48] sm:$0xff]  }
 0x1d2   :  { %7924 = vmatprep.subr.bf16.mxu1 %v8582_v14  ;;  %v8623_v13 = vld [vmem:[%s10648_s1 + $0xfc8] sm:$0xff]  }
 0x1d3   :  { %v8624_v14 = vld [vmem:[%s10648_s1 + $0xf08] sm:$0xff]  }
 0x1d4   :  { %7903 = vmatpush3.bf16.msra.mxu0 %v8583_v15  ;;  %v8625_v15 = vld [vmem:[%s10648_s1 + $0xf88] sm:$0xff]  }
 0x1d5   :  { %7925 = vmatpush3.bf16.msra.mxu1 %v8584_v16  ;;  %7904 = vmatprep.subr.bf16.mxu0 %v8585_v17  ;;  %v8626_v16 = vld [vmem:[%s10648_s1 + $0xf40] sm:$0xff]  }
 0x1d6   :  { %7926 = vmatprep.subr.bf16.mxu1 %v8586_v18  ;;  %v8627_v17 = vld [vmem:[%s10648_s1 + $0xfc0] sm:$0xff]  }
 0x1d7   :  { %v8628_v18 = vld [vmem:[%s10648_s1 + $0xf00] sm:$0xff]  }
 0x1d8   :  { %7905 = vmatpush3.bf16.msra.mxu0 %v8587_v19  ;;  %v37_v19 = vld [vmem:[%s10647_s0 + $0x78] sm:$0xff] }
 0x1d9   :  { %7927 = vmatpush3.bf16.msra.mxu1 %v8588_v20  ;;  %7906 = vmatprep.subr.bf16.mxu0 %v8589_v21  ;;  %v8629_v20 = vld [vmem:[%s10648_s1 + $0xf80] sm:$0xff]   ;;  %v320_v21 = vrot.slane %v37_v19, %v8866_v41 }
 0x1da   :  { %7928 = vmatprep.subr.bf16.mxu1 %v8590_v22  ;;  %v313_v22 = vcombine.high %v37_v19, %v37_v19 }
 0x1db   :  { %v496_v30 = vpack.c.bf16 %v320_v21, %v320_v21 }
 0x1dc   :  { %7907 = vmatpush3.bf16.msra.mxu0 %v8591_v23  ;;  %v8631_v23 = vld [vmem:[%s10648_s1 + $0x1078] sm:$0xff]  }
 0x1dd   :  { %7929 = vmatpush3.bf16.msra.mxu1 %v8592_v24  ;;  %7908 = vmatprep.subr.bf16.mxu0 %v8593_v25  ;;  %v328_v24 = vcombine.high %v320_v21, %v320_v21  ;;  %v327_v25 = vrot.slane %v313_v22, %v8866_v41  ;;  %v8667_v22 = vld [vmem:[%s10648_s1 + $0x11b8] sm:$0xff]  }
 0x1de   :  { %7930 = vmatprep.subr.bf16.mxu1 %v8594_v26  ;;  %v8632_v26 = vld [vmem:[%s10648_s1 + $0x10f8] sm:$0xff]  }
 0x1df   :  { %v497_v28 = vpack.c.bf16 %v328_v24, %v328_v24  ;;  %v8668_v24 = vld [vmem:[%s10648_s1 + $0x1170] sm:$0xff]  }
 0x1e0   :  { %7909 = vmatpush3.bf16.msra.mxu0 %v8595_v27  ;;  %v8633_v27 = vld [vmem:[%s10648_s1 + $0x1038] sm:$0xff]  }
 0x1e1   :  { %7931 = vmatpush3.bf16.msra.mxu1 %v8596_v29  ;;  %7938 = vmatprep.subr.bf16.mxu0 %v8598_v32  ;;  %v329_v29 = vcombine.high %v327_v25, %v327_v25  ;;  %v498_v32 = vpack.c.bf16 %v327_v25, %v327_v25 }
 0x1e2   :  { %7960 = vmatprep.subr.bf16.mxu1 %v8599_v35  ;;  %v8636_v35 = vld [vmem:[%s10648_s1 + $0x10f0] sm:$0xff]  }
 0x1e3   :  { %v7646_v47 = vpop.f32.mrf.mxu0  ;;  %6276 = vmatmul.mubr.bf16.vlgmr.msra.gmra.mxu0 %v492_v39  ;;  %v499_v34 = vpack.c.bf16 %v329_v29, %v329_v29  ;;  %v8638_v39 = vld [vmem:[%s10648_s1 + $0x10b0] sm:$0xff]  }
 0x1e4   :  { %v7668_v48 = vpop.f32.mrf.mxu1  ;;  %6316 = vmatmul.mubr.bf16.vlgmr.msra.gmra.mxu1 %v494_v42  ;;  %7939 = vmatpush3.bf16.msra.mxu0 %v8600_v36  ;;  %v8637_v36 = vld [vmem:[%s10648_s1 + $0x1030] sm:$0xff]  }
 0x1e5   :  { %7961 = vmatpush3.bf16.msra.mxu1 %v8601_v40  ;;  %v7647_v51 = vpop.f32.mrf.mxu0  ;;  %7940 = vmatprep.subr.bf16.mxu0 %v8602_v43  ;;  %v8639_v40 = vld [vmem:[%s10648_s1 + $0x1068] sm:$0xff]  }
 0x1e6   :  { %v7669_v52 = vpop.f32.mrf.mxu1  ;;  %v7648_v54 = vadd.f32 %v7647_v51, %v7646_v47  ;;  %7962 = vmatprep.subr.bf16.mxu1 %v8603_v45  ;;  %6355 = vmatprep.mubr.bf16.mxu0 %v497_v28  ;;  %v8641_v47 = vld [vmem:[%s10648_s1 + $0x1028] sm:$0xff]  }
 0x1e7   :  { %v7670_v55 = vadd.f32 %v7669_v52, %v7668_v48  ;;  %v7649_v57 = vpop.f32.mrf.mxu0  ;;  %6395 = vmatprep.mubr.bf16.mxu1 %v499_v34  ;;  %v8643_v52 = vld [vmem:[%s10648_s1 + $0x1060] sm:$0xff]   ;;  %v8673_v34 = vld [vmem:[%s10648_s1 + $0x11e8] sm:$0xff]  }
 0x1e8   :  { %v7671_v58 = vpop.f32.mrf.mxu1  ;;  %v5798_v60 = vadd.f32 %v7648_v54, %v10243_v10  ;;  %7941 = vmatpush3.bf16.msra.mxu0 %v8604_v46  ;;  %v8620_v10 = vld [vmem:[%s10648_s1 + $0xf10] sm:$0xff]   ;;  %v8645_v57 = vld [vmem:[%s10648_s1 + $0x1020] sm:$0xff]  }
 0x1e9   :  { %7963 = vmatpush3.bf16.msra.mxu1 %v8605_v49  ;;  %v7650_v62 = vpop.f32.mrf.mxu0  ;;  %7942 = vmatprep.subr.bf16.mxu0 %v8606_v50  ;;  %v8642_v50 = vld [vmem:[%s10648_s1 + $0x10a8] sm:$0xff]   ;;  %v8646_v58 = vld [vmem:[%s10648_s1 + $0x10a0] sm:$0xff]  }
 0x1ea   :  { %v7672_v63 = vpop.f32.mrf.mxu1  ;;  %v10347_v1 = vadd.f32 %v7670_v55, %v5798_v60  ;;  %7964 = vmatprep.subr.bf16.mxu1 %v8607_v53  ;;  %v8644_v55 = vld [vmem:[%s10648_s1 + $0x10e0] sm:$0xff]   ;;  %v8648_v60 = vld [vmem:[%s10648_s1 + $0x10d8] sm:$0xff]  }
 0x1eb   :  { %v8650_v62 = vld [vmem:[%s10648_s1 + $0x1098] sm:$0xff]   ;;  %v8651_v63 = vld [vmem:[%s10648_s1 + $0x1050] sm:$0xff]  }
 0x1ec   :  { %7943 = vmatpush3.bf16.msra.mxu0 %v8608_v56 }
 0x1ed   :  { %7965 = vmatpush3.bf16.msra.mxu1 %v8609_v59  ;;  %7944 = vmatprep.subr.bf16.mxu0 %v8610_v61  ;;  %v8647_v59 = vld [vmem:[%s10648_s1 + $0x1058] sm:$0xff]  }
 0x1ee   :  { %7966 = vmatprep.subr.bf16.mxu1 %v8611_v0  ;;  %v8649_v61 = vld [vmem:[%s10648_s1 + $0x1018] sm:$0xff]   ;;  %v8652_v0 = vld [vmem:[%s10648_s1 + $0x10d0] sm:$0xff]  }
 0x1f0   :  { %7945 = vmatpush3.bf16.msra.mxu0 %v8612_v2  ;;  %v8654_v2 = vld [vmem:[%s10648_s1 + $0x1090] sm:$0xff]  }
 0x1f1   :  { %7967 = vmatpush3.bf16.msra.mxu1 %v8613_v3  ;;  %7946 = vmatprep.subr.bf16.mxu0 %v8614_v4  ;;  %v8655_v3 = vld [vmem:[%s10648_s1 + $0x1048] sm:$0xff]  }
 0x1f2   :  { %7968 = vmatprep.subr.bf16.mxu1 %v8615_v5  ;;  %v8656_v4 = vld [vmem:[%s10648_s1 + $0x10c8] sm:$0xff]  }
 0x1f3   :  { %v8657_v5 = vld [vmem:[%s10648_s1 + $0x1008] sm:$0xff]  }
 0x1f4   :  { %7947 = vmatpush3.bf16.msra.mxu0 %v8616_v6  ;;  %v8658_v6 = vld [vmem:[%s10648_s1 + $0x1088] sm:$0xff]  }
 0x1f5   :  { %7969 = vmatpush3.bf16.msra.mxu1 %v8617_v7  ;;  %7948 = vmatprep.subr.bf16.mxu0 %v8618_v8  ;;  %v8659_v7 = vld [vmem:[%s10648_s1 + $0x1040] sm:$0xff]  }
 0x1f6   :  { %7970 = vmatprep.subr.bf16.mxu1 %v8619_v9  ;;  %v8660_v8 = vld [vmem:[%s10648_s1 + $0x10c0] sm:$0xff]  }
 0x1f7   :  { %v8661_v9 = vld [vmem:[%s10648_s1 + $0x1000] sm:$0xff]  }
 0x1f8   :  { %7949 = vmatpush3.bf16.msra.mxu0 %v8620_v10  ;;  %v38_v10 = vld [vmem:[%s10647_s0 + $0x80] sm:$0xff] }
 0x1f9   :  { %7971 = vmatpush3.bf16.msra.mxu1 %v8621_v11  ;;  %7950 = vmatprep.subr.bf16.mxu0 %v8622_v12  ;;  %v8662_v11 = vld [vmem:[%s10648_s1 + $0x1080] sm:$0xff]   ;;  %v337_v12 = vrot.slane %v38_v10, %v8866_v41 }
 0x1fa   :  { %7972 = vmatprep.subr.bf16.mxu1 %v8623_v13  ;;  %v330_v13 = vcombine.high %v38_v10, %v38_v10 }
 0x1fb   :  { %v500_v21 = vpack.c.bf16 %v337_v12, %v337_v12 }
 0x1fc   :  { %7951 = vmatpush3.bf16.msra.mxu0 %v8624_v14  ;;  %v8664_v14 = vld [vmem:[%s10648_s1 + $0x1178] sm:$0xff]  }
 0x1fd   :  { %7973 = vmatpush3.bf16.msra.mxu1 %v8625_v15  ;;  %7952 = vmatprep.subr.bf16.mxu0 %v8626_v16  ;;  %v345_v15 = vcombine.high %v337_v12, %v337_v12  ;;  %v344_v16 = vrot.slane %v330_v13, %v8866_v41 }
 0x1fe   :  { %7974 = vmatprep.subr.bf16.mxu1 %v8627_v17  ;;  %v8665_v17 = vld [vmem:[%s10648_s1 + $0x11f8] sm:$0xff]  }
 0x1ff   :  { %v501_v19 = vpack.c.bf16 %v345_v15, %v345_v15 }
 0x200   :  { %7953 = vmatpush3.bf16.msra.mxu0 %v8628_v18  ;;  %v8666_v18 = vld [vmem:[%s10648_s1 + $0x1138] sm:$0xff]  }
 0x201   :  { %7975 = vmatpush3.bf16.msra.mxu1 %v8629_v20  ;;  %7982 = vmatprep.subr.bf16.mxu0 %v8631_v23  ;;  %v346_v20 = vcombine.high %v344_v16, %v344_v16  ;;  %v502_v23 = vpack.c.bf16 %v344_v16, %v344_v16 }
 0x202   :  { %8004 = vmatprep.subr.bf16.mxu1 %v8632_v26  ;;  %v8669_v26 = vld [vmem:[%s10648_s1 + $0x11f0] sm:$0xff]  }
 0x203   :  { %v7690_v37 = vpop.f32.mrf.mxu0  ;;  %6356 = vmatmul.mubr.bf16.vlgmr.msra.gmra.mxu0 %v496_v30  ;;  %v503_v25 = vpack.c.bf16 %v346_v20, %v346_v20  ;;  %v8671_v30 = vld [vmem:[%s10648_s1 + $0x11b0] sm:$0xff]  }
 0x204   :  { %v7712_v38 = vpop.f32.mrf.mxu1  ;;  %6396 = vmatmul.mubr.bf16.vlgmr.msra.gmra.mxu1 %v498_v32  ;;  %7983 = vmatpush3.bf16.msra.mxu0 %v8633_v27  ;;  %v8670_v27 = vld [vmem:[%s10648_s1 + $0x1130] sm:$0xff]  }
 0x205   :  { %8005 = vmatpush3.bf16.msra.mxu1 %v8634_v31  ;;  %v7691_v42 = vpop.f32.mrf.mxu0  ;;  %7984 = vmatprep.subr.bf16.mxu0 %v8635_v33  ;;  %v8672_v31 = vld [vmem:[%s10648_s1 + $0x1168] sm:$0xff]  }
 0x206   :  { %v7713_v43 = vpop.f32.mrf.mxu1  ;;  %v7692_v45 = vadd.f32 %v7691_v42, %v7690_v37  ;;  %8006 = vmatprep.subr.bf16.mxu1 %v8636_v35  ;;  %6435 = vmatprep.mubr.bf16.mxu0 %v501_v19  ;;  %v8674_v37 = vld [vmem:[%s10648_s1 + $0x1128] sm:$0xff]  }
 0x207   :  { %v7714_v46 = vadd.f32 %v7713_v43, %v7712_v38  ;;  %v7693_v48 = vpop.f32.mrf.mxu0  ;;  %6475 = vmatprep.mubr.bf16.mxu1 %v503_v25  ;;  %v8676_v43 = vld [vmem:[%s10648_s1 + $0x1160] sm:$0xff]  }
 0x208   :  { %v7715_v49 = vpop.f32.mrf.mxu1  ;;  %v5878_v51 = vadd.f32 %v7692_v45, %v10347_v1  ;;  %7985 = vmatpush3.bf16.msra.mxu0 %v8637_v36  ;;  %v8653_v1 = vld [vmem:[%s10648_s1 + $0x1010] sm:$0xff]   ;;  %v8678_v48 = vld [vmem:[%s10648_s1 + $0x1120] sm:$0xff]  }
 0x209   :  { %8007 = vmatpush3.bf16.msra.mxu1 %v8638_v39  ;;  %v7694_v53 = vpop.f32.mrf.mxu0  ;;  %7986 = vmatprep.subr.bf16.mxu0 %v8639_v40  ;;  %v8675_v40 = vld [vmem:[%s10648_s1 + $0x11a8] sm:$0xff]   ;;  %v8679_v49 = vld [vmem:[%s10648_s1 + $0x11a0] sm:$0xff]  }
 0x20a   :  { %v7716_v54 = vpop.f32.mrf.mxu1  ;;  %v10451_v56 = vadd.f32 %v7714_v46, %v5878_v51  ;;  %8008 = vmatprep.subr.bf16.mxu1 %v8640_v44  ;;  %v8677_v46 = vld [vmem:[%s10648_s1 + $0x11e0] sm:$0xff]   ;;  %v8681_v51 = vld [vmem:[%s10648_s1 + $0x11d8] sm:$0xff]  }
 0x20b   :  { %v8683_v53 = vld [vmem:[%s10648_s1 + $0x1198] sm:$0xff]   ;;  %v8684_v54 = vld [vmem:[%s10648_s1 + $0x1150] sm:$0xff]  }
 0x20c   :  { %7987 = vmatpush3.bf16.msra.mxu0 %v8641_v47 }
 0x20d   :  { %8009 = vmatpush3.bf16.msra.mxu1 %v8642_v50  ;;  %7988 = vmatprep.subr.bf16.mxu0 %v8643_v52  ;;  %v8680_v50 = vld [vmem:[%s10648_s1 + $0x1158] sm:$0xff]  }
 0x20e   :  { %8010 = vmatprep.subr.bf16.mxu1 %v8644_v55  ;;  %v8682_v52 = vld [vmem:[%s10648_s1 + $0x1118] sm:$0xff]   ;;  %v8685_v55 = vld [vmem:[%s10648_s1 + $0x11d0] sm:$0xff]  }
 0x210   :  { %7989 = vmatpush3.bf16.msra.mxu0 %v8645_v57  ;;  %v8687_v57 = vld [vmem:[%s10648_s1 + $0x1190] sm:$0xff]  }
 0x211   :  { %8011 = vmatpush3.bf16.msra.mxu1 %v8646_v58  ;;  %7990 = vmatprep.subr.bf16.mxu0 %v8647_v59  ;;  %v8688_v58 = vld [vmem:[%s10648_s1 + $0x1148] sm:$0xff]  }
 0x212   :  { %8012 = vmatprep.subr.bf16.mxu1 %v8648_v60  ;;  %v8689_v59 = vld [vmem:[%s10648_s1 + $0x11c8] sm:$0xff]  }
 0x213   :  { %v8690_v60 = vld [vmem:[%s10648_s1 + $0x1108] sm:$0xff]  }
 0x214   :  { %7991 = vmatpush3.bf16.msra.mxu0 %v8649_v61  ;;  %v8691_v61 = vld [vmem:[%s10648_s1 + $0x1188] sm:$0xff]  }
 0x215   :  { %8013 = vmatpush3.bf16.msra.mxu1 %v8650_v62  ;;  %7992 = vmatprep.subr.bf16.mxu0 %v8651_v63  ;;  %v8692_v62 = vld [vmem:[%s10648_s1 + $0x1140] sm:$0xff]  }
 0x216   :  { %8014 = vmatprep.subr.bf16.mxu1 %v8652_v0  ;;  %v8693_v63 = vld [vmem:[%s10648_s1 + $0x11c0] sm:$0xff]  }
 0x217   :  { %v8694_v0 = vld [vmem:[%s10648_s1 + $0x1100] sm:$0xff]  }
 0x218   :  { %7993 = vmatpush3.bf16.msra.mxu0 %v8653_v1  ;;  %v8695_v1 = vld [vmem:[%s10648_s1 + $0x1180] sm:$0xff]  }
 0x219   :  { %8015 = vmatpush3.bf16.msra.mxu1 %v8654_v2  ;;  %7994 = vmatprep.subr.bf16.mxu0 %v8655_v3  ;;  %v39_v2 = vld [vmem:[%s10647_s0 + $0x88] sm:$0xff] }
 0x21a   :  { %8016 = vmatprep.subr.bf16.mxu1 %v8656_v4  ;;  %v354_v3 = vrot.slane %v39_v2, %v8866_v41  ;;  %v347_v4 = vcombine.high %v39_v2, %v39_v2 }
 0x21c   :  { %7995 = vmatpush3.bf16.msra.mxu0 %v8657_v5  ;;  %v362_v5 = vcombine.high %v354_v3, %v354_v3 }
 0x21d   :  { %8017 = vmatpush3.bf16.msra.mxu1 %v8658_v6  ;;  %7996 = vmatprep.subr.bf16.mxu0 %v8659_v7  ;;  %v361_v6 = vrot.slane %v347_v4, %v8866_v41  ;;  %v504_v7 = vpack.c.bf16 %v354_v3, %v354_v3 }
 0x21e   :  { %8018 = vmatprep.subr.bf16.mxu1 %v8660_v8  ;;  %v505_v8 = vpack.c.bf16 %v362_v5, %v362_v5 }
 0x220   :  { %7997 = vmatpush3.bf16.msra.mxu0 %v8661_v9  ;;  %v363_v9 = vcombine.high %v361_v6, %v361_v6 }
 0x221   :  { %8019 = vmatpush3.bf16.msra.mxu1 %v8662_v11  ;;  %8026 = vmatprep.subr.bf16.mxu0 %v8664_v14 }
 0x222   :  { %8048 = vmatprep.subr.bf16.mxu1 %v8665_v17 }
 0x223   :  { %v7734_v28 = vpop.f32.mrf.mxu0  ;;  %6436 = vmatmul.mubr.bf16.vlgmr.msra.gmra.mxu0 %v500_v21 }
 0x224   :  { %v7756_v29 = vpop.f32.mrf.mxu1  ;;  %6476 = vmatmul.mubr.bf16.vlgmr.msra.gmra.mxu1 %v502_v23  ;;  %8027 = vmatpush3.bf16.msra.mxu0 %v8666_v18 }
 0x225   :  { %8049 = vmatpush3.bf16.msra.mxu1 %v8667_v22  ;;  %v7735_v32 = vpop.f32.mrf.mxu0  ;;  %8028 = vmatprep.subr.bf16.mxu0 %v8668_v24 }
 0x226   :  { %v7757_v33 = vpop.f32.mrf.mxu1  ;;  %v7736_v35 = vadd.f32 %v7735_v32, %v7734_v28  ;;  %8050 = vmatprep.subr.bf16.mxu1 %v8669_v26 }
 0x227   :  { %v7758_v36 = vadd.f32 %v7757_v33, %v7756_v29  ;;  %v7737_v38 = vpop.f32.mrf.mxu0 }
 0x228   :  { %v7759_v39 = vpop.f32.mrf.mxu1  ;;  %v5958_v42 = vadd.f32 %v7736_v35, %v10451_v56  ;;  %8029 = vmatpush3.bf16.msra.mxu0 %v8670_v27  ;;  %v8686_v56 = vld [vmem:[%s10648_s1 + $0x1110] sm:$0xff]  }
 0x229   :  { %8051 = vmatpush3.bf16.msra.mxu1 %v8671_v30  ;;  %v7738_v44 = vpop.f32.mrf.mxu0  ;;  %8030 = vmatprep.subr.bf16.mxu0 %v8672_v31 }
 0x22a   :  { %v7760_v45 = vpop.f32.mrf.mxu1  ;;  %v10555_v47 = vadd.f32 %v7758_v36, %v5958_v42  ;;  %8052 = vmatprep.subr.bf16.mxu1 %v8673_v34 }
 0x22c   :  { %8031 = vmatpush3.bf16.msra.mxu0 %v8674_v37 }
 0x22d   :  { %8053 = vmatpush3.bf16.msra.mxu1 %v8675_v40  ;;  %8032 = vmatprep.subr.bf16.mxu0 %v8676_v43 }
 0x22e   :  { %8054 = vmatprep.subr.bf16.mxu1 %v8677_v46 }
 0x230   :  { %8033 = vmatpush3.bf16.msra.mxu0 %v8678_v48 }
 0x231   :  { %8055 = vmatpush3.bf16.msra.mxu1 %v8679_v49  ;;  %8034 = vmatprep.subr.bf16.mxu0 %v8680_v50 }
 0x232   :  { %8056 = vmatprep.subr.bf16.mxu1 %v8681_v51 }
 0x234   :  { %8035 = vmatpush3.bf16.msra.mxu0 %v8682_v52 }
 0x235   :  { %8057 = vmatpush3.bf16.msra.mxu1 %v8683_v53  ;;  %8036 = vmatprep.subr.bf16.mxu0 %v8684_v54 }
 0x236   :  { %8058 = vmatprep.subr.bf16.mxu1 %v8685_v55 }
 0x238   :  { %8037 = vmatpush3.bf16.msra.mxu0 %v8686_v56 }
 0x239   :  { %8059 = vmatpush3.bf16.msra.mxu1 %v8687_v57  ;;  %8038 = vmatprep.subr.bf16.mxu0 %v8688_v58 }
 0x23a   :  { %8060 = vmatprep.subr.bf16.mxu1 %v8689_v59 }
 0x23c   :  { %8039 = vmatpush3.bf16.msra.mxu0 %v8690_v60 }
 0x23d   :  { %8061 = vmatpush3.bf16.msra.mxu1 %v8691_v61  ;;  %8040 = vmatprep.subr.bf16.mxu0 %v8692_v62 }
 0x23e   :  { %8062 = vmatprep.subr.bf16.mxu1 %v8693_v63 }
 0x240   :  { %8041 = vmatpush3.bf16.msra.mxu0 %v8694_v0 }
 0x241   :  { %10 = vsyncpa [#allocation3], 0  ;;  %8063 = vmatpush3.bf16.msra.mxu1 %v8695_v1  ;;  %v506_v10 = vpack.c.bf16 %v361_v6, %v361_v6  ;;  %6515 = vmatprep.mubr.bf16.mxu0 %v505_v8  ;;  %v507_v11 = vpack.c.bf16 %v363_v9, %v363_v9  ;;  %v8697_v35 = vld [vmem:[%s10650_s3 + $0x38] sm:$0xff]   ;;  %v8728_v36 = vmov 0.0   ;;  %v8698_v37 = vld [vmem:[%s10650_s3 + $0x30] sm:$0xff]   ;;  %vm8729_vm0 = vmmov 0  }
 0x242   :  { %8079 = vmatprep.subr.bf16.mxu0 %v8728_v36  ;;  %v8699_v38 = vld [vmem:[%s10650_s3 + $0x28] sm:$0xff]   ;;  %v8700_v39 = vld [vmem:[%s10650_s3 + $0x20] sm:$0xff]   ;;  %v8701_v40 = vld [vmem:[%s10650_s3 + $0x18] sm:$0xff]   ;;  %s8730_s20 = smov [#allocation2]   ;;  %vm6676_vm1 = vcmask 74752  }
 0x243   :  { %v7778_v12 = vpop.f32.mrf.mxu0  ;;  %6516 = vmatmul.mubr.bf16.vlgmr.msra.gmra.mxu0 %v504_v7  ;;  %6555 = vmatprep.mubr.bf16.mxu1 %v507_v11  ;;  %v8702_v46 = vld [vmem:[%s10650_s3 + $0x10] sm:$0xff]   ;;  %v8703_v54 = vld [vmem:[%s10650_s3 + $0x8] sm:$0xff]   ;;  %v8704_v56 = vld [vmem:[%s10650_s3] sm:$0xff]   ;;  %s6684_s21 = sshll.u32 %s8730_s20, 4  ;;  %s6685_s21 = int_to_ptr.vmem [resolvable:$true] %s6684_s21 }
 0x244   :  { %v7800_v13 = vpop.f32.mrf.mxu1  ;;  %6556 = vmatmul.mubr.bf16.vlgmr.msra.gmra.mxu1 %v506_v10  ;;  %8080 = vmatpush3.bf16.msra.mxu0 %v8697_v35  ;;  %s8705_s22 = scalar_lea.vmem %s6685_s21, 32  ;;  %p8710_p1 = scmp.lt.s32.totalorder %s6685_s21, %s6685_s21 }
 0x245   :  { %v7779_v14 = vpop.f32.mrf.mxu0  ;;  %8081 = vmatprep.subr.bf16.mxu0 %v8728_v36  ;;  %8095 = vmatprep.mubr.msk.bf16.mxu0 %vm8729_vm0, %v8728_v36  ;;  %p8706_p0 = scmp.ne.s32.totalorder %s6685_s21, %s8705_s22  ;;  %p8711_p2 = scmp.lt.s32.totalorder %s8705_s22, %s8705_s22 }
 0x246   :  { %v7801_v15 = vpop.f32.mrf.mxu1  ;;  %v7780_v16 = vadd.f32 %v7779_v14, %v7778_v12 }
 0x247   :  { %v7802_v17 = vadd.f32 %v7801_v15, %v7800_v13  ;;  %v7781_v18 = vpop.f32.mrf.mxu0  ;;  %p8712_p3 = por %p8711_p2, %p8710_p1 }
 0x248   :  { %v7803_v41 = vpop.f32.mrf.mxu1  ;;  %v6038_v19 = vadd.f32 %v7780_v16, %v10555_v47  ;;  %8082 = vmatpush3.bf16.msra.mxu0 %v8698_v37 }
 0x249   :  { %v7782_v20 = vpop.f32.mrf.mxu0  ;;  %8083 = vmatprep.subr.bf16.mxu0 %v8728_v36  ;;  %p8713_p4 = pnand %p8712_p3, %p8706_p0 }
 0x24a   :  { %v7804_v21 = vpop.f32.mrf.mxu1  ;;  %v6078_v22 = vadd.f32 %v7802_v17, %v6038_v19 }
 0x24c   :  { %8084 = vmatpush3.bf16.msra.mxu0 %v8699_v38 }
 0x24d   :  { %8085 = vmatprep.subr.bf16.mxu0 %v8728_v36 }
 0x250   :  { %8086 = vmatpush3.bf16.msra.mxu0 %v8700_v39 }
 0x251   :  { %8087 = vmatprep.subr.bf16.mxu0 %v8728_v36 }
 0x254   :  { %8088 = vmatpush3.bf16.msra.mxu0 %v8701_v40 }
 0x255   :  { %8089 = vmatprep.subr.bf16.mxu0 %v8728_v36 }
 0x258   :  { %8090 = vmatpush3.bf16.msra.mxu0 %v8702_v46 }
 0x259   :  { %8091 = vmatprep.subr.bf16.mxu0 %v8728_v36 }
 0x25c   :  { %8092 = vmatpush3.bf16.msra.mxu0 %v8703_v54 }
 0x25d   :  { %8093 = vmatprep.subr.bf16.mxu0 %v8728_v36 }
 0x260   :  { %8094 = vmatpush3.bf16.msra.mxu0 %v8704_v56 }
 0x263   :  { %v7822_v23 = vpop.f32.mrf.mxu0 }
 0x264   :  { %v7844_v24 = vpop.f32.mrf.mxu1 }
 0x265   :  { %v7823_v25 = vpop.f32.mrf.mxu0 }
 0x266   :  { %v7845_v26 = vpop.f32.mrf.mxu1  ;;  %v7824_v27 = vadd.f32 %v7823_v25, %v7822_v23 }
 0x267   :  { %v7846_v28 = vadd.f32 %v7845_v26, %v7844_v24  ;;  %v7825_v29 = vpop.f32.mrf.mxu0 }
 0x268   :  { %v7847_v30 = vpop.f32.mrf.mxu1  ;;  %v6118_v31 = vadd.f32 %v7824_v27, %v6078_v22 }
 0x269   :  { %v7826_v32 = vpop.f32.mrf.mxu0 }
 0x26a   :  { %v7848_v33 = vpop.f32.mrf.mxu1  ;;  %v6158_v34 = vadd.f32 %v7846_v28, %v6118_v31 }
 0x283   :  { %v7866_v42 = vpop.f32.mrf.mxu0 }
 0x284   :  { %v7888_v43 = vpop.f32.mrf.mxu1 }
 0x285   :  { %v7867_v44 = vpop.f32.mrf.mxu0 }
 0x286   :  { %v7889_v45 = vpop.f32.mrf.mxu1  ;;  %v7868_v47 = vadd.f32 %v7867_v44, %v7866_v42 }
 0x287   :  { %v7890_v48 = vadd.f32 %v7889_v45, %v7888_v43  ;;  %v7869_v49 = vpop.f32.mrf.mxu0  ;;  %v7269_v43 = vld [vmem:[%s10651_s4] ss:$0 sm:$0xff] }
 0x288   :  { %v7891_v50 = vpop.f32.mrf.mxu1  ;;  %v6198_v51 = vadd.f32 %v7868_v47, %v6158_v34 }
 0x289   :  { %v7870_v52 = vpop.f32.mrf.mxu0 }
 0x28a   :  { %v7892_v53 = vpop.f32.mrf.mxu1  ;;  %v6238_v55 = vadd.f32 %v7890_v48, %v6198_v51 }
 0x2a3   :  { %v7910_v57 = vpop.f32.mrf.mxu0 }
 0x2a4   :  { %v7932_v58 = vpop.f32.mrf.mxu1 }
 0x2a5   :  { %v7911_v59 = vpop.f32.mrf.mxu0 }
 0x2a6   :  { %v7912_v60 = vadd.f32 %v7911_v59, %v7910_v57  ;;  %v7933_v61 = vpop.f32.mrf.mxu1 }
 0x2a7   :  { %v7934_v62 = vadd.f32 %v7933_v61, %v7932_v58  ;;  %v7913_v63 = vpop.f32.mrf.mxu0 }
 0x2a8   :  { %v6278_v0 = vadd.f32 %v7912_v60, %v6238_v55  ;;  %v7935_v1 = vpop.f32.mrf.mxu1 }
 0x2a9   :  { %v7914_v2 = vpop.f32.mrf.mxu0 }
 0x2aa   :  { %v6318_v3 = vadd.f32 %v7934_v62, %v6278_v0  ;;  %v7936_v4 = vpop.f32.mrf.mxu1 }
 0x2c3   :  { %v7954_v5 = vpop.f32.mrf.mxu0 }
 0x2c4   :  { %v7976_v6 = vpop.f32.mrf.mxu1 }
 0x2c5   :  { %v7955_v7 = vpop.f32.mrf.mxu0 }
 0x2c6   :  { %v7977_v8 = vpop.f32.mrf.mxu1  ;;  %v7956_v20 = vadd.f32 %v7955_v7, %v7954_v5 }
 0x2c7   :  { %v7957_v9 = vpop.f32.mrf.mxu0  ;;  %v7978_v22 = vadd.f32 %v7977_v8, %v7976_v6 }
 0x2c8   :  { %v7979_v10 = vpop.f32.mrf.mxu1  ;;  %v6358_v21 = vadd.f32 %v7956_v20, %v6318_v3 }
 0x2c9   :  { %v7958_v11 = vpop.f32.mrf.mxu0 }
 0x2ca   :  { %v7980_v12 = vpop.f32.mrf.mxu1  ;;  %v6398_v24 = vadd.f32 %v7978_v22, %v6358_v21 }
 0x2e3   :  { %v7998_v13 = vpop.f32.mrf.mxu0 }
 0x2e4   :  { %v8020_v14 = vpop.f32.mrf.mxu1 }
 0x2e5   :  { %v7999_v15 = vpop.f32.mrf.mxu0 }
 0x2e6   :  { %v8021_v16 = vpop.f32.mrf.mxu1  ;;  %v8000_v23 = vadd.f32 %v7999_v15, %v7998_v13 }
 0x2e7   :  { %v8001_v17 = vpop.f32.mrf.mxu0  ;;  %v8022_v26 = vadd.f32 %v8021_v16, %v8020_v14 }
 0x2e8   :  { %v8023_v18 = vpop.f32.mrf.mxu1  ;;  %v6438_v25 = vadd.f32 %v8000_v23, %v6398_v24 }
 0x2e9   :  { %v8002_v41 = vpop.f32.mrf.mxu0 }
 0x2ea   :  { %v8024_v19 = vpop.f32.mrf.mxu1  ;;  %v6478_v30 = vadd.f32 %v8022_v26, %v6438_v25 }
 0x303   :  { %v8042_v27 = vpop.f32.mrf.mxu0 }
 0x304   :  { %v8064_v28 = vpop.f32.mrf.mxu1 }
 0x305   :  { %v8043_v29 = vpop.f32.mrf.mxu0 }
 0x306   :  { %v8044_v31 = vadd.f32 %v8043_v29, %v8042_v27  ;;  %v8065_v32 = vpop.f32.mrf.mxu1 }
 0x307   :  { %v8045_v33 = vpop.f32.mrf.mxu0  ;;  %v8066_v35 = vadd.f32 %v8065_v32, %v8064_v28 }
 0x308   :  { %v6518_v34 = vadd.f32 %v8044_v31, %v6478_v30  ;;  %v8067_v36 = vpop.f32.mrf.mxu1 }
 0x309   :  { %v8046_v37 = vpop.f32.mrf.mxu0 }
 0x30a   :  { %v6558_v38 = vadd.f32 %v8066_v35, %v6518_v34  ;;  %v8068_v39 = vpop.f32.mrf.mxu1 }
 0x30c   :  { %v6563_v40 = vmax.f32 %v6558_v38, 0.0 }
 0x30e   :  { %v6564_v42 = vpack.c.bf16 %v6563_v40, %v6563_v40 }
 0x310   :  { %8096 = vmatmul.mubr.bf16.vlgmr.msra.gmra.mxu0 %v6564_v42 }
 0x3d0   :  { %v6670_v44 = vpop.f32.mrf.mxu0 }
 0x3d1   :  { %v6671_v45 = vadd.f32 %v7269_v43, %v6670_v44 }
 0x3d2   :  { %v8097_v46 = vpop.f32.mrf.mxu0 }
 0x3d3   :  { %6677 = vst.msk [vmem:[#allocation2] sm:$0x3] %vm6676_vm1, %v6671_v45 }
 0x3d4   :  { %v6673_v47 = vpop.f32.mrf.mxu0 }
 0x3d5   :  { %8716 = shalt.err (!%p8713_p4)
}
 0x3d6   :  { %6687 = dma.vmem_to_hbm [thread:$0]  %s6685_s21, 32, %s10652_s5, [#allocation3]   ;;  %v8098_v48 = vpop.f32.mrf.mxu0 }
 0x3d7   :  { %8725 = dma.done.wait [#allocation3], 32  }
 0x3d8   :  { %8726 = vsyncadd [#allocation3], 4294967264 }
 0x3d9   :  { %6691 = vsyncpa [#allocation3], 1 }

</bundles_post_ra>
